<compile_context>
chip_gen: v7x
topology: tpu7x:2x2x1
jax: 0.10.0
libtpu: 0.0.40
codegen_flags: <defaults>
</compile_context>

<pallas_src>
import functools

import jax
import jax.numpy as jnp
from jax import lax
from jax.experimental import pallas as pl
from jax.experimental.pallas import tpu as pltpu


def _round_up(v, m):
    return (v + m - 1) // m * m


# -----------------------------------------------------------------------------
# Fused kernel: whole CenterNetHead forward for one batch element.
# -----------------------------------------------------------------------------
def _centernet_head_kernel(x_ref, dup_ref, dw1_ref, pw_ref, shift1_ref,
                           dw2_ref, wepi_ref, bepi_ref, out_ref,
                           *, H, W, Wq, Wq2, Wx, C, NC):
    """x_ref     : (1, H+4, Wx, C)  zero-padded NHWC input (pad 2 + align slack)
       dup_ref   : (C, 4C)   lane-duplication matrix * stage-1 depthwise-BN scale
       dw1_ref   : (9, 4C)   stage-1 depthwise taps  [cls_br | reg_br x3]
       pw_ref    : (4C, 4C)  block-diag stage-1 pointwise * post-BN scale
       shift1    : (1, 4C)   stage-1 folded shift (dw shift -> pointwise -> BN)
       dw2_ref   : (9, 4C)   stage-2 depthwise taps  [cls_pred | wh | off | iou]
                             (pre-scaled by the stage-2 depthwise-BN scale)
       w_epi     : (NC+5, 4C) fused pointwise heads  rows [cls | iou | wh | off]
       b_epi     : (NC+5, 1) fused biases (+ stage-2 shifts folded through w_epi)
       out_ref   : (1, NC+5, H*Wq2) lane-dense channel-major output
    """
    Hx = H + 4
    Hp = H + 2                       # stage-1 frame = zero-padded feature frame
    C4 = 4 * C
    NO = NC + 5
    P1 = Hp * Wq
    P2 = H * Wq2

    # ---- lane-duplicate the C input channels into the 4 packed branch blocks
    # ([cls | reg | reg | reg]) with one small MXU matmul (no extra HBM DMA,
    # no unaligned lane concat); dup also carries the stage-1 dw-BN scale.
    xp = x_ref[0].astype(jnp.float32)                             # (Hx, Wx, C)
    x4 = jnp.dot(xp.reshape(Hx * Wx, C), dup_ref[...],
                 preferred_element_type=jnp.float32).reshape(Hx, Wx, C4)

    dw1 = dw1_ref[...]
    dw2 = dw2_ref[...]

    # ---- stage 1: packed depthwise 3x3 on the (Hp, Wq) frame ----------------
    # kw (sublane-shift) slices hoisted: 3 per stage instead of 9; k=0 peeled.
    acc1 = None
    for kw in range(3):
        col = x4[:, kw:kw + Wq, :]                                # (Hx, Wq, 4C)
        for kh in range(3):
            t = col[kh:kh + Hp] * dw1[kh * 3 + kw]
            acc1 = t if acc1 is None else acc1 + t

    # folded 1x1 conv + post-BN + ReLU (one K=N=4C MXU pass; shifts pre-folded)
    z1 = jnp.dot(acc1.reshape(P1, C4), pw_ref[...],
                 preferred_element_type=jnp.float32)
    f1 = jnp.maximum(z1 + shift1_ref[...], 0.0)

    # zero ring == the padding=1 the second 3x3 needs around cls_feat/reg_feat
    rows = lax.broadcasted_iota(jnp.int32, (Hp, Wq, C4), 0)
    cols = lax.broadcasted_iota(jnp.int32, (Hp, Wq, C4), 1)
    interior = (rows >= 1) & (rows <= H) & (cols >= 1) & (cols <= W)
    feat = jnp.where(interior, f1.reshape(Hp, Wq, C4), 0.0)       # (Hp, Wq, 4C)

    # ---- stage 2: packed depthwise 3x3 [cls_pred | wh | offset | iou taps] --
    acc2 = None
    for kw in range(3):
        col = feat[:, kw:kw + Wq2, :]                             # (Hp, Wq2, 4C)
        for kh in range(3):
            t = col[kh:kh + H] * dw2[kh * 3 + kw]
            acc2 = t if acc2 is None else acc2 + t

    # ---- fused epilogue: single K=4C MXU pass, no operand transposes --------
    # rows of `out`: [cls(NC) | iou(1) | wh(2) | offset(2)]
    out = lax.dot_general(wepi_ref[...], acc2.reshape(P2, C4),
                          (((1,), (1,)), ((), ())),
                          preferred_element_type=jnp.float32)     # (NO, P2)
    out = out + bepi_ref[...]
    row = lax.broadcasted_iota(jnp.int32, (NO, P2), 0)
    out = jnp.where(row <= NC, jax.nn.sigmoid(out), out)          # cls + iou only
    out_ref[0] = out.astype(out_ref.dtype)


# -----------------------------------------------------------------------------
# Wrapper: NCHW in / NCHW out (iou squeezed), single pallas_call.
# -----------------------------------------------------------------------------
def centernet_head_forward(x_nchw, params):
    N, C, H, W = x_nchw.shape
    NO, C4 = params["w_epi"].shape
    NC = NO - 5
    assert C4 == 4 * C, "packed params assume a lane-packing factor of 4"

    # Frame widths rounded to multiples of 8 so every in-kernel flatten
    # (rows, width, 4C) <-> (rows*width, 4C) is sublane-aligned (free).
    Wq2 = _round_up(W, 8)              # stage-2 / output frame width
    Wq = _round_up(Wq2 + 2, 8)         # stage-1 frame width (2-col halo)
    Wx = _round_up(Wq + 2, 8)          # padded-input width  (2-col halo)
    P1 = (H + 2) * Wq
    P2 = H * Wq2

    # NCHW -> NHWC once; zero-pad once (2 rows, 2 cols + alignment slack).
    x = jnp.transpose(x_nchw, (0, 2, 3, 1))
    xp = jnp.pad(x, ((0, 0), (2, 2), (2, Wx - 2 - W), (0, 0)))    # (N, H+4, Wx, C)

    kernel = functools.partial(_centernet_head_kernel, H=H, W=W, Wq=Wq,
                               Wq2=Wq2, Wx=Wx, C=C, NC=NC)

    param_bytes = sum(int(v.size) * v.dtype.itemsize for v in params.values())
    flops = N * (2 * (H + 4) * Wx * C * C4       # lane-dup matmul
                 + 2 * 9 * P1 * C4               # stage-1 depthwise taps
                 + 2 * P1 * C4 * C4              # stage-1 pointwise
                 + 2 * 9 * P2 * C4               # stage-2 depthwise taps
                 + 2 * P2 * C4 * NO)             # fused epilogue matmul
    bytes_accessed = (N * (H + 4) * Wx * C + N * NO * P2) * 4 + N * param_bytes
    cost = pl.CostEstimate(flops=flops, transcendentals=N * NO * P2,
                           bytes_accessed=bytes_accessed)

    out = pl.pallas_call(
        kernel,
        out_shape=jax.ShapeDtypeStruct((N, NO, P2), jnp.float32),
        grid=(N,),
        in_specs=[
            pl.BlockSpec((1, H + 4, Wx, C), lambda n: (n, 0, 0, 0)),
            pl.BlockSpec((C, C4), lambda n: (0, 0)),
            pl.BlockSpec((9, C4), lambda n: (0, 0)),
            pl.BlockSpec((C4, C4), lambda n: (0, 0)),
            pl.BlockSpec((1, C4), lambda n: (0, 0)),
            pl.BlockSpec((9, C4), lambda n: (0, 0)),
            pl.BlockSpec((NO, C4), lambda n: (0, 0)),
            pl.BlockSpec((NO, 1), lambda n: (0, 0)),
        ],
        out_specs=pl.BlockSpec((1, NO, P2), lambda n: (n, 0, 0)),
        compiler_params=pltpu.CompilerParams(
            dimension_semantics=("parallel",)),
        cost_estimate=cost,
    )(xp, params["dup"], params["dw1"], params["pw_blk"], params["shift1"],
      params["dw2"], params["w_epi"], params["b_epi"])

    # Outputs are channel-major and lane-dense; only free reshapes/slices left.
    out = out.reshape(N, NO, H, Wq2)[:, :, :, :W]
    cls = out[:, :NC]
    iou = out[:, NC]                       # == .squeeze(1) in the reference
    wh = out[:, NC + 1:NC + 3]
    offset = out[:, NC + 3:NC + 5]
    return cls, wh, offset, iou


# -----------------------------------------------------------------------------
# Deterministic synthetic parameters, folded into the packed kernel format.
# -----------------------------------------------------------------------------
def _folded_bn(key, C):
    k = jax.random.split(key, 4)
    gamma = 1.0 + 0.1 * jax.random.normal(k[0], (C,), jnp.float32)
    beta = 0.1 * jax.random.normal(k[1], (C,), jnp.float32)
    mean = 0.05 * jax.random.normal(k[2], (C,), jnp.float32)
    var = jnp.abs(1.0 + 0.1 * jax.random.normal(k[3], (C,), jnp.float32))
    scale = gamma / jnp.sqrt(var + 1e-5)
    shift = beta - mean * scale
    return scale, shift


def _sepconv_raw(key, C, O, bias, pw_std=None, pw_bias=0.0):
    k = jax.random.split(key, 4)
    dww = 0.1 * jax.random.normal(k[0], (9, C), jnp.float32)
    dwb = (0.05 * jax.random.normal(k[1], (C,), jnp.float32)
           if bias else jnp.zeros((C,), jnp.float32))
    bn_s, bn_b = _folded_bn(k[2], C)
    std = pw_std if pw_std is not None else float(1.0 / (C ** 0.5))
    pww = std * jax.random.normal(k[3], (C, O), jnp.float32)
    pwb = jnp.full((O,), pw_bias if bias else 0.0, jnp.float32)
    return dict(dww=dww, dwb=dwb, bn_s=bn_s, bn_b=bn_b, pww=pww, pwb=pwb)


def init_params(key, C, nc):
    ks = jax.random.split(key, 8)
    cls_b = _sepconv_raw(ks[0], C, C, bias=False)
    cls_post_s, cls_post_b = _folded_bn(ks[1], C)
    reg_b = _sepconv_raw(ks[2], C, C, bias=False)
    reg_post_s, reg_post_b = _folded_bn(ks[3], C)
    # normal_init(pred, 0, 0.01, bias): pointwise std 0.01, pointwise bias set
    cls_p = _sepconv_raw(ks[4], C, nc, bias=True, pw_std=0.01, pw_bias=-2.19)
    wh_p = _sepconv_raw(ks[5], C, 2, bias=True, pw_std=0.01, pw_bias=0.0)
    off_p = _sepconv_raw(ks[6], C, 2, bias=True, pw_std=0.01, pw_bias=0.0)
    iou_w = 0.01 * jax.random.normal(ks[7], (9, C), jnp.float32)   # dense 3x3, O=1
    iou_b = jnp.zeros((1,), jnp.float32)

    C4 = 4 * C
    NO = nc + 5

    def dw_affine(p):
        # (depthwise conv + dwb) folded through depthwise BN -> conv * s + t
        s = p["bn_s"]
        return s, p["dwb"] * s + p["bn_b"]

    # ---- stage 1: lane blocks [cls_branch | reg_branch x3] ------------------
    s1c, t1c = dw_affine(cls_b)
    s1r, t1r = dw_affine(reg_b)
    s1 = jnp.concatenate([s1c] + [s1r] * 3)                        # (4C,)
    t1 = jnp.concatenate([t1c] + [t1r] * 3)

    eye = jnp.eye(C, dtype=jnp.float32)
    dup = jnp.concatenate([eye] * 4, axis=1) * s1[None, :]         # (C, 4C)

    dw1 = jnp.concatenate([cls_b["dww"]] + [reg_b["dww"]] * 3, axis=1)  # (9, 4C)

    post_s = jnp.concatenate([cls_post_s] + [reg_post_s] * 3)
    post_b = jnp.concatenate([cls_post_b] + [reg_post_b] * 3)
    pw_blk = jnp.zeros((C4, C4), jnp.float32)
    pw_blk = pw_blk.at[0:C, 0:C].set(cls_b["pww"])
    for b in range(1, 4):
        pw_blk = pw_blk.at[b * C:(b + 1) * C, b * C:(b + 1) * C].set(reg_b["pww"])
    shift1 = (t1 @ pw_blk) * post_s + post_b                       # (4C,)
    pw_blk = pw_blk * post_s[None, :]                              # carry post-BN scale

    # ---- stage 2: lane blocks [cls_pred | wh | offset | iou] ----------------
    s2c, t2c = dw_affine(cls_p)
    s2w, t2w = dw_affine(wh_p)
    s2o, t2o = dw_affine(off_p)
    s2 = jnp.concatenate([s2c, s2w, s2o, jnp.ones((C,), jnp.float32)])
    t2 = jnp.concatenate([t2c, t2w, t2o, jnp.zeros((C,), jnp.float32)])
    dw2 = jnp.concatenate([cls_p["dww"], wh_p["dww"], off_p["dww"], iou_w],
                          axis=1) * s2[None, :]                    # (9, 4C)

    # ---- fused epilogue: rows [cls(nc) | iou(1) | wh(2) | offset(2)] --------
    w_epi = jnp.zeros((NO, C4), jnp.float32)
    w_epi = w_epi.at[0:nc, 0:C].set(cls_p["pww"].T)
    w_epi = w_epi.at[nc, 3 * C:4 * C].set(1.0)                     # iou channel sum
    w_epi = w_epi.at[nc + 1:nc + 3, C:2 * C].set(wh_p["pww"].T)
    w_epi = w_epi.at[nc + 3:nc + 5, 2 * C:3 * C].set(off_p["pww"].T)
    b_raw = jnp.concatenate([cls_p["pwb"], iou_b, wh_p["pwb"], off_p["pwb"]])
    b_epi = (b_raw + w_epi @ t2).reshape(NO, 1)                    # fold stage-2 shifts

    return dict(dup=dup, dw1=dw1, pw_blk=pw_blk,
                shift1=shift1.reshape(1, C4), dw2=dw2,
                w_epi=w_epi, b_epi=b_epi)


# -----------------------------------------------------------------------------
if __name__ == "__main__":
    N, FEAT, NC, H, W = 2, 32, 4, 16, 16

    key = jax.random.PRNGKey(0)
    k_in, k_par = jax.random.split(key)
    x = jax.random.normal(k_in, (N, FEAT, H, W), jnp.float32)   # NCHW, like PyTorch
    params = init_params(k_par, FEAT, NC)

    fwd = jax.jit(centernet_head_forward)
    cls, wh, offset, iou = fwd(x, params)
    for a in (cls, wh, offset, iou):
        jax.block_until_ready(a)

    assert cls.shape == (N, NC, H, W)
    assert wh.shape == (N, 2, H, W)
    assert offset.shape == (N, 2, H, W)
    assert iou.shape == (N, H, W)
    assert bool(jnp.all((cls >= 0) & (cls <= 1)))
    assert bool(jnp.all((iou >= 0) & (iou <= 1)))
    assert all(bool(jnp.all(jnp.isfinite(a))) for a in (cls, wh, offset, iou))

    print("KERNEL_OK")
</pallas_src>

<mosaic_0001>
module attributes {stable_mosaic.version = 11 : i64} {
  func.func @_centernet_head_kernel(%arg0: i32, %arg1: memref<1x20x32x32xf32, #tpu.memory_space<vmem>>, %arg2: memref<32x128xf32, #tpu.memory_space<vmem>>, %arg3: memref<9x128xf32, #tpu.memory_space<vmem>>, %arg4: memref<128x128xf32, #tpu.memory_space<vmem>>, %arg5: memref<1x128xf32, #tpu.memory_space<vmem>>, %arg6: memref<9x128xf32, #tpu.memory_space<vmem>>, %arg7: memref<9x128xf32, #tpu.memory_space<vmem>>, %arg8: memref<9x1xf32, #tpu.memory_space<vmem>>, %arg9: memref<1x9x256xf32, #tpu.memory_space<vmem>>) attributes {dimension_semantics = [#tpu.dimension_semantics<parallel>], iteration_bounds = array<i64: 2>, scalar_prefetch = 0 : i64, scratch_operands = 0 : i64, tpu.core_type = #tpu.core_type<tc>, window_params = [{transform_indices = @transform_0, window_bounds = array<i64: 1, 20, 32, 32>}, {pipeline_mode = #tpu.pipeline_mode<synchronous>, transform_indices = @transform_1, window_bounds = array<i64: 32, 128>}, {pipeline_mode = #tpu.pipeline_mode<synchronous>, transform_indices = @transform_2, window_bounds = array<i64: 9, 128>}, {pipeline_mode = #tpu.pipeline_mode<synchronous>, transform_indices = @transform_3, window_bounds = array<i64: 128, 128>}, {pipeline_mode = #tpu.pipeline_mode<synchronous>, transform_indices = @transform_4, window_bounds = array<i64: 1, 128>}, {pipeline_mode = #tpu.pipeline_mode<synchronous>, transform_indices = @transform_5, window_bounds = array<i64: 9, 128>}, {pipeline_mode = #tpu.pipeline_mode<synchronous>, transform_indices = @transform_6, window_bounds = array<i64: 9, 128>}, {pipeline_mode = #tpu.pipeline_mode<synchronous>, transform_indices = @transform_7, window_bounds = array<i64: 9, 1>}, {transform_indices = @transform_8, window_bounds = array<i64: 1, 9, 256>}]} {
    %c0 = arith.constant 0 : index
    %c0_0 = arith.constant 0 : index
    %c0_1 = arith.constant 0 : index
    %c0_2 = arith.constant 0 : index
    %0 = vector.load %arg1[%c0, %c0_0, %c0_1, %c0_2] : memref<1x20x32x32xf32, #tpu.memory_space<vmem>>, vector<1x20x32x32xf32>
    %1 = vector.shape_cast %0 : vector<1x20x32x32xf32> to vector<20x32x32xf32>
    %2 = vector.shape_cast %1 : vector<20x32x32xf32> to vector<640x32xf32>
    %c0_3 = arith.constant 0 : index
    %c0_4 = arith.constant 0 : index
    %3 = vector.load %arg2[%c0_3, %c0_4] : memref<32x128xf32, #tpu.memory_space<vmem>>, vector<32x128xf32>
    %cst = arith.constant dense<0.000000e+00> : vector<640x128xf32>
    %4 = tpu.matmul %2, %3, %cst {dimension_numbers = #tpu.dot_dimension_numbers<[1], [0], [0], [1], [0, 0, 1, 1], [], []>} : vector<640x32xf32>, vector<32x128xf32>, vector<640x128xf32> -> vector<640x128xf32>
    %5 = vector.shape_cast %4 : vector<640x128xf32> to vector<20x32x128xf32>
    %c0_5 = arith.constant 0 : index
    %c0_6 = arith.constant 0 : index
    %6 = vector.load %arg3[%c0_5, %c0_6] : memref<9x128xf32, #tpu.memory_space<vmem>>, vector<9x128xf32>
    %c0_7 = arith.constant 0 : index
    %c0_8 = arith.constant 0 : index
    %7 = vector.load %arg6[%c0_7, %c0_8] : memref<9x128xf32, #tpu.memory_space<vmem>>, vector<9x128xf32>
    %8 = vector.extract_strided_slice %5 {offsets = [0, 0, 0], sizes = [20, 24, 128], strides = [1, 1, 1]} : vector<20x32x128xf32> to vector<20x24x128xf32>
    %9 = vector.extract_strided_slice %8 {offsets = [0, 0, 0], sizes = [18, 24, 128], strides = [1, 1, 1]} : vector<20x24x128xf32> to vector<18x24x128xf32>
    %10 = vector.extract_strided_slice %6 {offsets = [0, 0], sizes = [1, 128], strides = [1, 1]} : vector<9x128xf32> to vector<1x128xf32>
    %11 = vector.shape_cast %10 : vector<1x128xf32> to vector<128xf32>
    %12 = vector.shape_cast %11 : vector<128xf32> to vector<1x1x128xf32>
    %13 = vector.broadcast %12 : vector<1x1x128xf32> to vector<18x24x128xf32>
    %14 = arith.mulf %9, %13 : vector<18x24x128xf32>
    %15 = vector.extract_strided_slice %8 {offsets = [1, 0, 0], sizes = [18, 24, 128], strides = [1, 1, 1]} : vector<20x24x128xf32> to vector<18x24x128xf32>
    %16 = vector.extract_strided_slice %6 {offsets = [3, 0], sizes = [1, 128], strides = [1, 1]} : vector<9x128xf32> to vector<1x128xf32>
    %17 = vector.shape_cast %16 : vector<1x128xf32> to vector<128xf32>
    %18 = vector.shape_cast %17 : vector<128xf32> to vector<1x1x128xf32>
    %19 = vector.broadcast %18 : vector<1x1x128xf32> to vector<18x24x128xf32>
    %20 = arith.mulf %15, %19 : vector<18x24x128xf32>
    %21 = arith.addf %14, %20 : vector<18x24x128xf32>
    %22 = vector.extract_strided_slice %8 {offsets = [2, 0, 0], sizes = [18, 24, 128], strides = [1, 1, 1]} : vector<20x24x128xf32> to vector<18x24x128xf32>
    %23 = vector.extract_strided_slice %6 {offsets = [6, 0], sizes = [1, 128], strides = [1, 1]} : vector<9x128xf32> to vector<1x128xf32>
    %24 = vector.shape_cast %23 : vector<1x128xf32> to vector<128xf32>
    %25 = vector.shape_cast %24 : vector<128xf32> to vector<1x1x128xf32>
    %26 = vector.broadcast %25 : vector<1x1x128xf32> to vector<18x24x128xf32>
    %27 = arith.mulf %22, %26 : vector<18x24x128xf32>
    %28 = arith.addf %21, %27 : vector<18x24x128xf32>
    %29 = vector.extract_strided_slice %5 {offsets = [0, 1, 0], sizes = [20, 24, 128], strides = [1, 1, 1]} : vector<20x32x128xf32> to vector<20x24x128xf32>
    %30 = vector.extract_strided_slice %29 {offsets = [0, 0, 0], sizes = [18, 24, 128], strides = [1, 1, 1]} : vector<20x24x128xf32> to vector<18x24x128xf32>
    %31 = vector.extract_strided_slice %6 {offsets = [1, 0], sizes = [1, 128], strides = [1, 1]} : vector<9x128xf32> to vector<1x128xf32>
    %32 = vector.shape_cast %31 : vector<1x128xf32> to vector<128xf32>
    %33 = vector.shape_cast %32 : vector<128xf32> to vector<1x1x128xf32>
    %34 = vector.broadcast %33 : vector<1x1x128xf32> to vector<18x24x128xf32>
    %35 = arith.mulf %30, %34 : vector<18x24x128xf32>
    %36 = arith.addf %28, %35 : vector<18x24x128xf32>
    %37 = vector.extract_strided_slice %29 {offsets = [1, 0, 0], sizes = [18, 24, 128], strides = [1, 1, 1]} : vector<20x24x128xf32> to vector<18x24x128xf32>
    %38 = vector.extract_strided_slice %6 {offsets = [4, 0], sizes = [1, 128], strides = [1, 1]} : vector<9x128xf32> to vector<1x128xf32>
    %39 = vector.shape_cast %38 : vector<1x128xf32> to vector<128xf32>
    %40 = vector.shape_cast %39 : vector<128xf32> to vector<1x1x128xf32>
    %41 = vector.broadcast %40 : vector<1x1x128xf32> to vector<18x24x128xf32>
    %42 = arith.mulf %37, %41 : vector<18x24x128xf32>
    %43 = arith.addf %36, %42 : vector<18x24x128xf32>
    %44 = vector.extract_strided_slice %29 {offsets = [2, 0, 0], sizes = [18, 24, 128], strides = [1, 1, 1]} : vector<20x24x128xf32> to vector<18x24x128xf32>
    %45 = vector.extract_strided_slice %6 {offsets = [7, 0], sizes = [1, 128], strides = [1, 1]} : vector<9x128xf32> to vector<1x128xf32>
    %46 = vector.shape_cast %45 : vector<1x128xf32> to vector<128xf32>
    %47 = vector.shape_cast %46 : vector<128xf32> to vector<1x1x128xf32>
    %48 = vector.broadcast %47 : vector<1x1x128xf32> to vector<18x24x128xf32>
    %49 = arith.mulf %44, %48 : vector<18x24x128xf32>
    %50 = arith.addf %43, %49 : vector<18x24x128xf32>
    %51 = vector.extract_strided_slice %5 {offsets = [0, 2, 0], sizes = [20, 24, 128], strides = [1, 1, 1]} : vector<20x32x128xf32> to vector<20x24x128xf32>
    %52 = vector.extract_strided_slice %51 {offsets = [0, 0, 0], sizes = [18, 24, 128], strides = [1, 1, 1]} : vector<20x24x128xf32> to vector<18x24x128xf32>
    %53 = vector.extract_strided_slice %6 {offsets = [2, 0], sizes = [1, 128], strides = [1, 1]} : vector<9x128xf32> to vector<1x128xf32>
    %54 = vector.shape_cast %53 : vector<1x128xf32> to vector<128xf32>
    %55 = vector.shape_cast %54 : vector<128xf32> to vector<1x1x128xf32>
    %56 = vector.broadcast %55 : vector<1x1x128xf32> to vector<18x24x128xf32>
    %57 = arith.mulf %52, %56 : vector<18x24x128xf32>
    %58 = arith.addf %50, %57 : vector<18x24x128xf32>
    %59 = vector.extract_strided_slice %51 {offsets = [1, 0, 0], sizes = [18, 24, 128], strides = [1, 1, 1]} : vector<20x24x128xf32> to vector<18x24x128xf32>
    %60 = vector.extract_strided_slice %6 {offsets = [5, 0], sizes = [1, 128], strides = [1, 1]} : vector<9x128xf32> to vector<1x128xf32>
    %61 = vector.shape_cast %60 : vector<1x128xf32> to vector<128xf32>
    %62 = vector.shape_cast %61 : vector<128xf32> to vector<1x1x128xf32>
    %63 = vector.broadcast %62 : vector<1x1x128xf32> to vector<18x24x128xf32>
    %64 = arith.mulf %59, %63 : vector<18x24x128xf32>
    %65 = arith.addf %58, %64 : vector<18x24x128xf32>
    %66 = vector.extract_strided_slice %51 {offsets = [2, 0, 0], sizes = [18, 24, 128], strides = [1, 1, 1]} : vector<20x24x128xf32> to vector<18x24x128xf32>
    %67 = vector.extract_strided_slice %6 {offsets = [8, 0], sizes = [1, 128], strides = [1, 1]} : vector<9x128xf32> to vector<1x128xf32>
    %68 = vector.shape_cast %67 : vector<1x128xf32> to vector<128xf32>
    %69 = vector.shape_cast %68 : vector<128xf32> to vector<1x1x128xf32>
    %70 = vector.broadcast %69 : vector<1x1x128xf32> to vector<18x24x128xf32>
    %71 = arith.mulf %66, %70 : vector<18x24x128xf32>
    %72 = arith.addf %65, %71 : vector<18x24x128xf32>
    %73 = vector.shape_cast %72 : vector<18x24x128xf32> to vector<432x128xf32>
    %c0_9 = arith.constant 0 : index
    %c0_10 = arith.constant 0 : index
    %74 = vector.load %arg4[%c0_9, %c0_10] : memref<128x128xf32, #tpu.memory_space<vmem>>, vector<128x128xf32>
    %cst_11 = arith.constant dense<0.000000e+00> : vector<432x128xf32>
    %75 = tpu.matmul %73, %74, %cst_11 {dimension_numbers = #tpu.dot_dimension_numbers<[1], [0], [0], [1], [0, 0, 1, 1], [], []>} : vector<432x128xf32>, vector<128x128xf32>, vector<432x128xf32> -> vector<432x128xf32>
    %c0_12 = arith.constant 0 : index
    %c0_13 = arith.constant 0 : index
    %76 = vector.load %arg5[%c0_12, %c0_13] : memref<1x128xf32, #tpu.memory_space<vmem>>, vector<1x128xf32>
    %77 = vector.broadcast %76 : vector<1x128xf32> to vector<432x128xf32>
    %78 = arith.addf %75, %77 : vector<432x128xf32>
    %cst_14 = arith.constant 0.000000e+00 : f32
    %79 = vector.broadcast %cst_14 : f32 to vector<432x128xf32>
    %80 = arith.maximumf %78, %79 : vector<432x128xf32>
    %81 = tpu.iota {dimensions = array<i32: 0>} : vector<18x24x128xi32>
    %82 = tpu.iota {dimensions = array<i32: 1>} : vector<18x24x128xi32>
    %c1_i32 = arith.constant 1 : i32
    %83 = vector.broadcast %c1_i32 : i32 to vector<18x24x128xi32>
    %84 = arith.cmpi sge, %81, %83 : vector<18x24x128xi32>
    %c16_i32 = arith.constant 16 : i32
    %85 = vector.broadcast %c16_i32 : i32 to vector<18x24x128xi32>
    %86 = arith.cmpi sle, %81, %85 : vector<18x24x128xi32>
    %87 = arith.andi %84, %86 : vector<18x24x128xi1>
    %c1_i32_15 = arith.constant 1 : i32
    %88 = vector.broadcast %c1_i32_15 : i32 to vector<18x24x128xi32>
    %89 = arith.cmpi sge, %82, %88 : vector<18x24x128xi32>
    %90 = arith.andi %87, %89 : vector<18x24x128xi1>
    %c16_i32_16 = arith.constant 16 : i32
    %91 = vector.broadcast %c16_i32_16 : i32 to vector<18x24x128xi32>
    %92 = arith.cmpi sle, %82, %91 : vector<18x24x128xi32>
    %93 = arith.andi %90, %92 : vector<18x24x128xi1>
    %94 = vector.shape_cast %80 : vector<432x128xf32> to vector<18x24x128xf32>
    %cst_17 = arith.constant 0.000000e+00 : f32
    %95 = vector.broadcast %cst_17 : f32 to vector<18x24x128xf32>
    %96 = arith.select %93, %94, %95 : vector<18x24x128xi1>, vector<18x24x128xf32>
    %97 = vector.extract_strided_slice %96 {offsets = [0, 0, 0], sizes = [18, 16, 128], strides = [1, 1, 1]} : vector<18x24x128xf32> to vector<18x16x128xf32>
    %98 = vector.extract_strided_slice %97 {offsets = [0, 0, 0], sizes = [16, 16, 128], strides = [1, 1, 1]} : vector<18x16x128xf32> to vector<16x16x128xf32>
    %99 = vector.extract_strided_slice %7 {offsets = [0, 0], sizes = [1, 128], strides = [1, 1]} : vector<9x128xf32> to vector<1x128xf32>
    %100 = vector.shape_cast %99 : vector<1x128xf32> to vector<128xf32>
    %101 = vector.shape_cast %100 : vector<128xf32> to vector<1x1x128xf32>
    %102 = vector.broadcast %101 : vector<1x1x128xf32> to vector<16x16x128xf32>
    %103 = arith.mulf %98, %102 : vector<16x16x128xf32>
    %104 = vector.extract_strided_slice %97 {offsets = [1, 0, 0], sizes = [16, 16, 128], strides = [1, 1, 1]} : vector<18x16x128xf32> to vector<16x16x128xf32>
    %105 = vector.extract_strided_slice %7 {offsets = [3, 0], sizes = [1, 128], strides = [1, 1]} : vector<9x128xf32> to vector<1x128xf32>
    %106 = vector.shape_cast %105 : vector<1x128xf32> to vector<128xf32>
    %107 = vector.shape_cast %106 : vector<128xf32> to vector<1x1x128xf32>
    %108 = vector.broadcast %107 : vector<1x1x128xf32> to vector<16x16x128xf32>
    %109 = arith.mulf %104, %108 : vector<16x16x128xf32>
    %110 = arith.addf %103, %109 : vector<16x16x128xf32>
    %111 = vector.extract_strided_slice %97 {offsets = [2, 0, 0], sizes = [16, 16, 128], strides = [1, 1, 1]} : vector<18x16x128xf32> to vector<16x16x128xf32>
    %112 = vector.extract_strided_slice %7 {offsets = [6, 0], sizes = [1, 128], strides = [1, 1]} : vector<9x128xf32> to vector<1x128xf32>
    %113 = vector.shape_cast %112 : vector<1x128xf32> to vector<128xf32>
    %114 = vector.shape_cast %113 : vector<128xf32> to vector<1x1x128xf32>
    %115 = vector.broadcast %114 : vector<1x1x128xf32> to vector<16x16x128xf32>
    %116 = arith.mulf %111, %115 : vector<16x16x128xf32>
    %117 = arith.addf %110, %116 : vector<16x16x128xf32>
    %118 = vector.extract_strided_slice %96 {offsets = [0, 1, 0], sizes = [18, 16, 128], strides = [1, 1, 1]} : vector<18x24x128xf32> to vector<18x16x128xf32>
    %119 = vector.extract_strided_slice %118 {offsets = [0, 0, 0], sizes = [16, 16, 128], strides = [1, 1, 1]} : vector<18x16x128xf32> to vector<16x16x128xf32>
    %120 = vector.extract_strided_slice %7 {offsets = [1, 0], sizes = [1, 128], strides = [1, 1]} : vector<9x128xf32> to vector<1x128xf32>
    %121 = vector.shape_cast %120 : vector<1x128xf32> to vector<128xf32>
    %122 = vector.shape_cast %121 : vector<128xf32> to vector<1x1x128xf32>
    %123 = vector.broadcast %122 : vector<1x1x128xf32> to vector<16x16x128xf32>
    %124 = arith.mulf %119, %123 : vector<16x16x128xf32>
    %125 = arith.addf %117, %124 : vector<16x16x128xf32>
    %126 = vector.extract_strided_slice %118 {offsets = [1, 0, 0], sizes = [16, 16, 128], strides = [1, 1, 1]} : vector<18x16x128xf32> to vector<16x16x128xf32>
    %127 = vector.extract_strided_slice %7 {offsets = [4, 0], sizes = [1, 128], strides = [1, 1]} : vector<9x128xf32> to vector<1x128xf32>
    %128 = vector.shape_cast %127 : vector<1x128xf32> to vector<128xf32>
    %129 = vector.shape_cast %128 : vector<128xf32> to vector<1x1x128xf32>
    %130 = vector.broadcast %129 : vector<1x1x128xf32> to vector<16x16x128xf32>
    %131 = arith.mulf %126, %130 : vector<16x16x128xf32>
    %132 = arith.addf %125, %131 : vector<16x16x128xf32>
    %133 = vector.extract_strided_slice %118 {offsets = [2, 0, 0], sizes = [16, 16, 128], strides = [1, 1, 1]} : vector<18x16x128xf32> to vector<16x16x128xf32>
    %134 = vector.extract_strided_slice %7 {offsets = [7, 0], sizes = [1, 128], strides = [1, 1]} : vector<9x128xf32> to vector<1x128xf32>
    %135 = vector.shape_cast %134 : vector<1x128xf32> to vector<128xf32>
    %136 = vector.shape_cast %135 : vector<128xf32> to vector<1x1x128xf32>
    %137 = vector.broadcast %136 : vector<1x1x128xf32> to vector<16x16x128xf32>
    %138 = arith.mulf %133, %137 : vector<16x16x128xf32>
    %139 = arith.addf %132, %138 : vector<16x16x128xf32>
    %140 = vector.extract_strided_slice %96 {offsets = [0, 2, 0], sizes = [18, 16, 128], strides = [1, 1, 1]} : vector<18x24x128xf32> to vector<18x16x128xf32>
    %141 = vector.extract_strided_slice %140 {offsets = [0, 0, 0], sizes = [16, 16, 128], strides = [1, 1, 1]} : vector<18x16x128xf32> to vector<16x16x128xf32>
    %142 = vector.extract_strided_slice %7 {offsets = [2, 0], sizes = [1, 128], strides = [1, 1]} : vector<9x128xf32> to vector<1x128xf32>
    %143 = vector.shape_cast %142 : vector<1x128xf32> to vector<128xf32>
    %144 = vector.shape_cast %143 : vector<128xf32> to vector<1x1x128xf32>
    %145 = vector.broadcast %144 : vector<1x1x128xf32> to vector<16x16x128xf32>
    %146 = arith.mulf %141, %145 : vector<16x16x128xf32>
    %147 = arith.addf %139, %146 : vector<16x16x128xf32>
    %148 = vector.extract_strided_slice %140 {offsets = [1, 0, 0], sizes = [16, 16, 128], strides = [1, 1, 1]} : vector<18x16x128xf32> to vector<16x16x128xf32>
    %149 = vector.extract_strided_slice %7 {offsets = [5, 0], sizes = [1, 128], strides = [1, 1]} : vector<9x128xf32> to vector<1x128xf32>
    %150 = vector.shape_cast %149 : vector<1x128xf32> to vector<128xf32>
    %151 = vector.shape_cast %150 : vector<128xf32> to vector<1x1x128xf32>
    %152 = vector.broadcast %151 : vector<1x1x128xf32> to vector<16x16x128xf32>
    %153 = arith.mulf %148, %152 : vector<16x16x128xf32>
    %154 = arith.addf %147, %153 : vector<16x16x128xf32>
    %155 = vector.extract_strided_slice %140 {offsets = [2, 0, 0], sizes = [16, 16, 128], strides = [1, 1, 1]} : vector<18x16x128xf32> to vector<16x16x128xf32>
    %156 = vector.extract_strided_slice %7 {offsets = [8, 0], sizes = [1, 128], strides = [1, 1]} : vector<9x128xf32> to vector<1x128xf32>
    %157 = vector.shape_cast %156 : vector<1x128xf32> to vector<128xf32>
    %158 = vector.shape_cast %157 : vector<128xf32> to vector<1x1x128xf32>
    %159 = vector.broadcast %158 : vector<1x1x128xf32> to vector<16x16x128xf32>
    %160 = arith.mulf %155, %159 : vector<16x16x128xf32>
    %161 = arith.addf %154, %160 : vector<16x16x128xf32>
    %c0_18 = arith.constant 0 : index
    %c0_19 = arith.constant 0 : index
    %162 = vector.load %arg7[%c0_18, %c0_19] : memref<9x128xf32, #tpu.memory_space<vmem>>, vector<9x128xf32>
    %163 = vector.shape_cast %161 : vector<16x16x128xf32> to vector<256x128xf32>
    %cst_20 = arith.constant dense<0.000000e+00> : vector<9x256xf32>
    %164 = tpu.matmul %162, %163, %cst_20 {dimension_numbers = #tpu.dot_dimension_numbers<[1], [1], [0], [0], [0, 0, 1, 0], [], []>} : vector<9x128xf32>, vector<256x128xf32>, vector<9x256xf32> -> vector<9x256xf32>
    %c0_21 = arith.constant 0 : index
    %c0_22 = arith.constant 0 : index
    %165 = vector.load %arg8[%c0_21, %c0_22] : memref<9x1xf32, #tpu.memory_space<vmem>>, vector<9x1xf32>
    %166 = vector.broadcast %165 : vector<9x1xf32> to vector<9x256xf32>
    %167 = arith.addf %164, %166 : vector<9x256xf32>
    %168 = tpu.iota {dimensions = array<i32: 0>} : vector<9x256xi32>
    %c4_i32 = arith.constant 4 : i32
    %169 = vector.broadcast %c4_i32 : i32 to vector<9x256xi32>
    %170 = arith.cmpi sle, %168, %169 : vector<9x256xi32>
    %171 = arith.negf %167 : vector<9x256xf32>
    %172 = math.exp %171 : vector<9x256xf32>
    %cst_23 = arith.constant 1.000000e+00 : f32
    %173 = vector.broadcast %cst_23 : f32 to vector<9x256xf32>
    %174 = arith.addf %173, %172 : vector<9x256xf32>
    %175 = arith.divf %173, %174 : vector<9x256xf32>
    %176 = arith.select %170, %175, %167 : vector<9x256xi1>, vector<9x256xf32>
    %c0_24 = arith.constant 0 : index
    %c0_25 = arith.constant 0 : index
    %c0_26 = arith.constant 0 : index
    %177 = vector.load %arg9[%c0_24, %c0_25, %c0_26] : memref<1x9x256xf32, #tpu.memory_space<vmem>>, vector<1x9x256xf32>
    %178 = vector.shape_cast %177 : vector<1x9x256xf32> to vector<9x256xf32>
    %179 = vector.shape_cast %176 : vector<9x256xf32> to vector<1x9x256xf32>
    tpu.vector_store %arg9[%c0_24, %c0_25, %c0_26], %179 {strides = array<i32>} : memref<1x9x256xf32, #tpu.memory_space<vmem>>, vector<1x9x256xf32>,
    return
  }
  func.func @transform_0(%arg0: i32) -> (i32, i32, i32, i32) {
    %c0_i32 = arith.constant 0 : i32
    %c0_i32_0 = arith.constant 0 : i32
    %c0_i32_1 = arith.constant 0 : i32
    %c0_i32_2 = arith.constant 0 : i32
    return %arg0, %c0_i32, %c0_i32_0, %c0_i32_1 : i32, i32, i32, i32
  }
  func.func @transform_1(%arg0: i32) -> (i32, i32) {
    %c0_i32 = arith.constant 0 : i32
    %c0_i32_0 = arith.constant 0 : i32
    %c0_i32_1 = arith.constant 0 : i32
    return %c0_i32, %c0_i32_0 : i32, i32
  }
  func.func @transform_2(%arg0: i32) -> (i32, i32) {
    %c0_i32 = arith.constant 0 : i32
    %c0_i32_0 = arith.constant 0 : i32
    %c0_i32_1 = arith.constant 0 : i32
    return %c0_i32, %c0_i32_0 : i32, i32
  }
  func.func @transform_3(%arg0: i32) -> (i32, i32) {
    %c0_i32 = arith.constant 0 : i32
    %c0_i32_0 = arith.constant 0 : i32
    %c0_i32_1 = arith.constant 0 : i32
    return %c0_i32, %c0_i32_0 : i32, i32
  }
  func.func @transform_4(%arg0: i32) -> (i32, i32) {
    %c0_i32 = arith.constant 0 : i32
    %c0_i32_0 = arith.constant 0 : i32
    %c0_i32_1 = arith.constant 0 : i32
    return %c0_i32, %c0_i32_0 : i32, i32
  }
  func.func @transform_5(%arg0: i32) -> (i32, i32) {
    %c0_i32 = arith.constant 0 : i32
    %c0_i32_0 = arith.constant 0 : i32
    %c0_i32_1 = arith.constant 0 : i32
    return %c0_i32, %c0_i32_0 : i32, i32
  }
  func.func @transform_6(%arg0: i32) -> (i32, i32) {
    %c0_i32 = arith.constant 0 : i32
    %c0_i32_0 = arith.constant 0 : i32
    %c0_i32_1 = arith.constant 0 : i32
    return %c0_i32, %c0_i32_0 : i32, i32
  }
  func.func @transform_7(%arg0: i32) -> (i32, i32) {
    %c0_i32 = arith.constant 0 : i32
    %c0_i32_0 = arith.constant 0 : i32
    %c0_i32_1 = arith.constant 0 : i32
    return %c0_i32, %c0_i32_0 : i32, i32
  }
  func.func @transform_8(%arg0: i32) -> (i32, i32, i32) {
    %c0_i32 = arith.constant 0 : i32
    %c0_i32_0 = arith.constant 0 : i32
    %c0_i32_1 = arith.constant 0 : i32
    return %arg0, %c0_i32, %c0_i32_0 : i32, i32, i32
  }
}

</mosaic_0001>

<bundles_post_ra>
// kernel: centernet_head_forward.1
= control target key start
LH: loop header
LB: loop body
LE: loop exit
PB: predicated region body
PF: predicated region fallthrough
CT: control target
= control target key end

     0   :  { %s6661_s27 = smov 0   ;;  %s11090_s0 = inlined_call_operand.vmem [shape: f32[2,20,32,32], index: 0, kind: input, shape index: {}]   ;;  %s11091_s1 = inlined_call_operand.vmem [shape: f32[32,128], index: 1, kind: input, shape index: {}]   ;;  %s11092_s2 = inlined_call_operand.vmem [shape: f32[9,128], index: 2, kind: input, shape index: {}]   ;;  %s11093_s3 = inlined_call_operand.vmem [shape: f32[128,128], index: 3, kind: input, shape index: {}]   ;;  %s11094_s4 = inlined_call_operand.vmem [shape: f32[1,128], index: 4, kind: input, shape index: {}]   ;;  %s11095_s5 = inlined_call_operand.vmem [shape: f32[9,128], index: 5, kind: input, shape index: {}]   ;;  %s11096_s6 = inlined_call_operand.vmem [shape: f32[9,128], index: 6, kind: input, shape index: {}]   ;;  %s11097_s7 = inlined_call_operand.vmem [shape: f32[9,1], index: 7, kind: input, shape index: {}]   ;;  %s11098_s8 = inlined_call_operand.vmem [shape: f32[2,9,256], index: 8, kind: output, shape index: {}]  }
   0x1 LB: > { %s5980_s28 = sadd.s32 4294967295, %s6613_s27   ;;  %p5984_p0 = scmp.ge.s32.totalorder %s6613_s27, 1  ;;  %s6613_s27 = sphi %s6661_s27, %s18_s27  }
   0x2   : > { %p262_p1 = scmp.lt.s32.totalorder %s6613_s27, 3 }
   0x4   : > { %p263_p2 = pnand %p5984_p0, %p262_p1 }
   0x6   : > { %266 = sbr.rel (%p263_p2) target bundleno = 1269 (0x4f5), region = 52 }
   0xd   : > { %v386_v0 = vld [vmem:[%s11091_s1] sm:$0xff]  ;;  %v387_v1 = vld [vmem:[%s11091_s1 + $0x8] sm:$0xff]  ;;  %v388_v2 = vld [vmem:[%s11091_s1 + $0x10] sm:$0xff]  ;;  %p296_p3 = scmp.lt.s32.totalorder %s5980_s28, 1  ;;  %vm390_vm0 = vcmask 261120   ;;  %vm1530_vm1 = vcmask 1046528  }
   0xe   : > { %v6509_v3 = vpack.c.bf16 %v387_v1, %v386_v0  ;;  %v389_v4 = vld [vmem:[%s11091_s1 + $0x18] sm:$0xff]  ;;  %v3676_v51 = vld [vmem:[%s11093_s3] sm:$0xff]  ;;  %v3677_v52 = vld [vmem:[%s11093_s3 + $0x8] sm:$0xff]  ;;  %vm2677_vm2 = vcmask 1045504  }
   0xf   : > { %v6513_v5 = vpack.c.bf16 %v389_v4, %v388_v2  ;;  %s11882_s28 = smov (!%p296_p3, %s5980_s28), 1  ;;  %v6517_v53 = vpack.c.bf16 %v3677_v52, %v3676_v51  ;;  %v3678_v56 = vld [vmem:[%s11093_s3 + $0x10] sm:$0xff]  ;;  %v3679_v57 = vld [vmem:[%s11093_s3 + $0x18] sm:$0xff]  ;;  %v3680_v63 = vld [vmem:[%s11093_s3 + $0x20] sm:$0xff] }
  0x10   : > { %6510 = vmatprep.subr.bf16.mxu0 %v6509_v3  ;;  %s6581_s15 = smul.u32 640, %s11882_s28  ;;  %v6521_v58 = vpack.c.bf16 %v3679_v57, %v3678_v56  ;;  %v3681_v0 = vld [vmem:[%s11093_s3 + $0x28] sm:$0xff]  ;;  %v3682_v4 = vld [vmem:[%s11093_s3 + $0x30] sm:$0xff]  ;;  %s6077_s24 = sshll.u32 %s11882_s28, 5 }
  0x11   : > { %6512 = vmatpush3.bf16.msra.mxu0 %v6509_v3  ;;  %6518 = vmatprep.subr.bf16.mxu1 %v6517_v53  ;;  %v6525_v1 = vpack.c.bf16 %v3681_v0, %v3680_v63  ;;  %s305_s29 = scalar_lea.vmem %s11098_s8, %s6077_s24 }
  0x12   : > { %6514 = vmatprep.subr.bf16.mxu0 %v6513_v5  ;;  %s6687_s18 = scalar_lea.vmem %s11090_s0, %s6581_s15  ;;  %6520 = vmatpush3.bf16.msra.mxu1 %v6517_v53 }
  0x13   : > { %v306_v6 = vld [vmem:[%s6687_s18] sm:$0xff]  ;;  %v307_v7 = vld [vmem:[%s6687_s18 + $0x8] sm:$0xff]  ;;  %v308_v8 = vld [vmem:[%s6687_s18 + $0x10] sm:$0xff]  ;;  %6522 = vmatprep.subr.bf16.mxu1 %v6521_v58 }
  0x14   : > { %6276 = vmatprep.mubr.msk.f32.mxu0 %vm390_vm0, %v306_v6  ;;  %v309_v9 = vld [vmem:[%s6687_s18 + $0x18] sm:$0xff]  ;;  %v310_v10 = vld [vmem:[%s6687_s18 + $0x20] sm:$0xff]  ;;  %v311_v11 = vld [vmem:[%s6687_s18 + $0x28] sm:$0xff] }
  0x15   : > { %6516 = vmatpush3.bf16.msra.mxu0 %v6513_v5  ;;  %v312_v12 = vld [vmem:[%s6687_s18 + $0x30] sm:$0xff]  ;;  %v313_v13 = vld [vmem:[%s6687_s18 + $0x38] sm:$0xff]  ;;  %v314_v14 = vld [vmem:[%s6687_s18 + $0x40] sm:$0xff] }
  0x16   : > { %v315_v15 = vld [vmem:[%s6687_s18 + $0x48] sm:$0xff]  ;;  %v316_v16 = vld [vmem:[%s6687_s18 + $0x50] sm:$0xff]  ;;  %v317_v17 = vld [vmem:[%s6687_s18 + $0x58] sm:$0xff]  ;;  %6524 = vmatpush3.bf16.msra.mxu1 %v6521_v58 }
  0x17   : > { %v318_v18 = vld [vmem:[%s6687_s18 + $0x60] sm:$0xff]  ;;  %v319_v19 = vld [vmem:[%s6687_s18 + $0x68] sm:$0xff]  ;;  %v320_v20 = vld [vmem:[%s6687_s18 + $0x70] sm:$0xff]  ;;  %6526 = vmatprep.subr.bf16.mxu1 %v6525_v1 }
  0x18   : > { %6277 = vmatmul.mubr.msk.f32.vlgmr.msra.gmra.mrb[0].mxu0 %vm390_vm0, %v307_v7  ;;  %v321_v21 = vld [vmem:[%s6687_s18 + $0x78] sm:$0xff]  ;;  %v322_v22 = vld [vmem:[%s6687_s18 + $0x80] sm:$0xff]  ;;  %v323_v23 = vld [vmem:[%s6687_s18 + $0x88] sm:$0xff] }
  0x19   : > { %6279 = vmatprep.mubr.msk.f32.mxu0 %vm390_vm0, %v308_v8  ;;  %v324_v24 = vld [vmem:[%s6687_s18 + $0x90] sm:$0xff]  ;;  %v325_v25 = vld [vmem:[%s6687_s18 + $0x98] sm:$0xff]  ;;  %v326_v26 = vld [vmem:[%s6687_s18 + $0xa0] sm:$0xff] }
  0x1a   : > { %v327_v27 = vld [vmem:[%s6687_s18 + $0xa8] sm:$0xff]  ;;  %v328_v28 = vld [vmem:[%s6687_s18 + $0xb0] sm:$0xff]  ;;  %v329_v29 = vld [vmem:[%s6687_s18 + $0xb8] sm:$0xff]  ;;  %6528 = vmatpush3.bf16.msra.mxu1 %v6525_v1 }
  0x1b   : > { %v330_v30 = vld [vmem:[%s6687_s18 + $0xc0] sm:$0xff]  ;;  %v331_v31 = vld [vmem:[%s6687_s18 + $0xc8] sm:$0xff]  ;;  %v332_v32 = vld [vmem:[%s6687_s18 + $0xd0] sm:$0xff] }
  0x1c   : > { %6280 = vmatmul.mubr.msk.f32.gmra.mrb[2].mxu0 %vm390_vm0, %v309_v9  ;;  %v333_v33 = vld [vmem:[%s6687_s18 + $0xd8] sm:$0xff]  ;;  %v334_v34 = vld [vmem:[%s6687_s18 + $0xe0] sm:$0xff]  ;;  %v335_v35 = vld [vmem:[%s6687_s18 + $0xe8] sm:$0xff] }
  0x1d   : > { %6282 = vmatprep.mubr.msk.f32.mxu0 %vm390_vm0, %v310_v10  ;;  %v336_v36 = vld [vmem:[%s6687_s18 + $0xf0] sm:$0xff]  ;;  %v337_v37 = vld [vmem:[%s6687_s18 + $0xf8] sm:$0xff]  ;;  %v338_v38 = vld [vmem:[%s6687_s18 + $0x100] sm:$0xff] }
  0x1e   : > { %v339_v39 = vld [vmem:[%s6687_s18 + $0x108] sm:$0xff]  ;;  %v340_v40 = vld [vmem:[%s6687_s18 + $0x110] sm:$0xff]  ;;  %v341_v41 = vld [vmem:[%s6687_s18 + $0x118] sm:$0xff] }
  0x1f   : > { %v342_v42 = vld [vmem:[%s6687_s18 + $0x120] sm:$0xff]  ;;  %v343_v43 = vld [vmem:[%s6687_s18 + $0x128] sm:$0xff]  ;;  %v344_v44 = vld [vmem:[%s6687_s18 + $0x130] sm:$0xff] }
  0x20   : > { %6283 = vmatmul.mubr.msk.f32.gmra.mrb[4].mxu0 %vm390_vm0, %v311_v11  ;;  %v345_v45 = vld [vmem:[%s6687_s18 + $0x138] sm:$0xff]  ;;  %v346_v46 = vld [vmem:[%s6687_s18 + $0x140] sm:$0xff]  ;;  %v347_v47 = vld [vmem:[%s6687_s18 + $0x148] sm:$0xff] }
  0x21   : > { %6285 = vmatprep.mubr.msk.f32.mxu0 %vm390_vm0, %v312_v12  ;;  %v348_v48 = vld [vmem:[%s6687_s18 + $0x150] sm:$0xff]  ;;  %v349_v49 = vld [vmem:[%s6687_s18 + $0x158] sm:$0xff]  ;;  %v350_v50 = vld [vmem:[%s6687_s18 + $0x160] sm:$0xff] }
  0x22   : > { %v351_v54 = vld [vmem:[%s6687_s18 + $0x168] sm:$0xff]  ;;  %v352_v55 = vld [vmem:[%s6687_s18 + $0x170] sm:$0xff]  ;;  %v353_v59 = vld [vmem:[%s6687_s18 + $0x178] sm:$0xff] }
  0x23   : > { %v354_v60 = vld [vmem:[%s6687_s18 + $0x180] sm:$0xff]  ;;  %v355_v61 = vld [vmem:[%s6687_s18 + $0x188] sm:$0xff]  ;;  %v356_v62 = vld [vmem:[%s6687_s18 + $0x190] sm:$0xff] }
  0x24   : > { %6286 = vmatmul.mubr.msk.f32.gmra.mrb[6].mxu0 %vm390_vm0, %v313_v13  ;;  %v357_v2 = vld [vmem:[%s6687_s18 + $0x198] sm:$0xff]  ;;  %v358_v3 = vld [vmem:[%s6687_s18 + $0x1a0] sm:$0xff]  ;;  %v359_v7 = vld [vmem:[%s6687_s18 + $0x1a8] sm:$0xff] }
  0x25   : > { %6288 = vmatprep.mubr.msk.f32.mxu0 %vm390_vm0, %v314_v14  ;;  %v3683_v5 = vld [vmem:[%s11093_s3 + $0x38] sm:$0xff]  ;;  %v360_v8 = vld [vmem:[%s6687_s18 + $0x1b0] sm:$0xff]  ;;  %v3684_v9 = vld [vmem:[%s11093_s3 + $0x40] sm:$0xff] }
  0x26   : > { %v6529_v6 = vpack.c.bf16 %v3683_v5, %v3682_v4  ;;  %v3685_v10 = vld [vmem:[%s11093_s3 + $0x48] sm:$0xff]  ;;  %v361_v12 = vld [vmem:[%s6687_s18 + $0x1b8] sm:$0xff]  ;;  %v362_v13 = vld [vmem:[%s6687_s18 + $0x1c0] sm:$0xff] }
  0x27   : > { %v6533_v11 = vpack.c.bf16 %v3685_v10, %v3684_v9  ;;  %v3686_v14 = vld [vmem:[%s11093_s3 + $0x50] sm:$0xff] }
  0x28   : > { %6289 = vmatmul.mubr.msk.f32.gmra.mrb[8].mxu0 %vm390_vm0, %v315_v15  ;;  %6530 = vmatprep.subr.bf16.mxu1 %v6529_v6  ;;  %v3687_v15 = vld [vmem:[%s11093_s3 + $0x58] sm:$0xff] }
  0x29   : > { %6291 = vmatprep.mubr.msk.f32.mxu0 %vm390_vm0, %v316_v16  ;;  %6532 = vmatpush3.bf16.msra.mxu1 %v6529_v6  ;;  %v6537_v16 = vpack.c.bf16 %v3687_v15, %v3686_v14 }
  0x2a   : > { %6534 = vmatprep.subr.bf16.mxu1 %v6533_v11 }
  0x2c   : > { %6292 = vmatmul.mubr.msk.f32.gmra.mrb[10].mxu0 %vm390_vm0, %v317_v17  ;;  %v3688_v17 = vld [vmem:[%s11093_s3 + $0x60] sm:$0xff] }
  0x2d   : > { %6294 = vmatprep.mubr.msk.f32.mxu0 %vm390_vm0, %v318_v18  ;;  %6536 = vmatpush3.bf16.msra.mxu1 %v6533_v11  ;;  %v3689_v18 = vld [vmem:[%s11093_s3 + $0x68] sm:$0xff] }
  0x2e   : > { %6538 = vmatprep.subr.bf16.mxu1 %v6537_v16 }
  0x30   : > { %6295 = vmatmul.mubr.msk.f32.gmra.mrb[12].mxu0 %vm390_vm0, %v319_v19  ;;  %v363_v19 = vld [vmem:[%s6687_s18 + $0x1c8] sm:$0xff] }
  0x31   : > { %6297 = vmatprep.mubr.msk.f32.mxu0 %vm390_vm0, %v320_v20  ;;  %v6541_v20 = vpack.c.bf16 %v3689_v18, %v3688_v17  ;;  %6540 = vmatpush3.bf16.msra.mxu1 %v6537_v16 }
  0x33   : > { %6542 = vmatprep.subr.bf16.mxu1 %v6541_v20 }
  0x34   : > { %6298 = vmatmul.mubr.msk.f32.gmra.mrb[14].mxu0 %vm390_vm0, %v321_v21  ;;  %v364_v21 = vld [vmem:[%s6687_s18 + $0x1d0] sm:$0xff] }
  0x35   : > { %6300 = vmatprep.mubr.msk.f32.mxu0 %vm390_vm0, %v322_v22  ;;  %v365_v22 = vld [vmem:[%s6687_s18 + $0x1d8] sm:$0xff]  ;;  %6544 = vmatpush3.bf16.msra.mxu1 %v6541_v20 }
  0x38   : > { %6301 = vmatmul.mubr.msk.f32.gmra.mrb[16].mxu0 %vm390_vm0, %v323_v23  ;;  %v366_v23 = vld [vmem:[%s6687_s18 + $0x1e0] sm:$0xff] }
  0x39   : > { %6303 = vmatprep.mubr.msk.f32.mxu0 %vm390_vm0, %v324_v24  ;;  %v3690_v24 = vld [vmem:[%s11093_s3 + $0x70] sm:$0xff] }
  0x3c   : > { %6304 = vmatmul.mubr.msk.f32.gmra.mrb[18].mxu0 %vm390_vm0, %v325_v25  ;;  %v3691_v25 = vld [vmem:[%s11093_s3 + $0x78] sm:$0xff] }
  0x3d   : > { %6306 = vmatprep.mubr.msk.f32.mxu0 %vm390_vm0, %v326_v26  ;;  %v6545_v26 = vpack.c.bf16 %v3691_v25, %v3690_v24 }
  0x3f   : > { %6546 = vmatprep.subr.bf16.mxu1 %v6545_v26 }
  0x40   : > { %6307 = vmatmul.mubr.msk.f32.gmra.mrb[20].mxu0 %vm390_vm0, %v327_v27  ;;  %v367_v27 = vld [vmem:[%s6687_s18 + $0x1e8] sm:$0xff]  ;;  %6548 = vmatpush3.bf16.msra.mxu1 %v6545_v26 }
  0x41   : > { %6309 = vmatprep.mubr.msk.f32.mxu0 %vm390_vm0, %v328_v28  ;;  %v368_v28 = vld [vmem:[%s6687_s18 + $0x1f0] sm:$0xff] }
  0x44   : > { %6310 = vmatmul.mubr.msk.f32.gmra.mrb[22].mxu0 %vm390_vm0, %v329_v29  ;;  %v369_v29 = vld [vmem:[%s6687_s18 + $0x1f8] sm:$0xff] }
  0x45   : > { %6312 = vmatprep.mubr.msk.f32.mxu0 %vm390_vm0, %v330_v30  ;;  %v370_v30 = vld [vmem:[%s6687_s18 + $0x200] sm:$0xff] }
  0x48   : > { %6313 = vmatmul.mubr.msk.f32.gmra.mrb[24].mxu0 %vm390_vm0, %v331_v31  ;;  %v371_v31 = vld [vmem:[%s6687_s18 + $0x208] sm:$0xff] }
  0x49   : > { %6315 = vmatprep.mubr.msk.f32.mxu0 %vm390_vm0, %v332_v32  ;;  %v372_v32 = vld [vmem:[%s6687_s18 + $0x210] sm:$0xff] }
  0x4c   : > { %6316 = vmatmul.mubr.msk.f32.gmra.mrb[26].mxu0 %vm390_vm0, %v333_v33  ;;  %v373_v33 = vld [vmem:[%s6687_s18 + $0x218] sm:$0xff] }
  0x4d   : > { %6318 = vmatprep.mubr.msk.f32.mxu0 %vm390_vm0, %v334_v34  ;;  %v374_v34 = vld [vmem:[%s6687_s18 + $0x220] sm:$0xff] }
  0x50   : > { %6319 = vmatmul.mubr.msk.f32.gmra.mrb[28].mxu0 %vm390_vm0, %v335_v35  ;;  %v375_v35 = vld [vmem:[%s6687_s18 + $0x228] sm:$0xff] }
  0x51   : > { %6321 = vmatprep.mubr.msk.f32.mxu0 %vm390_vm0, %v336_v36  ;;  %v376_v36 = vld [vmem:[%s6687_s18 + $0x230] sm:$0xff] }
  0x54   : > { %6322 = vmatmul.mubr.msk.f32.gmra.mrb[30].mxu0 %vm390_vm0, %v337_v37  ;;  %v377_v37 = vld [vmem:[%s6687_s18 + $0x238] sm:$0xff] }
  0x55   : > { %6324 = vmatprep.mubr.msk.f32.mxu0 %vm390_vm0, %v338_v38  ;;  %v378_v38 = vld [vmem:[%s6687_s18 + $0x240] sm:$0xff] }
  0x58   : > { %6325 = vmatmul.mubr.msk.f32.gmra.mrb[32].mxu0 %vm390_vm0, %v339_v39  ;;  %v379_v39 = vld [vmem:[%s6687_s18 + $0x248] sm:$0xff] }
  0x59   : > { %6327 = vmatprep.mubr.msk.f32.mxu0 %vm390_vm0, %v340_v40  ;;  %v380_v40 = vld [vmem:[%s6687_s18 + $0x250] sm:$0xff] }
  0x5c   : > { %6328 = vmatmul.mubr.msk.f32.gmra.mrb[34].mxu0 %vm390_vm0, %v341_v41  ;;  %v381_v41 = vld [vmem:[%s6687_s18 + $0x258] sm:$0xff] }
  0x5d   : > { %6330 = vmatprep.mubr.msk.f32.mxu0 %vm390_vm0, %v342_v42  ;;  %v382_v42 = vld [vmem:[%s6687_s18 + $0x260] sm:$0xff] }
  0x60   : > { %6331 = vmatmul.mubr.msk.f32.gmra.mrb[36].mxu0 %vm390_vm0, %v343_v43  ;;  %v383_v43 = vld [vmem:[%s6687_s18 + $0x268] sm:$0xff] }
  0x61   : > { %6333 = vmatprep.mubr.msk.f32.mxu0 %vm390_vm0, %v344_v44  ;;  %v384_v44 = vld [vmem:[%s6687_s18 + $0x270] sm:$0xff] }
  0x64   : > { %6334 = vmatmul.mubr.msk.f32.gmra.mrb[38].mxu0 %vm390_vm0, %v345_v45  ;;  %v385_v45 = vld [vmem:[%s6687_s18 + $0x278] sm:$0xff] }
  0x65   : > { %6336 = vmatprep.mubr.msk.f32.mxu0 %vm390_vm0, %v346_v46  ;;  %v1100_v46 = vlaneseq }
  0x68   : > { %6337 = vmatmul.mubr.msk.f32.gmra.mrb[40].mxu0 %vm390_vm0, %v347_v47  ;;  %v6897_v47 = vshrl.u32 %v1100_v46, 7 }
  0x69   : > { %6339 = vmatprep.mubr.msk.f32.mxu0 %vm390_vm0, %v348_v48 }
  0x6a   : > { %11267 = vst [vmem:[#allocation2_spill] sm:$0xff] %v6897_v47  ;;  %v11104_v48 = vsub.s32 1, %v6897_v47  ;;  %v11106_v53 = vsub.s32 0, %v6897_v47  ;;  %v11103_v56 = vsub.s32 4, %v6897_v47  ;;  %v11099_v1 = vsub.s32 6, %v6897_v47 }
  0x6c   : > { %6340 = vmatmul.mubr.msk.f32.gmra.mrb[42].mxu0 %vm390_vm0, %v349_v49  ;;  %v11102_v49 = vsub.s32 2, %v6897_v47 }
  0x6d   : > { %6342 = vmatprep.mubr.msk.f32.mxu0 %vm390_vm0, %v350_v50  ;;  %v1096_v50 = vld [vmem:[%s11092_s2] sm:$0xff] }
  0x6e   : > { %v6906_v51 = vrot.slane %v1096_v50, %v11104_v48  ;;  %v6910_v52 = vrot.slane %v1096_v50, %v11102_v49  ;;  %v6951_v17 = vrot.slane %v1096_v50, %v11099_v1 }
  0x70   : > { %6343 = vmatmul.mubr.msk.f32.gmra.mrb[44].mxu0 %vm390_vm0, %v351_v54 }
  0x71   : > { %6345 = vmatprep.mubr.msk.f32.mxu0 %vm390_vm0, %v352_v55  ;;  %v11105_v55 = vsub.s32 3, %v6897_v47 }
  0x74   : > { %6346 = vmatmul.mubr.msk.f32.gmra.mrb[46].mxu0 %vm390_vm0, %v353_v59 }
  0x75   : > { %6348 = vmatprep.mubr.msk.f32.mxu0 %vm390_vm0, %v354_v60  ;;  %v11100_v60 = vsub.s32 5, %v6897_v47 }
  0x78   : > { %6349 = vmatmul.mubr.msk.f32.gmra.mrb[48].mxu0 %vm390_vm0, %v355_v61  ;;  %v11101_v61 = vsub.s32 7, %v6897_v47 }
  0x79   : > { %6351 = vmatprep.mubr.msk.f32.mxu0 %vm390_vm0, %v356_v62  ;;  %v6921_v62 = vrot.slane %v1096_v50, %v11106_v53 }
  0x7b   : > { %11268 = vst [vmem:[#allocation3_spill] sm:$0xff] %v6921_v62 }
  0x7c   : > { %6352 = vmatmul.mubr.msk.f32.gmra.mrb[50].mxu0 %vm390_vm0, %v357_v2 }
  0x7d   : > { %6354 = vmatprep.mubr.msk.f32.mxu0 %vm390_vm0, %v358_v3 }
  0x80   : > { %6355 = vmatmul.mubr.msk.f32.gmra.mrb[52].mxu0 %vm390_vm0, %v359_v7  ;;  %v6928_v7 = vrot.slane %v1096_v50, %v11105_v55 }
  0x81   : > { %6357 = vmatprep.mubr.msk.f32.mxu0 %vm390_vm0, %v360_v8  ;;  %v6932_v8 = vrot.slane %v1096_v50, %v11103_v56 }
  0x84   : > { %6358 = vmatmul.mubr.msk.f32.gmra.mrb[54].mxu0 %vm390_vm0, %v361_v12  ;;  %v6938_v12 = vrot.slane %v1096_v50, %v11100_v60 }
  0x85   : > { %6360 = vmatprep.mubr.msk.f32.mxu0 %vm390_vm0, %v362_v13  ;;  %v6942_v13 = vrot.slane %v1096_v50, %v11101_v61 }
  0x88   : > { %6361 = vmatmul.mubr.msk.f32.gmra.mrb[56].mxu0 %vm390_vm0, %v363_v19 }
  0x89   : > { %6363 = vmatprep.mubr.msk.f32.mxu0 %vm390_vm0, %v364_v21 }
  0x8c   : > { %6364 = vmatmul.mubr.msk.f32.gmra.mrb[58].mxu0 %vm390_vm0, %v365_v22 }
  0x8d   : > { %6366 = vmatprep.mubr.msk.f32.mxu0 %vm390_vm0, %v366_v23 }
  0x90   : > { %6367 = vmatmul.mubr.msk.f32.gmra.mrb[60].mxu0 %vm390_vm0, %v367_v27 }
  0x91   : > { %6369 = vmatprep.mubr.msk.f32.mxu0 %vm390_vm0, %v368_v28 }
  0x94   : > { %6370 = vmatmul.mubr.msk.f32.gmra.mrb[62].mxu0 %vm390_vm0, %v369_v29 }
  0x95   : > { %6372 = vmatprep.mubr.msk.f32.mxu0 %vm390_vm0, %v370_v30 }
  0x98   : > { %6373 = vmatmul.mubr.msk.f32.gmra.mrb[64].mxu0 %vm390_vm0, %v371_v31 }
  0x99   : > { %6375 = vmatprep.mubr.msk.f32.mxu0 %vm390_vm0, %v372_v32 }
  0x9c   : > { %6376 = vmatmul.mubr.msk.f32.gmra.mrb[66].mxu0 %vm390_vm0, %v373_v33 }
  0x9d   : > { %6378 = vmatprep.mubr.msk.f32.mxu0 %vm390_vm0, %v374_v34 }
  0xa0   : > { %6379 = vmatmul.mubr.msk.f32.gmra.mrb[68].mxu0 %vm390_vm0, %v375_v35 }
  0xa1   : > { %6381 = vmatprep.mubr.msk.f32.mxu0 %vm390_vm0, %v376_v36 }
  0xa4   : > { %6382 = vmatmul.mubr.msk.f32.gmra.mrb[70].mxu0 %vm390_vm0, %v377_v37 }
  0xa5   : > { %6384 = vmatprep.mubr.msk.f32.mxu0 %vm390_vm0, %v378_v38 }
  0xa8   : > { %6385 = vmatmul.mubr.msk.f32.gmra.mrb[72].mxu0 %vm390_vm0, %v379_v39 }
  0xa9   : > { %6387 = vmatprep.mubr.msk.f32.mxu0 %vm390_vm0, %v380_v40 }
  0xac   : > { %6388 = vmatmul.mubr.msk.f32.gmra.mrb[74].mxu0 %vm390_vm0, %v381_v41 }
  0xad   : > { %6390 = vmatprep.mubr.msk.f32.mxu0 %vm390_vm0, %v382_v42 }
  0xb0   : > { %6391 = vmatmul.mubr.msk.f32.gmra.mrb[76].mxu0 %vm390_vm0, %v383_v43 }
  0xb1   : > { %6393 = vmatprep.mubr.msk.f32.mxu0 %vm390_vm0, %v384_v44 }
  0xb4   : > { %6394 = vmatmul.mubr.msk.f32.gmra.mrb[78].mxu0 %vm390_vm0, %v385_v45 }
  0xeb   : > { %v6278_v54 = vpop.f32.mrb[0].mxu0 }
  0xec   : > { %v1387_v57 = vmul.f32 %v6278_v54, %v6906_v51  ;;  %v2534_v58 = vmul.f32 %v6278_v54, %v6910_v52  ;;  %v697_v59 = vpop.f32.mrb[1].mxu0  ;;  %v1105_v18 = vmul.f32 %v6278_v54, %v6921_v62 }
  0xed   : > { %v1386_v63 = vmul.f32 %v6906_v51, %v697_v59  ;;  %v2533_v0 = vmul.f32 %v6910_v52, %v697_v59  ;;  %v1104_v22 = vmul.f32 %v6921_v62, %v697_v59 }
  0xee   : > { %v1532_v2 = vrot.slane %v1387_v57, 1  ;;  %v2679_v3 = vrot.slane %v2534_v58, 2 }
  0xef   : > { %v1531_v4 = vrot.slane %v1386_v63, 1  ;;  %v2678_v5 = vrot.slane %v2533_v0, 2  ;;  %v6281_v6 = vpop.f32.mrb[2].mxu0 }
  0xf0   : > { %v1389_v9 = vmul.f32 %v6281_v6, %v6906_v51  ;;  %v2536_v10 = vmul.f32 %v6281_v6, %v6910_v52  ;;  %v707_v11 = vpop.f32.mrb[3].mxu0 }
  0xf1   : > { %v6945_v14 = vsel %vm1530_vm1, %v1531_v4, %v1532_v2  ;;  %v1388_v15 = vmul.f32 %v6906_v51, %v707_v11  ;;  %v2535_v16 = vmul.f32 %v6910_v52, %v707_v11  ;;  %v6955_v21 = vsel %vm2677_vm2, %v2678_v5, %v2679_v3 }
  0xf2   : > { %v1536_v19 = vrot.slane %v1389_v9, 1  ;;  %v2683_v20 = vrot.slane %v2536_v10, 2  ;;  %v1106_v23 = vmul.f32 %v6921_v62, %v707_v11 }
  0xf3   : > { %v1534_v24 = vrot.slane %v1388_v15, 1  ;;  %v2681_v25 = vrot.slane %v2535_v16, 2  ;;  %v6284_v26 = vpop.f32.mrb[4].mxu0 }
  0xf4   : > { %v6960_v27 = vmul.f32 %v6284_v26, %v6921_v62  ;;  %v1163_v28 = vmul.f32 %v6284_v26, %v6928_v7  ;;  %v6964_v29 = vmul.f32 %v6284_v26, %v6906_v51  ;;  %v6967_v30 = vmul.f32 %v6284_v26, %v6932_v8  ;;  %v717_v31 = vpop.f32.mrb[5].mxu0 }
  0xf5   : > { %v6970_v32 = vsel %vm1530_vm1, %v1532_v2, %v1534_v24  ;;  %v6973_v33 = vsel %vm1530_vm1, %v1534_v24, %v1536_v19  ;;  %v6976_v34 = vsel %vm2677_vm2, %v2679_v3, %v2681_v25  ;;  %v6979_v35 = vsel %vm2677_vm2, %v2681_v25, %v2683_v20  ;;  %v7039_v24 = vld [vmem:[%s11092_s2 + $0x8] ss:$0 sm:$0xff] }
  0xf6   : > { %v6981_v36 = vadd.f32 %v1163_v28, %v1105_v18  ;;  %v1914_v38 = vrot.slane %v6967_v30, 1  ;;  %v6986_v39 = vmul.f32 %v6284_v26, %v6910_v52  ;;  %v6989_v40 = vmul.f32 %v6921_v62, %v717_v31 }
  0xf7   : > { %v1162_v41 = vmul.f32 %v6928_v7, %v717_v31  ;;  %v6993_v42 = vmul.f32 %v6906_v51, %v717_v31  ;;  %v1769_v43 = vmul.f32 %v6932_v8, %v717_v31  ;;  %v6287_v44 = vpop.f32.mrb[6].mxu0  ;;  %v6998_v46 = vmul.f32 %v6910_v52, %v717_v31 }
  0xf8   : > { %v7001_v50 = vmul.f32 %v6287_v44, %v6906_v51  ;;  %v7004_v54 = vmul.f32 %v6287_v44, %v6932_v8  ;;  %v727_v57 = vpop.f32.mrb[7].mxu0  ;;  %v7008_v0 = vmul.f32 %v6287_v44, %v6910_v52  ;;  %v7014_v5 = vmul.f32 %v6287_v44, %v6938_v12 }
  0xf9   : > { %v1216_v58 = vadd.f32 %v1162_v41, %v1104_v22  ;;  %v1913_v63 = vrot.slane %v1769_v43, 1  ;;  %v7018_v9 = vmul.f32 %v6921_v62, %v727_v57  ;;  %v1164_v10 = vmul.f32 %v6928_v7, %v727_v57 }
  0xfa   : > { %v1918_v4 = vrot.slane %v7004_v54, 1  ;;  %v7022_v11 = vmul.f32 %v6906_v51, %v727_v57  ;;  %v1771_v18 = vmul.f32 %v6932_v8, %v727_v57  ;;  %v7029_v19 = vmul.f32 %v6910_v52, %v727_v57 }
  0xfb   : > { %v7024_v15 = vpop.f32.mrb[8].mxu0  ;;  %v7032_v20 = vmul.f32 %v6938_v12, %v727_v57  ;;  %v7041_v25 = vadd.f32 %v1164_v10, %v1106_v23  ;;  %v1915_v43 = vsel %vm1530_vm1, %v1913_v63, %v1914_v38  ;;  %v2916_v60 = vmul.f32 %v6938_v12, %v717_v31 }
  0xfc   : > { %v7034_v22 = vpop.f32.mrb[9].mxu0  ;;  %v1916_v44 = vrot.slane %v1771_v18, 1  ;;  %v2152_v1 = vmul.f32 %v7024_v15, %v6942_v13  ;;  %v2917_v61 = vmul.f32 %v6284_v26, %v6938_v12 }
  0xfd   : > { %v1274_v41 = vmul.f32 %v6951_v17, %v7034_v22  ;;  %v2151_v57 = vmul.f32 %v6942_v13, %v7034_v22  ;;  %v3298_v49 = vmul.f32 %v7039_v24, %v7034_v22  ;;  %v3060_v59 = vrot.slane %v2916_v60, 2 }
  0xfe   : > { %v2296_v55 = vrot.slane %v2152_v1, 1  ;;  %v3061_v37 = vrot.slane %v2917_v61, 2  ;;  %v3063_v60 = vrot.slane %v7032_v20, 2 }
  0xff   : > { %v7054_v23 = vpop.f32.mrb[10].mxu0  ;;  %v1328_v10 = vadd.f32 %v1274_v41, %v1216_v58  ;;  %v2295_v48 = vrot.slane %v2151_v57, 1  ;;  %v3442_v1 = vrot.slane %v3298_v49, 2  ;;  %v1275_v57 = vmul.f32 %v7024_v15, %v6951_v17 }
 0x100   : > { %v7062_v63 = vmul.f32 %v7054_v23, %v6906_v51  ;;  %v7066_v18 = vmul.f32 %v7054_v23, %v6932_v8  ;;  %v2154_v56 = vmul.f32 %v7054_v23, %v6942_v13  ;;  %v7072_v58 = vmul.f32 %v7054_v23, %v6910_v52  ;;  %v7074_v31 = vpop.f32.mrb[11].mxu0 }
 0x101   : > { %v7078_v26 = vmul.f32 %v7054_v23, %v6938_v12  ;;  %v1711_v41 = vadd.f32 %v6945_v14, %v1328_v10  ;;  %v2297_v45 = vsel %vm1530_vm1, %v2295_v48, %v2296_v55  ;;  %v3299_v14 = vmul.f32 %v7024_v15, %v7039_v24 }
 0x102   : > { %11269 = vst [vmem:[#allocation4_spill] sm:$0xff] %v7062_v63  ;;  %11270 = vst [vmem:[#allocation5_spill] sm:$0xff] %v7072_v58  ;;  %v2300_v3 = vrot.slane %v2154_v56, 1  ;;  %v1917_v56 = vsel %vm1530_vm1, %v1914_v38, %v1916_v44  ;;  %v2153_v48 = vmul.f32 %v6942_v13, %v7074_v31  ;;  %v3300_v49 = vmul.f32 %v7039_v24, %v7074_v31 }
 0x103   : > { %v7084_v28 = vpop.f32.mrb[12].mxu0  ;;  %v2093_v2 = vadd.f32 %v1915_v43, %v1711_v41  ;;  %v3062_v43 = vsel %vm2677_vm2, %v3060_v59, %v3061_v37  ;;  %v3443_v61 = vrot.slane %v3299_v14, 2  ;;  %v1329_v41 = vadd.f32 %v1275_v57, %v6981_v36 }
 0x104   : > { %v7087_v16 = vpop.f32.mrb[13].mxu0  ;;  %v1276_v54 = vmul.f32 %v6951_v17, %v7074_v31  ;;  %v3064_v59 = vsel %vm2677_vm2, %v3061_v37, %v3063_v60  ;;  %v3301_v47 = vmul.f32 %v7054_v23, %v7039_v24 }
 0x105   : > { %v2475_v10 = vadd.f32 %v2297_v45, %v2093_v2  ;;  %v2298_v45 = vrot.slane %v2153_v48, 1  ;;  %v1919_v2 = vsel %vm1530_vm1, %v1916_v44, %v1918_v4  ;;  %v3444_v44 = vsel %vm2677_vm2, %v3442_v1, %v3443_v61 }
 0x106   : > { %v1330_v1 = vadd.f32 %v1276_v54, %v7041_v25  ;;  %v11276_v54 = vrot.slane %v6993_v42, 1 }
 0x107   : > { %v7105_v30 = vpop.f32.mrb[14].mxu0  ;;  %v2858_v38 = vadd.f32 %v6955_v21, %v2475_v10  ;;  %v1712_v10 = vadd.f32 %v6970_v32, %v1329_v41  ;;  %v2301_v32 = vsel %vm1530_vm1, %v2298_v45, %v2300_v3  ;;  %v11274_v41 = vrot.slane %v7014_v5, 2 }
 0x108   : > { %11271 = vst [vmem:[#allocation6_spill] sm:$0xff] %v7105_v30  ;;  %v7112_v20 = vmul.f32 %v7105_v30, %v6906_v51  ;;  %v7116_v36 = vmul.f32 %v7105_v30, %v6932_v8  ;;  %v7120_v14 = vmul.f32 %v7105_v30, %v6942_v13  ;;  %v7124_v21 = vmul.f32 %v7105_v30, %v6910_v52  ;;  %v7126_v57 = vpop.f32.mrb[15].mxu0 }
 0x109   : > { %v7130_v37 = vmul.f32 %v7105_v30, %v6938_v12  ;;  %v3240_v4 = vadd.f32 %v3062_v43, %v2858_v38  ;;  %v2094_v62 = vadd.f32 %v1917_v56, %v1712_v10  ;;  %v2299_v30 = vsel %vm1530_vm1, %v2296_v55, %v2298_v45 }
 0x10a   : > { %11272 = vst [vmem:[#allocation7_spill] sm:$0xff] %v7124_v21  ;;  %v3066_v38 = vsel %vm2677_vm2, %v3063_v60, %v11274_v41  ;;  %v1165_v55 = vmul.f32 %v6928_v7, %v7034_v22  ;;  %v1713_v25 = vadd.f32 %v6973_v33, %v1330_v1  ;;  %v3447_v3 = vrot.slane %v3301_v47, 2 }
 0x10b   : > { %11273 = vst [vmem:[#allocation8_spill] sm:$0xff] %v7130_v37  ;;  %v7138_v58 = vpop.f32.mrb[16].mxu0  ;;  %v3622_v63 = vadd.f32 %v3444_v44, %v3240_v4  ;;  %v3445_v37 = vrot.slane %v3300_v49, 2  ;;  %v2476_v48 = vadd.f32 %v2299_v30, %v2094_v62  ;;  %v1277_v49 = vmul.f32 %v6951_v17, %v7087_v16 }
 0x10c   : > { %v7141_v43 = vpop.f32.mrb[17].mxu0  ;;  %v11275_v5 = vrot.slane %v6964_v29, 1  ;;  %v1773_v62 = vmul.f32 %v6932_v8, %v7034_v22  ;;  %v7169_v30 = vmul.f32 %v7024_v15, %v6932_v8  ;;  %v2155_v47 = vmul.f32 %v6942_v13, %v7087_v16 }
 0x10d   : > { %6428 = vmatprep.mubr.f32.mxu1 %v3622_v63  ;;  %v3446_v56 = vsel %vm2677_vm2, %v3443_v61, %v3445_v37  ;;  %v2859_v23 = vadd.f32 %v6976_v34, %v2476_v48  ;;  %v1219_v61 = vadd.f32 %v1165_v55, %v6989_v40  ;;  %v2095_v10 = vadd.f32 %v1919_v2, %v1713_v25 }
 0x10e   : > { %v1540_v60 = vsel %vm1530_vm1, %v11276_v54, %v11275_v5  ;;  %v3448_v48 = vsel %vm2677_vm2, %v3445_v37, %v3447_v3  ;;  %v1921_v2 = vrot.slane %v7169_v30, 1  ;;  %v2156_v37 = vmul.f32 %v7084_v28, %v6942_v13 }
 0x10f   : > { %v7164_v63 = vpop.f32.mrb[18].mxu0  ;;  %v3241_v4 = vadd.f32 %v3064_v59, %v2859_v23  ;;  %v2477_v53 = vadd.f32 %v2301_v32, %v2095_v10  ;;  %v1331_v59 = vadd.f32 %v1277_v49, %v1219_v61  ;;  %v1920_v23 = vrot.slane %v1773_v62, 1 }
 0x110   : > { %v7175_v33 = vmul.f32 %v7164_v63, %v6906_v51  ;;  %v7179_v42 = vmul.f32 %v7164_v63, %v6932_v8  ;;  %v7183_v34 = vmul.f32 %v7164_v63, %v6942_v13  ;;  %v7187_v40 = vmul.f32 %v7164_v63, %v6910_v52  ;;  %v7189_v45 = vpop.f32.mrb[19].mxu0 }
 0x111   : > { %v7193_v44 = vmul.f32 %v7164_v63, %v6938_v12  ;;  %v3623_v54 = vadd.f32 %v3446_v56, %v3241_v4  ;;  %v2302_v25 = vrot.slane %v2155_v47, 1  ;;  %v11279_v3 = vrot.slane %v6986_v39, 2 }
 0x112   : > { %11277 = vst [vmem:[#allocation9_spill] sm:$0xff] %v7175_v33  ;;  %11278 = vst [vmem:[#allocation10_spill] sm:$0xff] %v7187_v40  ;;  %v11280_v1 = vrot.slane %v6998_v46, 2  ;;  %v2860_v32 = vadd.f32 %v6979_v35, %v2477_v53  ;;  %v1714_v56 = vadd.f32 %v1540_v60, %v1331_v59  ;;  %v2920_v49 = vmul.f32 %v6938_v12, %v7034_v22 }
 0x113   : > { %v7200_v6 = vpop.f32.mrb[20].mxu0  ;;  %6429 = vmatmul.mubr.f32.vlgmr.msra.gmra.mrb[0].mxu1 %v3623_v54  ;;  %v2921_v62 = vmul.f32 %v7024_v15, %v6938_v12  ;;  %v1922_v61 = vsel %vm1530_vm1, %v1920_v23, %v1921_v2  ;;  %v2303_v30 = vrot.slane %v2156_v37, 1  ;;  %v3302_v47 = vmul.f32 %v7039_v24, %v7087_v16 }
 0x114   : > { %v7202_v21 = vpop.f32.mrb[21].mxu0  ;;  %v2687_v5 = vsel %vm2677_vm2, %v11280_v1, %v11279_v3  ;;  %v3303_v46 = vmul.f32 %v7084_v28, %v7039_v24  ;;  %v3242_v4 = vadd.f32 %v3066_v38, %v2860_v32  ;;  %v2096_v10 = vadd.f32 %v1922_v61, %v1714_v56 }
 0x115   : > { %v3067_v1 = vrot.slane %v2920_v49, 2  ;;  %v3068_v53 = vrot.slane %v2921_v62, 2  ;;  %v2304_v60 = vsel %vm1530_vm1, %v2302_v25, %v2303_v30  ;;  %v3449_v54 = vrot.slane %v3302_v47, 2 }
 0x116   : > { %v3450_v59 = vrot.slane %v3303_v46, 2  ;;  %v1166_v23 = vmul.f32 %v7024_v15, %v6928_v7  ;;  %v3624_v3 = vadd.f32 %v3448_v48, %v3242_v4  ;;  %v2478_v41 = vadd.f32 %v2304_v60, %v2096_v10 }
 0x117   : > { %v7222_v35 = vpop.f32.mrb[22].mxu0  ;;  %v3069_v55 = vsel %vm2677_vm2, %v3067_v1, %v3068_v53  ;;  %v1278_v38 = vmul.f32 %v7084_v28, %v6951_v17  ;;  %v11281_v25 = vrot.slane %v7022_v11, 1  ;;  %v11282_v49 = vrot.slane %v6964_v29, 1 }
 0x118   : > { %v7227_v37 = vpop.f32.mrb[23].mxu0  ;;  %v3451_v32 = vsel %vm2677_vm2, %v3449_v54, %v3450_v59  ;;  %v1220_v56 = vadd.f32 %v1166_v23, %v6960_v27  ;;  %v1775_v61 = vmul.f32 %v6932_v8, %v7074_v31  ;;  %6431 = vmatprep.mubr.f32.mxu1 %v3624_v3  ;;  %v2861_v48 = vadd.f32 %v2687_v5, %v2478_v41 }
 0x119   : > { %v1542_v62 = vsel %vm1530_vm1, %v11282_v49, %v11281_v25  ;;  %v2157_v47 = vmul.f32 %v6942_v13, %v7126_v57  ;;  %v11283_v46 = vrot.slane %v7029_v19, 2  ;;  %v11284_v4 = vrot.slane %v6986_v39, 2 }
 0x11a   : > { %v2922_v10 = vmul.f32 %v6938_v12, %v7074_v31  ;;  %v1332_v1 = vadd.f32 %v1278_v38, %v1220_v56  ;;  %v1923_v60 = vrot.slane %v1775_v61, 1  ;;  %v3304_v54 = vmul.f32 %v7039_v24, %v7126_v57 }
 0x11b   : > { %v2689_v27 = vsel %vm2677_vm2, %v11284_v4, %v11283_v46  ;;  %v7250_v29 = vpop.f32.mrb[24].mxu0  ;;  %v7256_v41 = vmul.f32 %v7222_v35, %v6906_v51  ;;  %v3243_v23 = vadd.f32 %v3069_v55, %v2861_v48  ;;  %v2305_v39 = vrot.slane %v2157_v47, 1 }
 0x11c   : > { %v7258_v5 = vpop.f32.mrb[25].mxu0  ;;  %v3070_v3 = vrot.slane %v2922_v10, 2  ;;  %v7262_v25 = vmul.f32 %v7222_v35, %v6932_v8  ;;  %v1715_v49 = vadd.f32 %v1542_v62, %v1332_v1  ;;  %v1924_v38 = vsel %vm1530_vm1, %v1921_v2, %v1923_v60 }
 0x11d   : > { %11285 = vst [vmem:[#allocation11_spill] sm:$0xff] %v7256_v41  ;;  %v3452_v56 = vrot.slane %v3304_v54, 2  ;;  %v3625_v46 = vadd.f32 %v3451_v32, %v3243_v23  ;;  %v2306_v4 = vsel %vm1530_vm1, %v2303_v30, %v2305_v39  ;;  %v7274_v62 = vmul.f32 %v7222_v35, %v6942_v13 }
 0x11e   : > { %v3071_v40 = vsel %vm2677_vm2, %v3068_v53, %v3070_v3  ;;  %v2097_v48 = vadd.f32 %v1924_v38, %v1715_v49  ;;  %v7278_v2 = vmul.f32 %v7222_v35, %v6910_v52  ;;  %v7284_v30 = vmul.f32 %v7222_v35, %v6938_v12 }
 0x11f   : > { %v7269_v55 = vpop.f32.mrb[26].mxu0  ;;  %v3453_v47 = vsel %vm2677_vm2, %v3450_v59, %v3452_v56  ;;  %6432 = vmatmul.mubr.f32.gmra.mrb[2].mxu1 %v3625_v46  ;;  %v1167_v53 = vmul.f32 %v6928_v7, %v7074_v31  ;;  %v1279_v59 = vmul.f32 %v6951_v17, %v7126_v57  ;;  %v11288_v10 = vrot.slane %v7001_v50, 1 }
 0x120   : > { %11286 = vst [vmem:[#allocation12_spill] sm:$0xff] %v7278_v2  ;;  %v7280_v32 = vpop.f32.mrb[27].mxu0  ;;  %11287 = vst [vmem:[#allocation13_spill] sm:$0xff] %v7284_v30  ;;  %v11289_v1 = vrot.slane %v7022_v11, 1  ;;  %v2479_v23 = vadd.f32 %v2306_v4, %v2097_v48  ;;  %v11290_v46 = vrot.slane %v7066_v18, 1  ;;  %v11291_v41 = vrot.slane %v7120_v14, 1 }
 0x121   : > { %v1221_v33 = vadd.f32 %v1167_v53, %v7018_v9  ;;  %v11292_v50 = vrot.slane %v7008_v0, 2  ;;  %v11293_v11 = vrot.slane %v7029_v19, 2  ;;  %v3072_v48 = vrot.slane %v7078_v26, 2  ;;  %v11295_v18 = vld [vmem:[#allocation6_spill] sm:$0xff]  ;;  %v11296_v9 = vld [vmem:[#allocation3_spill] sm:$0xff] }
 0x122   : > { %v1544_v54 = vsel %vm1530_vm1, %v11289_v1, %v11288_v10  ;;  %v1926_v61 = vsel %vm1530_vm1, %v1923_v60, %v11290_v46  ;;  %v2308_v30 = vsel %vm1530_vm1, %v2305_v39, %v11291_v41  ;;  %v2862_v1 = vadd.f32 %v2689_v27, %v2479_v23 }
 0x123   : > { %v2691_v4 = vsel %vm2677_vm2, %v11293_v11, %v11292_v50  ;;  %v7310_v10 = vpop.f32.mrb[28].mxu0  ;;  %v3305_v60 = vmul.f32 %v11295_v18, %v7039_v24  ;;  %v1110_v53 = vmul.f32 %v11296_v9, %v7034_v22  ;;  %v1168_v14 = vmul.f32 %v6928_v7, %v7087_v16 }
 0x124   : > { %11294 = vst [vmem:[#allocation14_spill] sm:$0xff] %v7310_v10  ;;  %v7318_v41 = vpop.f32.mrb[29].mxu0  ;;  %v1333_v0 = vadd.f32 %v1279_v59, %v1221_v33  ;;  %v3073_v19 = vsel %vm2677_vm2, %v3070_v3, %v3072_v48  ;;  %v1280_v26 = vmul.f32 %v6951_v17, %v7141_v43  ;;  %v1394_v27 = vmul.f32 %v6906_v51, %v7034_v22 }
 0x125   : > { %v3244_v39 = vadd.f32 %v3071_v40, %v2862_v1  ;;  %v3454_v23 = vrot.slane %v3305_v60, 2  ;;  %v1222_v46 = vadd.f32 %v1168_v14, %v1110_v53  ;;  %v7327_v50 = vmul.f32 %v7024_v15, %v6906_v51 }
 0x126   : > { %v1716_v11 = vadd.f32 %v1544_v54, %v1333_v0  ;;  %v1545_v18 = vrot.slane %v1394_v27, 1  ;;  %v1777_v33 = vmul.f32 %v6932_v8, %v7087_v16  ;;  %v7333_v3 = vmul.f32 %v7084_v28, %v6932_v8 }
 0x127   : > { %v7335_v59 = vpop.f32.mrb[30].mxu0  ;;  %v3626_v48 = vadd.f32 %v3453_v47, %v3244_v39  ;;  %v3455_v40 = vsel %vm2677_vm2, %v3452_v56, %v3454_v23  ;;  %v1334_v1 = vadd.f32 %v1280_v26, %v1222_v46  ;;  %v1546_v60 = vrot.slane %v7327_v50, 1 }
 0x128   : > { %v7339_v53 = vpop.f32.mrb[31].mxu0  ;;  %v2098_v14 = vadd.f32 %v1926_v61, %v1716_v11  ;;  %v1927_v54 = vrot.slane %v1777_v33, 1  ;;  %v1928_v0 = vrot.slane %v7333_v3, 1  ;;  %v2159_v27 = vmul.f32 %v6942_v13, %v7141_v43 }
 0x129   : > { %11297 = vst [vmem:[#allocation6_spill] sm:$0xff] %v7339_v53  ;;  %6434 = vmatprep.mubr.f32.mxu1 %v3626_v48  ;;  %v1547_v38 = vsel %vm1530_vm1, %v1545_v18, %v1546_v60  ;;  %v2160_v47 = vmul.f32 %v7138_v58, %v6942_v13  ;;  %v2541_v56 = vmul.f32 %v6910_v52, %v7034_v22 }
 0x12a   : > { %v2542_v26 = vmul.f32 %v7024_v15, %v6910_v52  ;;  %v2480_v39 = vadd.f32 %v2308_v30, %v2098_v14  ;;  %v1717_v61 = vadd.f32 %v1547_v38, %v1334_v1  ;;  %v1929_v23 = vsel %vm1530_vm1, %v1927_v54, %v1928_v0 }
 0x12b   : > { %v2309_v46 = vrot.slane %v2159_v27, 1  ;;  %v7352_v50 = vpop.f32.mrb[32].mxu0  ;;  %v2310_v11 = vrot.slane %v2160_v47, 1  ;;  %v2692_v33 = vrot.slane %v2541_v56, 2  ;;  %v2924_v18 = vmul.f32 %v6938_v12, %v7087_v16 }
 0x12c   : > { %11298 = vst [vmem:[#allocation3_spill] sm:$0xff] %v7352_v50  ;;  %v2693_v3 = vrot.slane %v2542_v26, 2  ;;  %v7356_v48 = vpop.f32.mrb[33].mxu0  ;;  %v2863_v49 = vadd.f32 %v2691_v4, %v2480_v39  ;;  %v2099_v22 = vadd.f32 %v1929_v23, %v1717_v61  ;;  %v2925_v2 = vmul.f32 %v7084_v28, %v6938_v12 }
 0x12d   : > { %11299 = vst [vmem:[#allocation15_spill] sm:$0xff] %v7356_v48  ;;  %v3306_v30 = vmul.f32 %v7039_v24, %v7141_v43  ;;  %v2311_v38 = vsel %vm1530_vm1, %v2309_v46, %v2310_v11  ;;  %v3074_v14 = vrot.slane %v2924_v18, 2  ;;  %v3307_v54 = vmul.f32 %v7138_v58, %v7039_v24 }
 0x12e   : > { %v2694_v1 = vsel %vm2677_vm2, %v2692_v33, %v2693_v3  ;;  %v3245_v27 = vadd.f32 %v3073_v19, %v2863_v49  ;;  %v2481_v47 = vadd.f32 %v2311_v38, %v2099_v22  ;;  %v3075_v56 = vrot.slane %v2925_v2, 2 }
 0x12f   : > { %v3456_v26 = vrot.slane %v3306_v30, 2  ;;  %v7366_v4 = vpop.f32.mrb[34].mxu0  ;;  %v3457_v39 = vrot.slane %v3307_v54, 2  ;;  %v1111_v61 = vmul.f32 %v7024_v15, %v11296_v9  ;;  %v1169_v23 = vmul.f32 %v7084_v28, %v6928_v7 }
 0x130   : > { %v1281_v46 = vmul.f32 %v7138_v58, %v6951_v17  ;;  %v7374_v33 = vpop.f32.mrb[35].mxu0  ;;  %v3627_v18 = vadd.f32 %v3455_v40, %v3245_v27  ;;  %v2864_v50 = vadd.f32 %v2694_v1, %v2481_v47  ;;  %v3076_v49 = vsel %vm2677_vm2, %v3074_v14, %v3075_v56 }
 0x131   : > { %11300 = vst [vmem:[#allocation16_spill] sm:$0xff] %v7374_v33  ;;  %v1396_v2 = vmul.f32 %v6906_v51, %v7074_v31  ;;  %v3458_v19 = vsel %vm2677_vm2, %v3456_v26, %v3457_v39  ;;  %v1223_v22 = vadd.f32 %v1169_v23, %v1111_v61  ;;  %v1779_v15 = vmul.f32 %v6932_v8, %v7126_v57 }
 0x132   : > { %v2161_v30 = vmul.f32 %v6942_v13, %v7189_v45  ;;  %6435 = vmatmul.mubr.f32.gmra.mrb[4].mxu1 %v3627_v18  ;;  %v3246_v38 = vadd.f32 %v3076_v49, %v2864_v50  ;;  %v2543_v40 = vmul.f32 %v6910_v52, %v7074_v31  ;;  %v2926_v1 = vmul.f32 %v6938_v12, %v7126_v57 }
 0x133   : > { %v1548_v54 = vrot.slane %v1396_v2, 1  ;;  %v7388_v14 = vpop.f32.mrb[36].mxu0  ;;  %v1335_v27 = vadd.f32 %v1281_v46, %v1223_v22  ;;  %v1930_v47 = vrot.slane %v1779_v15, 1  ;;  %v3308_v61 = vmul.f32 %v7039_v24, %v7189_v45 }
 0x134   : > { %11301 = vst [vmem:[#allocation17_spill] sm:$0xff] %v7388_v14  ;;  %v2312_v26 = vrot.slane %v2161_v30, 1  ;;  %v7392_v23 = vpop.f32.mrb[37].mxu0  ;;  %v3628_v33 = vadd.f32 %v3458_v19, %v3246_v38  ;;  %v2695_v18 = vrot.slane %v2543_v40, 2  ;;  %v3077_v49 = vrot.slane %v2926_v1, 2 }
 0x135   : > { %11302 = vst [vmem:[#allocation18_spill] sm:$0xff] %v7392_v23  ;;  %v1549_v50 = vsel %vm1530_vm1, %v1546_v60, %v1548_v54  ;;  %v1931_v48 = vsel %vm1530_vm1, %v1928_v0, %v1930_v47  ;;  %v3459_v10 = vrot.slane %v3308_v61, 2  ;;  %v7401_v15 = vmul.f32 %v7269_v55, %v6906_v51  ;;  %v11312_v23 = vld [vmem:[#allocation5_spill] sm:$0xff] }
 0x136   : > { %v1718_v2 = vadd.f32 %v1549_v50, %v1335_v27  ;;  %v2313_v53 = vsel %vm1530_vm1, %v2310_v11, %v2312_v26  ;;  %6437 = vmatprep.mubr.f32.mxu1 %v3628_v33  ;;  %v2696_v46 = vsel %vm2677_vm2, %v2693_v3, %v2695_v18  ;;  %v3078_v22 = vsel %vm2677_vm2, %v3075_v56, %v3077_v49 }
 0x137   : > { %11303 = vst [vmem:[#allocation19_spill] sm:$0xff] %v7401_v15  ;;  %v7405_v60 = vmul.f32 %v7269_v55, %v6932_v8  ;;  %v7407_v19 = vpop.f32.mrb[38].mxu0  ;;  %v3460_v0 = vsel %vm2677_vm2, %v3457_v39, %v3459_v10  ;;  %v7412_v11 = vmul.f32 %v7269_v55, %v6942_v13  ;;  %v7416_v3 = vmul.f32 %v7269_v55, %v6910_v52 }
 0x138   : > { %v2100_v30 = vadd.f32 %v1931_v48, %v1718_v2  ;;  %v7418_v56 = vpop.f32.mrb[39].mxu0  ;;  %v7424_v40 = vmul.f32 %v7269_v55, %v6938_v12  ;;  %v1112_v48 = vmul.f32 %v11296_v9, %v7074_v31  ;;  %v1170_v61 = vmul.f32 %v6928_v7, %v7126_v57  ;;  %v11308_v2 = vld [vmem:[#allocation4_spill] sm:$0xff] }
 0x139   : > { %11304 = vst [vmem:[#allocation20_spill] sm:$0xff] %v7405_v60  ;;  %11305 = vst [vmem:[#allocation21_spill] sm:$0xff] %v7416_v3  ;;  %v1282_v50 = vmul.f32 %v6951_v17, %v7189_v45  ;;  %v11309_v33 = vrot.slane %v11308_v2, 1  ;;  %v11311_v31 = vrot.slane %v7183_v34, 1  ;;  %v11313_v3 = vrot.slane %v11312_v23, 2 }
 0x13a   : > { %11306 = vst [vmem:[#allocation22_spill] sm:$0xff] %v7418_v56  ;;  %11307 = vst [vmem:[#allocation23_spill] sm:$0xff] %v7424_v40  ;;  %v2482_v39 = vadd.f32 %v2313_v53, %v2100_v30  ;;  %v11310_v56 = vrot.slane %v7116_v36, 1  ;;  %v1224_v1 = vadd.f32 %v1170_v61, %v1112_v48  ;;  %v11314_v40 = vld [vmem:[#allocation8_spill] sm:$0xff]  ;;  %v3309_v36 = vmul.f32 %v7164_v63, %v7039_v24 }
 0x13b   : > { %v1551_v38 = vsel %vm1530_vm1, %v1548_v54, %v11309_v33  ;;  %v2315_v53 = vsel %vm1530_vm1, %v2312_v26, %v11311_v31  ;;  %v7443_v30 = vpop.f32.mrb[40].mxu0  ;;  %v2698_v15 = vsel %vm2677_vm2, %v2695_v18, %v11313_v3  ;;  %v3079_v2 = vrot.slane %v11314_v40, 2 }
 0x13c   : > { %v1933_v14 = vsel %vm1530_vm1, %v1930_v47, %v11310_v56  ;;  %v2865_v27 = vadd.f32 %v2696_v46, %v2482_v39  ;;  %v7449_v60 = vpop.f32.mrb[41].mxu0  ;;  %v1113_v34 = vmul.f32 %v11296_v9, %v7087_v16  ;;  %v1171_v54 = vmul.f32 %v6928_v7, %v7141_v43 }
 0x13d   : > { %v1283_v47 = vmul.f32 %v6951_v17, %v7202_v21  ;;  %v1336_v23 = vadd.f32 %v1282_v50, %v1224_v1  ;;  %v3080_v18 = vsel %vm2677_vm2, %v3077_v49, %v3079_v2  ;;  %v1398_v46 = vmul.f32 %v6906_v51, %v7087_v16 }
 0x13e   : > { %v3247_v26 = vadd.f32 %v3078_v22, %v2865_v27  ;;  %v3461_v3 = vrot.slane %v3309_v36, 2  ;;  %v1225_v56 = vadd.f32 %v1171_v54, %v1113_v34  ;;  %v7464_v63 = vmul.f32 %v7084_v28, %v6906_v51 }
 0x13f   : > { %v1781_v33 = vmul.f32 %v6932_v8, %v7141_v43  ;;  %v7468_v40 = vpop.f32.mrb[42].mxu0  ;;  %v1719_v39 = vadd.f32 %v1551_v38, %v1336_v23  ;;  %v1552_v22 = vrot.slane %v1398_v46, 1  ;;  %v7472_v49 = vmul.f32 %v7138_v58, %v6932_v8 }
 0x140   : > { %v3629_v48 = vadd.f32 %v3460_v0, %v3247_v26  ;;  %v7474_v1 = vpop.f32.mrb[43].mxu0  ;;  %v3462_v27 = vsel %vm2677_vm2, %v3459_v10, %v3461_v3  ;;  %v1337_v61 = vadd.f32 %v1283_v47, %v1225_v56  ;;  %v1553_v50 = vrot.slane %v7464_v63, 1 }
 0x141   : > { %11315 = vst [vmem:[#allocation4_spill] sm:$0xff] %v7474_v1  ;;  %v1934_v31 = vrot.slane %v1781_v33, 1  ;;  %v2101_v2 = vadd.f32 %v1933_v14, %v1719_v39  ;;  %v1935_v36 = vrot.slane %v7472_v49, 1  ;;  %v2163_v0 = vmul.f32 %v6942_v13, %v7202_v21 }
 0x142   : > { %6438 = vmatmul.mubr.f32.gmra.mrb[6].mxu1 %v3629_v48  ;;  %v2164_v38 = vmul.f32 %v7200_v6, %v6942_v13  ;;  %v1554_v34 = vsel %vm1530_vm1, %v1552_v22, %v1553_v50  ;;  %v2545_v54 = vmul.f32 %v6910_v52, %v7087_v16  ;;  %v2546_v10 = vmul.f32 %v7084_v28, %v6910_v52 }
 0x143   : > { %v2928_v47 = vmul.f32 %v6938_v12, %v7141_v43  ;;  %v7490_v14 = vpop.f32.mrb[44].mxu0  ;;  %v2483_v26 = vadd.f32 %v2315_v53, %v2101_v2  ;;  %v1720_v23 = vadd.f32 %v1554_v34, %v1337_v61  ;;  %v1936_v46 = vsel %vm1530_vm1, %v1934_v31, %v1935_v36 }
 0x144   : > { %11316 = vst [vmem:[#allocation5_spill] sm:$0xff] %v7490_v14  ;;  %v2316_v3 = vrot.slane %v2163_v0, 1  ;;  %v7493_v56 = vpop.f32.mrb[45].mxu0  ;;  %v2317_v63 = vrot.slane %v2164_v38, 1  ;;  %v2699_v33 = vrot.slane %v2545_v54, 2  ;;  %v2700_v48 = vrot.slane %v2546_v10, 2 }
 0x145   : > { %11317 = vst [vmem:[#allocation8_spill] sm:$0xff] %v7493_v56  ;;  %v2929_v16 = vmul.f32 %v7138_v58, %v6938_v12  ;;  %v2866_v39 = vadd.f32 %v2698_v15, %v2483_v26  ;;  %v2102_v22 = vadd.f32 %v1936_v46, %v1720_v23  ;;  %v3081_v49 = vrot.slane %v2928_v47, 2 }
 0x146   : > { %v3310_v1 = vmul.f32 %v7039_v24, %v7202_v21  ;;  %v2318_v53 = vsel %vm1530_vm1, %v2316_v3, %v2317_v63  ;;  %v2701_v61 = vsel %vm2677_vm2, %v2699_v33, %v2700_v48  ;;  %v3311_v2 = vmul.f32 %v7200_v6, %v7039_v24 }
 0x147   : > { %v3082_v31 = vrot.slane %v2929_v16, 2  ;;  %v7503_v0 = vpop.f32.mrb[46].mxu0  ;;  %v3248_v38 = vadd.f32 %v3080_v18, %v2866_v39  ;;  %v2484_v34 = vadd.f32 %v2318_v53, %v2102_v22  ;;  %v1114_v15 = vmul.f32 %v7084_v28, %v11296_v9 }
 0x148   : > { %v3463_v54 = vrot.slane %v3310_v1, 2  ;;  %v7507_v10 = vpop.f32.mrb[47].mxu0  ;;  %v3464_v26 = vrot.slane %v3311_v2, 2  ;;  %v1172_v23 = vmul.f32 %v7138_v58, %v6928_v7  ;;  %v1284_v46 = vmul.f32 %v7200_v6, %v6951_v17 }
 0x149   : > { %11318 = vst [vmem:[#allocation24_spill] sm:$0xff] %v7507_v10  ;;  %v3083_v47 = vsel %vm2677_vm2, %v3081_v49, %v3082_v31  ;;  %v3630_v3 = vadd.f32 %v3462_v27, %v3248_v38  ;;  %v2867_v33 = vadd.f32 %v2701_v61, %v2484_v34  ;;  %v1400_v18 = vmul.f32 %v6906_v51, %v7126_v57 }
 0x14a   : > { %v1783_v1 = vmul.f32 %v6932_v8, %v7189_v45  ;;  %v3465_v28 = vsel %vm2677_vm2, %v3463_v54, %v3464_v26  ;;  %v1226_v16 = vadd.f32 %v1172_v23, %v1114_v15  ;;  %v2165_v39 = vmul.f32 %v6942_v13, %v7227_v37 }
 0x14b   : > { %v2547_v22 = vmul.f32 %v6910_v52, %v7126_v57  ;;  %v7523_v49 = vpop.f32.mrb[48].mxu0  ;;  %6440 = vmatprep.mubr.f32.mxu1 %v3630_v3  ;;  %v3249_v27 = vadd.f32 %v3083_v47, %v2867_v33  ;;  %v1555_v53 = vrot.slane %v1400_v18, 1  ;;  %v2930_v2 = vmul.f32 %v6938_v12, %v7189_v45 }
 0x14c   : > { %11319 = vst [vmem:[#allocation25_spill] sm:$0xff] %v7523_v49  ;;  %v1937_v61 = vrot.slane %v1783_v1, 1  ;;  %v7527_v38 = vpop.f32.mrb[49].mxu0  ;;  %v1338_v34 = vadd.f32 %v1284_v46, %v1226_v16  ;;  %v2319_v54 = vrot.slane %v2165_v39, 1  ;;  %v3312_v23 = vmul.f32 %v7039_v24, %v7227_v37 }
 0x14d   : > { %11320 = vst [vmem:[#allocation26_spill] sm:$0xff] %v7527_v38  ;;  %v2702_v15 = vrot.slane %v2547_v22, 2  ;;  %v3631_v10 = vadd.f32 %v3465_v28, %v3249_v27  ;;  %v1556_v14 = vsel %vm1530_vm1, %v1553_v50, %v1555_v53  ;;  %v3084_v3 = vrot.slane %v2930_v2, 2 }
 0x14e   : > { %v1938_v49 = vsel %vm1530_vm1, %v1935_v36, %v1937_v61  ;;  %v1721_v47 = vadd.f32 %v1556_v14, %v1338_v34  ;;  %v2320_v33 = vsel %vm1530_vm1, %v2317_v63, %v2319_v54  ;;  %v3466_v1 = vrot.slane %v3312_v23, 2 }
 0x14f   : > { %v2703_v18 = vsel %vm2677_vm2, %v2700_v48, %v2702_v15  ;;  %6441 = vmatmul.mubr.f32.gmra.mrb[8].mxu1 %v3631_v10  ;;  %v3085_v46 = vsel %vm2677_vm2, %v3082_v31, %v3084_v3  ;;  %v7538_v16 = vmul.f32 %v7335_v59, %v6906_v51  ;;  %v7542_v28 = vmul.f32 %v7335_v59, %v6932_v8 }
 0x150   : > { %v7546_v50 = vmul.f32 %v7335_v59, %v6942_v13  ;;  %v2103_v36 = vadd.f32 %v1938_v49, %v1721_v47  ;;  %v3467_v14 = vsel %vm2677_vm2, %v3464_v26, %v3466_v1  ;;  %v7551_v63 = vmul.f32 %v7335_v59, %v6910_v52 }
 0x151   : > { %v7555_v48 = vmul.f32 %v7335_v59, %v6938_v12  ;;  %v1115_v22 = vmul.f32 %v11296_v9, %v7126_v57  ;;  %v1173_v27 = vmul.f32 %v6928_v7, %v7189_v45  ;;  %v1285_v2 = vmul.f32 %v6951_v17, %v7227_v37 }
 0x152   : > { %v2485_v49 = vadd.f32 %v2320_v33, %v2103_v36  ;;  %v11321_v34 = vrot.slane %v7112_v20, 1  ;;  %v11322_v47 = vrot.slane %v7179_v42, 1  ;;  %v11323_v10 = vrot.slane %v7274_v62, 1  ;;  %v11324_v33 = vld [vmem:[#allocation7_spill] sm:$0xff] }
 0x153   : > { %v11325_v36 = vrot.slane %v11324_v33, 2  ;;  %v1227_v38 = vadd.f32 %v1173_v27, %v1115_v22  ;;  %v3086_v56 = vrot.slane %v7193_v44, 2  ;;  %v3313_v20 = vmul.f32 %v7222_v35, %v7039_v24 }
 0x154   : > { %v1558_v23 = vsel %vm1530_vm1, %v1555_v53, %v11321_v34  ;;  %v1940_v31 = vsel %vm1530_vm1, %v1937_v61, %v11322_v47  ;;  %v2322_v57 = vsel %vm1530_vm1, %v2319_v54, %v11323_v10  ;;  %v2868_v39 = vadd.f32 %v2703_v18, %v2485_v49  ;;  %v7590_v54 = vpop.f32.mrb[50].mxu0 }
 0x155   : > { %v2705_v26 = vsel %vm2677_vm2, %v2702_v15, %v11325_v36  ;;  %v1116_v42 = vmul.f32 %v11296_v9, %v7141_v43  ;;  %v1174_v53 = vmul.f32 %v6928_v7, %v7202_v21  ;;  %v1286_v62 = vmul.f32 %v6951_v17, %v7258_v5  ;;  %v7593_v35 = vpop.f32.mrb[51].mxu0 }
 0x156   : > { %v1402_v61 = vmul.f32 %v6906_v51, %v7141_v43  ;;  %v3250_v15 = vadd.f32 %v3085_v46, %v2868_v39  ;;  %v1339_v18 = vadd.f32 %v1285_v2, %v1227_v38  ;;  %v3087_v44 = vsel %vm2677_vm2, %v3084_v3, %v3086_v56  ;;  %11326 = vst [vmem:[#allocation7_spill] sm:$0xff] %v7593_v35  ;;  %v11349_v35 = vld [vmem:[#allocation12_spill] sm:$0xff] }
 0x157   : > { %v3468_v10 = vrot.slane %v3313_v20, 2  ;;  %v1228_v22 = vadd.f32 %v1174_v53, %v1116_v42  ;;  %v1403_v49 = vmul.f32 %v7138_v58, %v6906_v51  ;;  %v1785_v34 = vmul.f32 %v6932_v8, %v7202_v21 }
 0x158   : > { %v1559_v27 = vrot.slane %v1402_v61, 1  ;;  %v3632_v47 = vadd.f32 %v3467_v14, %v3250_v15  ;;  %v1722_v33 = vadd.f32 %v1558_v23, %v1339_v18  ;;  %v1786_v38 = vmul.f32 %v7200_v6, %v6932_v8 }
 0x159   : > { %v3469_v36 = vsel %vm2677_vm2, %v3466_v1, %v3468_v10  ;;  %v1340_v46 = vadd.f32 %v1286_v62, %v1228_v22  ;;  %v1560_v56 = vrot.slane %v1403_v49, 1  ;;  %v1941_v3 = vrot.slane %v1785_v34, 1 }
 0x15a   : > { %v2167_v39 = vmul.f32 %v6942_v13, %v7258_v5  ;;  %6443 = vmatprep.mubr.f32.mxu1 %v3632_v47  ;;  %v2104_v2 = vadd.f32 %v1940_v31, %v1722_v33  ;;  %v1942_v20 = vrot.slane %v1786_v38, 1  ;;  %v2168_v42 = vmul.f32 %v7250_v29, %v6942_v13 }
 0x15b   : > { %v2549_v14 = vmul.f32 %v6910_v52, %v7141_v43  ;;  %v1561_v1 = vsel %vm1530_vm1, %v1559_v27, %v1560_v56  ;;  %v2550_v53 = vmul.f32 %v7138_v58, %v6910_v52  ;;  %v2932_v62 = vmul.f32 %v6938_v12, %v7202_v21 }
 0x15c   : > { %v2323_v23 = vrot.slane %v2167_v39, 1  ;;  %v2486_v61 = vadd.f32 %v2322_v57, %v2104_v2  ;;  %v1723_v15 = vadd.f32 %v1561_v1, %v1340_v46  ;;  %v1943_v31 = vsel %vm1530_vm1, %v1941_v3, %v1942_v20 }
 0x15d   : > { %v2324_v18 = vrot.slane %v2168_v42, 1  ;;  %v2706_v10 = vrot.slane %v2549_v14, 2  ;;  %v2707_v22 = vrot.slane %v2550_v53, 2  ;;  %v2933_v49 = vmul.f32 %v7200_v6, %v6938_v12  ;;  %v7626_v14 = vpop.f32.mrb[52].mxu0 }
 0x15e   : > { %v3088_v43 = vrot.slane %v2932_v62, 2  ;;  %v2869_v34 = vadd.f32 %v2705_v26, %v2486_v61  ;;  %v2105_v27 = vadd.f32 %v1943_v31, %v1723_v15  ;;  %v3314_v33 = vmul.f32 %v7039_v24, %v7258_v5  ;;  %11327 = vst [vmem:[#allocation27_spill] sm:$0xff] %v7626_v14  ;;  %v7633_v61 = vpop.f32.mrb[53].mxu0  ;;  %v11335_v14 = vld [vmem:[#allocation13_spill] sm:$0xff] }
 0x15f   : > { %v2325_v47 = vsel %vm1530_vm1, %v2323_v23, %v2324_v18  ;;  %v2708_v38 = vsel %vm2677_vm2, %v2706_v10, %v2707_v22  ;;  %v3089_v57 = vrot.slane %v2933_v49, 2  ;;  %v3315_v46 = vmul.f32 %v7250_v29, %v7039_v24  ;;  %11328 = vst [vmem:[#allocation28_spill] sm:$0xff] %v7633_v61 }
 0x160   : > { %v1117_v3 = vmul.f32 %v7138_v58, %v11296_v9  ;;  %v3251_v39 = vadd.f32 %v3087_v44, %v2869_v34  ;;  %v2487_v2 = vadd.f32 %v2325_v47, %v2105_v27  ;;  %v3470_v42 = vrot.slane %v3314_v33, 2 }
 0x161   : > { %v1175_v26 = vmul.f32 %v7200_v6, %v6928_v7  ;;  %v3090_v1 = vsel %vm2677_vm2, %v3088_v43, %v3089_v57  ;;  %v3471_v23 = vrot.slane %v3315_v46, 2  ;;  %v1287_v53 = vmul.f32 %v7250_v29, %v6951_v17 }
 0x162   : > { %v1404_v62 = vmul.f32 %v6906_v51, %v7189_v45  ;;  %v3633_v58 = vadd.f32 %v3469_v36, %v3251_v39  ;;  %v2870_v44 = vadd.f32 %v2708_v38, %v2487_v2  ;;  %v1787_v31 = vmul.f32 %v6932_v8, %v7227_v37 }
 0x163   : > { %v1229_v15 = vadd.f32 %v1175_v26, %v1117_v3  ;;  %v3472_v10 = vsel %vm2677_vm2, %v3470_v42, %v3471_v23  ;;  %v2169_v43 = vmul.f32 %v6942_v13, %v7280_v32  ;;  %v2551_v34 = vmul.f32 %v6910_v52, %v7189_v45 }
 0x164   : > { %v1562_v49 = vrot.slane %v1404_v62, 1  ;;  %6444 = vmatmul.mubr.f32.gmra.mrb[10].mxu1 %v3633_v58  ;;  %v3252_v27 = vadd.f32 %v3090_v1, %v2870_v44  ;;  %v1944_v33 = vrot.slane %v1787_v31, 1  ;;  %v2934_v36 = vmul.f32 %v6938_v12, %v7227_v37 }
 0x165   : > { %v1341_v47 = vadd.f32 %v1287_v53, %v1229_v15  ;;  %v2326_v46 = vrot.slane %v2169_v43, 1  ;;  %v2709_v3 = vrot.slane %v2551_v34, 2  ;;  %v3316_v39 = vmul.f32 %v7039_v24, %v7280_v32 }
 0x166   : > { %v1563_v38 = vsel %vm1530_vm1, %v1560_v56, %v1562_v49  ;;  %v3634_v2 = vadd.f32 %v3472_v10, %v3252_v27  ;;  %v1945_v26 = vsel %vm1530_vm1, %v1942_v20, %v1944_v33  ;;  %v3091_v62 = vrot.slane %v2934_v36, 2 }
 0x167   : > { %v1724_v42 = vadd.f32 %v1563_v38, %v1341_v47  ;;  %v2327_v58 = vsel %vm1530_vm1, %v2324_v18, %v2326_v46  ;;  %v2710_v1 = vsel %vm2677_vm2, %v2707_v22, %v2709_v3  ;;  %v3473_v53 = vrot.slane %v3316_v39, 2  ;;  %v11329_v38 = vld [vmem:[#allocation9_spill] sm:$0xff] }
 0x168   : > { %v7652_v44 = vmul.f32 %v7366_v4, %v6906_v51  ;;  %6446 = vmatprep.mubr.f32.mxu1 %v3634_v2  ;;  %v3092_v15 = vsel %vm2677_vm2, %v3089_v57, %v3091_v62  ;;  %v7657_v24 = vmul.f32 %v7366_v4, %v6932_v8  ;;  %v7661_v20 = vmul.f32 %v7366_v4, %v6942_v13 }
 0x169   : > { %v2106_v56 = vadd.f32 %v1945_v26, %v1724_v42  ;;  %v3474_v18 = vsel %vm2677_vm2, %v3471_v23, %v3473_v53  ;;  %v7667_v31 = vmul.f32 %v7366_v4, %v6910_v52  ;;  %v7671_v10 = vmul.f32 %v7366_v4, %v6938_v12  ;;  %v11333_v23 = vld [vmem:[#allocation10_spill] sm:$0xff] }
 0x16a   : > { %v1118_v27 = vmul.f32 %v11296_v9, %v7189_v45  ;;  %v1176_v47 = vmul.f32 %v6928_v7, %v7227_v37  ;;  %v1288_v36 = vmul.f32 %v6951_v17, %v7280_v32  ;;  %v11330_v39 = vrot.slane %v11329_v38, 1 }
 0x16b   : > { %v2488_v57 = vadd.f32 %v2327_v58, %v2106_v56  ;;  %v11331_v26 = vrot.slane %v7262_v25, 1  ;;  %v11332_v56 = vrot.slane %v7412_v11, 1  ;;  %v11334_v22 = vrot.slane %v11333_v23, 2 }
 0x16c   : > { %v1565_v2 = vsel %vm1530_vm1, %v1562_v49, %v11330_v39  ;;  %v1230_v34 = vadd.f32 %v1176_v47, %v1118_v27  ;;  %v3093_v61 = vrot.slane %v11335_v14, 2  ;;  %v7698_v49 = vld [vmem:[%s11092_s2 + $0x8] ss:$0 sm:$0xff]  ;;  %v1119_v11 = vmul.f32 %v11296_v9, %v7202_v21 }
 0x16d   : > { %v2871_v42 = vadd.f32 %v2710_v1, %v2488_v57  ;;  %v1947_v58 = vsel %vm1530_vm1, %v1944_v33, %v11331_v26  ;;  %v2329_v45 = vsel %vm1530_vm1, %v2326_v46, %v11332_v56  ;;  %v2712_v43 = vsel %vm2677_vm2, %v2709_v3, %v11334_v22  ;;  %v7710_v1 = vpop.f32.mrb[54].mxu0 }
 0x16e   : > { %v3317_v25 = vmul.f32 %v7698_v49, %v7269_v55  ;;  %v1177_v46 = vmul.f32 %v6928_v7, %v7258_v5  ;;  %v1289_v3 = vmul.f32 %v6951_v17, %v7318_v41  ;;  %v1406_v14 = vmul.f32 %v6906_v51, %v7202_v21  ;;  %11336 = vst [vmem:[#allocation9_spill] sm:$0xff] %v7710_v1 }
 0x16f   : > { %v3253_v33 = vadd.f32 %v3092_v15, %v2871_v42  ;;  %v1342_v22 = vadd.f32 %v1288_v36, %v1230_v34  ;;  %v3094_v57 = vsel %vm2677_vm2, %v3091_v62, %v3093_v61  ;;  %v7715_v55 = vmul.f32 %v7200_v6, %v6906_v51  ;;  %v7717_v15 = vpop.f32.mrb[55].mxu0 }
 0x170   : > { %v3475_v27 = vrot.slane %v3317_v25, 2  ;;  %11337 = vst [vmem:[#allocation10_spill] sm:$0xff] %v7717_v15  ;;  %v1231_v47 = vadd.f32 %v1177_v46, %v1119_v11  ;;  %v1566_v38 = vrot.slane %v1406_v14, 1  ;;  %v1789_v39 = vmul.f32 %v6932_v8, %v7258_v5 }
 0x171   : > { %v3635_v23 = vadd.f32 %v3474_v18, %v3253_v33  ;;  %v1725_v42 = vadd.f32 %v1565_v2, %v1342_v22  ;;  %v1567_v34 = vrot.slane %v7715_v55, 1  ;;  %v1790_v61 = vmul.f32 %v7250_v29, %v6932_v8  ;;  %v11338_v18 = vld [vmem:[#allocation14_spill] sm:$0xff] }
 0x172   : > { %v3476_v26 = vsel %vm2677_vm2, %v3473_v53, %v3475_v27  ;;  %v1343_v62 = vadd.f32 %v1289_v3, %v1231_v47  ;;  %v1948_v36 = vrot.slane %v1789_v39, 1  ;;  %v2171_v56 = vmul.f32 %v6942_v13, %v7318_v41 }
 0x173   : > { %6447 = vmatmul.mubr.f32.gmra.mrb[12].mxu1 %v3635_v23  ;;  %v2172_v25 = vmul.f32 %v11338_v18, %v6942_v13  ;;  %v2107_v11 = vadd.f32 %v1947_v58, %v1725_v42  ;;  %v1568_v33 = vsel %vm1530_vm1, %v1566_v38, %v1567_v34  ;;  %v1949_v2 = vrot.slane %v1790_v61, 1 }
 0x174   : > { %v2553_v53 = vmul.f32 %v6910_v52, %v7202_v21  ;;  %v1726_v46 = vadd.f32 %v1568_v33, %v1343_v62  ;;  %v2330_v14 = vrot.slane %v2171_v56, 1  ;;  %v2554_v3 = vmul.f32 %v7200_v6, %v6910_v52  ;;  %v7747_v33 = vpop.f32.mrb[56].mxu0 }
 0x175   : > { %v2331_v22 = vrot.slane %v2172_v25, 1  ;;  %v2489_v27 = vadd.f32 %v2329_v45, %v2107_v11  ;;  %v1950_v55 = vsel %vm1530_vm1, %v1948_v36, %v1949_v2  ;;  %v2936_v47 = vmul.f32 %v6938_v12, %v7258_v5  ;;  %11339 = vst [vmem:[#allocation13_spill] sm:$0xff] %v7747_v33 }
 0x176   : > { %v2713_v23 = vrot.slane %v2553_v53, 2  ;;  %v2108_v58 = vadd.f32 %v1950_v55, %v1726_v46  ;;  %v2714_v39 = vrot.slane %v2554_v3, 2  ;;  %v2937_v21 = vmul.f32 %v7250_v29, %v6938_v12  ;;  %v7751_v3 = vpop.f32.mrb[57].mxu0 }
 0x177   : > { %v2332_v38 = vsel %vm1530_vm1, %v2330_v14, %v2331_v22  ;;  %v2872_v42 = vadd.f32 %v2712_v43, %v2489_v27  ;;  %v3095_v61 = vrot.slane %v2936_v47, 2  ;;  %v3318_v62 = vmul.f32 %v7698_v49, %v7318_v41  ;;  %11340 = vst [vmem:[#allocation14_spill] sm:$0xff] %v7751_v3 }
 0x178   : > { %v3319_v45 = vmul.f32 %v7698_v49, %v11338_v18  ;;  %v2490_v36 = vadd.f32 %v2332_v38, %v2108_v58  ;;  %v2715_v56 = vsel %vm2677_vm2, %v2713_v23, %v2714_v39  ;;  %v3096_v25 = vrot.slane %v2937_v21, 2 }
 0x179   : > { %v1120_v11 = vmul.f32 %v7200_v6, %v11296_v9  ;;  %v3254_v53 = vadd.f32 %v3094_v57, %v2872_v42  ;;  %v3477_v46 = vrot.slane %v3318_v62, 2  ;;  %v1178_v43 = vmul.f32 %v7250_v29, %v6928_v7  ;;  %v11341_v62 = vld [vmem:[#allocation6_spill] sm:$0xff] }
 0x17a   : > { %v3478_v14 = vrot.slane %v3319_v45, 2  ;;  %v2873_v27 = vadd.f32 %v2715_v56, %v2490_v36  ;;  %v3097_v55 = vsel %vm2677_vm2, %v3095_v61, %v3096_v25  ;;  %v1290_v23 = vmul.f32 %v11338_v18, %v6951_v17 }
 0x17b   : > { %v1408_v47 = vmul.f32 %v6906_v51, %v7227_v37  ;;  %v3636_v6 = vadd.f32 %v3476_v26, %v3254_v53  ;;  %v1232_v57 = vadd.f32 %v1178_v43, %v1120_v11  ;;  %v1791_v38 = vmul.f32 %v6932_v8, %v7280_v32 }
 0x17c   : > { %v3479_v58 = vsel %vm2677_vm2, %v3477_v46, %v3478_v14  ;;  %v3255_v21 = vadd.f32 %v3097_v55, %v2873_v27  ;;  %v2173_v45 = vmul.f32 %v6942_v13, %v11341_v62  ;;  %v2555_v61 = vmul.f32 %v6910_v52, %v7227_v37 }
 0x17d   : > { %v1569_v42 = vrot.slane %v1408_v47, 1  ;;  %6449 = vmatprep.mubr.f32.mxu1 %v3636_v6  ;;  %v1344_v36 = vadd.f32 %v1290_v23, %v1232_v57  ;;  %v1951_v56 = vrot.slane %v1791_v38, 1  ;;  %v2938_v26 = vmul.f32 %v6938_v12, %v7280_v32 }
 0x17e   : > { %v3320_v11 = vmul.f32 %v7698_v49, %v11341_v62  ;;  %v3637_v53 = vadd.f32 %v3479_v58, %v3255_v21  ;;  %v2333_v43 = vrot.slane %v2173_v45, 1  ;;  %v2716_v27 = vrot.slane %v2555_v61, 2 }
 0x17f   : > { %v1570_v46 = vsel %vm1530_vm1, %v1567_v34, %v1569_v42  ;;  %v1952_v47 = vsel %vm1530_vm1, %v1949_v2, %v1951_v56  ;;  %v3098_v33 = vrot.slane %v2938_v26, 2  ;;  %v7775_v57 = vmul.f32 %v7407_v19, %v6906_v51 }
 0x180   : > { %v1727_v55 = vadd.f32 %v1570_v46, %v1344_v36  ;;  %v3480_v3 = vrot.slane %v3320_v11, 2  ;;  %6450 = vmatmul.mubr.f32.gmra.mrb[14].mxu1 %v3637_v53  ;;  %v2334_v23 = vsel %vm1530_vm1, %v2331_v22, %v2333_v43  ;;  %v2717_v6 = vsel %vm2677_vm2, %v2714_v39, %v2716_v27  ;;  %v11344_v46 = vld [vmem:[#allocation11_spill] sm:$0xff]  ;;  %v11346_v22 = vld [vmem:[#allocation20_spill] sm:$0xff] }
 0x181   : > { %11342 = vst [vmem:[#allocation6_spill] sm:$0xff] %v7775_v57  ;;  %v7779_v58 = vmul.f32 %v7407_v19, %v6932_v8  ;;  %v3099_v38 = vsel %vm2677_vm2, %v3096_v25, %v3098_v33  ;;  %v7785_v21 = vmul.f32 %v7407_v19, %v6942_v13  ;;  %v7791_v45 = vmul.f32 %v7407_v19, %v6910_v52 }
 0x182   : > { %v2109_v34 = vadd.f32 %v1952_v47, %v1727_v55  ;;  %v3481_v2 = vsel %vm2677_vm2, %v3478_v14, %v3480_v3  ;;  %v7795_v61 = vmul.f32 %v7407_v19, %v6938_v12  ;;  %v1121_v14 = vmul.f32 %v11296_v9, %v7227_v37 }
 0x183   : > { %11343 = vst [vmem:[#allocation29_spill] sm:$0xff] %v7791_v45  ;;  %v1179_v26 = vmul.f32 %v6928_v7, %v7280_v32  ;;  %v1291_v53 = vmul.f32 %v6951_v17, %v11341_v62  ;;  %v11345_v55 = vrot.slane %v11344_v46, 1  ;;  %v11347_v39 = vrot.slane %v11346_v22, 1  ;;  %v11351_v45 = vld [vmem:[#allocation23_spill] sm:$0xff] }
 0x184   : > { %v2491_v36 = vadd.f32 %v2334_v23, %v2109_v34  ;;  %v11348_v37 = vrot.slane %v7546_v50, 1  ;;  %v11350_v57 = vrot.slane %v11349_v35, 2  ;;  %v3100_v1 = vrot.slane %v11351_v45, 2  ;;  %v11352_v50 = vld [vmem:[#allocation15_spill] sm:$0xff] }
 0x185   : > { %v1572_v47 = vsel %vm1530_vm1, %v1569_v42, %v11345_v55  ;;  %v1954_v23 = vsel %vm1530_vm1, %v1951_v56, %v11347_v39  ;;  %v1233_v25 = vadd.f32 %v1179_v26, %v1121_v14  ;;  %v3321_v46 = vmul.f32 %v7698_v49, %v7335_v59 }
 0x186   : > { %v2874_v34 = vadd.f32 %v2717_v6, %v2491_v36  ;;  %v2336_v15 = vsel %vm1530_vm1, %v2333_v43, %v11348_v37  ;;  %v2719_v11 = vsel %vm2677_vm2, %v2716_v27, %v11350_v57  ;;  %v1122_v42 = vmul.f32 %v11296_v9, %v7258_v5  ;;  %v7828_v27 = vpop.f32.mrb[58].mxu0 }
 0x187   : > { %v1180_v56 = vmul.f32 %v6928_v7, %v7318_v41  ;;  %v1345_v22 = vadd.f32 %v1291_v53, %v1233_v25  ;;  %v1292_v43 = vmul.f32 %v6951_v17, %v11352_v50  ;;  %v1410_v35 = vmul.f32 %v6906_v51, %v7258_v5  ;;  %v7835_v36 = vpop.f32.mrb[59].mxu0 }
 0x188   : > { %v3256_v6 = vadd.f32 %v3099_v38, %v2874_v34  ;;  %v3101_v57 = vsel %vm2677_vm2, %v3098_v33, %v3100_v1  ;;  %v3482_v39 = vrot.slane %v3321_v46, 2  ;;  %v7833_v45 = vmul.f32 %v7250_v29, %v6906_v51  ;;  %11353 = vst [vmem:[#allocation11_spill] sm:$0xff] %v7835_v36 }
 0x189   : > { %v1234_v59 = vadd.f32 %v1180_v56, %v1122_v42  ;;  %v1728_v25 = vadd.f32 %v1572_v47, %v1345_v22  ;;  %v1573_v14 = vrot.slane %v1410_v35, 1  ;;  %v1793_v26 = vmul.f32 %v6932_v8, %v7318_v41 }
 0x18a   : > { %v3638_v38 = vadd.f32 %v3481_v2, %v3256_v6  ;;  %v3483_v53 = vsel %vm2677_vm2, %v3480_v3, %v3482_v39  ;;  %v1574_v34 = vrot.slane %v7833_v45, 1  ;;  %v1794_v1 = vmul.f32 %v11338_v18, %v6932_v8  ;;  %v11354_v2 = vld [vmem:[#allocation3_spill] sm:$0xff] }
 0x18b   : > { %v1346_v55 = vadd.f32 %v1292_v43, %v1234_v59  ;;  %v2110_v33 = vadd.f32 %v1954_v23, %v1728_v25  ;;  %v1955_v37 = vrot.slane %v1793_v26, 1  ;;  %v2175_v46 = vmul.f32 %v6942_v13, %v11352_v50 }
 0x18c   : > { %6452 = vmatprep.mubr.f32.mxu1 %v3638_v38  ;;  %v2176_v47 = vmul.f32 %v11354_v2, %v6942_v13  ;;  %v1575_v42 = vsel %vm1530_vm1, %v1573_v14, %v1574_v34  ;;  %v1956_v56 = vrot.slane %v1794_v1, 1  ;;  %v2557_v3 = vmul.f32 %v6910_v52, %v7258_v5 }
 0x18d   : > { %v2558_v6 = vmul.f32 %v7250_v29, %v6910_v52  ;;  %v2492_v22 = vadd.f32 %v2336_v15, %v2110_v33  ;;  %v1729_v43 = vadd.f32 %v1575_v42, %v1346_v55  ;;  %v2337_v35 = vrot.slane %v2175_v46, 1  ;;  %v7865_v42 = vpop.f32.mrb[60].mxu0 }
 0x18e   : > { %v2338_v23 = vrot.slane %v2176_v47, 1  ;;  %v1957_v39 = vsel %vm1530_vm1, %v1955_v37, %v1956_v56  ;;  %v2720_v59 = vrot.slane %v2557_v3, 2  ;;  %v2940_v38 = vmul.f32 %v6938_v12, %v7318_v41  ;;  %11355 = vst [vmem:[#allocation20_spill] sm:$0xff] %v7865_v42 }
 0x18f   : > { %v2721_v45 = vrot.slane %v2558_v6, 2  ;;  %v2875_v25 = vadd.f32 %v2719_v11, %v2492_v22  ;;  %v2111_v14 = vadd.f32 %v1957_v39, %v1729_v43  ;;  %v2941_v5 = vmul.f32 %v11338_v18, %v6938_v12 }
 0x190   : > { %v2339_v26 = vsel %vm1530_vm1, %v2337_v35, %v2338_v23  ;;  %v3102_v15 = vrot.slane %v2940_v38, 2  ;;  %v3322_v55 = vmul.f32 %v7698_v49, %v11352_v50  ;;  %v3323_v33 = vmul.f32 %v7698_v49, %v11354_v2  ;;  %v7871_v35 = vpop.f32.mrb[61].mxu0 }
 0x191   : > { %v2722_v1 = vsel %vm2677_vm2, %v2720_v59, %v2721_v45  ;;  %v3257_v37 = vadd.f32 %v3101_v57, %v2875_v25  ;;  %v2493_v46 = vadd.f32 %v2339_v26, %v2111_v14  ;;  %v3103_v47 = vrot.slane %v2941_v5, 2  ;;  %11356 = vst [vmem:[#allocation12_spill] sm:$0xff] %v7871_v35  ;;  %v11357_v26 = vld [vmem:[#allocation16_spill] sm:$0xff] }
 0x192   : > { %v1123_v11 = vmul.f32 %v7250_v29, %v11296_v9  ;;  %v3484_v3 = vrot.slane %v3322_v55, 2  ;;  %v3485_v6 = vrot.slane %v3323_v33, 2  ;;  %v1181_v22 = vmul.f32 %v11338_v18, %v6928_v7 }
 0x193   : > { %v1293_v43 = vmul.f32 %v11354_v2, %v6951_v17  ;;  %v3639_v39 = vadd.f32 %v3483_v53, %v3257_v37  ;;  %v2876_v59 = vadd.f32 %v2722_v1, %v2493_v46  ;;  %v3104_v57 = vsel %vm2677_vm2, %v3102_v15, %v3103_v47 }
 0x194   : > { %v1412_v38 = vmul.f32 %v6906_v51, %v7280_v32  ;;  %v3486_v29 = vsel %vm2677_vm2, %v3484_v3, %v3485_v6  ;;  %v1235_v25 = vadd.f32 %v1181_v22, %v1123_v11  ;;  %v1795_v14 = vmul.f32 %v6932_v8, %v11341_v62 }
 0x195   : > { %v2177_v5 = vmul.f32 %v6942_v13, %v11357_v26  ;;  %6453 = vmatmul.mubr.f32.gmra.mrb[16].mxu1 %v3639_v39  ;;  %v3258_v55 = vadd.f32 %v3104_v57, %v2876_v59  ;;  %v2559_v53 = vmul.f32 %v6910_v52, %v7280_v32  ;;  %v2942_v1 = vmul.f32 %v6938_v12, %v11341_v62 }
 0x196   : > { %v1576_v33 = vrot.slane %v1412_v38, 1  ;;  %v1347_v15 = vadd.f32 %v1293_v43, %v1235_v25  ;;  %v1958_v37 = vrot.slane %v1795_v14, 1  ;;  %v3324_v11 = vmul.f32 %v7698_v49, %v11357_v26 }
 0x197   : > { %v2340_v46 = vrot.slane %v2177_v5, 1  ;;  %v3640_v3 = vadd.f32 %v3486_v29, %v3258_v55  ;;  %v2723_v42 = vrot.slane %v2559_v53, 2  ;;  %v3105_v35 = vrot.slane %v2942_v1, 2 }
 0x198   : > { %v1577_v22 = vsel %vm1530_vm1, %v1574_v34, %v1576_v33  ;;  %v1959_v59 = vsel %vm1530_vm1, %v1956_v56, %v1958_v37  ;;  %v3487_v38 = vrot.slane %v3324_v11, 2  ;;  %v7894_v25 = vmul.f32 %v7468_v40, %v6906_v51 }
 0x199   : > { %v1730_v39 = vadd.f32 %v1577_v22, %v1347_v15  ;;  %v2341_v57 = vsel %vm1530_vm1, %v2338_v23, %v2340_v46  ;;  %6455 = vmatprep.mubr.f32.mxu1 %v3640_v3  ;;  %v2724_v36 = vsel %vm2677_vm2, %v2721_v45, %v2723_v42  ;;  %v3106_v43 = vsel %vm2677_vm2, %v3103_v47, %v3105_v35  ;;  %v11360_v3 = vld [vmem:[#allocation19_spill] sm:$0xff]  ;;  %v11364_v47 = vld [vmem:[#allocation21_spill] sm:$0xff] }
 0x19a   : > { %11358 = vst [vmem:[#allocation23_spill] sm:$0xff] %v7894_v25  ;;  %v7898_v34 = vmul.f32 %v7468_v40, %v6932_v8  ;;  %v3488_v14 = vsel %vm2677_vm2, %v3485_v6, %v3487_v38  ;;  %v7903_v56 = vmul.f32 %v7468_v40, %v6942_v13  ;;  %v7907_v23 = vmul.f32 %v7468_v40, %v6910_v52 }
 0x19b   : > { %v2112_v29 = vadd.f32 %v1959_v59, %v1730_v39  ;;  %v7913_v5 = vmul.f32 %v7468_v40, %v6938_v12  ;;  %v1124_v55 = vmul.f32 %v11296_v9, %v7280_v32  ;;  %v1182_v15 = vmul.f32 %v6928_v7, %v11341_v62 }
 0x19c   : > { %11359 = vst [vmem:[#allocation15_spill] sm:$0xff] %v7907_v23  ;;  %v1294_v11 = vmul.f32 %v6951_v17, %v11357_v26  ;;  %v11361_v22 = vrot.slane %v11360_v3, 1  ;;  %v11362_v59 = vrot.slane %v7542_v28, 1  ;;  %v11363_v32 = vrot.slane %v7661_v20, 1  ;;  %v11366_v20 = vld [vmem:[#allocation18_spill] sm:$0xff] }
 0x19d   : > { %v2494_v6 = vadd.f32 %v2341_v57, %v2112_v29  ;;  %v1236_v1 = vadd.f32 %v1182_v15, %v1124_v55  ;;  %v11365_v53 = vrot.slane %v11364_v47, 2  ;;  %v3107_v25 = vrot.slane %v7555_v48, 2  ;;  %v7947_v48 = vpop.f32.mrb[62].mxu0 }
 0x19e   : > { %v1579_v39 = vsel %vm1530_vm1, %v1576_v33, %v11361_v22  ;;  %v1961_v45 = vsel %vm1530_vm1, %v1958_v37, %v11362_v59  ;;  %v2343_v57 = vsel %vm1530_vm1, %v2340_v46, %v11363_v32  ;;  %v3325_v3 = vmul.f32 %v7698_v49, %v7366_v4  ;;  %11367 = vst [vmem:[#allocation3_spill] sm:$0xff] %v7947_v48  ;;  %v7955_v15 = vpop.f32.mrb[63].mxu0 }
 0x19f   : > { %v2877_v29 = vadd.f32 %v2724_v36, %v2494_v6  ;;  %v2726_v23 = vsel %vm2677_vm2, %v2723_v42, %v11365_v53  ;;  %v1125_v28 = vmul.f32 %v11296_v9, %v7318_v41  ;;  %v1183_v33 = vmul.f32 %v6928_v7, %v11352_v50  ;;  %11368 = vst [vmem:[#allocation16_spill] sm:$0xff] %v7955_v15 }
 0x1a0   : > { %v1295_v37 = vmul.f32 %v6951_v17, %v11366_v20  ;;  %v1348_v46 = vadd.f32 %v1294_v11, %v1236_v1  ;;  %v3108_v47 = vsel %vm2677_vm2, %v3105_v35, %v3107_v25  ;;  %v1414_v42 = vmul.f32 %v6906_v51, %v7318_v41 }
 0x1a1   : > { %v3259_v36 = vadd.f32 %v3106_v43, %v2877_v29  ;;  %v3489_v55 = vrot.slane %v3325_v3, 2  ;;  %v1237_v4 = vadd.f32 %v1183_v33, %v1125_v28  ;;  %v7951_v6 = vmul.f32 %v11338_v18, %v6906_v51  ;;  %v11369_v33 = vld [vmem:[#allocation17_spill] sm:$0xff] }
 0x1a2   : > { %v1797_v53 = vmul.f32 %v6932_v8, %v11352_v50  ;;  %v1731_v1 = vadd.f32 %v1579_v39, %v1348_v46  ;;  %v1580_v11 = vrot.slane %v1414_v42, 1  ;;  %v1798_v35 = vmul.f32 %v11354_v2, %v6932_v8 }
 0x1a3   : > { %v3641_v43 = vadd.f32 %v3488_v14, %v3259_v36  ;;  %v3490_v25 = vsel %vm2677_vm2, %v3487_v38, %v3489_v55  ;;  %v1349_v22 = vadd.f32 %v1295_v37, %v1237_v4  ;;  %v1581_v59 = vrot.slane %v7951_v6, 1 }
 0x1a4   : > { %v1962_v32 = vrot.slane %v1797_v53, 1  ;;  %v2113_v29 = vadd.f32 %v1961_v45, %v1731_v1  ;;  %v1963_v3 = vrot.slane %v1798_v35, 1  ;;  %v2179_v28 = vmul.f32 %v6942_v13, %v11366_v20 }
 0x1a5   : > { %6456 = vmatmul.mubr.f32.gmra.mrb[18].mxu1 %v3641_v43  ;;  %v2180_v14 = vmul.f32 %v11369_v33, %v6942_v13  ;;  %v1582_v39 = vsel %vm1530_vm1, %v1580_v11, %v1581_v59  ;;  %v2561_v36 = vmul.f32 %v6910_v52, %v7318_v41  ;;  %v2562_v38 = vmul.f32 %v11338_v18, %v6910_v52 }
 0x1a6   : > { %v2944_v37 = vmul.f32 %v6938_v12, %v11352_v50  ;;  %v2495_v46 = vadd.f32 %v2343_v57, %v2113_v29  ;;  %v1732_v45 = vadd.f32 %v1582_v39, %v1349_v22  ;;  %v1964_v42 = vsel %vm1530_vm1, %v1962_v32, %v1963_v3 }
 0x1a7   : > { %v2344_v55 = vrot.slane %v2179_v28, 1  ;;  %v2345_v4 = vrot.slane %v2180_v14, 1  ;;  %v2727_v6 = vrot.slane %v2561_v36, 2  ;;  %v2728_v53 = vrot.slane %v2562_v38, 2 }
 0x1a8   : > { %v2945_v43 = vmul.f32 %v11354_v2, %v6938_v12  ;;  %v2878_v1 = vadd.f32 %v2726_v23, %v2495_v46  ;;  %v2114_v11 = vadd.f32 %v1964_v42, %v1732_v45  ;;  %v3109_v41 = vrot.slane %v2944_v37, 2  ;;  %v7983_v23 = vpop.f32.mrb[64].mxu0 }
 0x1a9   : > { %v3326_v35 = vmul.f32 %v7698_v49, %v11366_v20  ;;  %v2346_v15 = vsel %vm1530_vm1, %v2344_v55, %v2345_v4  ;;  %v2729_v57 = vsel %vm2677_vm2, %v2727_v6, %v2728_v53  ;;  %v3327_v32 = vmul.f32 %v7698_v49, %v11369_v33  ;;  %11370 = vst [vmem:[#allocation19_spill] sm:$0xff] %v7983_v23  ;;  %v7990_v45 = vpop.f32.mrb[65].mxu0 }
 0x1aa   : > { %v3110_v22 = vrot.slane %v2945_v43, 2  ;;  %v3260_v29 = vadd.f32 %v3108_v47, %v2878_v1  ;;  %v2496_v28 = vadd.f32 %v2346_v15, %v2114_v11  ;;  %v1126_v39 = vmul.f32 %v11338_v18, %v11296_v9  ;;  %11371 = vst [vmem:[#allocation21_spill] sm:$0xff] %v7990_v45  ;;  %v11372_v43 = vld [vmem:[#allocation22_spill] sm:$0xff] }
 0x1ab   : > { %v3491_v14 = vrot.slane %v3326_v35, 2  ;;  %v3492_v38 = vrot.slane %v3327_v32, 2  ;;  %v1184_v37 = vmul.f32 %v11354_v2, %v6928_v7  ;;  %v1296_v46 = vmul.f32 %v11369_v33, %v6951_v17 }
 0x1ac   : > { %v3111_v36 = vsel %vm2677_vm2, %v3109_v41, %v3110_v22  ;;  %v3642_v42 = vadd.f32 %v3490_v25, %v3260_v29  ;;  %v2879_v47 = vadd.f32 %v2729_v57, %v2496_v28  ;;  %v1416_v15 = vmul.f32 %v6906_v51, %v11341_v62 }
 0x1ad   : > { %v1799_v18 = vmul.f32 %v6932_v8, %v11357_v26  ;;  %v3493_v55 = vsel %vm2677_vm2, %v3491_v14, %v3492_v38  ;;  %v1238_v6 = vadd.f32 %v1184_v37, %v1126_v39  ;;  %v2181_v1 = vmul.f32 %v6942_v13, %v11372_v43 }
 0x1ae   : > { %v2563_v11 = vmul.f32 %v6910_v52, %v11341_v62  ;;  %6458 = vmatprep.mubr.f32.mxu1 %v3642_v42  ;;  %v3261_v41 = vadd.f32 %v3111_v36, %v2879_v47  ;;  %v1583_v35 = vrot.slane %v1416_v15, 1  ;;  %v2946_v57 = vmul.f32 %v6938_v12, %v11357_v26 }
 0x1af   : > { %v1965_v25 = vrot.slane %v1799_v18, 1  ;;  %v1350_v32 = vadd.f32 %v1296_v46, %v1238_v6  ;;  %v2347_v29 = vrot.slane %v2181_v1, 1  ;;  %v3328_v14 = vmul.f32 %v7698_v49, %v11372_v43 }
 0x1b0   : > { %v2730_v28 = vrot.slane %v2563_v11, 2  ;;  %v3643_v39 = vadd.f32 %v3493_v55, %v3261_v41  ;;  %v1584_v37 = vsel %vm1530_vm1, %v1581_v59, %v1583_v35  ;;  %v3112_v23 = vrot.slane %v2946_v57, 2 }
 0x1b1   : > { %v1966_v45 = vsel %vm1530_vm1, %v1963_v3, %v1965_v25  ;;  %v1733_v48 = vadd.f32 %v1584_v37, %v1350_v32  ;;  %v2348_v36 = vsel %vm1530_vm1, %v2345_v4, %v2347_v29  ;;  %v3494_v47 = vrot.slane %v3328_v14, 2 }
 0x1b2   : > { %v2731_v42 = vsel %vm2677_vm2, %v2728_v53, %v2730_v28  ;;  %6459 = vmatmul.mubr.f32.gmra.mrb[20].mxu1 %v3643_v39  ;;  %v3113_v46 = vsel %vm2677_vm2, %v3110_v22, %v3112_v23  ;;  %v8012_v15 = vmul.f32 %v7503_v0, %v6906_v51  ;;  %v8016_v18 = vmul.f32 %v7503_v0, %v6932_v8 }
 0x1b3   : > { %v8020_v59 = vmul.f32 %v7503_v0, %v6942_v13  ;;  %v2115_v3 = vadd.f32 %v1966_v45, %v1733_v48  ;;  %v3495_v4 = vsel %vm2677_vm2, %v3492_v38, %v3494_v47  ;;  %v8025_v53 = vmul.f32 %v7503_v0, %v6910_v52 }
 0x1b4   : > { %v8029_v22 = vmul.f32 %v7503_v0, %v6938_v12  ;;  %v1127_v11 = vmul.f32 %v11296_v9, %v11341_v62  ;;  %v1185_v45 = vmul.f32 %v6928_v7, %v11357_v26  ;;  %v1297_v41 = vmul.f32 %v6951_v17, %v11372_v43 }
 0x1b5   : > { %v2497_v48 = vadd.f32 %v2348_v36, %v2115_v3  ;;  %v11373_v57 = vrot.slane %v7538_v16, 1  ;;  %v11374_v14 = vrot.slane %v7657_v24, 1  ;;  %v11375_v37 = vrot.slane %v7785_v21, 1 }
 0x1b6   : > { %v11376_v36 = vrot.slane %v7551_v63, 2  ;;  %v1239_v55 = vadd.f32 %v1185_v45, %v1127_v11  ;;  %v3114_v6 = vrot.slane %v7671_v10, 2  ;;  %v3329_v16 = vmul.f32 %v7698_v49, %v7407_v19 }
 0x1b7   : > { %v1586_v32 = vsel %vm1530_vm1, %v1583_v35, %v11373_v57  ;;  %v1968_v39 = vsel %vm1530_vm1, %v1965_v25, %v11374_v14  ;;  %v2350_v62 = vsel %vm1530_vm1, %v2347_v29, %v11375_v37  ;;  %v2880_v38 = vadd.f32 %v2731_v42, %v2497_v48  ;;  %v8064_v25 = vpop.f32.mrb[66].mxu0 }
 0x1b8   : > { %v2733_v3 = vsel %vm2677_vm2, %v2730_v28, %v11376_v36  ;;  %v1128_v24 = vmul.f32 %v11296_v9, %v11352_v50  ;;  %v1186_v35 = vmul.f32 %v6928_v7, %v11366_v20  ;;  %v1298_v21 = vmul.f32 %v6951_v17, %v7449_v60  ;;  %v8067_v19 = vpop.f32.mrb[67].mxu0 }
 0x1b9   : > { %v1418_v63 = vmul.f32 %v6906_v51, %v11352_v50  ;;  %v3262_v29 = vadd.f32 %v3113_v46, %v2880_v38  ;;  %v1351_v28 = vadd.f32 %v1297_v41, %v1239_v55  ;;  %v3115_v10 = vsel %vm2677_vm2, %v3112_v23, %v3114_v6  ;;  %11377 = vst [vmem:[#allocation18_spill] sm:$0xff] %v8067_v19 }
 0x1ba   : > { %v3496_v42 = vrot.slane %v3329_v16, 2  ;;  %v1240_v11 = vadd.f32 %v1186_v35, %v1128_v24  ;;  %v1419_v48 = vmul.f32 %v11354_v2, %v6906_v51  ;;  %v1801_v57 = vmul.f32 %v6932_v8, %v11366_v20 }
 0x1bb   : > { %v1587_v45 = vrot.slane %v1418_v63, 1  ;;  %v3644_v14 = vadd.f32 %v3495_v4, %v3262_v29  ;;  %v1734_v37 = vadd.f32 %v1586_v32, %v1351_v28  ;;  %v1802_v46 = vmul.f32 %v11369_v33, %v6932_v8 }
 0x1bc   : > { %v3497_v36 = vsel %vm2677_vm2, %v3494_v47, %v3496_v42  ;;  %v1352_v55 = vadd.f32 %v1298_v21, %v1240_v11  ;;  %v1588_v23 = vrot.slane %v1419_v48, 1  ;;  %v1969_v6 = vrot.slane %v1801_v57, 1 }
 0x1bd   : > { %v2183_v38 = vmul.f32 %v6942_v13, %v7449_v60  ;;  %6461 = vmatprep.mubr.f32.mxu1 %v3644_v14  ;;  %v2116_v41 = vadd.f32 %v1968_v39, %v1734_v37  ;;  %v1970_v16 = vrot.slane %v1802_v46, 1  ;;  %v2184_v24 = vmul.f32 %v7443_v30, %v6942_v13 }
 0x1be   : > { %v2565_v4 = vmul.f32 %v6910_v52, %v11352_v50  ;;  %v1589_v47 = vsel %vm1530_vm1, %v1587_v45, %v1588_v23  ;;  %v2566_v35 = vmul.f32 %v11354_v2, %v6910_v52  ;;  %v2948_v21 = vmul.f32 %v6938_v12, %v11366_v20 }
 0x1bf   : > { %v2351_v32 = vrot.slane %v2183_v38, 1  ;;  %v2498_v63 = vadd.f32 %v2350_v62, %v2116_v41  ;;  %v1735_v29 = vadd.f32 %v1589_v47, %v1352_v55  ;;  %v1971_v39 = vsel %vm1530_vm1, %v1969_v6, %v1970_v16 }
 0x1c0   : > { %v2352_v28 = vrot.slane %v2184_v24, 1  ;;  %v2734_v42 = vrot.slane %v2565_v4, 2  ;;  %v2735_v11 = vrot.slane %v2566_v35, 2  ;;  %v2949_v48 = vmul.f32 %v11369_v33, %v6938_v12  ;;  %v8100_v4 = vpop.f32.mrb[68].mxu0 }
 0x1c1   : > { %v3116_v50 = vrot.slane %v2948_v21, 2  ;;  %v2881_v57 = vadd.f32 %v2733_v3, %v2498_v63  ;;  %v2117_v45 = vadd.f32 %v1971_v39, %v1735_v29  ;;  %v3330_v37 = vmul.f32 %v7698_v49, %v7449_v60  ;;  %11378 = vst [vmem:[#allocation17_spill] sm:$0xff] %v8100_v4  ;;  %v8107_v63 = vpop.f32.mrb[69].mxu0 }
 0x1c2   : > { %v2353_v14 = vsel %vm1530_vm1, %v2351_v32, %v2352_v28  ;;  %v2736_v46 = vsel %vm2677_vm2, %v2734_v42, %v2735_v11  ;;  %v3117_v62 = vrot.slane %v2949_v48, 2  ;;  %v3331_v55 = vmul.f32 %v7698_v49, %v7443_v30  ;;  %11379 = vst [vmem:[#allocation22_spill] sm:$0xff] %v8107_v63  ;;  %v11396_v63 = vld [vmem:[#allocation29_spill] sm:$0xff] }
 0x1c3   : > { %v1129_v6 = vmul.f32 %v11354_v2, %v11296_v9  ;;  %v3263_v38 = vadd.f32 %v3115_v10, %v2881_v57  ;;  %v2499_v41 = vadd.f32 %v2353_v14, %v2117_v45  ;;  %v3498_v24 = vrot.slane %v3330_v37, 2  ;;  %v11380_v57 = vld [vmem:[#allocation4_spill] sm:$0xff] }
 0x1c4   : > { %v1187_v3 = vmul.f32 %v11369_v33, %v6928_v7  ;;  %v3118_v47 = vsel %vm2677_vm2, %v3116_v50, %v3117_v62  ;;  %v3499_v32 = vrot.slane %v3331_v55, 2  ;;  %v1299_v35 = vmul.f32 %v7443_v30, %v6951_v17 }
 0x1c5   : > { %v1420_v21 = vmul.f32 %v6906_v51, %v11357_v26  ;;  %v3645_v2 = vadd.f32 %v3497_v36, %v3263_v38  ;;  %v2882_v10 = vadd.f32 %v2736_v46, %v2499_v41  ;;  %v1803_v39 = vmul.f32 %v6932_v8, %v11372_v43 }
 0x1c6   : > { %v1241_v29 = vadd.f32 %v1187_v3, %v1129_v6  ;;  %v3500_v42 = vsel %vm2677_vm2, %v3498_v24, %v3499_v32  ;;  %v2185_v50 = vmul.f32 %v6942_v13, %v11380_v57  ;;  %v2567_v45 = vmul.f32 %v6910_v52, %v11357_v26 }
 0x1c7   : > { %v1590_v48 = vrot.slane %v1420_v21, 1  ;;  %6462 = vmatmul.mubr.f32.gmra.mrb[22].mxu1 %v3645_v2  ;;  %v3264_v14 = vadd.f32 %v3118_v47, %v2882_v10  ;;  %v1972_v55 = vrot.slane %v1803_v39, 1  ;;  %v2950_v36 = vmul.f32 %v6938_v12, %v11372_v43 }
 0x1c8   : > { %v1353_v37 = vadd.f32 %v1299_v35, %v1241_v29  ;;  %v2354_v6 = vrot.slane %v2185_v50, 1  ;;  %v2737_v38 = vrot.slane %v2567_v45, 2  ;;  %v3332_v41 = vmul.f32 %v7698_v49, %v11380_v57 }
 0x1c9   : > { %v1591_v46 = vsel %vm1530_vm1, %v1588_v23, %v1590_v48  ;;  %v3646_v24 = vadd.f32 %v3500_v42, %v3264_v14  ;;  %v1973_v21 = vsel %vm1530_vm1, %v1970_v16, %v1972_v55  ;;  %v3119_v1 = vrot.slane %v2950_v36, 2 }
 0x1ca   : > { %v1736_v3 = vadd.f32 %v1591_v46, %v1353_v37  ;;  %v2355_v2 = vsel %vm1530_vm1, %v2352_v28, %v2354_v6  ;;  %v2738_v47 = vsel %vm2677_vm2, %v2735_v11, %v2737_v38  ;;  %v3501_v35 = vrot.slane %v3332_v41, 2 }
 0x1cb   : > { %v8126_v10 = vmul.f32 %v7590_v54, %v6906_v51  ;;  %6464 = vmatprep.mubr.f32.mxu1 %v3646_v24  ;;  %v3120_v29 = vsel %vm2677_vm2, %v3117_v62, %v3119_v1  ;;  %v8131_v39 = vmul.f32 %v7590_v54, %v6932_v8  ;;  %v8135_v16 = vmul.f32 %v7590_v54, %v6942_v13 }
 0x1cc   : > { %v2118_v23 = vadd.f32 %v1973_v21, %v1736_v3  ;;  %v3502_v28 = vsel %vm2677_vm2, %v3499_v32, %v3501_v35  ;;  %v8141_v42 = vmul.f32 %v7590_v54, %v6910_v52  ;;  %v8145_v50 = vmul.f32 %v7590_v54, %v6938_v12 }
 0x1cd   : > { %v1130_v37 = vmul.f32 %v11296_v9, %v11357_v26  ;;  %v1188_v36 = vmul.f32 %v6928_v7, %v11372_v43  ;;  %v1300_v46 = vmul.f32 %v6951_v17, %v11380_v57  ;;  %v11381_v41 = vrot.slane %v7652_v44, 1 }
 0x1ce   : > { %v2500_v62 = vadd.f32 %v2355_v2, %v2118_v23  ;;  %v11382_v21 = vrot.slane %v7779_v58, 1  ;;  %v11383_v23 = vrot.slane %v7903_v56, 1  ;;  %v11384_v32 = vrot.slane %v7667_v31, 2  ;;  %v11385_v56 = vld [vmem:[#allocation8_spill] sm:$0xff] }
 0x1cf   : > { %v1593_v24 = vsel %vm1530_vm1, %v1590_v48, %v11381_v41  ;;  %v1242_v45 = vadd.f32 %v1188_v36, %v1130_v37  ;;  %v3121_v14 = vrot.slane %v7795_v61, 2  ;;  %v3333_v44 = vmul.f32 %v7698_v49, %v7468_v40 }
 0x1d0   : > { %v2883_v3 = vadd.f32 %v2738_v47, %v2500_v62  ;;  %v1975_v2 = vsel %vm1530_vm1, %v1972_v55, %v11382_v21  ;;  %v2357_v26 = vsel %vm1530_vm1, %v2354_v6, %v11383_v23  ;;  %v2740_v11 = vsel %vm2677_vm2, %v2737_v38, %v11384_v32  ;;  %v8179_v38 = vpop.f32.mrb[70].mxu0 }
 0x1d1   : > { %v1131_v48 = vmul.f32 %v11296_v9, %v11366_v20  ;;  %v1189_v55 = vmul.f32 %v6928_v7, %v7449_v60  ;;  %v1301_v6 = vmul.f32 %v6951_v17, %v11385_v56  ;;  %v1422_v31 = vmul.f32 %v6906_v51, %v11366_v20 }
 0x1d2   : > { %v3265_v58 = vadd.f32 %v3120_v29, %v2883_v3  ;;  %v1354_v47 = vadd.f32 %v1300_v46, %v1242_v45  ;;  %v3122_v61 = vsel %vm2677_vm2, %v3119_v1, %v3121_v14  ;;  %v3503_v62 = vrot.slane %v3333_v44, 2  ;;  %v8186_v29 = vpop.f32.mrb[71].mxu0 }
 0x1d3   : > { %v8184_v40 = vmul.f32 %v11369_v33, %v6906_v51  ;;  %11386 = vst [vmem:[#allocation4_spill] sm:$0xff] %v8186_v29  ;;  %v1243_v32 = vadd.f32 %v1189_v55, %v1131_v48  ;;  %v1594_v36 = vrot.slane %v1422_v31, 1  ;;  %v1805_v41 = vmul.f32 %v6932_v8, %v7449_v60 }
 0x1d4   : > { %v3647_v37 = vadd.f32 %v3502_v28, %v3265_v58  ;;  %v1737_v3 = vadd.f32 %v1593_v24, %v1354_v47  ;;  %v3504_v21 = vsel %vm2677_vm2, %v3501_v35, %v3503_v62  ;;  %v1806_v1 = vmul.f32 %v7443_v30, %v6932_v8  ;;  %v11387_v28 = vld [vmem:[#allocation5_spill] sm:$0xff] }
 0x1d5   : > { %v1595_v45 = vrot.slane %v8184_v40, 1  ;;  %v1355_v14 = vadd.f32 %v1301_v6, %v1243_v32  ;;  %v1976_v46 = vrot.slane %v1805_v41, 1  ;;  %v2187_v23 = vmul.f32 %v6942_v13, %v11385_v56 }
 0x1d6   : > { %6465 = vmatmul.mubr.f32.gmra.mrb[24].mxu1 %v3647_v37  ;;  %v2188_v44 = vmul.f32 %v11387_v28, %v6942_v13  ;;  %v2119_v48 = vadd.f32 %v1975_v2, %v1737_v3  ;;  %v1977_v24 = vrot.slane %v1806_v1, 1  ;;  %v2569_v35 = vmul.f32 %v6910_v52, %v11366_v20 }
 0x1d7   : > { %v1596_v58 = vsel %vm1530_vm1, %v1594_v36, %v1595_v45  ;;  %v2358_v31 = vrot.slane %v2187_v23, 1  ;;  %v2570_v6 = vmul.f32 %v11369_v33, %v6910_v52  ;;  %v2952_v32 = vmul.f32 %v6938_v12, %v7449_v60 }
 0x1d8   : > { %v1738_v55 = vadd.f32 %v1596_v58, %v1355_v14  ;;  %v2359_v47 = vrot.slane %v2188_v44, 1  ;;  %v2501_v62 = vadd.f32 %v2357_v26, %v2119_v48  ;;  %v1978_v40 = vsel %vm1530_vm1, %v1976_v46, %v1977_v24  ;;  %v8216_v58 = vpop.f32.mrb[72].mxu0 }
 0x1d9   : > { %v2741_v37 = vrot.slane %v2569_v35, 2  ;;  %v2742_v41 = vrot.slane %v2570_v6, 2  ;;  %v2953_v20 = vmul.f32 %v7443_v30, %v6938_v12  ;;  %v3123_v1 = vrot.slane %v2952_v32, 2  ;;  %11388 = vst [vmem:[#allocation8_spill] sm:$0xff] %v8216_v58  ;;  %v8220_v6 = vpop.f32.mrb[73].mxu0 }
 0x1da   : > { %v2120_v2 = vadd.f32 %v1978_v40, %v1738_v55  ;;  %v2360_v36 = vsel %vm1530_vm1, %v2358_v31, %v2359_v47  ;;  %v2884_v3 = vadd.f32 %v2740_v11, %v2501_v62  ;;  %v3334_v14 = vmul.f32 %v7698_v49, %v11385_v56  ;;  %11389 = vst [vmem:[#allocation5_spill] sm:$0xff] %v8220_v6 }
 0x1db   : > { %v3335_v26 = vmul.f32 %v7698_v49, %v11387_v28  ;;  %v2743_v23 = vsel %vm2677_vm2, %v2741_v37, %v2742_v41  ;;  %v3124_v44 = vrot.slane %v2953_v20, 2  ;;  %v1132_v48 = vmul.f32 %v11369_v33, %v11296_v9 }
 0x1dc   : > { %v2502_v46 = vadd.f32 %v2360_v36, %v2120_v2  ;;  %v3266_v35 = vadd.f32 %v3122_v61, %v2884_v3  ;;  %v3505_v55 = vrot.slane %v3334_v14, 2  ;;  %v1190_v11 = vmul.f32 %v7443_v30, %v6928_v7  ;;  %v11390_v14 = vld [vmem:[#allocation24_spill] sm:$0xff] }
 0x1dd   : > { %v3506_v31 = vrot.slane %v3335_v26, 2  ;;  %v3125_v40 = vsel %vm2677_vm2, %v3123_v1, %v3124_v44  ;;  %v1302_v37 = vmul.f32 %v11387_v28, %v6951_v17  ;;  %v1424_v32 = vmul.f32 %v6906_v51, %v11372_v43 }
 0x1de   : > { %v2885_v62 = vadd.f32 %v2743_v23, %v2502_v46  ;;  %v3648_v33 = vadd.f32 %v3504_v21, %v3266_v35  ;;  %v1244_v61 = vadd.f32 %v1190_v11, %v1132_v48  ;;  %v1807_v36 = vmul.f32 %v6932_v8, %v11380_v57 }
 0x1df   : > { %v3507_v2 = vsel %vm2677_vm2, %v3505_v55, %v3506_v31  ;;  %v1597_v3 = vrot.slane %v1424_v32, 1  ;;  %v2189_v26 = vmul.f32 %v6942_v13, %v11390_v14  ;;  %v2571_v1 = vmul.f32 %v6910_v52, %v11372_v43 }
 0x1e0   : > { %v3267_v20 = vadd.f32 %v3125_v40, %v2885_v62  ;;  %6467 = vmatprep.mubr.f32.mxu1 %v3648_v33  ;;  %v1356_v46 = vadd.f32 %v1302_v37, %v1244_v61  ;;  %v1979_v23 = vrot.slane %v1807_v36, 1  ;;  %v2954_v21 = vmul.f32 %v6938_v12, %v11380_v57  ;;  %v11391_v61 = vld [vmem:[#allocation9_spill] sm:$0xff] }
 0x1e1   : > { %v3336_v48 = vmul.f32 %v7698_v49, %v11390_v14  ;;  %v1598_v55 = vsel %vm1530_vm1, %v1595_v45, %v1597_v3  ;;  %v2361_v11 = vrot.slane %v2189_v26, 1  ;;  %v2744_v62 = vrot.slane %v2571_v1, 2 }
 0x1e2   : > { %v3649_v35 = vadd.f32 %v3507_v2, %v3267_v20  ;;  %v1739_v40 = vadd.f32 %v1598_v55, %v1356_v46  ;;  %v1980_v32 = vsel %vm1530_vm1, %v1977_v24, %v1979_v23  ;;  %v3126_v29 = vrot.slane %v2954_v21, 2  ;;  %v11392_v55 = vld [vmem:[#allocation6_spill] sm:$0xff] }
 0x1e3   : > { %v3508_v19 = vrot.slane %v3336_v48, 2  ;;  %v2362_v37 = vsel %vm1530_vm1, %v2359_v47, %v2361_v11  ;;  %v2745_v33 = vsel %vm2677_vm2, %v2742_v41, %v2744_v62  ;;  %v8244_v36 = vmul.f32 %v11391_v61, %v6906_v51 }
 0x1e4   : > { %6468 = vmatmul.mubr.f32.gmra.mrb[26].mxu1 %v3649_v35  ;;  %v8248_v49 = vmul.f32 %v11391_v61, %v6932_v8  ;;  %v2121_v45 = vadd.f32 %v1980_v32, %v1739_v40  ;;  %v3127_v2 = vsel %vm2677_vm2, %v3124_v44, %v3126_v29  ;;  %v8254_v20 = vmul.f32 %v11391_v61, %v6942_v13 }
 0x1e5   : > { %v3509_v24 = vsel %vm2677_vm2, %v3506_v31, %v3508_v19  ;;  %v8260_v26 = vmul.f32 %v11391_v61, %v6910_v52  ;;  %v8264_v1 = vmul.f32 %v11391_v61, %v6938_v12  ;;  %v1133_v31 = vmul.f32 %v11296_v9, %v11372_v43 }
 0x1e6   : > { %v2503_v46 = vadd.f32 %v2362_v37, %v2121_v45  ;;  %v1191_v21 = vmul.f32 %v6928_v7, %v11380_v57  ;;  %v1303_v35 = vmul.f32 %v6951_v17, %v11390_v14  ;;  %v11393_v40 = vrot.slane %v11392_v55, 1  ;;  %v6430_v45 = vpop.f32.mrb[0].mxu1 }
 0x1e7   : > { %v11394_v47 = vrot.slane %v7898_v34, 1  ;;  %v11395_v43 = vrot.slane %v8020_v59, 1  ;;  %v11397_v48 = vrot.slane %v11396_v63, 2  ;;  %v3765_v4 = vpop.f32.mrb[1].mxu1  ;;  %v3128_v55 = vrot.slane %v7913_v5, 2 }
 0x1e8   : > { %v1600_v32 = vsel %vm1530_vm1, %v1597_v3, %v11393_v40  ;;  %v2886_v41 = vadd.f32 %v2745_v33, %v2503_v46  ;;  %v1245_v44 = vadd.f32 %v1191_v21, %v1133_v31  ;;  %v8290_v34 = vld [vmem:[%s11092_s2 + $0x8] ss:$0 sm:$0xff]  ;;  %v1134_v59 = vmul.f32 %v11296_v9, %v7449_v60 }
 0x1e9   : > { %v1982_v37 = vsel %vm1530_vm1, %v1979_v23, %v11394_v47  ;;  %v2364_v6 = vsel %vm1530_vm1, %v2361_v11, %v11395_v43  ;;  %v2747_v58 = vsel %vm2677_vm2, %v2744_v62, %v11397_v48  ;;  %v3337_v3 = vmul.f32 %v8290_v34, %v7503_v0  ;;  %v11398_v62 = vld [vmem:[#allocation26_spill] sm:$0xff] }
 0x1ea   : > { %v1192_v23 = vmul.f32 %v6928_v7, %v11385_v56  ;;  %v3268_v63 = vadd.f32 %v3127_v2, %v2886_v41  ;;  %v1357_v11 = vadd.f32 %v1303_v35, %v1245_v44  ;;  %v1304_v4 = vmul.f32 %v6951_v17, %v11398_v62 }
 0x1eb   : > { %v1426_v5 = vmul.f32 %v6906_v51, %v7449_v60  ;;  %v3129_v33 = vsel %vm2677_vm2, %v3126_v29, %v3128_v55  ;;  %v3510_v47 = vrot.slane %v3337_v3, 2  ;;  %v8305_v0 = vmul.f32 %v7443_v30, %v6906_v51  ;;  %v8317_v55 = vpop.f32.mrb[74].mxu0 }
 0x1ec   : > { %v1246_v46 = vadd.f32 %v1192_v23, %v1134_v59  ;;  %v3650_v31 = vadd.f32 %v3509_v24, %v3268_v63  ;;  %v1740_v21 = vadd.f32 %v1600_v32, %v1357_v11  ;;  %v1809_v2 = vmul.f32 %v6932_v8, %v11385_v56  ;;  %v11399_v24 = vld [vmem:[#allocation25_spill] sm:$0xff]  ;;  %v8324_v63 = vpop.f32.mrb[75].mxu0 }
 0x1ed   : > { %v1601_v48 = vrot.slane %v1426_v5, 1  ;;  %v3511_v41 = vsel %vm2677_vm2, %v3508_v19, %v3510_v47  ;;  %v1602_v35 = vrot.slane %v8305_v0, 1  ;;  %v1810_v29 = vmul.f32 %v11387_v28, %v6932_v8  ;;  %11400 = vst [vmem:[#allocation24_spill] sm:$0xff] %v8324_v63  ;;  %v8360_v63 = vpop.f32.mrb[76].mxu0 }
 0x1ee   : > { %v1358_v44 = vadd.f32 %v1304_v4, %v1246_v46  ;;  %6470 = vmatprep.mubr.f32.mxu1 %v3650_v31  ;;  %v2122_v40 = vadd.f32 %v1982_v37, %v1740_v21  ;;  %v1983_v45 = vrot.slane %v1809_v2, 1  ;;  %v2191_v43 = vmul.f32 %v6942_v13, %v11398_v62  ;;  %11402 = vst [vmem:[#allocation9_spill] sm:$0xff] %v8360_v63 }
 0x1ef   : > { %v2192_v32 = vmul.f32 %v11399_v24, %v6942_v13  ;;  %v1603_v3 = vsel %vm1530_vm1, %v1601_v48, %v1602_v35  ;;  %v1984_v19 = vrot.slane %v1810_v29, 1  ;;  %v2573_v59 = vmul.f32 %v6910_v52, %v7449_v60 }
 0x1f0   : > { %v2574_v23 = vmul.f32 %v7443_v30, %v6910_v52  ;;  %v2504_v37 = vadd.f32 %v2364_v6, %v2122_v40  ;;  %v1741_v11 = vadd.f32 %v1603_v3, %v1358_v44  ;;  %v2365_v4 = vrot.slane %v2191_v43, 1 }
 0x1f1   : > { %v2366_v5 = vrot.slane %v2192_v32, 1  ;;  %v1985_v47 = vsel %vm1530_vm1, %v1983_v45, %v1984_v19  ;;  %v2748_v46 = vrot.slane %v2573_v59, 2  ;;  %v2956_v31 = vmul.f32 %v6938_v12, %v11385_v56 }
 0x1f2   : > { %v2749_v0 = vrot.slane %v2574_v23, 2  ;;  %v2887_v21 = vadd.f32 %v2747_v58, %v2504_v37  ;;  %v2123_v48 = vadd.f32 %v1985_v47, %v1741_v11  ;;  %v2957_v2 = vmul.f32 %v11387_v28, %v6938_v12 }
 0x1f3   : > { %v2367_v60 = vsel %vm1530_vm1, %v2365_v4, %v2366_v5  ;;  %v3130_v6 = vrot.slane %v2956_v31, 2  ;;  %v3338_v44 = vmul.f32 %v8290_v34, %v11398_v62  ;;  %v3339_v40 = vmul.f32 %v8290_v34, %v11399_v24 }
 0x1f4   : > { %v2750_v29 = vsel %vm2677_vm2, %v2748_v46, %v2749_v0  ;;  %v3269_v45 = vadd.f32 %v3129_v33, %v2887_v21  ;;  %v2505_v43 = vadd.f32 %v2367_v60, %v2123_v48  ;;  %v3131_v32 = vrot.slane %v2957_v2, 2  ;;  %v11401_v21 = vld [vmem:[#allocation7_spill] sm:$0xff] }
 0x1f5   : > { %v1135_v58 = vmul.f32 %v7443_v30, %v11296_v9  ;;  %v3512_v3 = vrot.slane %v3338_v44, 2  ;;  %v3513_v59 = vrot.slane %v3339_v40, 2  ;;  %v1193_v23 = vmul.f32 %v11387_v28, %v6928_v7 }
 0x1f6   : > { %v1305_v37 = vmul.f32 %v11399_v24, %v6951_v17  ;;  %v3651_v11 = vadd.f32 %v3511_v41, %v3269_v45  ;;  %v2888_v4 = vadd.f32 %v2750_v29, %v2505_v43  ;;  %v3132_v47 = vsel %vm2677_vm2, %v3130_v6, %v3131_v32 }
 0x1f7   : > { %v1428_v33 = vmul.f32 %v6906_v51, %v11380_v57  ;;  %v3514_v46 = vsel %vm2677_vm2, %v3512_v3, %v3513_v59  ;;  %v1247_v31 = vadd.f32 %v1193_v23, %v1135_v58  ;;  %v1811_v30 = vmul.f32 %v6932_v8, %v11390_v14 }
 0x1f8   : > { %v2193_v48 = vmul.f32 %v6942_v13, %v11401_v21  ;;  %6471 = vmatmul.mubr.f32.gmra.mrb[28].mxu1 %v3651_v11  ;;  %v3270_v60 = vadd.f32 %v3132_v47, %v2888_v4  ;;  %v2575_v41 = vmul.f32 %v6910_v52, %v11380_v57  ;;  %v2958_v29 = vmul.f32 %v6938_v12, %v11390_v14 }
 0x1f9   : > { %v1604_v2 = vrot.slane %v1428_v33, 1  ;;  %v1359_v6 = vadd.f32 %v1305_v37, %v1247_v31  ;;  %v1986_v44 = vrot.slane %v1811_v30, 1  ;;  %v3340_v45 = vmul.f32 %v8290_v34, %v11401_v21  ;;  %v8372_v30 = vpop.f32.mrb[77].mxu0 }
 0x1fa   : > { %v2368_v40 = vrot.slane %v2193_v48, 1  ;;  %v3652_v43 = vadd.f32 %v3514_v46, %v3270_v60  ;;  %v2751_v3 = vrot.slane %v2575_v41, 2  ;;  %v3133_v23 = vrot.slane %v2958_v29, 2  ;;  %11404 = vst [vmem:[#allocation29_spill] sm:$0xff] %v8372_v30 }
 0x1fb   : > { %v1605_v58 = vsel %vm1530_vm1, %v1602_v35, %v1604_v2  ;;  %v1987_v4 = vsel %vm1530_vm1, %v1984_v19, %v1986_v44  ;;  %v3515_v33 = vrot.slane %v3340_v45, 2  ;;  %v8366_v46 = vmul.f32 %v7828_v27, %v6906_v51 }
 0x1fc   : > { %v1742_v11 = vadd.f32 %v1605_v58, %v1359_v6  ;;  %v2369_v47 = vsel %vm1530_vm1, %v2366_v5, %v2368_v40  ;;  %6473 = vmatprep.mubr.f32.mxu1 %v3652_v43  ;;  %v2752_v37 = vsel %vm2677_vm2, %v2749_v0, %v2751_v3  ;;  %v3134_v31 = vsel %vm2677_vm2, %v3131_v32, %v3133_v23  ;;  %v11410_v6 = vld [vmem:[#allocation15_spill] sm:$0xff] }
 0x1fd   : > { %11403 = vst [vmem:[#allocation6_spill] sm:$0xff] %v8366_v46  ;;  %v8370_v35 = vmul.f32 %v7828_v27, %v6932_v8  ;;  %v3516_v5 = vsel %vm2677_vm2, %v3513_v59, %v3515_v33  ;;  %v8377_v48 = vmul.f32 %v7828_v27, %v6942_v13  ;;  %v8381_v0 = vmul.f32 %v7828_v27, %v6910_v52 }
 0x1fe   : > { %v2124_v19 = vadd.f32 %v1987_v4, %v1742_v11  ;;  %v8387_v41 = vmul.f32 %v7828_v27, %v6938_v12  ;;  %v1136_v29 = vmul.f32 %v11296_v9, %v11380_v57  ;;  %v1194_v43 = vmul.f32 %v6928_v7, %v11390_v14  ;;  %v11406_v11 = vld [vmem:[#allocation23_spill] sm:$0xff] }
 0x1ff   : > { %11405 = vst [vmem:[#allocation26_spill] sm:$0xff] %v8381_v0  ;;  %v1306_v58 = vmul.f32 %v6951_v17, %v11401_v21  ;;  %v11407_v4 = vrot.slane %v11406_v11, 1  ;;  %v11408_v60 = vrot.slane %v8016_v18, 1  ;;  %v11409_v57 = vrot.slane %v8135_v16, 1  ;;  %v11412_v16 = vld [vmem:[#allocation28_spill] sm:$0xff] }
 0x200   : > { %v2506_v59 = vadd.f32 %v2369_v47, %v2124_v19  ;;  %v1248_v45 = vadd.f32 %v1194_v43, %v1136_v29  ;;  %v11411_v63 = vrot.slane %v11410_v6, 2  ;;  %v3135_v46 = vrot.slane %v8029_v22, 2 }
 0x201   : > { %v1607_v32 = vsel %vm1530_vm1, %v1604_v2, %v11407_v4  ;;  %v1989_v30 = vsel %vm1530_vm1, %v1986_v44, %v11408_v60  ;;  %v2371_v47 = vsel %vm1530_vm1, %v2368_v40, %v11409_v57  ;;  %v3341_v11 = vmul.f32 %v8290_v34, %v7590_v54 }
 0x202   : > { %v2889_v19 = vadd.f32 %v2752_v37, %v2506_v59  ;;  %v2754_v0 = vsel %vm2677_vm2, %v2751_v3, %v11411_v63  ;;  %v1137_v18 = vmul.f32 %v11296_v9, %v11385_v56  ;;  %v1195_v2 = vmul.f32 %v6928_v7, %v11398_v62 }
 0x203   : > { %v1307_v44 = vmul.f32 %v6951_v17, %v11412_v16  ;;  %v1360_v37 = vadd.f32 %v1306_v58, %v1248_v45  ;;  %v3136_v60 = vsel %vm2677_vm2, %v3133_v23, %v3135_v46  ;;  %v1430_v63 = vmul.f32 %v6906_v51, %v11385_v56 }
 0x204   : > { %v3271_v40 = vadd.f32 %v3134_v31, %v2889_v19  ;;  %v3517_v22 = vrot.slane %v3341_v11, 2  ;;  %v1249_v3 = vadd.f32 %v1195_v2, %v1137_v18  ;;  %v8423_v54 = vmul.f32 %v11387_v28, %v6906_v51  ;;  %v11413_v11 = vld [vmem:[#allocation27_spill] sm:$0xff] }
 0x205   : > { %v1813_v29 = vmul.f32 %v6932_v8, %v11398_v62  ;;  %v1743_v6 = vadd.f32 %v1607_v32, %v1360_v37  ;;  %v1608_v43 = vrot.slane %v1430_v63, 1  ;;  %v1814_v31 = vmul.f32 %v11399_v24, %v6932_v8 }
 0x206   : > { %v3653_v59 = vadd.f32 %v3516_v5, %v3271_v40  ;;  %v3518_v23 = vsel %vm2677_vm2, %v3515_v33, %v3517_v22  ;;  %v1361_v46 = vadd.f32 %v1307_v44, %v1249_v3  ;;  %v1609_v45 = vrot.slane %v8423_v54, 1 }
 0x207   : > { %v1990_v58 = vrot.slane %v1813_v29, 1  ;;  %v2125_v4 = vadd.f32 %v1989_v30, %v1743_v6  ;;  %v1991_v57 = vrot.slane %v1814_v31, 1  ;;  %v2195_v19 = vmul.f32 %v6942_v13, %v11412_v16 }
 0x208   : > { %6474 = vmatmul.mubr.f32.gmra.mrb[30].mxu1 %v3653_v59  ;;  %v2196_v5 = vmul.f32 %v11413_v11, %v6942_v13  ;;  %v1610_v32 = vsel %vm1530_vm1, %v1608_v43, %v1609_v45  ;;  %v2577_v18 = vmul.f32 %v6910_v52, %v11385_v56  ;;  %v2578_v33 = vmul.f32 %v11387_v28, %v6910_v52 }
 0x209   : > { %v2960_v2 = vmul.f32 %v6938_v12, %v11398_v62  ;;  %v2507_v44 = vadd.f32 %v2371_v47, %v2125_v4  ;;  %v1744_v30 = vadd.f32 %v1610_v32, %v1361_v46  ;;  %v1992_v40 = vsel %vm1530_vm1, %v1990_v58, %v1991_v57 }
 0x20a   : > { %v2372_v37 = vrot.slane %v2195_v19, 1  ;;  %v2373_v63 = vrot.slane %v2196_v5, 1  ;;  %v2755_v22 = vrot.slane %v2577_v18, 2  ;;  %v2756_v3 = vrot.slane %v2578_v33, 2 }
 0x20b   : > { %v2961_v54 = vmul.f32 %v11399_v24, %v6938_v12  ;;  %v2890_v29 = vadd.f32 %v2754_v0, %v2507_v44  ;;  %v2126_v59 = vadd.f32 %v1992_v40, %v1744_v30  ;;  %v3137_v56 = vrot.slane %v2960_v2, 2 }
 0x20c   : > { %v3342_v6 = vmul.f32 %v8290_v34, %v11412_v16  ;;  %v2374_v43 = vsel %vm1530_vm1, %v2372_v37, %v2373_v63  ;;  %v2757_v47 = vsel %vm2677_vm2, %v2755_v22, %v2756_v3  ;;  %v3343_v46 = vmul.f32 %v8290_v34, %v11413_v11  ;;  %v11414_v37 = vld [vmem:[#allocation10_spill] sm:$0xff] }
 0x20d   : > { %v3138_v31 = vrot.slane %v2961_v54, 2  ;;  %v3272_v58 = vadd.f32 %v3136_v60, %v2890_v29  ;;  %v2508_v4 = vadd.f32 %v2374_v43, %v2126_v59  ;;  %v1138_v5 = vmul.f32 %v11387_v28, %v11296_v9 }
 0x20e   : > { %v3519_v19 = vrot.slane %v3342_v6, 2  ;;  %v3520_v32 = vrot.slane %v3343_v46, 2  ;;  %v1196_v18 = vmul.f32 %v11399_v24, %v6928_v7  ;;  %v1308_v33 = vmul.f32 %v11413_v11, %v6951_v17 }
 0x20f   : > { %v3139_v0 = vsel %vm2677_vm2, %v3137_v56, %v3138_v31  ;;  %v3654_v2 = vadd.f32 %v3518_v23, %v3272_v58  ;;  %v2891_v44 = vadd.f32 %v2757_v47, %v2508_v4  ;;  %v1432_v30 = vmul.f32 %v6906_v51, %v11390_v14  ;;  %v8471_v58 = vpop.f32.mrb[78].mxu0 }
 0x210   : > { %v1815_v60 = vmul.f32 %v6932_v8, %v11401_v21  ;;  %v3521_v40 = vsel %vm2677_vm2, %v3519_v19, %v3520_v32  ;;  %v1250_v28 = vadd.f32 %v1196_v18, %v1138_v5  ;;  %v2197_v22 = vmul.f32 %v6942_v13, %v11414_v37 }
 0x211   : > { %v2579_v54 = vmul.f32 %v6910_v52, %v11390_v14  ;;  %6476 = vmatprep.mubr.f32.mxu1 %v3654_v2  ;;  %v3273_v29 = vadd.f32 %v3139_v0, %v2891_v44  ;;  %v1611_v59 = vrot.slane %v1432_v30, 1  ;;  %v2962_v56 = vmul.f32 %v6938_v12, %v11401_v21  ;;  %v8475_v0 = vpop.f32.mrb[79].mxu0 }
 0x212   : > { %v1993_v23 = vrot.slane %v1815_v60, 1  ;;  %v1362_v6 = vadd.f32 %v1308_v33, %v1250_v28  ;;  %v2375_v43 = vrot.slane %v2197_v22, 1  ;;  %v3344_v46 = vmul.f32 %v8290_v34, %v11414_v37  ;;  %v11415_v28 = vld [vmem:[#allocation3_spill] sm:$0xff] }
 0x213   : > { %v2758_v47 = vrot.slane %v2579_v54, 2  ;;  %v3655_v4 = vadd.f32 %v3521_v40, %v3273_v29  ;;  %v1612_v19 = vsel %vm1530_vm1, %v1609_v45, %v1611_v59  ;;  %v3140_v18 = vrot.slane %v2962_v56, 2 }
 0x214   : > { %v1994_v5 = vsel %vm1530_vm1, %v1991_v57, %v1993_v23  ;;  %v1745_v2 = vadd.f32 %v1612_v19, %v1362_v6  ;;  %v2376_v44 = vsel %vm1530_vm1, %v2373_v63, %v2375_v43  ;;  %v3522_v30 = vrot.slane %v3344_v46, 2 }
 0x215   : > { %v2759_v33 = vsel %vm2677_vm2, %v2756_v3, %v2758_v47  ;;  %6477 = vmatmul.mubr.f32.gmra.mrb[32].mxu1 %v3655_v4  ;;  %v3141_v60 = vsel %vm2677_vm2, %v3138_v31, %v3140_v18  ;;  %v8482_v22 = vmul.f32 %v11415_v28, %v6906_v51  ;;  %v8486_v45 = vmul.f32 %v11415_v28, %v6932_v8 }
 0x216   : > { %v8490_v57 = vmul.f32 %v11415_v28, %v6942_v13  ;;  %v2127_v40 = vadd.f32 %v1994_v5, %v1745_v2  ;;  %v3523_v63 = vsel %vm2677_vm2, %v3520_v32, %v3522_v30  ;;  %v8495_v3 = vmul.f32 %v11415_v28, %v6910_v52 }
 0x217   : > { %11416 = vst [vmem:[#allocation25_spill] sm:$0xff] %v8482_v22  ;;  %v8499_v31 = vmul.f32 %v11415_v28, %v6938_v12  ;;  %v1139_v6 = vmul.f32 %v11296_v9, %v11390_v14  ;;  %v1197_v4 = vmul.f32 %v6928_v7, %v11401_v21  ;;  %v1309_v19 = vmul.f32 %v6951_v17, %v11414_v37 }
 0x218   : > { %11417 = vst [vmem:[#allocation7_spill] sm:$0xff] %v8495_v3  ;;  %v2509_v46 = vadd.f32 %v2376_v44, %v2127_v40  ;;  %v11418_v5 = vrot.slane %v8012_v15, 1  ;;  %v11419_v54 = vrot.slane %v8131_v39, 1  ;;  %v11420_v56 = vrot.slane %v8254_v20, 1  ;;  %v11422_v20 = vld [vmem:[#allocation14_spill] sm:$0xff] }
 0x219   : > { %v11421_v44 = vrot.slane %v8025_v53, 2  ;;  %v1251_v3 = vadd.f32 %v1197_v4, %v1139_v6  ;;  %v3142_v22 = vrot.slane %v8145_v50, 2  ;;  %v3345_v15 = vmul.f32 %v8290_v34, %v11391_v61 }
 0x21a   : > { %v1614_v2 = vsel %vm1530_vm1, %v1611_v59, %v11418_v5  ;;  %v1996_v29 = vsel %vm1530_vm1, %v1993_v23, %v11419_v54  ;;  %v2378_v14 = vsel %vm1530_vm1, %v2375_v43, %v11420_v56  ;;  %v2892_v32 = vadd.f32 %v2759_v33, %v2509_v46 }
 0x21b   : > { %v2761_v40 = vsel %vm2677_vm2, %v2758_v47, %v11421_v44  ;;  %v1140_v39 = vmul.f32 %v11296_v9, %v11398_v62  ;;  %v1198_v59 = vmul.f32 %v6928_v7, %v11412_v16  ;;  %v1310_v23 = vmul.f32 %v6951_v17, %v11422_v20 }
 0x21c   : > { %v1434_v53 = vmul.f32 %v6906_v51, %v11398_v62  ;;  %v3274_v43 = vadd.f32 %v3141_v60, %v2892_v32  ;;  %v1363_v47 = vadd.f32 %v1309_v19, %v1251_v3  ;;  %v3143_v33 = vsel %vm2677_vm2, %v3140_v18, %v3142_v22 }
 0x21d   : > { %v3524_v50 = vrot.slane %v3345_v15, 2  ;;  %v1252_v54 = vadd.f32 %v1198_v59, %v1140_v39  ;;  %v1435_v61 = vmul.f32 %v11399_v24, %v6906_v51  ;;  %v1817_v6 = vmul.f32 %v6932_v8, %v11412_v16  ;;  %v11423_v15 = vld [vmem:[#allocation13_spill] sm:$0xff] }
 0x21e   : > { %v1615_v56 = vrot.slane %v1434_v53, 1  ;;  %v3656_v46 = vadd.f32 %v3523_v63, %v3274_v43  ;;  %v1746_v4 = vadd.f32 %v1614_v2, %v1363_v47  ;;  %v1818_v44 = vmul.f32 %v11413_v11, %v6932_v8 }
 0x21f   : > { %v3525_v5 = vsel %vm2677_vm2, %v3522_v30, %v3524_v50  ;;  %v1364_v60 = vadd.f32 %v1310_v23, %v1252_v54  ;;  %v1616_v3 = vrot.slane %v1435_v61, 1  ;;  %v1997_v32 = vrot.slane %v1817_v6, 1 }
 0x220   : > { %v2199_v18 = vmul.f32 %v6942_v13, %v11422_v20  ;;  %6479 = vmatprep.mubr.f32.mxu1 %v3656_v46  ;;  %v2128_v22 = vadd.f32 %v1996_v29, %v1746_v4  ;;  %v1998_v19 = vrot.slane %v1818_v44, 1  ;;  %v2200_v39 = vmul.f32 %v11423_v15, %v6942_v13 }
 0x221   : > { %v2581_v63 = vmul.f32 %v6910_v52, %v11398_v62  ;;  %v1617_v30 = vsel %vm1530_vm1, %v1615_v56, %v1616_v3  ;;  %v2582_v59 = vmul.f32 %v11399_v24, %v6910_v52  ;;  %v2964_v23 = vmul.f32 %v6938_v12, %v11412_v16 }
 0x222   : > { %v2379_v2 = vrot.slane %v2199_v18, 1  ;;  %v2510_v53 = vadd.f32 %v2378_v14, %v2128_v22  ;;  %v1747_v43 = vadd.f32 %v1617_v30, %v1364_v60  ;;  %v1999_v29 = vsel %vm1530_vm1, %v1997_v32, %v1998_v19 }
 0x223   : > { %v2380_v47 = vrot.slane %v2200_v39, 1  ;;  %v2762_v50 = vrot.slane %v2581_v63, 2  ;;  %v2763_v54 = vrot.slane %v2582_v59, 2  ;;  %v2965_v61 = vmul.f32 %v11413_v11, %v6938_v12 }
 0x224   : > { %v3144_v62 = vrot.slane %v2964_v23, 2  ;;  %v2893_v6 = vadd.f32 %v2761_v40, %v2510_v53  ;;  %v2129_v56 = vadd.f32 %v1999_v29, %v1747_v43  ;;  %v3346_v4 = vmul.f32 %v8290_v34, %v11422_v20 }
 0x225   : > { %v2381_v46 = vsel %vm1530_vm1, %v2379_v2, %v2380_v47  ;;  %v2764_v44 = vsel %vm2677_vm2, %v2762_v50, %v2763_v54  ;;  %v3145_v14 = vrot.slane %v2965_v61, 2  ;;  %v3347_v60 = vmul.f32 %v8290_v34, %v11423_v15  ;;  %v11424_v50 = vld [vmem:[#allocation11_spill] sm:$0xff] }
 0x226   : > { %v1141_v32 = vmul.f32 %v11399_v24, %v11296_v9  ;;  %v3275_v18 = vadd.f32 %v3143_v33, %v2893_v6  ;;  %v2511_v22 = vadd.f32 %v2381_v46, %v2129_v56  ;;  %v3526_v39 = vrot.slane %v3346_v4, 2 }
 0x227   : > { %v1199_v40 = vmul.f32 %v11413_v11, %v6928_v7  ;;  %v3146_v63 = vsel %vm2677_vm2, %v3144_v62, %v3145_v14  ;;  %v3527_v30 = vrot.slane %v3347_v60, 2  ;;  %v1311_v2 = vmul.f32 %v11423_v15, %v6951_v17 }
 0x228   : > { %v1436_v59 = vmul.f32 %v6906_v51, %v11401_v21  ;;  %v3657_v23 = vadd.f32 %v3525_v5, %v3275_v18  ;;  %v2894_v53 = vadd.f32 %v2764_v44, %v2511_v22  ;;  %v1819_v24 = vmul.f32 %v6932_v8, %v11414_v37 }
 0x229   : > { %v1253_v43 = vadd.f32 %v1199_v40, %v1141_v32  ;;  %v3528_v33 = vsel %vm2677_vm2, %v3526_v39, %v3527_v30  ;;  %v2201_v61 = vmul.f32 %v6942_v13, %v11424_v50  ;;  %v2583_v62 = vmul.f32 %v6910_v52, %v11401_v21 }
 0x22a   : > { %v1618_v29 = vrot.slane %v1436_v59, 1  ;;  %6480 = vmatmul.mubr.f32.gmra.mrb[34].mxu1 %v3657_v23  ;;  %v3276_v6 = vadd.f32 %v3146_v63, %v2894_v53  ;;  %v2000_v46 = vrot.slane %v1819_v24, 1  ;;  %v2966_v5 = vmul.f32 %v6938_v12, %v11414_v37 }
 0x22b   : > { %v1365_v56 = vadd.f32 %v1311_v2, %v1253_v43  ;;  %v2382_v44 = vrot.slane %v2201_v61, 1  ;;  %v2765_v60 = vrot.slane %v2583_v62, 2  ;;  %v3348_v32 = vmul.f32 %v8290_v34, %v11424_v50 }
 0x22c   : > { %v1619_v4 = vsel %vm1530_vm1, %v1616_v3, %v1618_v29  ;;  %v3658_v18 = vadd.f32 %v3528_v33, %v3276_v6  ;;  %v2001_v39 = vsel %vm1530_vm1, %v1998_v19, %v2000_v46  ;;  %v3147_v40 = vrot.slane %v2966_v5, 2 }
 0x22d   : > { %v1748_v22 = vadd.f32 %v1619_v4, %v1365_v56  ;;  %v2383_v59 = vsel %vm1530_vm1, %v2380_v47, %v2382_v44  ;;  %v2766_v63 = vsel %vm2677_vm2, %v2763_v54, %v2765_v60  ;;  %v3529_v2 = vrot.slane %v3348_v32, 2 }
 0x22e   : > { %v8588_v23 = vmul.f32 %v8064_v25, %v6906_v51  ;;  %6482 = vmatprep.mubr.f32.mxu1 %v3658_v18  ;;  %v3148_v53 = vsel %vm2677_vm2, %v3145_v14, %v3147_v40  ;;  %v8593_v43 = vmul.f32 %v8064_v25, %v6932_v8  ;;  %v8597_v19 = vmul.f32 %v8064_v25, %v6942_v13  ;;  %v8621_v18 = vpop.f32.mrb[2].mxu1 }
 0x22f   : > { %v2130_v3 = vadd.f32 %v2001_v39, %v1748_v22  ;;  %v3530_v47 = vsel %vm2677_vm2, %v3527_v30, %v3529_v2  ;;  %v8603_v24 = vmul.f32 %v8064_v25, %v6910_v52  ;;  %v8607_v33 = vmul.f32 %v8064_v25, %v6938_v12  ;;  %11428 = vst [vmem:[#allocation28_spill] sm:$0xff] %v8621_v18  ;;  %v3775_v61 = vpop.f32.mrb[3].mxu1 }
 0x230   : > { %11425 = vst [vmem:[#allocation23_spill] sm:$0xff] %v8588_v23  ;;  %v1142_v6 = vmul.f32 %v11296_v9, %v11401_v21  ;;  %v1200_v56 = vmul.f32 %v6928_v7, %v11414_v37  ;;  %v1312_v5 = vmul.f32 %v6951_v17, %v11424_v50  ;;  %v11427_v4 = vrot.slane %v8126_v10, 1 }
 0x231   : > { %11426 = vst [vmem:[#allocation15_spill] sm:$0xff] %v8603_v24  ;;  %v2512_v14 = vadd.f32 %v2383_v59, %v2130_v3  ;;  %v11429_v39 = vrot.slane %v8248_v49, 1  ;;  %v11430_v21 = vrot.slane %v8377_v48, 1  ;;  %v11431_v30 = vrot.slane %v8141_v42, 2 }
 0x232   : > { %v1621_v32 = vsel %vm1530_vm1, %v1618_v29, %v11427_v4  ;;  %v1254_v62 = vadd.f32 %v1200_v56, %v1142_v6  ;;  %v3149_v10 = vrot.slane %v8264_v1, 2  ;;  %v3349_v29 = vmul.f32 %v8290_v34, %v7828_v27 }
 0x233   : > { %v2895_v22 = vadd.f32 %v2766_v63, %v2512_v14  ;;  %v2003_v59 = vsel %vm1530_vm1, %v2000_v46, %v11429_v39  ;;  %v2385_v3 = vsel %vm1530_vm1, %v2382_v44, %v11430_v21  ;;  %v2768_v54 = vsel %vm2677_vm2, %v2765_v60, %v11431_v30  ;;  %v8637_v63 = vpop.f32.mrb[4].mxu1  ;;  %v11433_v44 = vld [vmem:[#allocation12_spill] sm:$0xff] }
 0x234   : > { %v1143_v49 = vmul.f32 %v11296_v9, %v11412_v16  ;;  %11432 = vst [vmem:[#allocation27_spill] sm:$0xff] %v8637_v63  ;;  %v1201_v48 = vmul.f32 %v6928_v7, %v11422_v20  ;;  %v1313_v42 = vmul.f32 %v6951_v17, %v11433_v44  ;;  %v1438_v60 = vmul.f32 %v6906_v51, %v11412_v16  ;;  %v8652_v4 = vpop.f32.mrb[5].mxu1 }
 0x235   : > { %v3277_v46 = vadd.f32 %v3148_v53, %v2895_v22  ;;  %v1366_v14 = vadd.f32 %v1312_v5, %v1254_v62  ;;  %v3150_v1 = vsel %vm2677_vm2, %v3147_v40, %v3149_v10  ;;  %v3531_v61 = vrot.slane %v3349_v29, 2  ;;  %11434 = vst [vmem:[#allocation10_spill] sm:$0xff] %v8652_v4  ;;  %v8660_v5 = vpop.f32.mrb[6].mxu1  ;;  %v11436_v29 = vld [vmem:[#allocation20_spill] sm:$0xff] }
 0x236   : > { %v8648_v27 = vmul.f32 %v11413_v11, %v6906_v51  ;;  %v1255_v30 = vadd.f32 %v1201_v48, %v1143_v49  ;;  %v1622_v53 = vrot.slane %v1438_v60, 1  ;;  %v1821_v56 = vmul.f32 %v6932_v8, %v11422_v20  ;;  %11435 = vst [vmem:[#allocation3_spill] sm:$0xff] %v8660_v5 }
 0x237   : > { %v3659_v6 = vadd.f32 %v3530_v47, %v3277_v46  ;;  %v1749_v22 = vadd.f32 %v1621_v32, %v1366_v14  ;;  %v3532_v39 = vsel %vm2677_vm2, %v3529_v2, %v3531_v61  ;;  %v8658_v40 = vmul.f32 %v11423_v15, %v6932_v8  ;;  %v8666_v32 = vpop.f32.mrb[7].mxu1 }
 0x238   : > { %v1623_v62 = vrot.slane %v8648_v27, 1  ;;  %v1367_v47 = vadd.f32 %v1313_v42, %v1255_v30  ;;  %v2004_v21 = vrot.slane %v1821_v56, 1  ;;  %v2203_v10 = vmul.f32 %v6942_v13, %v11433_v44  ;;  %11437 = vst [vmem:[#allocation14_spill] sm:$0xff] %v8666_v32 }
 0x239   : > { %6483 = vmatmul.mubr.f32.gmra.mrb[36].mxu1 %v3659_v6  ;;  %v2204_v49 = vmul.f32 %v11436_v29, %v6942_v13  ;;  %v2131_v2 = vadd.f32 %v2003_v59, %v1749_v22  ;;  %v2005_v48 = vrot.slane %v8658_v40, 1  ;;  %v2585_v60 = vmul.f32 %v6910_v52, %v11412_v16  ;;  %v8677_v22 = vpop.f32.mrb[8].mxu1 }
 0x23a   : > { %v1624_v46 = vsel %vm1530_vm1, %v1622_v53, %v1623_v62  ;;  %v2386_v61 = vrot.slane %v2203_v10, 1  ;;  %v2586_v27 = vmul.f32 %v11413_v11, %v6910_v52  ;;  %v2968_v59 = vmul.f32 %v6938_v12, %v11422_v20  ;;  %11438 = vst [vmem:[#allocation13_spill] sm:$0xff] %v8677_v22 }
 0x23b   : > { %v1750_v14 = vadd.f32 %v1624_v46, %v1367_v47  ;;  %v2387_v42 = vrot.slane %v2204_v49, 1  ;;  %v2513_v6 = vadd.f32 %v2385_v3, %v2131_v2  ;;  %v2006_v30 = vsel %vm1530_vm1, %v2004_v21, %v2005_v48 }
 0x23c   : > { %v2769_v56 = vrot.slane %v2585_v60, 2  ;;  %v2770_v32 = vrot.slane %v2586_v27, 2  ;;  %v2969_v16 = vmul.f32 %v11423_v15, %v6938_v12  ;;  %v3151_v10 = vrot.slane %v2968_v59, 2 }
 0x23d   : > { %v2132_v53 = vadd.f32 %v2006_v30, %v1750_v14  ;;  %v2388_v40 = vsel %vm1530_vm1, %v2386_v61, %v2387_v42  ;;  %v2896_v47 = vadd.f32 %v2768_v54, %v2513_v6  ;;  %v3350_v3 = vmul.f32 %v8290_v34, %v11433_v44  ;;  %v8691_v6 = vpop.f32.mrb[9].mxu1 }
 0x23e   : > { %v3351_v21 = vmul.f32 %v8290_v34, %v11436_v29  ;;  %v2771_v2 = vsel %vm2677_vm2, %v2769_v56, %v2770_v32  ;;  %v3152_v46 = vrot.slane %v2969_v16, 2  ;;  %v1144_v60 = vmul.f32 %v11413_v11, %v11296_v9  ;;  %11439 = vst [vmem:[#allocation11_spill] sm:$0xff] %v8691_v6 }
 0x23f   : > { %v2514_v49 = vadd.f32 %v2388_v40, %v2132_v53  ;;  %v3278_v14 = vadd.f32 %v3150_v1, %v2896_v47  ;;  %v3533_v61 = vrot.slane %v3350_v3, 2  ;;  %v1202_v54 = vmul.f32 %v11423_v15, %v6928_v7 }
 0x240   : > { %v3534_v27 = vrot.slane %v3351_v21, 2  ;;  %v3153_v59 = vsel %vm2677_vm2, %v3151_v10, %v3152_v46  ;;  %v1314_v53 = vmul.f32 %v11436_v29, %v6951_v17  ;;  %v1440_v56 = vmul.f32 %v6906_v51, %v11414_v37  ;;  %v11440_v21 = vld [vmem:[#allocation16_spill] sm:$0xff] }
 0x241   : > { %v2897_v30 = vadd.f32 %v2771_v2, %v2514_v49  ;;  %v3660_v40 = vadd.f32 %v3532_v39, %v3278_v14  ;;  %v1256_v1 = vadd.f32 %v1202_v54, %v1144_v60  ;;  %v1823_v16 = vmul.f32 %v6932_v8, %v11424_v50  ;;  %v8705_v2 = vpop.f32.mrb[10].mxu1 }
 0x242   : > { %v3535_v11 = vsel %vm2677_vm2, %v3533_v61, %v3534_v27  ;;  %v1625_v3 = vrot.slane %v1440_v56, 1  ;;  %v2205_v49 = vmul.f32 %v6942_v13, %v11440_v21  ;;  %v2587_v10 = vmul.f32 %v6910_v52, %v11414_v37  ;;  %11441 = vst [vmem:[#allocation12_spill] sm:$0xff] %v8705_v2 }
 0x243   : > { %v3279_v47 = vadd.f32 %v3153_v59, %v2897_v30  ;;  %6485 = vmatprep.mubr.f32.mxu1 %v3660_v40  ;;  %v1368_v6 = vadd.f32 %v1314_v53, %v1256_v1  ;;  %v2007_v22 = vrot.slane %v1823_v16, 1  ;;  %v2970_v39 = vmul.f32 %v6938_v12, %v11424_v50 }
 0x244   : > { %v3352_v60 = vmul.f32 %v8290_v34, %v11440_v21  ;;  %v1626_v61 = vsel %vm1530_vm1, %v1623_v62, %v1625_v3  ;;  %v2389_v54 = vrot.slane %v2205_v49, 1  ;;  %v2772_v30 = vrot.slane %v2587_v10, 2  ;;  %v8723_v62 = vpop.f32.mrb[11].mxu1 }
 0x245   : > { %v3661_v14 = vadd.f32 %v3535_v11, %v3279_v47  ;;  %v1751_v59 = vadd.f32 %v1626_v61, %v1368_v6  ;;  %v2008_v56 = vsel %vm1530_vm1, %v2005_v48, %v2007_v22  ;;  %v3154_v5 = vrot.slane %v2970_v39, 2  ;;  %11443 = vst [vmem:[#allocation16_spill] sm:$0xff] %v8723_v62 }
 0x246   : > { %v3536_v4 = vrot.slane %v3352_v60, 2  ;;  %v2390_v53 = vsel %vm1530_vm1, %v2387_v42, %v2389_v54  ;;  %v2773_v40 = vsel %vm2677_vm2, %v2770_v32, %v2772_v30  ;;  %v8717_v1 = vmul.f32 %v8179_v38, %v6932_v8  ;;  %v8731_v32 = vpop.f32.mrb[12].mxu1 }
 0x247   : > { %6486 = vmatmul.mubr.f32.gmra.mrb[38].mxu1 %v3661_v14  ;;  %v8721_v11 = vmul.f32 %v8179_v38, %v6942_v13  ;;  %v2133_v6 = vadd.f32 %v2008_v56, %v1751_v59  ;;  %v3155_v48 = vsel %vm2677_vm2, %v3152_v46, %v3154_v5  ;;  %v8729_v42 = vmul.f32 %v8179_v38, %v6910_v52  ;;  %v8741_v46 = vpop.f32.mrb[13].mxu1 }
 0x248   : > { %11442 = vst [vmem:[#allocation20_spill] sm:$0xff] %v8717_v1  ;;  %v3537_v16 = vsel %vm2677_vm2, %v3534_v27, %v3536_v4  ;;  %11445 = vst [vmem:[#allocation31_spill] sm:$0xff] %v8731_v32  ;;  %v8737_v10 = vmul.f32 %v8179_v38, %v6938_v12  ;;  %v1145_v39 = vmul.f32 %v11296_v9, %v11414_v37  ;;  %v11448_v59 = vrot.slane %v8244_v36, 1 }
 0x249   : > { %11444 = vst [vmem:[#allocation30_spill] sm:$0xff] %v8729_v42  ;;  %11447 = vst [vmem:[#allocation33_spill] sm:$0xff] %v8741_v46  ;;  %v2515_v27 = vadd.f32 %v2390_v53, %v2133_v6  ;;  %v1203_v14 = vmul.f32 %v6928_v7, %v11424_v50  ;;  %v1315_v61 = vmul.f32 %v6951_v17, %v11440_v21  ;;  %v11449_v47 = vrot.slane %v8370_v35, 1 }
 0x24a   : > { %11446 = vst [vmem:[#allocation32_spill] sm:$0xff] %v8737_v10  ;;  %v1628_v56 = vsel %vm1530_vm1, %v1625_v3, %v11448_v59  ;;  %v11450_v37 = vrot.slane %v8490_v57, 1  ;;  %v11451_v6 = vrot.slane %v8260_v26, 2  ;;  %v3156_v62 = vrot.slane %v8387_v41, 2  ;;  %v11452_v3 = vld [vmem:[#allocation19_spill] sm:$0xff]  ;;  %v11454_v57 = vld [vmem:[#allocation8_spill] sm:$0xff] }
 0x24b   : > { %v2010_v49 = vsel %vm1530_vm1, %v2007_v22, %v11449_v47  ;;  %v2898_v46 = vadd.f32 %v2773_v40, %v2515_v27  ;;  %v1257_v32 = vadd.f32 %v1203_v14, %v1145_v39  ;;  %v3353_v36 = vmul.f32 %v8290_v34, %v11415_v28  ;;  %v11453_v22 = vld [vmem:[#allocation17_spill] sm:$0xff] }
 0x24c   : > { %v2392_v53 = vsel %vm1530_vm1, %v2389_v54, %v11450_v37  ;;  %v2775_v60 = vsel %vm2677_vm2, %v2772_v30, %v11451_v6  ;;  %v1153_v35 = vmul.f32 %v11452_v3, %v11296_v9  ;;  %v1211_v47 = vmul.f32 %v11453_v22, %v6928_v7 }
 0x24d   : > { %v1323_v54 = vmul.f32 %v11454_v57, %v6951_v17  ;;  %v8771_v26 = vmul.f32 %v11454_v57, %v6932_v8  ;;  %v3280_v30 = vadd.f32 %v3155_v48, %v2898_v46  ;;  %v1369_v40 = vadd.f32 %v1315_v61, %v1257_v32  ;;  %v11456_v48 = vld [vmem:[#allocation21_spill] sm:$0xff]  ;;  %v11458_v46 = vld [vmem:[#allocation22_spill] sm:$0xff] }
 0x24e   : > { %v3157_v41 = vsel %vm2677_vm2, %v3154_v5, %v3156_v62  ;;  %v3538_v39 = vrot.slane %v3353_v36, 2  ;;  %v1265_v27 = vadd.f32 %v1211_v47, %v1153_v35  ;;  %v8777_v14 = vmul.f32 %v11454_v57, %v6942_v13  ;;  %v11459_v36 = vld [vmem:[#allocation5_spill] sm:$0xff] }
 0x24f   : > { %v8781_v59 = vmul.f32 %v11454_v57, %v6938_v12  ;;  %v3662_v37 = vadd.f32 %v3537_v16, %v3280_v30  ;;  %v1752_v6 = vadd.f32 %v1628_v56, %v1369_v40  ;;  %v1152_v32 = vmul.f32 %v11296_v9, %v11456_v48 }
 0x250   : > { %v3539_v2 = vsel %vm2677_vm2, %v3536_v4, %v3538_v39  ;;  %v8786_v5 = vadd.f32 %v1323_v54, %v1265_v27  ;;  %v1210_v61 = vmul.f32 %v6928_v7, %v11458_v46  ;;  %v1322_v35 = vmul.f32 %v6951_v17, %v11459_v36 }
 0x251   : > { %11455 = vst [vmem:[#allocation19_spill] sm:$0xff] %v8781_v59  ;;  %6488 = vmatprep.mubr.f32.mxu1 %v3662_v37  ;;  %v2134_v47 = vadd.f32 %v2010_v49, %v1752_v6  ;;  %v8795_v16 = vmul.f32 %v6932_v8, %v11459_v36  ;;  %v8799_v4 = vmul.f32 %v6942_v13, %v11459_v36  ;;  %v11477_v23 = vrot.slane %v8597_v19, 1 }
 0x252   : > { %11457 = vst [vmem:[#allocation17_spill] sm:$0xff] %v8786_v5  ;;  %v8803_v56 = vmul.f32 %v6938_v12, %v11459_v36  ;;  %v1264_v54 = vadd.f32 %v1210_v61, %v1152_v32  ;;  %v1146_v30 = vmul.f32 %v11296_v9, %v11422_v20  ;;  %v1204_v40 = vmul.f32 %v6928_v7, %v11433_v44 }
 0x253   : > { %v1316_v49 = vmul.f32 %v6951_v17, %v11456_v48  ;;  %v2516_v39 = vadd.f32 %v2392_v53, %v2134_v47  ;;  %v1442_v6 = vmul.f32 %v6906_v51, %v11422_v20  ;;  %v8815_v62 = vpop.f32.mrb[14].mxu1  ;;  %v1443_v28 = vmul.f32 %v11423_v15, %v6906_v51 }
 0x254   : > { %11460 = vst [vmem:[#allocation8_spill] sm:$0xff] %v8803_v56  ;;  %11461 = vst [vmem:[#allocation21_spill] sm:$0xff] %v8815_v62  ;;  %v8817_v32 = vadd.f32 %v1322_v35, %v1264_v54  ;;  %v1258_v61 = vadd.f32 %v1204_v40, %v1146_v30  ;;  %v1825_v63 = vmul.f32 %v6932_v8, %v11433_v44  ;;  %v8823_v42 = vpop.f32.mrb[15].mxu1 }
 0x255   : > { %11463 = vst [vmem:[#allocation5_spill] sm:$0xff] %v8823_v42  ;;  %v2899_v53 = vadd.f32 %v2775_v60, %v2516_v39  ;;  %v1629_v47 = vrot.slane %v1442_v6, 1  ;;  %v1826_v37 = vmul.f32 %v11436_v29, %v6932_v8  ;;  %v2207_v27 = vmul.f32 %v6942_v13, %v11456_v48 }
 0x256   : > { %11462 = vst [vmem:[#allocation22_spill] sm:$0xff] %v8817_v32  ;;  %v1370_v62 = vadd.f32 %v1316_v49, %v1258_v61  ;;  %v1630_v35 = vrot.slane %v1443_v28, 1  ;;  %v2011_v54 = vrot.slane %v1825_v63, 1  ;;  %v2208_v30 = vmul.f32 %v11452_v3, %v6942_v13 }
 0x257   : > { %v3281_v40 = vadd.f32 %v3157_v41, %v2899_v53  ;;  %v2012_v18 = vrot.slane %v1826_v37, 1  ;;  %v2393_v59 = vrot.slane %v2207_v27, 1  ;;  %v2589_v42 = vmul.f32 %v6910_v52, %v11422_v20 }
 0x258   : > { %v1631_v60 = vsel %vm1530_vm1, %v1629_v47, %v1630_v35  ;;  %v2394_v39 = vrot.slane %v2208_v30, 1  ;;  %v2590_v6 = vmul.f32 %v11423_v15, %v6910_v52  ;;  %v2972_v49 = vmul.f32 %v6938_v12, %v11433_v44 }
 0x259   : > { %v3663_v28 = vadd.f32 %v3539_v2, %v3281_v40  ;;  %v1753_v63 = vadd.f32 %v1631_v60, %v1370_v62  ;;  %v2013_v61 = vsel %vm1530_vm1, %v2011_v54, %v2012_v18  ;;  %v2776_v56 = vrot.slane %v2589_v42, 2 }
 0x25a   : > { %v2395_v41 = vsel %vm1530_vm1, %v2393_v59, %v2394_v39  ;;  %v2777_v27 = vrot.slane %v2590_v6, 2  ;;  %v2973_v20 = vmul.f32 %v11436_v29, %v6938_v12  ;;  %v3158_v37 = vrot.slane %v2972_v49, 2 }
 0x25b   : > { %6489 = vmatmul.mubr.f32.gmra.mrb[40].mxu1 %v3663_v28  ;;  %v2135_v53 = vadd.f32 %v2013_v61, %v1753_v63  ;;  %v3354_v47 = vmul.f32 %v8290_v34, %v11456_v48  ;;  %v3355_v30 = vmul.f32 %v8290_v34, %v11452_v3  ;;  %v1147_v2 = vmul.f32 %v11423_v15, %v11296_v9 }
 0x25c   : > { %v2778_v42 = vsel %vm2677_vm2, %v2776_v56, %v2777_v27  ;;  %v3159_v62 = vrot.slane %v2973_v20, 2  ;;  %v1205_v59 = vmul.f32 %v11436_v29, %v6928_v7  ;;  %v1317_v54 = vmul.f32 %v11452_v3, %v6951_v17  ;;  %v11464_v56 = vld [vmem:[#allocation18_spill] sm:$0xff] }
 0x25d   : > { %v2517_v40 = vadd.f32 %v2395_v41, %v2135_v53  ;;  %v3540_v60 = vrot.slane %v3354_v47, 2  ;;  %v3541_v6 = vrot.slane %v3355_v30, 2  ;;  %v1444_v49 = vmul.f32 %v6906_v51, %v11424_v50 }
 0x25e   : > { %v3160_v34 = vsel %vm2677_vm2, %v3158_v37, %v3159_v62  ;;  %v1259_v28 = vadd.f32 %v1205_v59, %v1147_v2  ;;  %v1827_v15 = vmul.f32 %v6932_v8, %v11440_v21  ;;  %v2209_v63 = vmul.f32 %v6942_v13, %v11464_v56 }
 0x25f   : > { %v2900_v61 = vadd.f32 %v2778_v42, %v2517_v40  ;;  %v3542_v20 = vsel %vm2677_vm2, %v3540_v60, %v3541_v6  ;;  %v1632_v10 = vrot.slane %v1444_v49, 1  ;;  %v2591_v41 = vmul.f32 %v6910_v52, %v11424_v50  ;;  %v8869_v42 = vld [vmem:[%s11092_s2 + $0x8] ss:$0 sm:$0xff] }
 0x260   : > { %v1371_v53 = vadd.f32 %v1317_v54, %v1259_v28  ;;  %v2014_v47 = vrot.slane %v1827_v15, 1  ;;  %v2396_v30 = vrot.slane %v2209_v63, 1  ;;  %v2974_v37 = vmul.f32 %v6938_v12, %v11440_v21 }
 0x261   : > { %v3282_v2 = vadd.f32 %v3160_v34, %v2900_v61  ;;  %v1633_v59 = vsel %vm1530_vm1, %v1630_v35, %v1632_v10  ;;  %v2779_v24 = vrot.slane %v2591_v41, 2  ;;  %v8873_v40 = vmul.f32 %v8869_v42, %v11464_v56 }
 0x262   : > { %v1754_v60 = vadd.f32 %v1633_v59, %v1371_v53  ;;  %v2015_v54 = vsel %vm1530_vm1, %v2012_v18, %v2014_v47  ;;  %v2397_v49 = vsel %vm1530_vm1, %v2394_v39, %v2396_v30  ;;  %v3161_v28 = vrot.slane %v2974_v37, 2 }
 0x263   : > { %v3664_v15 = vadd.f32 %v3542_v20, %v3282_v2  ;;  %v2780_v34 = vsel %vm2677_vm2, %v2777_v27, %v2779_v24  ;;  %v3543_v35 = vrot.slane %v8873_v40, 2  ;;  %v8881_v63 = vmul.f32 %v8317_v55, %v6932_v8  ;;  %v11468_v40 = vld [vmem:[#allocation4_spill] sm:$0xff] }
 0x264   : > { %v2136_v61 = vadd.f32 %v2015_v54, %v1754_v60  ;;  %v3162_v41 = vsel %vm2677_vm2, %v3159_v62, %v3161_v28  ;;  %v8886_v53 = vmul.f32 %v8317_v55, %v6942_v13  ;;  %v8890_v18 = vmul.f32 %v8317_v55, %v6938_v12 }
 0x265   : > { %6491 = vmatprep.mubr.f32.mxu1 %v3664_v15  ;;  %v3544_v39 = vsel %vm2677_vm2, %v3541_v6, %v3543_v35  ;;  %v8896_v20 = vmul.f32 %v8869_v42, %v8317_v55  ;;  %v1154_v62 = vmul.f32 %v11296_v9, %v11464_v56  ;;  %v1212_v60 = vmul.f32 %v6928_v7, %v11468_v40  ;;  %v11469_v6 = vld [vmem:[#allocation24_spill] sm:$0xff] }
 0x266   : > { %11465 = vst [vmem:[#allocation18_spill] sm:$0xff] %v8886_v53  ;;  %11466 = vst [vmem:[#allocation34_spill] sm:$0xff] %v8890_v18  ;;  %v2518_v37 = vadd.f32 %v2397_v49, %v2136_v61  ;;  %v1324_v15 = vmul.f32 %v6951_v17, %v11469_v6  ;;  %v8909_v55 = vmul.f32 %v6932_v8, %v11469_v6 }
 0x267   : > { %11467 = vst [vmem:[#allocation35_spill] sm:$0xff] %v8896_v20  ;;  %v8913_v27 = vmul.f32 %v6942_v13, %v11469_v6  ;;  %v1266_v61 = vadd.f32 %v1212_v60, %v1154_v62  ;;  %v8917_v59 = vmul.f32 %v6938_v12, %v11469_v6  ;;  %v1148_v54 = vmul.f32 %v11296_v9, %v11424_v50 }
 0x268   : > { %v2901_v49 = vadd.f32 %v2780_v34, %v2518_v37  ;;  %v8921_v2 = vpop.f32.mrb[16].mxu1  ;;  %v1206_v53 = vmul.f32 %v6928_v7, %v11440_v21  ;;  %v1318_v34 = vmul.f32 %v6951_v17, %v11464_v56  ;;  %v2399_v5 = vsel %vm1530_vm1, %v2396_v30, %v11477_v23  ;;  %v11480_v23 = vld [vmem:[#allocation9_spill] sm:$0xff] }
 0x269   : > { %11470 = vst [vmem:[#allocation4_spill] sm:$0xff] %v8913_v27  ;;  %11471 = vst [vmem:[#allocation24_spill] sm:$0xff] %v8917_v59  ;;  %v8929_v62 = vpop.f32.mrb[17].mxu1  ;;  %v8931_v60 = vadd.f32 %v1324_v15, %v1266_v61  ;;  %v11474_v59 = vld [vmem:[#allocation6_spill] sm:$0xff]  ;;  %v11481_v30 = vrot.slane %v8909_v55, 1 }
 0x26a   : > { %11472 = vst [vmem:[#allocation36_spill] sm:$0xff] %v8921_v2  ;;  %11473 = vst [vmem:[#allocation37_spill] sm:$0xff] %v8929_v62  ;;  %v3283_v37 = vadd.f32 %v3162_v41, %v2901_v49  ;;  %v11475_v1 = vrot.slane %v11474_v59, 1  ;;  %v11476_v2 = vrot.slane %v8486_v45, 1  ;;  %v1260_v20 = vadd.f32 %v1206_v53, %v1148_v54  ;;  %v11478_v27 = vld [vmem:[#allocation26_spill] sm:$0xff] }
 0x26b   : > { %v11479_v32 = vrot.slane %v11478_v27, 2  ;;  %v3163_v41 = vrot.slane %v8499_v31, 2  ;;  %v3357_v59 = vmul.f32 %v8869_v42, %v8064_v25  ;;  %v1156_v45 = vmul.f32 %v11453_v22, %v11296_v9 }
 0x26c   : > { %v1635_v50 = vsel %vm1530_vm1, %v1632_v10, %v11475_v1  ;;  %v2017_v18 = vsel %vm1530_vm1, %v2014_v47, %v11476_v2  ;;  %v3665_v15 = vadd.f32 %v3544_v39, %v3283_v37  ;;  %v1214_v1 = vmul.f32 %v11454_v57, %v6928_v7 }
 0x26d   : > { %v2782_v62 = vsel %vm2677_vm2, %v2779_v24, %v11479_v32  ;;  %v1372_v10 = vadd.f32 %v1318_v34, %v1260_v20  ;;  %v3164_v19 = vsel %vm2677_vm2, %v3161_v28, %v3163_v41  ;;  %v1326_v47 = vmul.f32 %v11480_v23, %v6951_v17 }
 0x26e   : > { %v1455_v24 = vmul.f32 %v11453_v22, %v6906_v51  ;;  %6492 = vmatmul.mubr.f32.gmra.mrb[42].mxu1 %v3665_v15  ;;  %v3545_v31 = vrot.slane %v3357_v59, 2  ;;  %v1268_v32 = vadd.f32 %v1214_v1, %v1156_v45  ;;  %v8959_v25 = vmul.f32 %v6906_v51, %v11468_v40  ;;  %v11483_v45 = vld [vmem:[#allocation29_spill] sm:$0xff] }
 0x26f   : > { %v11482_v53 = vrot.slane %v8771_v26, 1  ;;  %v1755_v28 = vadd.f32 %v1635_v50, %v1372_v10  ;;  %v8968_v20 = vmul.f32 %v11480_v23, %v6942_v13  ;;  %v8972_v2 = vmul.f32 %v8869_v42, %v11480_v23 }
 0x270   : > { %v1651_v27 = vrot.slane %v1455_v24, 1  ;;  %v3546_v54 = vsel %vm2677_vm2, %v3543_v35, %v3545_v31  ;;  %v1380_v49 = vadd.f32 %v1326_v47, %v1268_v32  ;;  %v11177_v61 = vrot.slane %v8959_v25, 1 }
 0x271   : > { %v2036_v39 = vsel %vm1530_vm1, %v11482_v53, %v11481_v30  ;;  %v1155_v34 = vmul.f32 %v11296_v9, %v11458_v46  ;;  %v2137_v37 = vadd.f32 %v2017_v18, %v1755_v28  ;;  %v11176_v50 = vrot.slane %v8968_v20, 1 }
 0x272   : > { %v1213_v15 = vmul.f32 %v6928_v7, %v11459_v36  ;;  %v1654_v59 = vsel %vm1530_vm1, %v1651_v27, %v11177_v61  ;;  %v1325_v35 = vmul.f32 %v6951_v17, %v11483_v45  ;;  %v1454_v1 = vmul.f32 %v6906_v51, %v11458_v46 }
 0x273   : > { %v11484_v10 = vmov %v11482_v53  ;;  %v11485_v18 = vrot.slane %v8795_v16, 1  ;;  %v2519_v47 = vadd.f32 %v2399_v5, %v2137_v37  ;;  %v1763_v24 = vadd.f32 %v1654_v59, %v1380_v49 }
 0x274   : > { %v1267_v31 = vadd.f32 %v1213_v15, %v1155_v34  ;;  %v2219_v32 = vmul.f32 %v6942_v13, %v11483_v45  ;;  %v1650_v30 = vrot.slane %v1454_v1, 1  ;;  %v8998_v53 = vmul.f32 %v8869_v42, %v11483_v45 }
 0x275   : > { %v2034_v23 = vsel %vm1530_vm1, %v11485_v18, %v11484_v10  ;;  %v1149_v28 = vmul.f32 %v11296_v9, %v11433_v44  ;;  %v1207_v26 = vmul.f32 %v6928_v7, %v11456_v48  ;;  %v2902_v16 = vadd.f32 %v2782_v62, %v2519_v47 }
 0x276   : > { %v9004_v41 = vadd.f32 %v2036_v39, %v1763_v24  ;;  %v1379_v5 = vadd.f32 %v1325_v35, %v1267_v31  ;;  %v2414_v49 = vrot.slane %v2219_v32, 1  ;;  %v1652_v34 = vsel %vm1530_vm1, %v1650_v30, %v1651_v27 }
 0x277   : > { %v1261_v15 = vadd.f32 %v1207_v26, %v1149_v28  ;;  %v1319_v59 = vmul.f32 %v6951_v17, %v11458_v46  ;;  %v3284_v45 = vadd.f32 %v3164_v19, %v2902_v16  ;;  %v1446_v62 = vmul.f32 %v6906_v51, %v11433_v44 }
 0x278   : > { %v1762_v1 = vadd.f32 %v1652_v34, %v1379_v5  ;;  %v2416_v10 = vsel %vm1530_vm1, %v2414_v49, %v11176_v50  ;;  %v9015_v39 = vpop.f32.mrb[18].mxu1  ;;  %v1447_v27 = vmul.f32 %v11436_v29, %v6906_v51  ;;  %v1829_v18 = vmul.f32 %v6932_v8, %v11456_v48 }
 0x279   : > { %v1373_v35 = vadd.f32 %v1319_v59, %v1261_v15  ;;  %v1830_v19 = vmul.f32 %v11452_v3, %v6932_v8  ;;  %v9023_v47 = vpop.f32.mrb[19].mxu1  ;;  %v3666_v24 = vadd.f32 %v3546_v54, %v3284_v45  ;;  %v1636_v32 = vrot.slane %v1446_v62, 1 }
 0x27a   : > { %11486 = vst [vmem:[#allocation6_spill] sm:$0xff] %v9023_v47  ;;  %v2144_v31 = vadd.f32 %v2034_v23, %v1762_v1  ;;  %v2211_v30 = vmul.f32 %v6942_v13, %v11458_v46  ;;  %v1637_v28 = vrot.slane %v1447_v27, 1  ;;  %v2018_v26 = vrot.slane %v1829_v18, 1 }
 0x27b   : > { %v2019_v16 = vrot.slane %v1830_v19, 1  ;;  %v2212_v5 = vmul.f32 %v11453_v22, %v6942_v13  ;;  %6494 = vmatprep.mubr.f32.mxu1 %v3666_v24  ;;  %v2593_v15 = vmul.f32 %v6910_v52, %v11433_v44  ;;  %v2594_v54 = vmul.f32 %v11436_v29, %v6910_v52 }
 0x27c   : > { %v9029_v49 = vadd.f32 %v2416_v10, %v2144_v31  ;;  %v2400_v34 = vrot.slane %v2211_v30, 1  ;;  %v1638_v23 = vsel %vm1530_vm1, %v1636_v32, %v1637_v28  ;;  %v2976_v1 = vmul.f32 %v6938_v12, %v11456_v48 }
 0x27d   : > { %v2020_v59 = vsel %vm1530_vm1, %v2018_v26, %v2019_v16  ;;  %v2401_v45 = vrot.slane %v2212_v5, 1  ;;  %v1756_v62 = vadd.f32 %v1638_v23, %v1373_v35  ;;  %v2783_v27 = vrot.slane %v2593_v15, 2 }
 0x27e   : > { %v2784_v18 = vrot.slane %v2594_v54, 2  ;;  %v2977_v10 = vmul.f32 %v11452_v3, %v6938_v12  ;;  %v3165_v44 = vrot.slane %v2976_v1, 2  ;;  %v3358_v24 = vmul.f32 %v8869_v42, %v11458_v46 }
 0x27f   : > { %v2402_v19 = vsel %vm1530_vm1, %v2400_v34, %v2401_v45  ;;  %v3359_v31 = vmul.f32 %v8869_v42, %v11453_v22  ;;  %v2138_v32 = vadd.f32 %v2020_v59, %v1756_v62  ;;  %v1150_v35 = vmul.f32 %v11436_v29, %v11296_v9 }
 0x280   : > { %v2785_v30 = vsel %vm2677_vm2, %v2783_v27, %v2784_v18  ;;  %v3166_v26 = vrot.slane %v2977_v10, 2  ;;  %v3547_v5 = vrot.slane %v3358_v24, 2  ;;  %v1208_v54 = vmul.f32 %v11452_v3, %v6928_v7 }
 0x281   : > { %v3548_v15 = vrot.slane %v3359_v31, 2  ;;  %v1320_v34 = vmul.f32 %v11453_v22, %v6951_v17  ;;  %v2520_v23 = vadd.f32 %v2402_v19, %v2138_v32  ;;  %v1448_v59 = vmul.f32 %v6906_v51, %v11440_v21 }
 0x282   : > { %v3167_v1 = vsel %vm2677_vm2, %v3165_v44, %v3166_v26  ;;  %v1831_v62 = vmul.f32 %v6932_v8, %v11464_v56  ;;  %v1262_v29 = vadd.f32 %v1208_v54, %v1150_v35  ;;  %v2213_v10 = vmul.f32 %v6942_v13, %v11468_v40 }
 0x283   : > { %v3549_v27 = vsel %vm2677_vm2, %v3547_v5, %v3548_v15  ;;  %v2595_v24 = vmul.f32 %v6910_v52, %v11440_v21  ;;  %v2903_v31 = vadd.f32 %v2785_v30, %v2520_v23  ;;  %v1639_v37 = vrot.slane %v1448_v59, 1 }
 0x284   : > { %v2021_v19 = vrot.slane %v1831_v62, 1  ;;  %v9065_v44 = vmul.f32 %v6938_v12, %v11464_v56  ;;  %v1374_v32 = vadd.f32 %v1320_v34, %v1262_v29  ;;  %v2403_v50 = vrot.slane %v2213_v10, 1 }
 0x285   : > { %v2786_v61 = vrot.slane %v2595_v24, 2  ;;  %v9069_v5 = vmul.f32 %v8869_v42, %v11468_v40  ;;  %v3285_v35 = vadd.f32 %v3167_v1, %v2903_v31  ;;  %v1640_v54 = vsel %vm1530_vm1, %v1637_v28, %v1639_v37  ;;  %v9074_v23 = vpop.f32.mrb[20].mxu1 }
 0x286   : > { %v2022_v47 = vsel %vm1530_vm1, %v2019_v16, %v2021_v19  ;;  %v3168_v30 = vrot.slane %v9065_v44, 2  ;;  %v1757_v59 = vadd.f32 %v1640_v54, %v1374_v32  ;;  %v2404_v62 = vsel %vm1530_vm1, %v2401_v45, %v2403_v50  ;;  %v9079_v10 = vpop.f32.mrb[21].mxu1 }
 0x287   : > { %v2787_v34 = vsel %vm2677_vm2, %v2784_v18, %v2786_v61  ;;  %v3550_v29 = vrot.slane %v9069_v5, 2  ;;  %11487 = vst [vmem:[#allocation26_spill] sm:$0xff] %v9079_v10  ;;  %v3667_v24 = vadd.f32 %v3549_v27, %v3285_v35  ;;  %v2222_v28 = vmul.f32 %v8471_v58, %v6942_v13 }
 0x288   : > { %v3169_v1 = vsel %vm2677_vm2, %v3166_v26, %v3168_v30  ;;  %v9086_v16 = vmul.f32 %v8869_v42, %v8471_v58  ;;  %v2139_v31 = vadd.f32 %v2022_v47, %v1757_v59  ;;  %v1157_v45 = vmul.f32 %v11296_v9, %v11468_v40 }
 0x289   : > { %v3551_v44 = vsel %vm2677_vm2, %v3548_v15, %v3550_v29  ;;  %v1215_v18 = vmul.f32 %v6928_v7, %v11469_v6  ;;  %6495 = vmatmul.mubr.f32.gmra.mrb[44].mxu1 %v3667_v24  ;;  %v2419_v27 = vrot.slane %v2222_v28, 1  ;;  %v1327_v32 = vmul.f32 %v6951_v17, %v8475_v0 }
 0x28a   : > { %v1457_v58 = vmul.f32 %v8179_v38, %v6906_v51  ;;  %v2521_v5 = vadd.f32 %v2404_v62, %v2139_v31  ;;  %v11488_v15 = vrot.slane %v8881_v63, 1  ;;  %v11489_v35 = vrot.slane %v8909_v55, 1 }
 0x28b   : > { %v1269_v47 = vadd.f32 %v1215_v18, %v1157_v45  ;;  %v2221_v59 = vmul.f32 %v6942_v13, %v8475_v0  ;;  %v9107_v28 = vmul.f32 %v8869_v42, %v8475_v0  ;;  %v1151_v26 = vmul.f32 %v11296_v9, %v11440_v21 }
 0x28c   : > { %v2038_v54 = vsel %vm1530_vm1, %v11489_v35, %v11488_v15  ;;  %v1655_v24 = vrot.slane %v1457_v58, 1  ;;  %v1209_v62 = vmul.f32 %v6928_v7, %v11464_v56  ;;  %v2904_v31 = vadd.f32 %v2787_v34, %v2521_v5  ;;  %v11491_v15 = vld [vmem:[#allocation25_spill] sm:$0xff] }
 0x28d   : > { %v1381_v63 = vadd.f32 %v1327_v32, %v1269_v47  ;;  %v2417_v45 = vrot.slane %v2221_v59, 1  ;;  %v1321_v55 = vmul.f32 %v6951_v17, %v11468_v40  ;;  %v11490_v18 = vrot.slane %v8959_v25, 1 }
 0x28e   : > { %v3564_v58 = vrot.slane %v9107_v28, 2  ;;  %v1263_v0 = vadd.f32 %v1209_v62, %v1151_v26  ;;  %v11492_v35 = vrot.slane %v11491_v15, 1  ;;  %v3286_v21 = vadd.f32 %v3169_v1, %v2904_v31 }
 0x28f   : > { %v1656_v13 = vsel %vm1530_vm1, %v11490_v18, %v1655_v24  ;;  %v11493_v7 = vrot.slane %v8968_v20, 1  ;;  %v2420_v32 = vsel %vm1530_vm1, %v2417_v45, %v2419_v27  ;;  %v11494_v5 = vrot.slane %v8593_v43, 1  ;;  %v11496_v24 = vld [vmem:[#allocation7_spill] sm:$0xff] }
 0x290   : > { %v1642_v9 = vsel %vm1530_vm1, %v1639_v37, %v11492_v35  ;;  %v1764_v10 = vadd.f32 %v1656_v13, %v1381_v63  ;;  %v1375_v25 = vadd.f32 %v1321_v55, %v1263_v0  ;;  %v11495_v47 = vrot.slane %v8721_v11, 1 }
 0x291   : > { %v2418_v34 = vsel %vm1530_vm1, %v11493_v7, %v2417_v45  ;;  %v2024_v26 = vsel %vm1530_vm1, %v2021_v19, %v11494_v5  ;;  %v3668_v1 = vadd.f32 %v3551_v44, %v3286_v21  ;;  %v11497_v20 = vrot.slane %v11496_v24, 2  ;;  %v11500_v21 = vld [vmem:[#allocation22_spill] sm:$0xff] }
 0x292   : > { %v9127_v17 = vadd.f32 %v2418_v34, %v9004_v41  ;;  %v2406_v37 = vsel %vm1530_vm1, %v2403_v50, %v11495_v47  ;;  %v2146_v59 = vadd.f32 %v2038_v54, %v1764_v10  ;;  %v3170_v27 = vrot.slane %v8607_v33, 2 }
 0x293   : > { %v2789_v62 = vsel %vm2677_vm2, %v2786_v61, %v11497_v20  ;;  %v1758_v31 = vadd.f32 %v1642_v9, %v1375_v25  ;;  %v3361_v41 = vmul.f32 %v8869_v42, %v8179_v38  ;;  %v1450_v43 = vmul.f32 %v6906_v51, %v11456_v48  ;;  %6497 = vmatprep.mubr.f32.mxu1 %v3668_v1 }
 0x294   : > { %v1451_v11 = vmul.f32 %v11452_v3, %v6906_v51  ;;  %v9145_v50 = vadd.f32 %v2420_v32, %v2146_v59  ;;  %v3171_v19 = vsel %vm2677_vm2, %v3168_v30, %v3170_v27  ;;  %v1833_v61 = vmul.f32 %v6932_v8, %v11458_v46 }
 0x295   : > { %v1834_v33 = vmul.f32 %v11453_v22, %v6932_v8  ;;  %v2140_v10 = vadd.f32 %v2024_v26, %v1758_v31  ;;  %v3552_v44 = vrot.slane %v3361_v41, 2  ;;  %v1643_v38 = vrot.slane %v1450_v43, 1 }
 0x296   : > { %v1644_v54 = vrot.slane %v1451_v11, 1  ;;  %v2025_v63 = vrot.slane %v1833_v61, 1  ;;  %v11498_v55 = vrot.slane %v8777_v14, 1  ;;  %v11499_v18 = vrot.slane %v8799_v4, 1 }
 0x297   : > { %v2026_v45 = vrot.slane %v1834_v33, 1  ;;  %v2597_v30 = vmul.f32 %v6910_v52, %v11456_v48  ;;  %v2522_v0 = vadd.f32 %v2406_v37, %v2140_v10  ;;  %v3553_v15 = vsel %vm2677_vm2, %v3550_v29, %v3552_v44 }
 0x298   : > { %v2409_v13 = vsel %vm1530_vm1, %v11499_v18, %v11498_v55  ;;  %v1645_v35 = vsel %vm1530_vm1, %v1643_v38, %v1644_v54  ;;  %v2598_v9 = vmul.f32 %v11452_v3, %v6910_v52  ;;  %v2980_v4 = vmul.f32 %v6938_v12, %v11458_v46 }
 0x299   : > { %v1759_v7 = vadd.f32 %v1645_v35, %v11500_v21  ;;  %v2027_v34 = vsel %vm1530_vm1, %v2025_v63, %v2026_v45  ;;  %v2790_v32 = vrot.slane %v2597_v30, 2  ;;  %v2905_v25 = vadd.f32 %v2789_v62, %v2522_v0  ;;  %v11507_v21 = vld [vmem:[#allocation20_spill] sm:$0xff] }
 0x29a   : > { %v2791_v5 = vrot.slane %v2598_v9, 2  ;;  %v2981_v48 = vmul.f32 %v11453_v22, %v6938_v12  ;;  %v3362_v29 = vmul.f32 %v8869_v42, %v11459_v36  ;;  %v3172_v47 = vrot.slane %v2980_v4, 2  ;;  %v9178_v36 = vpop.f32.mrb[22].mxu1 }
 0x29b   : > { %v2141_v26 = vadd.f32 %v2027_v34, %v1759_v7  ;;  %v3363_v3 = vmul.f32 %v8869_v42, %v11454_v57  ;;  %v1452_v37 = vmul.f32 %v6906_v51, %v11464_v56  ;;  %v3287_v1 = vadd.f32 %v3171_v19, %v2905_v25  ;;  %v11501_v57 = vld [vmem:[#allocation4_spill] sm:$0xff]  ;;  %v9188_v10 = vpop.f32.mrb[23].mxu1 }
 0x29c   : > { %v2792_v59 = vsel %vm2677_vm2, %v2790_v32, %v2791_v5  ;;  %v3173_v24 = vrot.slane %v2981_v48, 2  ;;  %v3554_v20 = vrot.slane %v3362_v29, 2  ;;  %v1835_v41 = vmul.f32 %v6932_v8, %v11468_v40 }
 0x29d   : > { %v2523_v62 = vadd.f32 %v2409_v13, %v2141_v26  ;;  %v3555_v27 = vrot.slane %v3363_v3, 2  ;;  %v1646_v31 = vrot.slane %v1452_v37, 1  ;;  %v3669_v43 = vadd.f32 %v3553_v15, %v3287_v1  ;;  %v11505_v15 = vld [vmem:[#allocation23_spill] sm:$0xff] }
 0x29e   : > { %v3174_v11 = vsel %vm2677_vm2, %v3172_v47, %v3173_v24  ;;  %v11502_v61 = vrot.slane %v11501_v57, 1  ;;  %v11503_v51 = vmov %v11498_v55  ;;  %v2599_v33 = vmul.f32 %v6910_v52, %v11464_v56  ;;  %v11504_v55 = vld [vmem:[#allocation17_spill] sm:$0xff]  ;;  %v11512_v26 = vld [vmem:[#allocation15_spill] sm:$0xff] }
 0x29f   : > { %v2906_v44 = vadd.f32 %v2792_v59, %v2523_v62  ;;  %v3556_v38 = vsel %vm2677_vm2, %v3554_v20, %v3555_v27  ;;  %v1647_v8 = vsel %vm1530_vm1, %v1644_v54, %v1646_v31  ;;  %v2028_v63 = vrot.slane %v1835_v41, 1  ;;  %6498 = vmatmul.mubr.f32.gmra.mrb[46].mxu1 %v3669_v43  ;;  %v11514_v59 = vld [vmem:[#allocation32_spill] sm:$0xff] }
 0x2a0   : > { %v2411_v19 = vsel %vm1530_vm1, %v11503_v51, %v11502_v61  ;;  %v1760_v18 = vadd.f32 %v1647_v8, %v11504_v55  ;;  %v2793_v13 = vrot.slane %v2599_v33, 2  ;;  %v2982_v14 = vmul.f32 %v6938_v12, %v11468_v40 }
 0x2a1   : > { %v3364_v30 = vmul.f32 %v8869_v42, %v11469_v6  ;;  %v3288_v0 = vadd.f32 %v3174_v11, %v2906_v44  ;;  %v2029_v56 = vsel %vm1530_vm1, %v2026_v45, %v2028_v63  ;;  %v11506_v35 = vrot.slane %v11505_v15, 1  ;;  %v11509_v42 = vld [vmem:[#allocation18_spill] sm:$0xff] }
 0x2a2   : > { %v11508_v54 = vrot.slane %v11507_v21, 1  ;;  %v2142_v34 = vadd.f32 %v2029_v56, %v1760_v18  ;;  %v2794_v32 = vsel %vm2677_vm2, %v2791_v5, %v2793_v13  ;;  %v3175_v4 = vrot.slane %v2982_v14, 2 }
 0x2a3   : > { %v1649_v9 = vsel %vm1530_vm1, %v1646_v31, %v11506_v35  ;;  %v3557_v25 = vrot.slane %v3364_v30, 2  ;;  %v3670_v12 = vadd.f32 %v3556_v38, %v3288_v0  ;;  %v11510_v6 = vrot.slane %v11509_v42, 1  ;;  %v9239_v30 = vld [vmem:[%s11094_s4] ss:$0 sm:$0xff] }
 0x2a4   : > { %v2031_v7 = vsel %vm1530_vm1, %v2028_v63, %v11508_v54  ;;  %v1761_v48 = vadd.f32 %v1649_v9, %v8931_v60  ;;  %v11511_v45 = vmov %v11502_v61  ;;  %v11513_v47 = vrot.slane %v11512_v26, 2  ;;  %v11515_v60 = vld [vmem:[#allocation35_spill] sm:$0xff] }
 0x2a5   : > { %v2413_v29 = vsel %vm1530_vm1, %v11511_v45, %v11510_v6  ;;  %v2524_v37 = vadd.f32 %v2411_v19, %v2142_v34  ;;  %v3176_v1 = vsel %vm2677_vm2, %v3173_v24, %v3175_v4  ;;  %v3558_v5 = vsel %vm2677_vm2, %v3555_v27, %v3557_v25  ;;  %6500 = vmatprep.mubr.f32.mxu1 %v3670_v12  ;;  %v11517_v24 = vld [vmem:[#allocation8_spill] sm:$0xff]  ;;  %v11518_v27 = vld [vmem:[#allocation19_spill] sm:$0xff] }
 0x2a6   : > { %v2796_v3 = vsel %vm2677_vm2, %v2793_v13, %v11513_v47  ;;  %v3177_v20 = vrot.slane %v11514_v59, 2  ;;  %v2143_v62 = vadd.f32 %v2031_v7, %v1761_v48  ;;  %v11516_v31 = vrot.slane %v11515_v60, 2  ;;  %v11521_v13 = vld [vmem:[#allocation24_spill] sm:$0xff] }
 0x2a7   : > { %v2601_v43 = vmul.f32 %v6910_v52, %v11458_v46  ;;  %v2602_v11 = vmul.f32 %v11453_v22, %v6910_v52  ;;  %v2907_v57 = vadd.f32 %v2794_v32, %v2524_v37  ;;  %v3179_v51 = vrot.slane %v11517_v24, 2 }
 0x2a8   : > { %v3560_v41 = vsel %vm2677_vm2, %v3557_v25, %v11516_v31  ;;  %v3178_v61 = vsel %vm2677_vm2, %v3175_v4, %v3177_v20  ;;  %v3180_v19 = vrot.slane %v11518_v27, 2  ;;  %v2525_v33 = vadd.f32 %v2413_v29, %v2143_v62  ;;  %v11527_v25 = vld [vmem:[#allocation2_spill] sm:$0xff] }
 0x2a9   : > { %v2797_v44 = vrot.slane %v2601_v43, 2  ;;  %v2798_v38 = vrot.slane %v2602_v11, 2  ;;  %v11519_v8 = vrot.slane %v8972_v2, 2  ;;  %v11520_v63 = vrot.slane %v8998_v53, 2  ;;  %v11524_v2 = vld [vmem:[#allocation34_spill] sm:$0xff] }
 0x2aa   : > { %v3289_v46 = vadd.f32 %v3176_v1, %v2907_v57  ;;  %v3181_v18 = vsel %vm2677_vm2, %v3179_v51, %v3180_v19  ;;  %v2603_v22 = vmul.f32 %v6910_v52, %v11468_v40  ;;  %v3182_v14 = vrot.slane %v11521_v13, 2  ;;  %v1098_v40 = vld [vmem:[%s11095_s5] sm:$0xff] }
 0x2ab   : > { %v3563_v55 = vsel %vm2677_vm2, %v11520_v63, %v11519_v8  ;;  %v2908_v0 = vadd.f32 %v2796_v3, %v2525_v33  ;;  %v2799_v56 = vsel %vm2677_vm2, %v2797_v44, %v2798_v38  ;;  %v11522_v53 = vmov %v11519_v8 }
 0x2ac   : > { %v3565_v15 = vsel %vm2677_vm2, %v11522_v53, %v3564_v58  ;;  %v11523_v35 = vrot.slane %v9086_v16, 2  ;;  %v3671_v9 = vadd.f32 %v3558_v5, %v3289_v46  ;;  %v2909_v21 = vadd.f32 %v2799_v56, %v9029_v49  ;;  %v11526_v16 = vld [vmem:[#allocation28_spill] sm:$0xff]  ;;  %v11528_v49 = vld [vmem:[#allocation30_spill] sm:$0xff] }
 0x2ad   : > { %v2800_v54 = vrot.slane %v2603_v22, 2  ;;  %v3183_v7 = vsel %vm2677_vm2, %v3180_v19, %v3182_v14  ;;  %v3290_v34 = vadd.f32 %v3178_v61, %v2908_v0  ;;  %v11525_v32 = vrot.slane %v11524_v2, 2  ;;  %v11541_v56 = vld [vmem:[#allocation10_spill] sm:$0xff] }
 0x2ae   : > { %v3567_v52 = vsel %vm2677_vm2, %v3564_v58, %v11523_v35  ;;  %v3781_v28 = vadd.f32 %v11526_v16, %v9239_v30  ;;  %vm4092_vm3 = vcmp.ge.s32.totalorder %v11527_v25, 1  ;;  %v9263_v58 = vpop.f32.mrb[24].mxu1  ;;  %6501 = vmatmul.mubr.f32.gmra.mrb[48].mxu1 %v3671_v9  ;;  %v3291_v12 = vadd.f32 %v3181_v18, %v2909_v21  ;;  %v11539_v18 = vld [vmem:[#allocation27_spill] sm:$0xff]  ;;  %v11543_v21 = vld [vmem:[#allocation14_spill] sm:$0xff] }
 0x2af   : > { %v3185_v4 = vsel %vm2677_vm2, %v3182_v14, %v11525_v32  ;;  %v2801_v48 = vsel %vm2677_vm2, %v2798_v38, %v2800_v54  ;;  %v11529_v42 = vrot.slane %v11528_v49, 2  ;;  %v11530_v45 = vsub.s32 0, %v11527_v25  ;;  %v9273_v26 = vpop.f32.mrb[25].mxu1 }
 0x2b0   : > { %v3672_v47 = vadd.f32 %v3560_v41, %v3290_v34  ;;  %v2910_v3 = vadd.f32 %v2801_v48, %v9127_v17  ;;  %v4037_v1 = vmax.f32 %v3781_v28, 0.0  ;;  %v3673_v5 = vadd.f32 %v3563_v55, %v3291_v12 }
 0x2b1   : > { %v2803_v6 = vsel %vm2677_vm2, %v2800_v54, %v11529_v42  ;;  %v9271_v29 = vrot.slane %v1098_v40, %v11530_v45  ;;  %v11531_v20 = vsub.s32 3, %v11527_v25  ;;  %v11532_v60 = vsub.s32 1, %v11527_v25 }
 0x2b2   : > { %v2911_v37 = vadd.f32 %v2803_v6, %v9145_v50  ;;  %6503 = vmatprep.mubr.f32.mxu1 %v3672_v47  ;;  %v3292_v43 = vadd.f32 %v3183_v7, %v2910_v3  ;;  %v4113_v17 = vsel %vm4092_vm3, %v4037_v1, 0.0  ;;  %v11533_v50 = vsub.s32 4, %v11527_v25 }
 0x2b3   : > { %v4168_v59 = vmul.f32 0.0, %v9271_v29  ;;  %v9280_v62 = vrot.slane %v1098_v40, %v11531_v20  ;;  %v9284_v31 = vrot.slane %v1098_v40, %v11532_v60  ;;  %6504 = vmatmul.mubr.f32.gmra.mrb[50].mxu1 %v3673_v5  ;;  %v9293_v57 = vmul.f32 %v9271_v29, %v4113_v17 }
 0x2b4   : > { %v3293_v11 = vadd.f32 %v3185_v4, %v2911_v37  ;;  %v9290_v41 = vrot.slane %v1098_v40, %v11533_v50  ;;  %v3674_v51 = vadd.f32 %v3565_v15, %v3292_v43  ;;  %v11536_v33 = vsub.s32 2, %v11527_v25  ;;  %v11565_v37 = vld [vmem:[#allocation33_spill] sm:$0xff]  ;;  %v9478_v50 = vld [vmem:[%s11095_s5 + $0x8] ss:$0 sm:$0xff] }
 0x2b5   : > { %11534 = vst [vmem:[#allocation9_spill] sm:$0xff] %v9293_v57  ;;  %v4204_v61 = vmul.f32 %v9280_v62, %v4113_v17  ;;  %v9297_v24 = vmul.f32 %v9284_v31, %v4113_v17  ;;  %v11537_v8 = vsub.s32 7, %v11527_v25  ;;  %v11538_v55 = vsub.s32 5, %v11527_v25 }
 0x2b6   : > { %v3675_v27 = vadd.f32 %v3567_v52, %v3293_v11  ;;  %v9300_v19 = vmul.f32 %v9290_v41, %v4113_v17  ;;  %v9304_v44 = vrot.slane %v1098_v40, %v11536_v33  ;;  %v3791_v22 = vadd.f32 %v11539_v18, %v9239_v30  ;;  %6506 = vmatprep.mubr.f32.mxu1 %v3674_v51  ;;  %v11542_v52 = vld [vmem:[#allocation3_spill] sm:$0xff] }
 0x2b7   : > { %11535 = vst [vmem:[#allocation29_spill] sm:$0xff] %v9297_v24  ;;  %v9306_v38 = vadd.f32 %v4204_v61, %v4168_v59  ;;  %v9310_v63 = vrot.slane %v1098_v40, %v11537_v8  ;;  %v9314_v46 = vrot.slane %v1098_v40, %v11538_v55  ;;  %v9323_v0 = vadd.s32 16, %v11527_v25  ;;  %v9377_v60 = vpop.f32.mrb[26].mxu1  ;;  %v11550_v8 = vld [vmem:[#allocation11_spill] sm:$0xff] }
 0x2b8   : > { %v9320_v14 = vmul.f32 %v9304_v44, %v4113_v17  ;;  %v3786_v53 = vadd.f32 %v9239_v30, %v11541_v56  ;;  %6507 = vmatmul.mubr.f32.gmra.mrb[52].mxu1 %v3675_v27  ;;  %v4039_v35 = vmax.f32 %v3791_v22, 0.0  ;;  %v3801_v9 = vadd.f32 %v11542_v52, %v9239_v30  ;;  %v9384_v61 = vpop.f32.mrb[27].mxu1  ;;  %v11549_v27 = vld [vmem:[#allocation13_spill] sm:$0xff] }
 0x2b9   : > { %v9328_v15 = vmul.f32 %v9314_v46, %v4113_v17  ;;  %v3796_v54 = vadd.f32 %v9239_v30, %v11543_v21  ;;  %vm4103_vm4 = vcmp.le.s32.totalorder %v9323_v0, 16  ;;  %v11544_v28 = vsub.s32 6, %v11527_v25 }
 0x2ba   : > { %11540 = vst [vmem:[#allocation25_spill] sm:$0xff] %v9320_v14  ;;  %v9337_v2 = vmax.f32 %v3786_v53, 0.0  ;;  %v4115_v32 = vsel %vm4103_vm4, %v4039_v35, 0.0  ;;  %v9341_v4 = vmax.f32 %v3801_v9, 0.0  ;;  %v3811_v33 = vadd.f32 %v11549_v27, %v9239_v30 }
 0x2bb   : > { %v4040_v16 = vmax.f32 %v3796_v54, 0.0  ;;  %v9345_v12 = vrot.slane %v1098_v40, %v11544_v28  ;;  %v9348_v48 = vmul.f32 %v9284_v31, %v4115_v32  ;;  %v9351_v49 = vmul.f32 %v9290_v41, %v4115_v32  ;;  %v11558_v28 = vld [vmem:[#allocation12_spill] sm:$0xff]  ;;  %v11561_v54 = vld [vmem:[#allocation31_spill] sm:$0xff] }
 0x2bc   : > { %v9354_v42 = vmul.f32 %v9304_v44, %v4115_v32  ;;  %v9357_v6 = vmul.f32 %v9314_v46, %v4115_v32  ;;  %v4205_v47 = vmul.f32 %v9280_v62, %v9337_v2  ;;  %v9364_v40 = vmul.f32 %v9284_v31, %v9337_v2 }
 0x2bd   : > { %11545 = vst [vmem:[#allocation7_spill] sm:$0xff] %v9348_v48  ;;  %v9368_v3 = vmul.f32 %v9290_v41, %v9337_v2  ;;  %v9375_v20 = vmul.f32 %v9271_v29, %v9337_v2  ;;  %v9388_v51 = vsel %vm4092_vm3, %v4040_v16, 0.0  ;;  %v3806_v55 = vadd.f32 %v9239_v30, %v11550_v8 }
 0x2be   : > { %11546 = vst [vmem:[#allocation22_spill] sm:$0xff] %v9354_v42  ;;  %11547 = vst [vmem:[#allocation4_spill] sm:$0xff] %v9364_v40  ;;  %v9380_v11 = vadd.f32 %v4205_v47, %v4168_v59  ;;  %v9396_v59 = vmul.f32 %v9284_v31, %v9341_v4  ;;  %v9400_v18 = vmul.f32 %v9304_v44, %v9337_v2  ;;  %v4043_v9 = vmax.f32 %v3811_v33, 0.0  ;;  %v11560_v33 = vld [vmem:[#allocation16_spill] sm:$0xff] }
 0x2bf   : > { %11548 = vst [vmem:[#allocation17_spill] sm:$0xff] %v9375_v20  ;;  %v9404_v22 = vmul.f32 %v9271_v29, %v9388_v51  ;;  %v9408_v56 = vmul.f32 %v9280_v62, %v9388_v51  ;;  %v9412_v53 = vmul.f32 %v9284_v31, %v9388_v51  ;;  %v9416_v35 = vmul.f32 %v9345_v12, %v9388_v51 }
 0x2c0   : > { %11551 = vst [vmem:[#allocation23_spill] sm:$0xff] %v9396_v59  ;;  %11552 = vst [vmem:[#allocation20_spill] sm:$0xff] %v9400_v18  ;;  %v9420_v52 = vmul.f32 %v9290_v41, %v9388_v51  ;;  %v4042_v21 = vmax.f32 %v3806_v55, 0.0  ;;  %v9426_v16 = vmul.f32 %v9290_v41, %v9341_v4  ;;  %v3821_v47 = vadd.f32 %v11558_v28, %v9239_v30 }
 0x2c1   : > { %11553 = vst [vmem:[#allocation18_spill] sm:$0xff] %v9404_v22  ;;  %11554 = vst [vmem:[#allocation15_spill] sm:$0xff] %v9408_v56  ;;  %v9432_v27 = vsel %vm4092_vm3, %v4043_v9, 0.0  ;;  %v3816_v55 = vadd.f32 %v9239_v30, %v11560_v33  ;;  %v3831_v5 = vadd.f32 %v11561_v54, %v9239_v30  ;;  %v11570_v42 = vrot.slane %v9396_v59, 1 }
 0x2c2   : > { %11555 = vst [vmem:[#allocation32_spill] sm:$0xff] %v9412_v53  ;;  %11556 = vst [vmem:[#allocation35_spill] sm:$0xff] %v9420_v52  ;;  %v4118_v8 = vsel %vm4103_vm4, %v4042_v21, 0.0  ;;  %v9442_v34 = vmul.f32 %v9271_v29, %v9432_v27  ;;  %v9446_v28 = vmul.f32 %v9280_v62, %v9432_v27  ;;  %v9450_v9 = vmul.f32 %v9284_v31, %v9432_v27 }
 0x2c3   : > { %11557 = vst [vmem:[#allocation8_spill] sm:$0xff] %v9426_v16  ;;  %11559 = vst [vmem:[#allocation19_spill] sm:$0xff] %v9432_v27  ;;  %v3826_v21 = vadd.f32 %v9239_v30, %v11565_v37  ;;  %v9456_v33 = vmul.f32 %v9345_v12, %v9432_v27  ;;  %v9460_v54 = vmul.f32 %v9290_v41, %v9432_v27 }
 0x2c4   : > { %11562 = vst [vmem:[#allocation24_spill] sm:$0xff] %v9442_v34  ;;  %11563 = vst [vmem:[#allocation34_spill] sm:$0xff] %v9446_v28  ;;  %v4348_v13 = vmul.f32 %v9284_v31, %v4118_v8  ;;  %v4589_v17 = vmul.f32 %v9290_v41, %v4118_v8  ;;  %v9466_v45 = vmul.f32 %v9310_v63, %v4118_v8 }
 0x2c5   : > { %11564 = vst [vmem:[#allocation28_spill] sm:$0xff] %v9450_v9  ;;  %11566 = vst [vmem:[#allocation30_spill] sm:$0xff] %v9456_v33  ;;  %v9469_v1 = vmul.f32 %v9304_v44, %v4118_v8  ;;  %v9472_v37 = vmul.f32 %v9314_v46, %v4118_v8  ;;  %v9484_v22 = vmul.f32 %v9478_v50, %v4118_v8  ;;  %v11572_v9 = vrot.slane %v9426_v16, 1 }
 0x2c6   : > { %11567 = vst [vmem:[#allocation27_spill] sm:$0xff] %v9460_v54  ;;  %v4449_v32 = vrot.slane %v4348_v13, 1  ;;  %v4688_v34 = vrot.slane %v4589_v17, 1  ;;  %v4045_v54 = vmax.f32 %v3821_v47, 0.0  ;;  %v9498_v47 = vmax.f32 %v3816_v55, 0.0 }
 0x2c7   : > { %11568 = vst [vmem:[#allocation10_spill] sm:$0xff] %v9469_v1  ;;  %11569 = vst [vmem:[#allocation3_spill] sm:$0xff] %v9472_v37  ;;  %v9518_v55 = vmax.f32 %v3831_v5, 0.0  ;;  %v11583_v5 = vld [vmem:[#allocation21_spill] sm:$0xff] }
 0x2c8   : > { %v9489_v7 = vsel %vm1530_vm1, %v11570_v42, %v4449_v32  ;;  %v9494_v13 = vsel %vm1530_vm1, %v11572_v9, %v4688_v34  ;;  %v4121_v17 = vsel %vm4103_vm4, %v4045_v54, 0.0  ;;  %11574 = vst [vmem:[#allocation11_spill] sm:$0xff] %v9498_v47  ;;  %v4046_v9 = vmax.f32 %v3826_v21, 0.0 }
 0x2c9   : > { %11571 = vst [vmem:[#allocation14_spill] sm:$0xff] %v9489_v7  ;;  %11573 = vst [vmem:[#allocation13_spill] sm:$0xff] %v9494_v13  ;;  %v9501_v53 = vmul.f32 %v9284_v31, %v4121_v17  ;;  %v9504_v8 = vmul.f32 %v9290_v41, %v4121_v17  ;;  %v9507_v28 = vmul.f32 %v9310_v63, %v4121_v17 }
 0x2ca   : > { %v9510_v42 = vmul.f32 %v9304_v44, %v4121_v17  ;;  %v9513_v34 = vmul.f32 %v9314_v46, %v4121_v17  ;;  %v9516_v32 = vmul.f32 %v9478_v50, %v4121_v17  ;;  %11581 = vst [vmem:[#allocation40_spill] sm:$0xff] %v9518_v55  ;;  %v9528_v13 = vsel %vm4092_vm3, %v4046_v9, 0.0 }
 0x2cb   : > { %11575 = vst [vmem:[#allocation12_spill] sm:$0xff] %v9501_v53  ;;  %11576 = vst [vmem:[#allocation16_spill] sm:$0xff] %v9504_v8  ;;  %v3841_v17 = vadd.f32 %v11583_v5, %v9239_v30  ;;  %v9535_v43 = vmul.f32 %v9271_v29, %v9528_v13  ;;  %v9539_v1 = vmul.f32 %v9280_v62, %v9528_v13  ;;  %v11588_v5 = vld [vmem:[#allocation5_spill] sm:$0xff]  ;;  %v11592_v53 = vld [vmem:[#allocation36_spill] sm:$0xff] }
 0x2cc   : > { %11577 = vst [vmem:[#allocation31_spill] sm:$0xff] %v9507_v28  ;;  %11578 = vst [vmem:[#allocation33_spill] sm:$0xff] %v9510_v42  ;;  %v9543_v59 = vmul.f32 %v9284_v31, %v9528_v13  ;;  %v9547_v9 = vmul.f32 %v9345_v12, %v9528_v13  ;;  %v3836_v21 = vadd.f32 %v9239_v30, %v11588_v5  ;;  %v11594_v8 = vld [vmem:[#allocation37_spill] sm:$0xff] }
 0x2cd   : > { %11579 = vst [vmem:[#allocation38_spill] sm:$0xff] %v9513_v34  ;;  %11580 = vst [vmem:[#allocation39_spill] sm:$0xff] %v9516_v32  ;;  %v4049_v37 = vmax.f32 %v3841_v17, 0.0  ;;  %v9553_v7 = vmul.f32 %v9284_v31, %v9518_v55  ;;  %v9562_v42 = vmul.f32 %v9290_v41, %v9518_v55  ;;  %v3851_v17 = vadd.f32 %v11592_v53, %v9239_v30 }
 0x2ce   : > { %11582 = vst [vmem:[#allocation41_spill] sm:$0xff] %v9528_v13  ;;  %11584 = vst [vmem:[#allocation21_spill] sm:$0xff] %v9535_v43  ;;  %v9558_v43 = vmul.f32 %v9290_v41, %v9528_v13  ;;  %v3846_v54 = vadd.f32 %v9239_v30, %v11594_v8 }
 0x2cf   : > { %11585 = vst [vmem:[#allocation42_spill] sm:$0xff] %v9539_v1  ;;  %11586 = vst [vmem:[#allocation43_spill] sm:$0xff] %v9543_v59  ;;  %v9568_v5 = vsel %vm4092_vm3, %v4049_v37, 0.0  ;;  %v4048_v1 = vmax.f32 %v3836_v21, 0.0  ;;  %v3861_v37 = vadd.f32 %v9015_v39, %v9239_v30  ;;  %v9587_v21 = vpop.f32.mrb[28].mxu1 }
 0x2d0   : > { %11587 = vst [vmem:[#allocation44_spill] sm:$0xff] %v9547_v9  ;;  %11589 = vst [vmem:[#allocation5_spill] sm:$0xff] %v9553_v7  ;;  %v9575_v59 = vmul.f32 %v9271_v29, %v9568_v5  ;;  %v9583_v53 = vmul.f32 %v9284_v31, %v9568_v5  ;;  %v9591_v8 = vmul.f32 %v9345_v12, %v9568_v5  ;;  %v9599_v13 = vpop.f32.mrb[29].mxu1 }
 0x2d1   : > { %11590 = vst [vmem:[#allocation45_spill] sm:$0xff] %v9558_v43  ;;  %11591 = vst [vmem:[#allocation46_spill] sm:$0xff] %v9562_v42  ;;  %v9579_v43 = vmul.f32 %v9280_v62, %v9568_v5  ;;  %v9595_v34 = vmul.f32 %v9290_v41, %v9568_v5 }
 0x2d2   : > { %11593 = vst [vmem:[#allocation36_spill] sm:$0xff] %v9568_v5  ;;  %11595 = vst [vmem:[#allocation37_spill] sm:$0xff] %v9575_v59  ;;  %v4124_v59 = vsel %vm4103_vm4, %v4048_v1, 0.0  ;;  %v11615_v5 = vld [vmem:[#allocation6_spill] sm:$0xff] }
 0x2d3   : > { %11596 = vst [vmem:[#allocation47_spill] sm:$0xff] %v9579_v43  ;;  %11597 = vst [vmem:[#allocation48_spill] sm:$0xff] %v9583_v53  ;;  %v4051_v43 = vmax.f32 %v3851_v17, 0.0  ;;  %v4354_v9 = vmul.f32 %v9284_v31, %v4124_v59  ;;  %v4595_v39 = vmul.f32 %v9290_v41, %v4124_v59  ;;  %v9605_v32 = vmul.f32 %v9310_v63, %v4124_v59 }
 0x2d4   : > { %11598 = vst [vmem:[#allocation49_spill] sm:$0xff] %v9591_v8  ;;  %11599 = vst [vmem:[#allocation50_spill] sm:$0xff] %v9595_v34  ;;  %v9608_v8 = vmul.f32 %v9304_v44, %v4124_v59  ;;  %v9611_v34 = vmul.f32 %v9314_v46, %v4124_v59  ;;  %v9614_v1 = vmul.f32 %v9478_v50, %v4124_v59  ;;  %v11606_v59 = vrot.slane %v9553_v7, 1 }
 0x2d5   : > { %11600 = vst [vmem:[#allocation51_spill] sm:$0xff] %v9605_v32  ;;  %v4127_v17 = vsel %vm4103_vm4, %v4051_v43, 0.0  ;;  %v4459_v28 = vrot.slane %v4354_v9, 1  ;;  %v4698_v14 = vrot.slane %v4595_v39, 1  ;;  %v11608_v9 = vrot.slane %v9562_v42, 1 }
 0x2d6   : > { %11601 = vst [vmem:[#allocation52_spill] sm:$0xff] %v9608_v8  ;;  %11602 = vst [vmem:[#allocation53_spill] sm:$0xff] %v9611_v34  ;;  %v9620_v55 = vmul.f32 %v9284_v31, %v4127_v17  ;;  %v9626_v33 = vmul.f32 %v9290_v41, %v4127_v17  ;;  %v9640_v18 = vmul.f32 %v9310_v63, %v4127_v17  ;;  %v11776_v25 = vld [vmem:[#allocation43_spill] sm:$0xff] }
 0x2d7   : > { %11603 = vst [vmem:[#allocation54_spill] sm:$0xff] %v9614_v1  ;;  %v9631_v43 = vsel %vm1530_vm1, %v11606_v59, %v4459_v28  ;;  %v9636_v39 = vsel %vm1530_vm1, %v11608_v9, %v4698_v14  ;;  %v9644_v27 = vmul.f32 %v9304_v44, %v4127_v17  ;;  %v9647_v53 = vmul.f32 %v9314_v46, %v4127_v17 }
 0x2d8   : > { %11604 = vst [vmem:[#allocation55_spill] sm:$0xff] %v9620_v55  ;;  %11605 = vst [vmem:[#allocation56_spill] sm:$0xff] %v9626_v33  ;;  %v9650_v28 = vmul.f32 %v9478_v50, %v4127_v17  ;;  %v9654_v9 = vmax.f32 %v3861_v37, 0.0  ;;  %v3856_v8 = vadd.f32 %v9239_v30, %v11615_v5  ;;  %v3871_v7 = vadd.f32 %v9074_v23, %v9239_v30 }
 0x2d9   : > { %11607 = vst [vmem:[#allocation57_spill] sm:$0xff] %v9631_v43  ;;  %11609 = vst [vmem:[#allocation58_spill] sm:$0xff] %v9636_v39  ;;  %v9660_v43 = vmax.f32 %v3846_v54, 0.0  ;;  %v11617_v39 = vld [vmem:[#allocation26_spill] sm:$0xff]  ;;  %v3881_v54 = vadd.f32 %v9178_v36, %v9239_v30  ;;  %v3876_v23 = vadd.f32 %v9239_v30, %v9188_v10 }
 0x2da   : > { %11610 = vst [vmem:[#allocation59_spill] sm:$0xff] %v9640_v18  ;;  %11611 = vst [vmem:[#allocation60_spill] sm:$0xff] %v9644_v27  ;;  %v4052_v17 = vmax.f32 %v3856_v8, 0.0  ;;  %v3866_v59 = vadd.f32 %v9239_v30, %v11617_v39  ;;  %v9668_v37 = vmul.f32 %v9284_v31, %v9654_v9  ;;  %v9672_v5 = vmul.f32 %v9290_v41, %v9654_v9 }
 0x2db   : > { %11612 = vst [vmem:[#allocation61_spill] sm:$0xff] %v9647_v53  ;;  %11613 = vst [vmem:[#allocation62_spill] sm:$0xff] %v9650_v28  ;;  %v4055_v55 = vmax.f32 %v3871_v7, 0.0  ;;  %v3891_v27 = vadd.f32 %v9263_v58, %v9239_v30  ;;  %v4057_v14 = vmax.f32 %v3881_v54, 0.0 }
 0x2dc   : > { %11614 = vst [vmem:[#allocation63_spill] sm:$0xff] %v9654_v9  ;;  %11616 = vst [vmem:[#allocation6_spill] sm:$0xff] %v9660_v43  ;;  %v9681_v8 = vsel %vm4092_vm3, %v4052_v17, 0.0  ;;  %v4054_v39 = vmax.f32 %v3866_v59, 0.0 }
 0x2dd   : > { %11618 = vst [vmem:[#allocation26_spill] sm:$0xff] %v9668_v37  ;;  %11619 = vst [vmem:[#allocation64_spill] sm:$0xff] %v9672_v5  ;;  %v9688_v16 = vmul.f32 %v9271_v29, %v9681_v8  ;;  %v9692_v36 = vmul.f32 %v9280_v62, %v9681_v8  ;;  %v9696_v10 = vmul.f32 %v9284_v31, %v9681_v8  ;;  %v9705_v58 = vsel %vm4092_vm3, %v4055_v55, 0.0  ;;  %v6475_v55 = vpop.f32.mrb[30].mxu1 }
 0x2de   : > { %11620 = vst [vmem:[#allocation65_spill] sm:$0xff] %v9681_v8  ;;  %v9701_v59 = vmul.f32 %v9345_v12, %v9681_v8  ;;  %11625 = vst [vmem:[#allocation70_spill] sm:$0xff] %v9705_v58  ;;  %v4130_v17 = vsel %vm4103_vm4, %v4054_v39, 0.0  ;;  %v9716_v7 = vmul.f32 %v9271_v29, %v9705_v58  ;;  %v9720_v53 = vmul.f32 %v9280_v62, %v9705_v58 }
 0x2df   : > { %11621 = vst [vmem:[#allocation66_spill] sm:$0xff] %v9688_v16  ;;  %11622 = vst [vmem:[#allocation67_spill] sm:$0xff] %v9692_v36  ;;  %v9712_v36 = vmul.f32 %v9290_v41, %v9681_v8  ;;  %v9724_v33 = vmul.f32 %v9345_v12, %v9705_v58  ;;  %v9728_v54 = vmul.f32 %v9284_v31, %v9705_v58  ;;  %v4133_v28 = vsel %vm4103_vm4, %v4057_v14, 0.0 }
 0x2e0   : > { %11623 = vst [vmem:[#allocation68_spill] sm:$0xff] %v9696_v10  ;;  %11624 = vst [vmem:[#allocation69_spill] sm:$0xff] %v9701_v59  ;;  %v4360_v39 = vmul.f32 %v9284_v31, %v4130_v17  ;;  %v4601_v16 = vmul.f32 %v9290_v41, %v4130_v17  ;;  %v3915_v10 = vpop.f32.mrb[31].mxu1  ;;  %v9746_v8 = vmul.f32 %v9290_v41, %v9705_v58  ;;  %v9785_v18 = vmax.f32 %v3891_v27, 0.0 }
 0x2e1   : > { %11626 = vst [vmem:[#allocation71_spill] sm:$0xff] %v9712_v36  ;;  %11627 = vst [vmem:[#allocation72_spill] sm:$0xff] %v9716_v7  ;;  %v9733_v7 = vmul.f32 %v9310_v63, %v4130_v17  ;;  %v9736_v36 = vmul.f32 %v9304_v44, %v4130_v17  ;;  %v9765_v14 = vmul.f32 %v9284_v31, %v4133_v28 }
 0x2e2   : > { %11628 = vst [vmem:[#allocation73_spill] sm:$0xff] %v9720_v53  ;;  %11629 = vst [vmem:[#allocation74_spill] sm:$0xff] %v9724_v33  ;;  %v9739_v53 = vmul.f32 %v9314_v46, %v4130_v17  ;;  %v9742_v33 = vmul.f32 %v9478_v50, %v4130_v17  ;;  %v4469_v59 = vrot.slane %v4360_v39, 1  ;;  %v4708_v9 = vrot.slane %v4601_v16, 1 }
 0x2e3   : > { %11630 = vst [vmem:[#allocation75_spill] sm:$0xff] %v9728_v54  ;;  %11631 = vst [vmem:[#allocation76_spill] sm:$0xff] %v9733_v7  ;;  %v11636_v17 = vrot.slane %v9668_v37, 1  ;;  %v9768_v39 = vmul.f32 %v9290_v41, %v4133_v28  ;;  %v9772_v42 = vmul.f32 %v9310_v63, %v4133_v28  ;;  %v9775_v43 = vmul.f32 %v9304_v44, %v4133_v28 }
 0x2e4   : > { %11632 = vst [vmem:[#allocation77_spill] sm:$0xff] %v9736_v36  ;;  %11633 = vst [vmem:[#allocation78_spill] sm:$0xff] %v9739_v53  ;;  %v3886_v37 = vadd.f32 %v9239_v30, %v9273_v26  ;;  %v9800_v27 = vmul.f32 %v9290_v41, %v9785_v18  ;;  %v3911_v54 = vadd.f32 %v9587_v21, %v9239_v30 }
 0x2e5   : > { %11634 = vst [vmem:[#allocation79_spill] sm:$0xff] %v9742_v33  ;;  %11635 = vst [vmem:[#allocation80_spill] sm:$0xff] %v9746_v8  ;;  %v9757_v1 = vsel %vm1530_vm1, %v11636_v17, %v4469_v59  ;;  %v11638_v8 = vrot.slane %v9672_v5, 1  ;;  %v9778_v59 = vmul.f32 %v9314_v46, %v4133_v28  ;;  %v9783_v17 = vmul.f32 %v9478_v50, %v4133_v28 }
 0x2e6   : > { %11637 = vst [vmem:[#allocation81_spill] sm:$0xff] %v9757_v1  ;;  %11640 = vst [vmem:[#allocation83_spill] sm:$0xff] %v9765_v14  ;;  %v9790_v1 = vmax.f32 %v3876_v23, 0.0  ;;  %v3896_v28 = vadd.f32 %v9239_v30, %v9384_v61  ;;  %v3906_v23 = vadd.f32 %v9239_v30, %v9599_v13  ;;  %v3921_v36 = vadd.f32 %v6475_v55, %v9239_v30 }
 0x2e7   : > { %v9762_v16 = vsel %vm1530_vm1, %v11638_v8, %v4708_v9  ;;  %11641 = vst [vmem:[#allocation84_spill] sm:$0xff] %v9768_v39  ;;  %11642 = vst [vmem:[#allocation85_spill] sm:$0xff] %v9772_v42  ;;  %v3901_v9 = vadd.f32 %v9377_v60, %v9239_v30  ;;  %v3916_v26 = vadd.f32 %v9239_v30, %v3915_v10  ;;  %v4058_v60 = vmax.f32 %v3886_v37, 0.0 }
 0x2e8   : > { %11639 = vst [vmem:[#allocation82_spill] sm:$0xff] %v9762_v16  ;;  %11643 = vst [vmem:[#allocation86_spill] sm:$0xff] %v9775_v43  ;;  %v4060_v43 = vmax.f32 %v3896_v28, 0.0  ;;  %v4063_v14 = vmax.f32 %v3911_v54, 0.0  ;;  %v9812_v39 = vmax.f32 %v3921_v36, 0.0  ;;  %v11660_v53 = vrot.slane %v9800_v27, 1 }
 0x2e9   : > { %11644 = vst [vmem:[#allocation87_spill] sm:$0xff] %v9778_v59  ;;  %11645 = vst [vmem:[#allocation88_spill] sm:$0xff] %v9783_v17  ;;  %v4061_v34 = vmax.f32 %v3901_v9, 0.0  ;;  %v9810_v59 = vmax.f32 %v3906_v23, 0.0  ;;  %v9816_v21 = vsel %vm4092_vm3, %v4058_v60, 0.0  ;;  %v4064_v10 = vmax.f32 %v3916_v26, 0.0 }
 0x2ea   : > { %11646 = vst [vmem:[#allocation89_spill] sm:$0xff] %v9785_v18  ;;  %11647 = vst [vmem:[#allocation90_spill] sm:$0xff] %v9790_v1  ;;  %v4136_v37 = vsel %vm4103_vm4, %v4060_v43, 0.0  ;;  %v9826_v55 = vmul.f32 %v9280_v62, %v9816_v21  ;;  %v9830_v36 = vmul.f32 %v9345_v12, %v9816_v21  ;;  %v9834_v54 = vmul.f32 %v9290_v41, %v9816_v21  ;;  %v6478_v9 = vpop.f32.mrb[32].mxu1 }
 0x2eb   : > { %11648 = vst [vmem:[#allocation91_spill] sm:$0xff] %v9800_v27  ;;  %11649 = vst [vmem:[#allocation92_spill] sm:$0xff] %v9810_v59  ;;  %v9820_v13 = vsel %vm4092_vm3, %v4061_v34, 0.0  ;;  %v4185_v34 = vmul.f32 %v9271_v29, %v9785_v18  ;;  %v9839_v28 = vmul.f32 %v9284_v31, %v4136_v37  ;;  %v4607_v43 = vmul.f32 %v9290_v41, %v4136_v37  ;;  %v3925_v60 = vpop.f32.mrb[33].mxu1 }
 0x2ec   : > { %11650 = vst [vmem:[#allocation93_spill] sm:$0xff] %v9816_v21  ;;  %11651 = vst [vmem:[#allocation94_spill] sm:$0xff] %v9820_v13  ;;  %v9843_v23 = vmul.f32 %v9310_v63, %v4136_v37  ;;  %v9846_v26 = vmul.f32 %v9304_v44, %v4136_v37  ;;  %v9850_v8 = vmul.f32 %v9345_v12, %v9820_v13  ;;  %v9864_v16 = vsel %vm4092_vm3, %v4064_v10, 0.0 }
 0x2ed   : > { %11652 = vst [vmem:[#allocation95_spill] sm:$0xff] %v9826_v55  ;;  %11653 = vst [vmem:[#allocation96_spill] sm:$0xff] %v9830_v36  ;;  %v9853_v61 = vmul.f32 %v9314_v46, %v4136_v37  ;;  %v4139_v55 = vsel %vm4103_vm4, %v4063_v14, 0.0  ;;  %v4479_v36 = vrot.slane %v9839_v28, 1  ;;  %v4718_v17 = vrot.slane %v4607_v43, 1 }
 0x2ee   : > { %11654 = vst [vmem:[#allocation97_spill] sm:$0xff] %v9834_v54  ;;  %11655 = vst [vmem:[#allocation98_spill] sm:$0xff] %v9843_v23  ;;  %v9856_v54 = vmul.f32 %v9478_v50, %v4136_v37  ;;  %v9869_v5 = vmul.f32 %v9284_v31, %v4139_v55  ;;  %v4610_v37 = vmul.f32 %v9290_v41, %v4139_v55 }
 0x2ef   : > { %11656 = vst [vmem:[#allocation99_spill] sm:$0xff] %v9850_v8  ;;  %11657 = vst [vmem:[#allocation100_spill] sm:$0xff] %v9853_v61  ;;  %v9874_v28 = vmul.f32 %v9310_v63, %v4139_v55  ;;  %v9877_v43 = vmul.f32 %v9304_v44, %v4139_v55  ;;  %v9880_v10 = vmul.f32 %v9314_v46, %v4139_v55 }
 0x2f0   : > { %11658 = vst [vmem:[#allocation101_spill] sm:$0xff] %v9856_v54  ;;  %v9885_v42 = vsel %vm1530_vm1, %v11660_v53, %v4718_v17  ;;  %v4723_v61 = vrot.slane %v4610_v37, 1  ;;  %v3931_v23 = vadd.f32 %v6478_v9, %v9239_v30  ;;  %v9892_v58 = vmul.f32 %v9478_v50, %v4139_v55 }
 0x2f1   : > { %11659 = vst [vmem:[#allocation102_spill] sm:$0xff] %v9874_v28  ;;  %11661 = vst [vmem:[#allocation103_spill] sm:$0xff] %v9885_v42  ;;  %v3926_v1 = vadd.f32 %v9239_v30, %v3925_v60  ;;  %v4184_v53 = vmul.f32 %v9271_v29, %v9816_v21  ;;  %v4220_v17 = vmul.f32 %v9280_v62, %v9820_v13 }
 0x2f2   : > { %11662 = vst [vmem:[#allocation104_spill] sm:$0xff] %v9892_v58  ;;  %v4067_v27 = vmax.f32 %v3931_v23, 0.0  ;;  %v4221_v9 = vmul.f32 %v9280_v62, %v9810_v59  ;;  %v4288_v14 = vmul.f32 %v9345_v12, %v9864_v16  ;;  %v4289_v55 = vmul.f32 %v9345_v12, %v9812_v39 }
 0x2f3   : > { %v4066_v37 = vmax.f32 %v3926_v1, 0.0  ;;  %v4252_v23 = vadd.f32 %v4220_v17, %v4184_v53  ;;  %v4364_v54 = vmul.f32 %v9284_v31, %v9816_v21  ;;  %v4365_v1 = vmul.f32 %v9284_v31, %v9785_v18 }
 0x2f4   : > { %v9908_v60 = vsel %vm4092_vm3, %v4067_v27, 0.0  ;;  %v4253_v33 = vadd.f32 %v4221_v9, %v4185_v34  ;;  %v4608_v58 = vmul.f32 %v9290_v41, %v9820_v13  ;;  %v4609_v42 = vmul.f32 %v9290_v41, %v9810_v59 }
 0x2f5   : > { %v4142_v8 = vsel %vm4103_vm4, %v4066_v37, 0.0  ;;  %v4320_v34 = vadd.f32 %v4288_v14, %v4252_v23  ;;  %v4476_v7 = vrot.slane %v4364_v54, 1  ;;  %v4477_v20 = vrot.slane %v4365_v1, 1 }
 0x2f6   : > { %v9921_v27 = vmul.f32 %v9284_v31, %v4142_v8  ;;  %v9924_v53 = vmul.f32 %v9290_v41, %v4142_v8  ;;  %v4854_v17 = vmul.f32 %v9310_v63, %v4142_v8  ;;  %v9928_v28 = vmul.f32 %v9304_v44, %v4142_v8 }
 0x2f7   : > { %v9931_v37 = vmul.f32 %v9314_v46, %v4142_v8  ;;  %v4321_v9 = vadd.f32 %v4289_v55, %v4253_v33  ;;  %v4720_v47 = vrot.slane %v4608_v58, 1  ;;  %v4721_v56 = vrot.slane %v4609_v42, 1 }
 0x2f8   : > { %11663 = vst [vmem:[#allocation105_spill] sm:$0xff] %v9928_v28  ;;  %v4967_v48 = vrot.slane %v4854_v17, 1  ;;  %v4852_v57 = vmul.f32 %v9310_v63, %v9864_v16  ;;  %v4853_v14 = vmul.f32 %v9310_v63, %v9812_v39  ;;  %v5096_v33 = vmul.f32 %v9304_v44, %v9816_v21 }
 0x2f9   : > { %v5097_v54 = vmul.f32 %v9304_v44, %v9785_v18  ;;  %v4478_v55 = vsel %vm1530_vm1, %v4476_v7, %v4477_v20  ;;  %v4480_v23 = vsel %vm1530_vm1, %v4477_v20, %v4479_v36  ;;  %v4722_v1 = vsel %vm1530_vm1, %v4720_v47, %v4721_v56 }
 0x2fa   : > { %v4724_v42 = vsel %vm1530_vm1, %v4721_v56, %v4723_v61  ;;  %v4564_v58 = vadd.f32 %v4478_v55, %v4320_v34  ;;  %v4565_v17 = vadd.f32 %v4480_v23, %v4321_v9  ;;  %v4964_v24 = vrot.slane %v4852_v57, 1 }
 0x2fb   : > { %v4965_v32 = vrot.slane %v4853_v14, 1  ;;  %v5208_v40 = vrot.slane %v5096_v33, 2  ;;  %v5209_v52 = vrot.slane %v5097_v54, 2  ;;  %v5340_v21 = vmul.f32 %v9314_v46, %v9820_v13 }
 0x2fc   : > { %v5341_v18 = vmul.f32 %v9314_v46, %v9810_v59  ;;  %v4808_v28 = vadd.f32 %v4722_v1, %v4564_v58  ;;  %v4809_v7 = vadd.f32 %v4724_v42, %v4565_v17  ;;  %v11664_v57 = vrot.slane %v9846_v26, 2 }
 0x2fd   : > { %v4966_v20 = vsel %vm1530_vm1, %v4964_v24, %v4965_v32  ;;  %v4968_v47 = vsel %vm1530_vm1, %v4965_v32, %v4967_v48  ;;  %v6481_v36 = vpop.f32.mrb[34].mxu1  ;;  %v5210_v56 = vsel %vm2677_vm2, %v5208_v40, %v5209_v52  ;;  %v5452_v34 = vrot.slane %v5340_v21, 2 }
 0x2fe   : > { %v5212_v61 = vsel %vm2677_vm2, %v5209_v52, %v11664_v57  ;;  %v5453_v9 = vrot.slane %v5341_v18, 2  ;;  %v3941_v14 = vadd.f32 %v6481_v36, %v9239_v30  ;;  %v3935_v33 = vpop.f32.mrb[35].mxu1  ;;  %v5052_v54 = vadd.f32 %v4966_v20, %v4808_v28 }
 0x2ff   : > { %v5053_v55 = vadd.f32 %v4968_v47, %v4809_v7  ;;  %v5584_v23 = vmul.f32 %v9478_v50, %v9864_v16  ;;  %v3936_v24 = vadd.f32 %v9239_v30, %v3935_v33  ;;  %v11665_v40 = vrot.slane %v9880_v10, 2 }
 0x300   : > { %v5454_v48 = vsel %vm2677_vm2, %v5452_v34, %v5453_v9  ;;  %v5585_v52 = vmul.f32 %v9478_v50, %v9812_v39  ;;  %v4069_v18 = vmax.f32 %v3941_v14, 0.0  ;;  %v5296_v21 = vadd.f32 %v5210_v56, %v5052_v54 }
 0x301   : > { %v5456_v32 = vsel %vm2677_vm2, %v5453_v9, %v11665_v40  ;;  %v5297_v26 = vadd.f32 %v5212_v61, %v5053_v55  ;;  %v5586_v28 = vmul.f32 %v9478_v50, %v4142_v8  ;;  %v9970_v1 = vmax.f32 %v3936_v24, 0.0 }
 0x302   : > { %v5696_v42 = vrot.slane %v5584_v23, 2  ;;  %v5697_v58 = vrot.slane %v5585_v52, 2  ;;  %v4273_v17 = vmul.f32 %v9345_v12, %v9341_v4  ;;  %v9976_v10 = vsel %vm4103_vm4, %v4069_v18, 0.0 }
 0x303   : > { %v5540_v7 = vadd.f32 %v5454_v48, %v5296_v21  ;;  %v5541_v20 = vadd.f32 %v5456_v32, %v5297_v26  ;;  %v5699_v47 = vrot.slane %v5586_v28, 2  ;;  %v9980_v36 = vmul.f32 %v9284_v31, %v9976_v10 }
 0x304   : > { %v9984_v8 = vmul.f32 %v9290_v41, %v9976_v10  ;;  %v9988_v56 = vmul.f32 %v9310_v63, %v9976_v10  ;;  %v9992_v57 = vmul.f32 %v9304_v44, %v9976_v10  ;;  %v9996_v61 = vmul.f32 %v9314_v46, %v9976_v10 }
 0x305   : > { %v5698_v34 = vsel %vm2677_vm2, %v5696_v42, %v5697_v58  ;;  %v5700_v9 = vsel %vm2677_vm2, %v5697_v58, %v5699_v47  ;;  %v4304_v14 = vadd.f32 %v9416_v35, %v9306_v38  ;;  %v4305_v32 = vadd.f32 %v4273_v17, %v9380_v11 }
 0x306   : > { %v4733_v54 = vrot.slane %v9984_v8, 1  ;;  %v4972_v55 = vrot.slane %v9988_v56, 1  ;;  %v5784_v48 = vadd.f32 %v5698_v34, %v5540_v7  ;;  %v5785_v40 = vadd.f32 %v5700_v9, %v5541_v20 }
 0x307   : > { %v4340_v52 = vmul.f32 0.0, %v9284_v31  ;;  %v11666_v18 = vrot.slane %v9368_v3, 1  ;;  %v11667_v38 = vrot.slane %v9300_v19, 1  ;;  %v11668_v21 = vrot.slane %v9351_v49, 1 }
 0x308   : > { %v4828_v42 = vmul.f32 %v9310_v63, %v9388_v51  ;;  %v6549_v58 = vpack.c.bf16 %v5785_v40, %v5784_v48  ;;  %v4829_v11 = vmul.f32 %v9310_v63, %v9341_v4  ;;  %v5072_v17 = vmul.f32 0.0, %v9304_v44 }
 0x309   : > { %v4682_v35 = vsel %vm1530_vm1, %v11667_v38, %v11666_v18  ;;  %v11669_v26 = vmov %v11666_v18  ;;  %v5317_v19 = vmul.f32 %v9314_v46, %v9337_v2  ;;  %v4436_v7 = vrot.slane %v4340_v52, 1 }
 0x30a   : > { %v4684_v28 = vsel %vm1530_vm1, %v11669_v26, %v11668_v21  ;;  %v4924_v20 = vrot.slane %v4828_v42, 1  ;;  %v5560_v49 = vmul.f32 %v9478_v50, %v9388_v51  ;;  %v5561_v3 = vmul.f32 %v9478_v50, %v9341_v4  ;;  %6550 = vmatprep.subr.bf16.mxu1 %v6549_v58 }
 0x30b   : > { %v4925_v47 = vrot.slane %v4829_v11, 1  ;;  %v5168_v34 = vrot.slane %v5072_v17, 2  ;;  %v5413_v9 = vrot.slane %v5317_v19, 2  ;;  %v4186_v48 = vmul.f32 %v9271_v29, %v9820_v13 }
 0x30c   : > { %v6484_v40 = vpop.f32.mrb[36].mxu1  ;;  %v4548_v18 = vadd.f32 %v4436_v7, %v4304_v14  ;;  %v4549_v38 = vadd.f32 %v4436_v7, %v4305_v32  ;;  %v5656_v21 = vrot.slane %v5560_v49, 2  ;;  %v5657_v2 = vrot.slane %v5561_v3, 2 }
 0x30d   : > { %v3951_v52 = vadd.f32 %v6484_v40, %v9239_v30  ;;  %v3945_v26 = vpop.f32.mrb[37].mxu1  ;;  %v4926_v42 = vsel %vm1530_vm1, %v4924_v20, %v4925_v47  ;;  %v11670_v23 = vrot.slane %v9466_v45, 1  ;;  %v11671_v11 = vrot.slane %v9328_v15, 2 }
 0x30e   : > { %v3946_v19 = vadd.f32 %v9239_v30, %v3945_v26  ;;  %v4792_v33 = vadd.f32 %v4682_v35, %v4548_v18  ;;  %v4793_v14 = vadd.f32 %v4684_v28, %v4549_v38  ;;  %v11672_v32 = vrot.slane %v9357_v6, 2 }
 0x30f   : > { %v4928_v58 = vsel %vm1530_vm1, %v4925_v47, %v11670_v23  ;;  %v5414_v17 = vsel %vm2677_vm2, %v11671_v11, %v5413_v9  ;;  %v10044_v49 = vmax.f32 %v3951_v52, 0.0  ;;  %v5658_v20 = vsel %vm2677_vm2, %v5656_v21, %v5657_v2 }
 0x310   : > { %v5416_v7 = vsel %vm2677_vm2, %v5413_v9, %v11672_v32  ;;  %v11673_v45 = vrot.slane %v9484_v22, 2  ;;  %v4187_v15 = vmul.f32 %v9271_v29, %v9810_v59  ;;  %v4070_v3 = vmax.f32 %v3946_v19, 0.0 }
 0x311   : > { %v5036_v47 = vadd.f32 %v4926_v42, %v4792_v33  ;;  %v5037_v40 = vadd.f32 %v4928_v58, %v4793_v14  ;;  %v4222_v35 = vmul.f32 %v9280_v62, %v9864_v16  ;;  %v4223_v6 = vmul.f32 %v9280_v62, %v9812_v39 }
 0x312   : > { %v5660_v23 = vsel %vm2677_vm2, %v5657_v2, %v11673_v45  ;;  %v4290_v28 = vmul.f32 %v9345_v12, %v9908_v60  ;;  %v4291_v22 = vmul.f32 %v9345_v12, %v9970_v1  ;;  %v4367_v9 = vmul.f32 %v9284_v31, %v9820_v13 }
 0x313   : > { %v10064_v18 = vsel %vm4092_vm3, %v4070_v3, 0.0  ;;  %v5280_v33 = vadd.f32 %v5168_v34, %v5036_v47  ;;  %v5281_v38 = vadd.f32 %v5168_v34, %v5037_v40  ;;  %v4254_v21 = vadd.f32 %v4222_v35, %v4186_v48 }
 0x314   : > { %v4255_v2 = vadd.f32 %v4223_v6, %v4187_v15  ;;  %v4368_v52 = vmul.f32 %v9284_v31, %v9810_v59  ;;  %v4481_v26 = vrot.slane %v4367_v9, 1  ;;  %v4611_v42 = vmul.f32 %v9290_v41, %v9864_v16 }
 0x315   : > { %v5524_v58 = vadd.f32 %v5414_v17, %v5280_v33  ;;  %v5525_v11 = vadd.f32 %v5416_v7, %v5281_v38  ;;  %v4322_v19 = vadd.f32 %v4290_v28, %v4254_v21  ;;  %v4612_v14 = vmul.f32 %v9290_v41, %v9812_v39 }
 0x316   : > { %v4323_v32 = vadd.f32 %v4291_v22, %v4255_v2  ;;  %v4482_v45 = vrot.slane %v4368_v52, 1  ;;  %v4725_v3 = vrot.slane %v4611_v42, 1  ;;  %v4855_v34 = vmul.f32 %v9310_v63, %v9908_v60 }
 0x317   : > { %v5768_v48 = vadd.f32 %v5658_v20, %v5524_v58  ;;  %v5769_v15 = vadd.f32 %v5660_v23, %v5525_v11  ;;  %v4726_v47 = vrot.slane %v4612_v14, 1  ;;  %v4856_v40 = vmul.f32 %v9310_v63, %v9970_v1 }
 0x318   : > { %v4483_v35 = vsel %vm1530_vm1, %v4481_v26, %v4482_v45  ;;  %v11674_v17 = vrot.slane %v9869_v5, 1  ;;  %v4969_v6 = vrot.slane %v4855_v34, 1  ;;  %v5099_v28 = vmul.f32 %v9304_v44, %v9820_v13 }
 0x319   : > { %v6551_v22 = vpack.c.bf16 %v5769_v15, %v5768_v48  ;;  %v4566_v9 = vadd.f32 %v4483_v35, %v4322_v19  ;;  %v4727_v20 = vsel %vm1530_vm1, %v4725_v3, %v4726_v47  ;;  %v11675_v23 = vrot.slane %v9924_v53, 1 }
 0x31a   : > { %v4485_v7 = vsel %vm1530_vm1, %v4482_v45, %v11674_v17  ;;  %v4970_v21 = vrot.slane %v4856_v40, 1  ;;  %v5100_v2 = vmul.f32 %v9304_v44, %v9810_v59  ;;  %v5213_v5 = vrot.slane %v5099_v28, 2  ;;  %v6487_v52 = vpop.f32.mrb[38].mxu1 }
 0x31b   : > { %v4567_v33 = vadd.f32 %v4485_v7, %v4323_v32  ;;  %v4729_v38 = vsel %vm1530_vm1, %v4726_v47, %v11675_v23  ;;  %6552 = vmatpush3.bf16.xpose.msra.mxu1 %v6551_v22  ;;  %v4810_v26 = vadd.f32 %v4727_v20, %v4566_v9  ;;  %v5343_v58 = vmul.f32 %v9314_v46, %v9864_v16  ;;  %v3955_v53 = vpop.f32.mrb[39].mxu1 }
 0x31c   : > { %v5344_v11 = vmul.f32 %v9314_v46, %v9812_v39  ;;  %v3961_v19 = vadd.f32 %v6487_v52, %v9239_v30  ;;  %v4971_v14 = vsel %vm1530_vm1, %v4969_v6, %v4970_v21  ;;  %v4973_v32 = vsel %vm1530_vm1, %v4970_v21, %v4972_v55 }
 0x31d   : > { %v4811_v42 = vadd.f32 %v4729_v38, %v4567_v33  ;;  %v5214_v45 = vrot.slane %v5100_v2, 2  ;;  %v3956_v3 = vadd.f32 %v9239_v30, %v3955_v53  ;;  %v5054_v34 = vadd.f32 %v4971_v14, %v4810_v26 }
 0x31e   : > { %v5457_v15 = vrot.slane %v5343_v58, 2  ;;  %v4073_v47 = vmax.f32 %v3961_v19, 0.0  ;;  %v11676_v35 = vrot.slane %v9877_v43, 2  ;;  %v5458_v7 = vrot.slane %v5344_v11, 2 }
 0x31f   : > { %v5055_v48 = vadd.f32 %v4973_v32, %v4811_v42  ;;  %v5215_v40 = vsel %vm2677_vm2, %v5213_v5, %v5214_v45  ;;  %v4072_v28 = vmax.f32 %v3956_v3, 0.0  ;;  %v5587_v56 = vmul.f32 %v9478_v50, %v9908_v60 }
 0x320   : > { %v5217_v17 = vsel %vm2677_vm2, %v5214_v45, %v11676_v35  ;;  %v5298_v6 = vadd.f32 %v5215_v40, %v5054_v34  ;;  %v10106_v30 = vsel %vm4092_vm3, %v4073_v47, 0.0  ;;  %v5459_v55 = vsel %vm2677_vm2, %v5457_v15, %v5458_v7  ;;  %v11678_v47 = vld [vmem:[#allocation9_spill] sm:$0xff]  ;;  %v11679_v40 = vld [vmem:[#allocation15_spill] sm:$0xff] }
 0x321   : > { %v5299_v22 = vadd.f32 %v5217_v17, %v5055_v48  ;;  %v11677_v9 = vrot.slane %v9931_v37, 2  ;;  %v5588_v43 = vmul.f32 %v9478_v50, %v9970_v1  ;;  %v10116_v20 = vsel %vm4103_vm4, %v4072_v28, 0.0  ;;  %v11680_v17 = vld [vmem:[#allocation11_spill] sm:$0xff]  ;;  %v11681_v28 = vld [vmem:[#allocation17_spill] sm:$0xff] }
 0x322   : > { %v5542_v23 = vadd.f32 %v5459_v55, %v5298_v6  ;;  %v5589_v21 = vmul.f32 %v9478_v50, %v9976_v10  ;;  %v10122_v2 = vmul.f32 %v9284_v31, %v10116_v20  ;;  %v10126_v37 = vmul.f32 %v9290_v41, %v10116_v20  ;;  %v11684_v55 = vld [vmem:[#allocation29_spill] sm:$0xff] }
 0x323   : > { %v5461_v33 = vsel %vm2677_vm2, %v5458_v7, %v11677_v9  ;;  %v10130_v5 = vmul.f32 %v9310_v63, %v10116_v20  ;;  %v10134_v52 = vmul.f32 %v9304_v44, %v10116_v20  ;;  %v10138_v26 = vmul.f32 %v9314_v46, %v10116_v20 }
 0x324   : > { %v5543_v38 = vadd.f32 %v5461_v33, %v5299_v22  ;;  %v5701_v10 = vrot.slane %v5587_v56, 2  ;;  %v5702_v42 = vrot.slane %v5588_v43, 2  ;;  %v5704_v58 = vrot.slane %v5589_v21, 2  ;;  %v11682_v22 = vld [vmem:[#allocation4_spill] sm:$0xff]  ;;  %v11686_v43 = vld [vmem:[#allocation7_spill] sm:$0xff] }
 0x325   : > { %v4207_v34 = vmul.f32 %v9280_v62, %v9341_v4  ;;  %v4238_v35 = vadd.f32 %v11679_v40, %v11678_v47  ;;  %v4275_v7 = vmul.f32 %v9345_v12, %v11680_v17  ;;  %v11683_v56 = vrot.slane %v11682_v22, 1  ;;  %v11691_v47 = vld [vmem:[#allocation19_spill] sm:$0xff] }
 0x326   : > { %v5703_v45 = vsel %vm2677_vm2, %v5701_v10, %v5702_v42  ;;  %v5705_v3 = vsel %vm2677_vm2, %v5702_v42, %v5704_v58  ;;  %v11685_v9 = vrot.slane %v11684_v55, 1  ;;  %v11687_v21 = vrot.slane %v11686_v43, 1  ;;  %v11692_v55 = vld [vmem:[#allocation8_spill] sm:$0xff] }
 0x327   : > { %v5786_v48 = vadd.f32 %v5703_v45, %v5542_v23  ;;  %v5787_v15 = vadd.f32 %v5705_v3, %v5543_v38  ;;  %v4239_v6 = vadd.f32 %v4207_v34, %v11681_v28  ;;  %v11688_v10 = vmov %v11683_v56  ;;  %v11689_v38 = vld [vmem:[#allocation35_spill] sm:$0xff]  ;;  %v11690_v45 = vld [vmem:[#allocation30_spill] sm:$0xff]  ;;  %v11694_v43 = vld [vmem:[#allocation20_spill] sm:$0xff] }
 0x328   : > { %v4443_v33 = vsel %vm1530_vm1, %v11685_v9, %v11683_v56  ;;  %v4445_v23 = vsel %vm1530_vm1, %v11688_v10, %v11687_v21  ;;  %v4685_v42 = vrot.slane %v11689_v38, 1  ;;  %v4306_v3 = vadd.f32 %v11690_v45, %v4238_v35  ;;  %v11695_v45 = vld [vmem:[#allocation25_spill] sm:$0xff] }
 0x329   : > { %v6553_v58 = vpack.c.bf16 %v5787_v15, %v5786_v48  ;;  %v4831_v34 = vmul.f32 %v9310_v63, %v11691_v47  ;;  %v4832_v40 = vmul.f32 %v9310_v63, %v11680_v17  ;;  %v4307_v28 = vadd.f32 %v4275_v7, %v4239_v6  ;;  %v11697_v6 = vld [vmem:[#allocation22_spill] sm:$0xff] }
 0x32a   : > { %v11693_v56 = vrot.slane %v11692_v55, 1  ;;  %v5174_v22 = vrot.slane %v11694_v43, 2  ;;  %v5319_v21 = vmul.f32 %v9314_v46, %v9388_v51  ;;  %v4550_v48 = vadd.f32 %v4443_v33, %v4306_v3 }
 0x32b   : > { %6554 = vmatprep.subr.bf16.mxu1 %v6553_v58  ;;  %v4929_v15 = vrot.slane %v4831_v34, 1  ;;  %v4930_v35 = vrot.slane %v4832_v40, 1  ;;  %v5320_v10 = vmul.f32 %v9314_v46, %v9341_v4  ;;  %v4551_v38 = vadd.f32 %v4445_v23, %v4307_v28  ;;  %v11699_v58 = vld [vmem:[#allocation31_spill] sm:$0xff]  ;;  %v11701_v40 = vld [vmem:[#allocation13_spill] sm:$0xff] }
 0x32c   : > { %v4687_v9 = vsel %vm1530_vm1, %v4685_v42, %v11693_v56  ;;  %v11696_v14 = vrot.slane %v11695_v45, 2  ;;  %v11698_v55 = vrot.slane %v11697_v6, 2  ;;  %v5417_v56 = vrot.slane %v5319_v21, 2  ;;  %v11702_v21 = vld [vmem:[#allocation3_spill] sm:$0xff] }
 0x32d   : > { %v4794_v43 = vadd.f32 %v4687_v9, %v4550_v48  ;;  %v4931_v11 = vsel %vm1530_vm1, %v4929_v15, %v4930_v35  ;;  %v11700_v33 = vrot.slane %v11699_v58, 1  ;;  %v5418_v34 = vrot.slane %v5320_v10, 2 }
 0x32e   : > { %v5175_v7 = vsel %vm2677_vm2, %v11696_v14, %v5174_v22  ;;  %v5177_v42 = vsel %vm2677_vm2, %v5174_v22, %v11698_v55  ;;  %v4795_v32 = vadd.f32 %v11701_v40, %v4551_v38  ;;  %v5563_v23 = vmul.f32 %v9478_v50, %v11691_v47 }
 0x32f   : > { %v4933_v3 = vsel %vm1530_vm1, %v4930_v35, %v11700_v33  ;;  %v5564_v14 = vmul.f32 %v9478_v50, %v11680_v17  ;;  %v4188_v28 = vmul.f32 %v9271_v29, %v9864_v16  ;;  %v5038_v22 = vadd.f32 %v4931_v11, %v4794_v43  ;;  %v6490_v50 = vpop.f32.mrb[40].mxu1 }
 0x330   : > { %v5419_v9 = vsel %vm2677_vm2, %v5417_v56, %v5418_v34  ;;  %v11703_v48 = vrot.slane %v11702_v21, 2  ;;  %v4189_v35 = vmul.f32 %v9271_v29, %v9812_v39  ;;  %v5039_v10 = vadd.f32 %v4933_v3, %v4795_v32  ;;  %v10212_v32 = vld [vmem:[%s11094_s4] ss:$0 sm:$0xff]  ;;  %v3965_v33 = vpop.f32.mrb[41].mxu1 }
 0x331   : > { %v5661_v38 = vrot.slane %v5563_v23, 2  ;;  %v5662_v45 = vrot.slane %v5564_v14, 2  ;;  %v4224_v6 = vmul.f32 %v9280_v62, %v9908_v60  ;;  %v5282_v55 = vadd.f32 %v5175_v7, %v5038_v22 }
 0x332   : > { %v5421_v15 = vsel %vm2677_vm2, %v5418_v34, %v11703_v48  ;;  %v4225_v11 = vmul.f32 %v9280_v62, %v9970_v1  ;;  %v4292_v56 = vmul.f32 %v9345_v12, %v10064_v18  ;;  %v4293_v43 = vmul.f32 %v9345_v12, %v10044_v49  ;;  %v11704_v34 = vld [vmem:[#allocation39_spill] sm:$0xff] }
 0x333   : > { %v3971_v58 = vadd.f32 %v10212_v32, %v6490_v50  ;;  %v5283_v3 = vadd.f32 %v5177_v42, %v5039_v10  ;;  %v5663_v7 = vsel %vm2677_vm2, %v5661_v38, %v5662_v45  ;;  %v11705_v40 = vrot.slane %v11704_v34, 2 }
 0x334   : > { %v3966_v14 = vadd.f32 %v10212_v32, %v3965_v33  ;;  %v5526_v22 = vadd.f32 %v5419_v9, %v5282_v55  ;;  %v4256_v21 = vadd.f32 %v4224_v6, %v4188_v28  ;;  %v4257_v48 = vadd.f32 %v4225_v11, %v4189_v35 }
 0x335   : > { %v5665_v23 = vsel %vm2677_vm2, %v5662_v45, %v11705_v40  ;;  %v4075_v19 = vmax.f32 %v3971_v58, 0.0  ;;  %v5527_v24 = vadd.f32 %v5421_v15, %v5283_v3  ;;  %v4370_v53 = vmul.f32 %v9284_v31, %v9864_v16  ;;  %v11709_v58 = vld [vmem:[#allocation105_spill] sm:$0xff] }
 0x336   : > { %v4371_v50 = vmul.f32 %v9284_v31, %v9812_v39  ;;  %v10224_v42 = vmax.f32 %v3966_v14, 0.0  ;;  %v5770_v10 = vadd.f32 %v5663_v7, %v5526_v22  ;;  %v4324_v38 = vadd.f32 %v4292_v56, %v4256_v21 }
 0x337   : > { %v4325_v34 = vadd.f32 %v4293_v43, %v4257_v48  ;;  %v10228_v45 = vsel %vm4103_vm4, %v4075_v19, 0.0  ;;  %v5771_v9 = vadd.f32 %v5665_v23, %v5527_v24  ;;  %v4486_v28 = vrot.slane %v4370_v53, 1 }
 0x338   : > { %v4487_v35 = vrot.slane %v4371_v50, 1  ;;  %v10232_v15 = vmul.f32 %v9284_v31, %v10228_v45  ;;  %v10236_v6 = vmul.f32 %v9290_v41, %v10228_v45  ;;  %v10240_v55 = vmul.f32 %v9310_v63, %v10228_v45 }
 0x339   : > { %v10244_v11 = vmul.f32 %v9304_v44, %v10228_v45  ;;  %v10248_v24 = vmul.f32 %v9314_v46, %v10228_v45  ;;  %v6555_v19 = vpack.c.bf16 %v5771_v9, %v5770_v10  ;;  %v11707_v56 = vrot.slane %v9921_v27, 1 }
 0x33a   : > { %v4488_v53 = vsel %vm1530_vm1, %v4486_v28, %v4487_v35  ;;  %v4614_v22 = vmul.f32 %v9290_v41, %v9908_v60  ;;  %v4615_v27 = vmul.f32 %v9290_v41, %v9970_v1  ;;  %v4858_v21 = vmul.f32 %v9310_v63, %v10064_v18 }
 0x33b   : > { %11706 = vst [vmem:[#allocation9_spill] sm:$0xff] %v10244_v11  ;;  %v4490_v43 = vsel %vm1530_vm1, %v4487_v35, %v11707_v56  ;;  %6556 = vmatpush3.bf16.xpose.msra.mxu1 %v6555_v19  ;;  %v4568_v23 = vadd.f32 %v4488_v53, %v4324_v38  ;;  %v4859_v48 = vmul.f32 %v9310_v63, %v10044_v49  ;;  %v11710_v40 = vrot.slane %v11709_v58, 2 }
 0x33c   : > { %v4569_v14 = vadd.f32 %v4490_v43, %v4325_v34  ;;  %v5102_v50 = vmul.f32 %v9304_v44, %v9864_v16  ;;  %v4730_v10 = vrot.slane %v4614_v22, 1  ;;  %v5103_v38 = vmul.f32 %v9304_v44, %v9812_v39  ;;  %v10278_v16 = vld [vmem:[%s11095_s5 + $0x8] ss:$0 sm:$0xff] }
 0x33d   : > { %v5346_v34 = vmul.f32 %v9314_v46, %v9908_v60  ;;  %v5347_v9 = vmul.f32 %v9314_v46, %v9970_v1  ;;  %v4731_v28 = vrot.slane %v4615_v27, 1  ;;  %v4974_v35 = vrot.slane %v4858_v21, 1 }
 0x33e   : > { %v4975_v19 = vrot.slane %v4859_v48, 1  ;;  %v5218_v53 = vrot.slane %v5102_v50, 2  ;;  %v5219_v56 = vrot.slane %v5103_v38, 2  ;;  %v5590_v39 = vmul.f32 %v10278_v16, %v10064_v18 }
 0x33f   : > { %v5462_v43 = vrot.slane %v5346_v34, 2  ;;  %v5463_v7 = vrot.slane %v5347_v9, 2  ;;  %v4732_v22 = vsel %vm1530_vm1, %v4730_v10, %v4731_v28  ;;  %v4734_v27 = vsel %vm1530_vm1, %v4731_v28, %v4733_v54 }
 0x340   : > { %v4976_v21 = vsel %vm1530_vm1, %v4974_v35, %v4975_v19  ;;  %v11708_v48 = vrot.slane %v10130_v5, 1  ;;  %v4812_v38 = vadd.f32 %v4732_v22, %v4568_v23  ;;  %v4813_v34 = vadd.f32 %v4734_v27, %v4569_v14 }
 0x341   : > { %v5220_v9 = vsel %vm2677_vm2, %v5218_v53, %v5219_v56  ;;  %v5222_v33 = vsel %vm2677_vm2, %v5219_v56, %v11710_v40  ;;  %v5464_v10 = vsel %vm2677_vm2, %v5462_v43, %v5463_v7  ;;  %v11711_v8 = vrot.slane %v9996_v61, 2  ;;  %v11712_v61 = vld [vmem:[#allocation18_spill] sm:$0xff]  ;;  %v6493_v43 = vpop.f32.mrb[42].mxu1 }
 0x342   : > { %v4978_v50 = vsel %vm1530_vm1, %v4975_v19, %v11708_v48  ;;  %v5591_v28 = vmul.f32 %v10278_v16, %v10044_v49  ;;  %v5592_v5 = vmul.f32 %v10278_v16, %v10116_v20  ;;  %v5056_v23 = vadd.f32 %v4976_v21, %v4812_v38  ;;  %v11713_v56 = vld [vmem:[#allocation34_spill] sm:$0xff]  ;;  %v11714_v48 = vld [vmem:[#allocation40_spill] sm:$0xff]  ;;  %v11715_v21 = vld [vmem:[#allocation23_spill] sm:$0xff] }
 0x343   : > { %v5466_v54 = vsel %vm2677_vm2, %v5463_v7, %v11711_v8  ;;  %v5057_v14 = vadd.f32 %v4978_v50, %v4813_v34  ;;  %v5706_v35 = vrot.slane %v5590_v39, 2  ;;  %v4173_v58 = vmul.f32 %v9271_v29, %v9341_v4  ;;  %v11717_v39 = vld [vmem:[#allocation32_spill] sm:$0xff] }
 0x344   : > { %v5707_v19 = vrot.slane %v5591_v28, 2  ;;  %v5709_v40 = vrot.slane %v5592_v5, 2  ;;  %v4209_v53 = vmul.f32 %v9280_v62, %v11680_v17  ;;  %v4240_v7 = vadd.f32 %v11713_v56, %v11712_v61  ;;  %v3975_v28 = vpop.f32.mrb[43].mxu1 }
 0x345   : > { %v5300_v22 = vadd.f32 %v5220_v9, %v5056_v23  ;;  %v5301_v27 = vadd.f32 %v5222_v33, %v5057_v14  ;;  %v4277_v20 = vmul.f32 %v9345_v12, %v11714_v48  ;;  %v11716_v50 = vrot.slane %v11715_v21, 1  ;;  %v11719_v14 = vld [vmem:[#allocation44_spill] sm:$0xff] }
 0x346   : > { %v11718_v38 = vrot.slane %v11717_v39, 1  ;;  %v3981_v8 = vadd.f32 %v10212_v32, %v6493_v43  ;;  %v5708_v5 = vsel %vm2677_vm2, %v5706_v35, %v5707_v19  ;;  %v5710_v3 = vsel %vm2677_vm2, %v5707_v19, %v5709_v40  ;;  %v11720_v39 = vld [vmem:[#allocation27_spill] sm:$0xff]  ;;  %v11721_v19 = vld [vmem:[#allocation14_spill] sm:$0xff] }
 0x347   : > { %v4241_v61 = vadd.f32 %v4209_v53, %v4173_v58  ;;  %v3976_v9 = vadd.f32 %v10212_v32, %v3975_v28  ;;  %v5544_v33 = vadd.f32 %v5464_v10, %v5300_v22  ;;  %v5545_v23 = vadd.f32 %v5466_v54, %v5301_v27  ;;  %v11722_v53 = vld [vmem:[#allocation41_spill] sm:$0xff] }
 0x348   : > { %v4448_v34 = vsel %vm1530_vm1, %v11718_v38, %v11716_v50  ;;  %v4308_v56 = vadd.f32 %v11719_v14, %v4240_v7  ;;  %v10320_v13 = vmax.f32 %v3981_v8, 0.0  ;;  %v4591_v50 = vmul.f32 %v9290_v41, %v11680_v17 }
 0x349   : > { %v4309_v21 = vadd.f32 %v4277_v20, %v4241_v61  ;;  %v4690_v43 = vrot.slane %v11720_v39, 1  ;;  %v4076_v38 = vmax.f32 %v3976_v9, 0.0  ;;  %v5788_v59 = vadd.f32 %v5708_v5, %v5544_v33 }
 0x34a   : > { %v5789_v35 = vadd.f32 %v5710_v3, %v5545_v23  ;;  %v4552_v11 = vadd.f32 %v4448_v34, %v4308_v56  ;;  %v4691_v40 = vrot.slane %v4591_v50, 1  ;;  %v4834_v10 = vmul.f32 %v9310_v63, %v11722_v53  ;;  %v11723_v34 = vld [vmem:[#allocation16_spill] sm:$0xff]  ;;  %v11725_v56 = vld [vmem:[#allocation51_spill] sm:$0xff] }
 0x34b   : > { %v4553_v58 = vadd.f32 %v11721_v19, %v4309_v21  ;;  %v4835_v54 = vmul.f32 %v9310_v63, %v11714_v48  ;;  %v10332_v7 = vsel %vm4092_vm3, %v4076_v38, 0.0  ;;  %v5078_v27 = vmul.f32 %v9304_v44, %v9388_v51 }
 0x34c   : > { %v6557_v22 = vpack.c.bf16 %v5789_v35, %v5788_v59  ;;  %v5079_v3 = vmul.f32 %v9304_v44, %v9341_v4  ;;  %v4692_v20 = vsel %vm1530_vm1, %v4690_v43, %v4691_v40  ;;  %v11724_v8 = vrot.slane %v11723_v34, 1 }
 0x34d   : > { %v4934_v5 = vrot.slane %v4834_v10, 1  ;;  %v4935_v61 = vrot.slane %v4835_v54, 1  ;;  %v4796_v9 = vadd.f32 %v4692_v20, %v4552_v11  ;;  %v5178_v23 = vrot.slane %v5078_v27, 2  ;;  %v11727_v11 = vld [vmem:[#allocation10_spill] sm:$0xff] }
 0x34e   : > { %v4694_v28 = vsel %vm1530_vm1, %v4691_v40, %v11724_v8  ;;  %6558 = vmatprep.subr.bf16.mxu1 %v6557_v22  ;;  %v5179_v14 = vrot.slane %v5079_v3, 2  ;;  %v11726_v51 = vrot.slane %v11725_v56, 1  ;;  %v5322_v4 = vmul.f32 %v9314_v46, %v11691_v47  ;;  %v11729_v8 = vld [vmem:[#allocation38_spill] sm:$0xff] }
 0x34f   : > { %v4797_v33 = vadd.f32 %v4694_v28, %v4553_v58  ;;  %v4936_v59 = vsel %vm1530_vm1, %v4934_v5, %v4935_v61  ;;  %v5323_v50 = vmul.f32 %v9314_v46, %v11680_v17  ;;  %v11728_v35 = vrot.slane %v11727_v11, 2 }
 0x350   : > { %v4938_v21 = vsel %vm1530_vm1, %v4935_v61, %v11726_v51  ;;  %v5040_v39 = vadd.f32 %v4936_v59, %v4796_v9  ;;  %v5180_v38 = vsel %vm2677_vm2, %v5178_v23, %v5179_v14  ;;  %v5422_v58 = vrot.slane %v5322_v4, 2  ;;  %v11731_v51 = vld [vmem:[#allocation54_spill] sm:$0xff] }
 0x351   : > { %v5041_v43 = vadd.f32 %v4938_v21, %v4797_v33  ;;  %v5182_v19 = vsel %vm2677_vm2, %v5179_v14, %v11728_v35  ;;  %v5423_v40 = vrot.slane %v5323_v50, 2  ;;  %v5566_v10 = vmul.f32 %v10278_v16, %v11722_v53 }
 0x352   : > { %v5567_v54 = vmul.f32 %v10278_v16, %v11714_v48  ;;  %v5284_v22 = vadd.f32 %v5180_v38, %v5040_v39  ;;  %v10360_v3 = vmul.f32 %v9271_v29, %v10332_v7  ;;  %v10363_v20 = vmul.f32 0.0, %v9345_v12 }
 0x353   : > { %v5285_v27 = vadd.f32 %v5182_v19, %v5041_v43  ;;  %v5424_v34 = vsel %vm2677_vm2, %v5422_v58, %v5423_v40  ;;  %v11730_v28 = vrot.slane %v11729_v8, 2  ;;  %v5666_v61 = vrot.slane %v5566_v10, 2 }
 0x354   : > { %v5667_v9 = vrot.slane %v5567_v54, 2  ;;  %v5528_v33 = vadd.f32 %v5424_v34, %v5284_v22  ;;  %v4190_v14 = vmul.f32 %v9271_v29, %v9908_v60  ;;  %v4191_v59 = vmul.f32 %v9271_v29, %v9970_v1 }
 0x355   : > { %v5426_v5 = vsel %vm2677_vm2, %v5423_v40, %v11730_v28  ;;  %v11732_v21 = vrot.slane %v11731_v51, 2  ;;  %v4226_v50 = vmul.f32 %v9280_v62, %v10064_v18  ;;  %v4227_v39 = vmul.f32 %v9280_v62, %v10044_v49 }
 0x356   : > { %v5529_v23 = vadd.f32 %v5426_v5, %v5285_v27  ;;  %v5668_v56 = vsel %vm2677_vm2, %v5666_v61, %v5667_v9  ;;  %v4294_v11 = vmul.f32 %v9345_v12, %v10106_v30  ;;  %v4295_v35 = vmul.f32 %v9345_v12, %v10224_v42 }
 0x357   : > { %v5670_v4 = vsel %vm2677_vm2, %v5667_v9, %v11732_v21  ;;  %v5772_v43 = vadd.f32 %v5668_v56, %v5528_v33  ;;  %v4258_v19 = vadd.f32 %v4226_v50, %v4190_v14  ;;  %v4259_v58 = vadd.f32 %v4227_v39, %v4191_v59 }
 0x358   : > { %v5773_v38 = vadd.f32 %v5670_v4, %v5529_v23  ;;  %v4373_v40 = vmul.f32 %v9284_v31, %v9908_v60  ;;  %v4374_v10 = vmul.f32 %v9284_v31, %v9970_v1  ;;  %v4617_v22 = vmul.f32 %v9290_v41, %v10064_v18 }
 0x359   : > { %v4618_v27 = vmul.f32 %v9290_v41, %v10044_v49  ;;  %v4861_v34 = vmul.f32 %v9310_v63, %v10106_v30  ;;  %v4326_v8 = vadd.f32 %v4294_v11, %v4258_v19  ;;  %v4327_v28 = vadd.f32 %v4295_v35, %v4259_v58 }
 0x35a   : > { %v6559_v54 = vpack.c.bf16 %v5773_v38, %v5772_v43  ;;  %v4491_v5 = vrot.slane %v4373_v40, 1  ;;  %v4492_v61 = vrot.slane %v4374_v10, 1  ;;  %v4735_v9 = vrot.slane %v4617_v22, 1 }
 0x35b   : > { %v4736_v33 = vrot.slane %v4618_v27, 1  ;;  %v4862_v23 = vmul.f32 %v9310_v63, %v10224_v42  ;;  %v4979_v14 = vrot.slane %v4861_v34, 1  ;;  %v11733_v56 = vrot.slane %v9980_v36, 1 }
 0x35c   : > { %6560 = vmatpush3.bf16.xpose.msra.mxu1 %v6559_v54  ;;  %v4493_v59 = vsel %vm1530_vm1, %v4491_v5, %v4492_v61  ;;  %v5105_v21 = vmul.f32 %v9304_v44, %v9908_v60  ;;  %v5106_v4 = vmul.f32 %v9304_v44, %v9970_v1  ;;  %v11734_v38 = vrot.slane %v10126_v37, 1 }
 0x35d   : > { %v4495_v51 = vsel %vm1530_vm1, %v4492_v61, %v11733_v56  ;;  %v4570_v50 = vadd.f32 %v4493_v59, %v4326_v8  ;;  %v4737_v43 = vsel %vm1530_vm1, %v4735_v9, %v4736_v33  ;;  %v4980_v35 = vrot.slane %v4862_v23, 1 }
 0x35e   : > { %v4571_v39 = vadd.f32 %v4495_v51, %v4327_v28  ;;  %v4739_v11 = vsel %vm1530_vm1, %v4736_v33, %v11734_v38  ;;  %v5223_v19 = vrot.slane %v5105_v21, 2  ;;  %v5224_v58 = vrot.slane %v5106_v4, 2  ;;  %v6496_v33 = vpop.f32.mrb[44].mxu1 }
 0x35f   : > { %v5349_v36 = vmul.f32 %v9314_v46, %v10064_v18  ;;  %v4814_v40 = vadd.f32 %v4737_v43, %v4570_v50  ;;  %v5350_v60 = vmul.f32 %v9314_v46, %v10044_v49  ;;  %v5593_v1 = vmul.f32 %v10278_v16, %v10106_v30 }
 0x360   : > { %v4815_v10 = vadd.f32 %v4739_v11, %v4571_v39  ;;  %v4981_v54 = vsel %vm1530_vm1, %v4979_v14, %v4980_v35  ;;  %v11735_v37 = vrot.slane %v10240_v55, 1  ;;  %v5225_v27 = vsel %vm2677_vm2, %v5223_v19, %v5224_v58 }
 0x361   : > { %v11736_v34 = vrot.slane %v9992_v57, 2  ;;  %v5058_v28 = vadd.f32 %v4981_v54, %v4814_v40  ;;  %v5467_v61 = vrot.slane %v5349_v36, 2  ;;  %v5468_v9 = vrot.slane %v5350_v60, 2  ;;  %v3985_v57 = vpop.f32.mrb[45].mxu1  ;;  %v11738_v60 = vld [vmem:[#allocation24_spill] sm:$0xff] }
 0x362   : > { %v4983_v22 = vsel %vm1530_vm1, %v4980_v35, %v11735_v37  ;;  %v5594_v23 = vmul.f32 %v10278_v16, %v10224_v42  ;;  %v5595_v14 = vmul.f32 %v10278_v16, %v10228_v45  ;;  %v5711_v55 = vrot.slane %v5593_v1, 2  ;;  %v11739_v1 = vld [vmem:[#allocation42_spill] sm:$0xff] }
 0x363   : > { %v5227_v8 = vsel %vm2677_vm2, %v5224_v58, %v11736_v34  ;;  %v5059_v5 = vadd.f32 %v4983_v22, %v4815_v10  ;;  %v4175_v59 = vmul.f32 %v9271_v29, %v11680_v17  ;;  %v3991_v56 = vadd.f32 %v10212_v32, %v6496_v33 }
 0x364   : > { %v5302_v51 = vadd.f32 %v5225_v27, %v5058_v28  ;;  %v5469_v4 = vsel %vm2677_vm2, %v5467_v61, %v5468_v9  ;;  %v3986_v50 = vadd.f32 %v10212_v32, %v3985_v57  ;;  %v11737_v39 = vrot.slane %v10138_v26, 2  ;;  %v11742_v57 = vld [vmem:[#allocation49_spill] sm:$0xff] }
 0x365   : > { %v5303_v21 = vadd.f32 %v5227_v8, %v5059_v5  ;;  %v5712_v38 = vrot.slane %v5594_v23, 2  ;;  %v5714_v11 = vrot.slane %v5595_v14, 2  ;;  %v4079_v45 = vmax.f32 %v3991_v56, 0.0  ;;  %v11740_v5 = vld [vmem:[#allocation6_spill] sm:$0xff] }
 0x366   : > { %v5471_v43 = vsel %vm2677_vm2, %v5468_v9, %v11737_v39  ;;  %v5546_v35 = vadd.f32 %v5469_v4, %v5302_v51  ;;  %v4211_v58 = vmul.f32 %v9280_v62, %v11714_v48  ;;  %v4078_v36 = vmax.f32 %v3986_v50, 0.0 }
 0x367   : > { %v5547_v19 = vadd.f32 %v5471_v43, %v5303_v21  ;;  %v5713_v40 = vsel %vm2677_vm2, %v5711_v55, %v5712_v38  ;;  %v5715_v10 = vsel %vm2677_vm2, %v5712_v38, %v5714_v11  ;;  %v4242_v54 = vadd.f32 %v11739_v1, %v11738_v60  ;;  %v11745_v60 = vld [vmem:[#allocation46_spill] sm:$0xff] }
 0x368   : > { %v10443_v26 = vsel %vm4092_vm3, %v4079_v45, 0.0  ;;  %v5790_v37 = vadd.f32 %v5713_v40, %v5546_v35  ;;  %v4243_v27 = vadd.f32 %v4211_v58, %v4175_v59  ;;  %v10447_v34 = vsel %vm4103_vm4, %v4078_v36, 0.0  ;;  %v11744_v35 = vld [vmem:[#allocation36_spill] sm:$0xff] }
 0x369   : > { %v5791_v22 = vadd.f32 %v5715_v10, %v5547_v19  ;;  %v10451_v8 = vmul.f32 %v9271_v29, %v10443_v26  ;;  %v4232_v28 = vmul.f32 %v9280_v62, %v10443_v26  ;;  %v4279_v61 = vmul.f32 %v9345_v12, %v11740_v5 }
 0x36a   : > { %v10459_v9 = vmul.f32 %v9284_v31, %v10447_v34  ;;  %v10463_v33 = vmul.f32 %v9290_v41, %v10447_v34  ;;  %v10467_v23 = vmul.f32 %v9310_v63, %v10447_v34  ;;  %v10471_v14 = vmul.f32 %v9304_v44, %v10447_v34 }
 0x36b   : > { %v10475_v55 = vmul.f32 %v9314_v46, %v10447_v34  ;;  %v10478_v59 = vadd.f32 %v4232_v28, %v10360_v3  ;;  %v6561_v56 = vpack.c.bf16 %v5791_v22, %v5790_v37  ;;  %v4310_v51 = vadd.f32 %v11742_v57, %v4242_v54  ;;  %v11743_v3 = vld [vmem:[#allocation45_spill] sm:$0xff] }
 0x36c   : > { %11741 = vst [vmem:[#allocation15_spill] sm:$0xff] %v10471_v14  ;;  %v4311_v38 = vadd.f32 %v4279_v61, %v4243_v27  ;;  %v4350_v11 = vmul.f32 %v9284_v31, %v11680_v17  ;;  %v4695_v45 = vrot.slane %v11743_v3, 1  ;;  %v4837_v19 = vmul.f32 %v9310_v63, %v11744_v35  ;;  %v11749_v3 = vld [vmem:[#allocation12_spill] sm:$0xff] }
 0x36d   : > { %6562 = vmatprep.subr.bf16.mxu1 %v6561_v56  ;;  %v4838_v58 = vmul.f32 %v9310_v63, %v11740_v5  ;;  %v5081_v36 = vmul.f32 %v9304_v44, %v11691_v47  ;;  %v5082_v40 = vmul.f32 %v9304_v44, %v11680_v17  ;;  %v11746_v1 = vrot.slane %v11745_v60, 1  ;;  %v5800_v47 = vld [vmem:[%s11096_s6] sm:$0xff]  ;;  %v11747_v17 = vld [vmem:[#allocation28_spill] sm:$0xff] }
 0x36e   : > { %v4452_v10 = vrot.slane %v4350_v11, 1  ;;  %v5325_v37 = vmul.f32 %v9314_v46, %v11722_v53  ;;  %v5326_v22 = vmul.f32 %v9314_v46, %v11714_v48  ;;  %v4939_v27 = vrot.slane %v4837_v19, 1  ;;  %6264 = vmatprep.mubr.f32.mxu1 %v5800_v47 }
 0x36f   : > { %v4697_v54 = vsel %vm1530_vm1, %v4695_v45, %v11746_v1  ;;  %v4940_v28 = vrot.slane %v4838_v58, 1  ;;  %v5183_v61 = vrot.slane %v5081_v36, 2  ;;  %v5184_v56 = vrot.slane %v5082_v40, 2  ;;  %v11751_v36 = vld [vmem:[#allocation59_spill] sm:$0xff] }
 0x370   : > { %v11748_v57 = vrot.slane %v11747_v17, 1  ;;  %v11750_v45 = vrot.slane %v11749_v3, 1  ;;  %v5427_v1 = vrot.slane %v5325_v37, 2  ;;  %v5428_v39 = vrot.slane %v5326_v22, 2  ;;  %v11753_v17 = vld [vmem:[#allocation33_spill] sm:$0xff] }
 0x371   : > { %v4941_v58 = vsel %vm1530_vm1, %v4939_v27, %v4940_v28  ;;  %v11752_v40 = vrot.slane %v11751_v36, 1  ;;  %v5185_v4 = vsel %vm2677_vm2, %v5183_v61, %v5184_v56  ;;  %v11754_v50 = vrot.slane %v11753_v17, 2 }
 0x372   : > { %v4453_v11 = vsel %vm1530_vm1, %v11748_v57, %v4452_v10  ;;  %v4455_v60 = vsel %vm1530_vm1, %v4452_v10, %v11750_v45  ;;  %v5429_v3 = vsel %vm2677_vm2, %v5427_v1, %v5428_v39  ;;  %v11755_v10 = vld [vmem:[#allocation53_spill] sm:$0xff]  ;;  %v5569_v27 = vmul.f32 %v10278_v16, %v11744_v35 }
 0x373   : > { %v4554_v21 = vadd.f32 %v4453_v11, %v4310_v51  ;;  %v4555_v19 = vadd.f32 %v4455_v60, %v4311_v38  ;;  %v4943_v43 = vsel %vm1530_vm1, %v4940_v28, %v11752_v40  ;;  %v5187_v57 = vsel %vm2677_vm2, %v5184_v56, %v11754_v50  ;;  %v11757_v38 = vld [vmem:[#allocation58_spill] sm:$0xff]  ;;  %v6499_v60 = vpop.f32.mrb[46].mxu1 }
 0x374   : > { %v11756_v37 = vrot.slane %v11755_v10, 2  ;;  %v5570_v28 = vmul.f32 %v10278_v16, %v11740_v5  ;;  %v4192_v61 = vmul.f32 %v9271_v29, %v10064_v18  ;;  %v4193_v50 = vmul.f32 %v9271_v29, %v10044_v49  ;;  %v3995_v10 = vpop.f32.mrb[47].mxu1 }
 0x375   : > { %v4798_v51 = vadd.f32 %v4697_v54, %v4554_v21  ;;  %v4799_v47 = vadd.f32 %v11757_v38, %v4555_v19  ;;  %v4228_v56 = vmul.f32 %v9280_v62, %v10106_v30  ;;  %v4229_v21 = vmul.f32 %v9280_v62, %v10224_v42 }
 0x376   : > { %v5431_v22 = vsel %vm2677_vm2, %v5428_v39, %v11756_v37  ;;  %v5671_v11 = vrot.slane %v5569_v27, 2  ;;  %v5672_v45 = vrot.slane %v5570_v28, 2  ;;  %v4296_v36 = vmul.f32 %v9345_v12, %v10332_v7 }
 0x377   : > { %v5042_v39 = vadd.f32 %v4941_v58, %v4798_v51  ;;  %v5043_v54 = vadd.f32 %v4943_v43, %v4799_v47  ;;  %v4260_v1 = vadd.f32 %v4228_v56, %v4192_v61  ;;  %v4261_v19 = vadd.f32 %v4229_v21, %v4193_v50  ;;  %v11758_v58 = vld [vmem:[#allocation62_spill] sm:$0xff] }
 0x378   : > { %v4297_v40 = vmul.f32 %v9345_v12, %v10320_v13  ;;  %v4001_v17 = vadd.f32 %v10212_v32, %v6499_v60  ;;  %v5673_v14 = vsel %vm2677_vm2, %v5671_v11, %v5672_v45  ;;  %v3996_v43 = vadd.f32 %v10212_v32, %v3995_v10 }
 0x379   : > { %v5286_v37 = vadd.f32 %v5185_v4, %v5042_v39  ;;  %v5287_v38 = vadd.f32 %v5187_v57, %v5043_v54  ;;  %v11759_v51 = vrot.slane %v11758_v58, 2  ;;  %v4328_v27 = vadd.f32 %v4296_v36, %v4260_v1 }
 0x37a   : > { %v4329_v28 = vadd.f32 %v4297_v40, %v4261_v19  ;;  %v4081_v61 = vmax.f32 %v4001_v17, 0.0  ;;  %v4376_v21 = vmul.f32 %v9284_v31, %v10064_v18  ;;  %v10550_v60 = vmax.f32 %v3996_v43, 0.0 }
 0x37b   : > { %v5675_v47 = vsel %vm2677_vm2, %v5672_v45, %v11759_v51  ;;  %v5530_v50 = vadd.f32 %v5429_v3, %v5286_v37  ;;  %v5531_v56 = vadd.f32 %v5431_v22, %v5287_v38  ;;  %v4377_v4 = vmul.f32 %v9284_v31, %v10044_v49 }
 0x37c   : > { %v4620_v57 = vmul.f32 %v9290_v41, %v10106_v30  ;;  %v4621_v39 = vmul.f32 %v9290_v41, %v10224_v42  ;;  %v10560_v54 = vsel %vm4103_vm4, %v4081_v61, 0.0  ;;  %v4496_v11 = vrot.slane %v4376_v21, 1 }
 0x37d   : > { %v5774_v3 = vadd.f32 %v5673_v14, %v5530_v50  ;;  %v5775_v22 = vadd.f32 %v5675_v47, %v5531_v56  ;;  %v4387_v45 = vmul.f32 %v9284_v31, %v10560_v54  ;;  %v10566_v1 = vmul.f32 %v9290_v41, %v10560_v54 }
 0x37e   : > { %v10570_v19 = vmul.f32 %v9310_v63, %v10560_v54  ;;  %v10574_v36 = vmul.f32 %v9304_v44, %v10560_v54  ;;  %v10578_v14 = vmul.f32 %v9314_v46, %v10560_v54  ;;  %v4199_v17 = vmul.f32 %v9271_v29, %v10550_v60 }
 0x37f   : > { %11760 = vst [vmem:[#allocation11_spill] sm:$0xff] %v10566_v1  ;;  %v6563_v40 = vpack.c.bf16 %v5775_v22, %v5774_v3  ;;  %v10584_v10 = vmul.f32 %v9284_v31, %v10550_v60  ;;  %v4514_v37 = vrot.slane %v4387_v45, 1  ;;  %v4497_v61 = vrot.slane %v4377_v4, 1 }
 0x380   : > { %11761 = vst [vmem:[#allocation17_spill] sm:$0xff] %v10574_v36  ;;  %11762 = vst [vmem:[#allocation4_spill] sm:$0xff] %v10578_v14  ;;  %v4740_v50 = vrot.slane %v4620_v57, 1  ;;  %v4741_v56 = vrot.slane %v4621_v39, 1  ;;  %v4864_v21 = vmul.f32 %v9310_v63, %v10332_v7  ;;  %v4865_v3 = vmul.f32 %v9310_v63, %v10320_v13 }
 0x381   : > { %11763 = vst [vmem:[#allocation29_spill] sm:$0xff] %v10584_v10  ;;  %6564 = vmatpush3.bf16.xpose.msra.mxu1 %v6563_v40  ;;  %v11258_v47 = vrot.slane %v10584_v10, 1  ;;  %v5108_v22 = vmul.f32 %v9304_v44, %v10064_v18  ;;  %v4498_v40 = vsel %vm1530_vm1, %v4496_v11, %v4497_v61  ;;  %v11764_v58 = vrot.slane %v10122_v2, 1  ;;  %v6502_v39 = vpop.f32.mrb[48].mxu1 }
 0x382   : > { %v5109_v57 = vmul.f32 %v9304_v44, %v10044_v49  ;;  %v4572_v51 = vadd.f32 %v4498_v40, %v4328_v27  ;;  %v4742_v43 = vsel %vm1530_vm1, %v4740_v50, %v4741_v56  ;;  %v11765_v18 = vrot.slane %v10236_v6, 1 }
 0x383   : > { %v4515_v45 = vsel %vm1530_vm1, %v11258_v47, %v4514_v37  ;;  %v4500_v4 = vsel %vm1530_vm1, %v4497_v61, %v11764_v58  ;;  %v4011_v37 = vadd.f32 %v10212_v32, %v6502_v39  ;;  %v4005_v47 = vpop.f32.mrb[49].mxu1  ;;  %v4984_v11 = vrot.slane %v4864_v21, 1 }
 0x384   : > { %v4573_v38 = vadd.f32 %v4500_v4, %v4329_v28  ;;  %v4744_v36 = vsel %vm1530_vm1, %v4741_v56, %v11765_v18  ;;  %v4985_v10 = vrot.slane %v4865_v3, 1  ;;  %v5228_v2 = vrot.slane %v5108_v22, 2 }
 0x385   : > { %v4006_v58 = vadd.f32 %v10212_v32, %v4005_v47  ;;  %v4816_v61 = vadd.f32 %v4742_v43, %v4572_v51  ;;  %v5229_v49 = vrot.slane %v5109_v57, 2  ;;  %v10612_v1 = vmax.f32 %v4011_v37, 0.0 }
 0x386   : > { %v4817_v14 = vadd.f32 %v4744_v36, %v4573_v38  ;;  %v4986_v27 = vsel %vm1530_vm1, %v4984_v11, %v4985_v10  ;;  %v11766_v28 = vrot.slane %v10467_v23, 1  ;;  %v5352_v50 = vmul.f32 %v9314_v46, %v10106_v30  ;;  %v6505_v21 = vpop.f32.mrb[50].mxu1 }
 0x387   : > { %v4082_v56 = vmax.f32 %v4006_v58, 0.0  ;;  %v5060_v3 = vadd.f32 %v4986_v27, %v4816_v61  ;;  %v5230_v47 = vsel %vm2677_vm2, %v5228_v2, %v5229_v49  ;;  %v4235_v36 = vmul.f32 %v9280_v62, %v10612_v1  ;;  %v4015_v43 = vpop.f32.mrb[51].mxu1 }
 0x388   : > { %v4988_v6 = vsel %vm1530_vm1, %v4985_v10, %v11766_v28  ;;  %v10625_v38 = vmul.f32 %v9345_v12, %v10612_v1  ;;  %v10629_v23 = vmul.f32 %v9290_v41, %v10612_v1  ;;  %v10633_v10 = vmul.f32 %v9310_v63, %v10612_v1 }
 0x389   : > { %v5061_v22 = vadd.f32 %v4988_v6, %v4817_v14  ;;  %v10637_v14 = vsel %vm4092_vm3, %v4082_v56, 0.0  ;;  %v4016_v51 = vadd.f32 %v10212_v32, %v4015_v43  ;;  %v11767_v40 = vrot.slane %v10134_v52, 2 }
 0x38a   : > { %v5304_v57 = vadd.f32 %v5230_v47, %v5060_v3  ;;  %v4234_v39 = vmul.f32 %v9280_v62, %v10637_v14  ;;  %v4300_v18 = vmul.f32 %v9345_v12, %v10637_v14  ;;  %v10649_v37 = vmul.f32 %v9290_v41, %v10637_v14 }
 0x38b   : > { %v5232_v4 = vsel %vm2677_vm2, %v5229_v49, %v11767_v40  ;;  %v10653_v11 = vmul.f32 %v9310_v63, %v10637_v14  ;;  %v10657_v52 = vmul.f32 %v9314_v46, %v10637_v14  ;;  %v4084_v32 = vmax.f32 %v4016_v51, 0.0  ;;  %v6508_v61 = vpop.f32.mrb[52].mxu1 }
 0x38c   : > { %v4267_v2 = vadd.f32 %v4235_v36, %v4199_v17  ;;  %v11262_v58 = vrot.slane %v10629_v23, 1  ;;  %v4266_v49 = vadd.f32 %v4234_v39, %v10451_v8  ;;  %v10662_v27 = vadd.f32 %v4300_v18, %v10478_v59  ;;  %v4025_v56 = vpop.f32.mrb[53].mxu1  ;;  %v11772_v61 = vld [vmem:[#allocation47_spill] sm:$0xff] }
 0x38d   : > { %11768 = vst [vmem:[#allocation7_spill] sm:$0xff] %v10657_v52  ;;  %v4160_v3 = vsel %vm4103_vm4, %v4084_v32, 0.0  ;;  %v11263_v47 = vrot.slane %v10633_v10, 1  ;;  %v5305_v0 = vadd.f32 %v5232_v4, %v5061_v22  ;;  %v5353_v39 = vmul.f32 %v9314_v46, %v10224_v42 }
 0x38e   : > { %v4335_v17 = vadd.f32 %v10363_v20, %v4267_v2  ;;  %v10672_v36 = vadd.f32 %v10363_v20, %v4266_v49  ;;  %v4631_v8 = vmul.f32 %v9290_v41, %v4160_v3  ;;  %v4872_v59 = vmul.f32 %v9310_v63, %v4160_v3 }
 0x38f   : > { %v10677_v43 = vmul.f32 %v9314_v46, %v4160_v3  ;;  %v10680_v40 = vmul.f32 %v10278_v16, %v4160_v3  ;;  %v5472_v2 = vrot.slane %v5352_v50, 2  ;;  %v5473_v49 = vrot.slane %v5353_v39, 2 }
 0x390   : > { %v4579_v51 = vadd.f32 %v4515_v45, %v4335_v17  ;;  %v4758_v18 = vrot.slane %v4631_v8, 1  ;;  %v4997_v32 = vrot.slane %v4872_v59, 1  ;;  %v5596_v56 = vmul.f32 %v10278_v16, %v10332_v7 }
 0x391   : > { %11769 = vst [vmem:[#allocation35_spill] sm:$0xff] %v10677_v43  ;;  %v5597_v45 = vmul.f32 %v10278_v16, %v10320_v13  ;;  %v5598_v50 = vmul.f32 %v10278_v16, %v10447_v34  ;;  %v4177_v3 = vmul.f32 %v9271_v29, %v11714_v48  ;;  %v5474_v8 = vsel %vm2677_vm2, %v5472_v2, %v5473_v49  ;;  %v11771_v34 = vld [vmem:[#allocation21_spill] sm:$0xff] }
 0x392   : > { %v4759_v22 = vsel %vm1530_vm1, %v11262_v58, %v4758_v18  ;;  %v10696_v4 = vsel %vm1530_vm1, %v11263_v47, %v4997_v32  ;;  %v11770_v59 = vrot.slane %v10248_v24, 2  ;;  %v5716_v18 = vrot.slane %v5596_v56, 2  ;;  %v11773_v47 = vld [vmem:[#allocation63_spill] sm:$0xff] }
 0x393   : > { %v10702_v17 = vadd.f32 %v4759_v22, %v4579_v51  ;;  %v5548_v20 = vadd.f32 %v5474_v8, %v5304_v57  ;;  %v5717_v28 = vrot.slane %v5597_v45, 2  ;;  %v5719_v32 = vrot.slane %v5598_v50, 2  ;;  %v11774_v22 = vld [vmem:[#allocation5_spill] sm:$0xff]  ;;  %v11778_v45 = vld [vmem:[#allocation50_spill] sm:$0xff] }
 0x394   : > { %v5476_v39 = vsel %vm2677_vm2, %v5473_v49, %v11770_v59  ;;  %v4213_v58 = vmul.f32 %v9280_v62, %v11740_v5  ;;  %v4244_v6 = vadd.f32 %v11772_v61, %v11771_v34  ;;  %v4281_v51 = vmul.f32 %v9345_v12, %v11773_v47 }
 0x395   : > { %v5549_v21 = vadd.f32 %v5476_v39, %v5305_v0  ;;  %v11775_v2 = vrot.slane %v11774_v22, 1  ;;  %v11777_v24 = vrot.slane %v11776_v25, 1  ;;  %v5718_v57 = vsel %vm2677_vm2, %v5716_v18, %v5717_v28  ;;  %v11779_v39 = vld [vmem:[#allocation69_spill] sm:$0xff] }
 0x396   : > { %v5720_v0 = vsel %vm2677_vm2, %v5717_v28, %v5719_v32  ;;  %v4597_v56 = vmul.f32 %v9290_v41, %v11740_v5  ;;  %v4700_v50 = vrot.slane %v11778_v45, 1  ;;  %v5792_v8 = vadd.f32 %v5718_v57, %v5548_v20  ;;  %v11780_v22 = vld [vmem:[#allocation65_spill] sm:$0xff] }
 0x397   : > { %v4458_v49 = vsel %vm1530_vm1, %v11777_v24, %v11775_v2  ;;  %v5793_v61 = vadd.f32 %v5720_v0, %v5549_v21  ;;  %v4245_v59 = vadd.f32 %v4213_v58, %v4177_v3  ;;  %v4312_v34 = vadd.f32 %v11779_v39, %v4244_v6  ;;  %v11781_v21 = vld [vmem:[#allocation56_spill] sm:$0xff] }
 0x398   : > { %v4701_v43 = vrot.slane %v4597_v56, 1  ;;  %v4840_v25 = vmul.f32 %v9310_v63, %v11780_v22  ;;  %v4841_v2 = vmul.f32 %v9310_v63, %v11773_v47  ;;  %v5084_v28 = vmul.f32 %v9304_v44, %v11722_v53  ;;  %v11783_v56 = vld [vmem:[#allocation57_spill] sm:$0xff] }
 0x399   : > { %v6565_v18 = vpack.c.bf16 %v5793_v61, %v5792_v8  ;;  %v4313_v32 = vadd.f32 %v4281_v51, %v4245_v59  ;;  %v4556_v24 = vadd.f32 %v4458_v49, %v4312_v34  ;;  %v5085_v20 = vmul.f32 %v9304_v44, %v11714_v48  ;;  %v11784_v49 = vld [vmem:[#allocation76_spill] sm:$0xff] }
 0x39a   : > { %v4702_v58 = vsel %vm1530_vm1, %v4700_v50, %v4701_v43  ;;  %v11782_v6 = vrot.slane %v11781_v21, 1  ;;  %v4944_v57 = vrot.slane %v4840_v25, 1  ;;  %v4945_v0 = vrot.slane %v4841_v2, 1  ;;  %v11786_v25 = vld [vmem:[#allocation52_spill] sm:$0xff] }
 0x39b   : > { %6566 = vmatprep.subr.bf16.mxu1 %v6565_v18  ;;  %v4557_v45 = vadd.f32 %v11783_v56, %v4313_v32  ;;  %v4800_v39 = vadd.f32 %v4702_v58, %v4556_v24  ;;  %v5188_v52 = vrot.slane %v5084_v28, 2  ;;  %v5189_v53 = vrot.slane %v5085_v20, 2 }
 0x39c   : > { %v4704_v3 = vsel %vm1530_vm1, %v4701_v43, %v11782_v6  ;;  %v4946_v51 = vsel %vm1530_vm1, %v4944_v57, %v4945_v0  ;;  %v11785_v8 = vrot.slane %v11784_v49, 1  ;;  %v5328_v50 = vmul.f32 %v9314_v46, %v11744_v35  ;;  %v11788_v57 = vld [vmem:[#allocation61_spill] sm:$0xff] }
 0x39d   : > { %v5329_v43 = vmul.f32 %v9314_v46, %v11740_v5  ;;  %v4801_v61 = vadd.f32 %v4704_v3, %v4557_v45  ;;  %v5044_v59 = vadd.f32 %v4946_v51, %v4800_v39  ;;  %v5190_v34 = vsel %vm2677_vm2, %v5188_v52, %v5189_v53 }
 0x39e   : > { %v4948_v48 = vsel %vm1530_vm1, %v4945_v0, %v11785_v8  ;;  %v11787_v2 = vrot.slane %v11786_v25, 2  ;;  %v5432_v18 = vrot.slane %v5328_v50, 2  ;;  %v5572_v24 = vmul.f32 %v10278_v16, %v11780_v22  ;;  %v11790_v50 = vld [vmem:[#allocation79_spill] sm:$0xff] }
 0x39f   : > { %v5433_v32 = vrot.slane %v5329_v43, 2  ;;  %v5573_v20 = vmul.f32 %v10278_v16, %v11773_v47  ;;  %v5045_v58 = vadd.f32 %v4948_v48, %v4801_v61  ;;  %v5288_v21 = vadd.f32 %v5190_v34, %v5044_v59 }
 0x3a0   : > { %v5192_v28 = vsel %vm2677_vm2, %v5189_v53, %v11787_v2  ;;  %v4194_v6 = vmul.f32 %v9271_v29, %v10106_v30  ;;  %v4195_v52 = vmul.f32 %v9271_v29, %v10224_v42  ;;  %v11789_v0 = vrot.slane %v11788_v57, 2 }
 0x3a1   : > { %v5434_v3 = vsel %vm2677_vm2, %v5432_v18, %v5433_v32  ;;  %v5676_v45 = vrot.slane %v5572_v24, 2  ;;  %v5677_v39 = vrot.slane %v5573_v20, 2  ;;  %v5289_v53 = vadd.f32 %v5192_v28, %v5045_v58 }
 0x3a2   : > { %v5436_v56 = vsel %vm2677_vm2, %v5433_v32, %v11789_v0  ;;  %v5532_v51 = vadd.f32 %v5434_v3, %v5288_v21  ;;  %v4230_v49 = vmul.f32 %v9280_v62, %v10332_v7  ;;  %v4231_v8 = vmul.f32 %v9280_v62, %v10320_v13 }
 0x3a3   : > { %v5678_v48 = vsel %vm2677_vm2, %v5676_v45, %v5677_v39  ;;  %v11791_v43 = vrot.slane %v11790_v50, 2  ;;  %v4298_v59 = vmul.f32 %v9345_v12, %v10443_v26  ;;  %v4299_v34 = vmul.f32 %v9345_v12, %v10550_v60 }
 0x3a4   : > { %v5533_v25 = vadd.f32 %v5436_v56, %v5289_v53  ;;  %v5776_v2 = vadd.f32 %v5678_v48, %v5532_v51  ;;  %v4262_v28 = vadd.f32 %v4230_v49, %v4194_v6  ;;  %v4263_v18 = vadd.f32 %v4231_v8, %v4195_v52 }
 0x3a5   : > { %v5680_v61 = vsel %vm2677_vm2, %v5677_v39, %v11791_v43  ;;  %v4379_v32 = vmul.f32 %v9284_v31, %v10106_v30  ;;  %v4380_v24 = vmul.f32 %v9284_v31, %v10224_v42  ;;  %v4623_v20 = vmul.f32 %v9290_v41, %v10332_v7 }
 0x3a6   : > { %v4624_v58 = vmul.f32 %v9290_v41, %v10320_v13  ;;  %v5777_v21 = vadd.f32 %v5680_v61, %v5533_v25  ;;  %v4330_v3 = vadd.f32 %v4298_v59, %v4262_v28  ;;  %v4331_v57 = vadd.f32 %v4299_v34, %v4263_v18 }
 0x3a7   : > { %v4867_v0 = vmul.f32 %v9310_v63, %v10443_v26  ;;  %v4501_v6 = vrot.slane %v4379_v32, 1  ;;  %v4502_v52 = vrot.slane %v4380_v24, 1  ;;  %v4745_v56 = vrot.slane %v4623_v20, 1 }
 0x3a8   : > { %v4746_v45 = vrot.slane %v4624_v58, 1  ;;  %v6567_v39 = vpack.c.bf16 %v5777_v21, %v5776_v2  ;;  %v4868_v53 = vmul.f32 %v9310_v63, %v10550_v60  ;;  %v5111_v49 = vmul.f32 %v9304_v44, %v10106_v30 }
 0x3a9   : > { %v4989_v51 = vrot.slane %v4867_v0, 1  ;;  %v4503_v8 = vsel %vm1530_vm1, %v4501_v6, %v4502_v52  ;;  %v11792_v48 = vrot.slane %v10232_v15, 1  ;;  %v11793_v61 = vrot.slane %v10463_v33, 1 }
 0x3aa   : > { %v4747_v43 = vsel %vm1530_vm1, %v4745_v56, %v4746_v45  ;;  %6568 = vmatpush3.bf16.xpose.msra.mxu1 %v6567_v39  ;;  %v4574_v34 = vadd.f32 %v4503_v8, %v4330_v3  ;;  %v4990_v2 = vrot.slane %v4868_v53, 1  ;;  %v5112_v28 = vmul.f32 %v9304_v44, %v10224_v42  ;;  %v11795_v53 = vld [vmem:[#allocation9_spill] sm:$0xff] }
 0x3ab   : > { %v4505_v50 = vsel %vm1530_vm1, %v4502_v52, %v11792_v48  ;;  %v4749_v59 = vsel %vm1530_vm1, %v4746_v45, %v11793_v61  ;;  %v5233_v30 = vrot.slane %v5111_v49, 2  ;;  %v5355_v18 = vmul.f32 %v9314_v46, %v10332_v7 }
 0x3ac   : > { %v4575_v25 = vadd.f32 %v4505_v50, %v4331_v57  ;;  %v5356_v15 = vmul.f32 %v9314_v46, %v10320_v13  ;;  %v5599_v32 = vmul.f32 %v10278_v16, %v10443_v26  ;;  %v4818_v33 = vadd.f32 %v4747_v43, %v4574_v34 }
 0x3ad   : > { %v4991_v20 = vsel %vm1530_vm1, %v4989_v51, %v4990_v2  ;;  %v11794_v58 = vrot.slane %v10570_v19, 1  ;;  %v5234_v3 = vrot.slane %v5112_v28, 2  ;;  %v5477_v42 = vrot.slane %v5355_v18, 2 }
 0x3ae   : > { %v4819_v24 = vadd.f32 %v4749_v59, %v4575_v25  ;;  %v5478_v57 = vrot.slane %v5356_v15, 2  ;;  %v5600_v0 = vmul.f32 %v10278_v16, %v10550_v60  ;;  %v5062_v6 = vadd.f32 %v4991_v20, %v4818_v33  ;;  %v11798_v25 = vld [vmem:[#allocation37_spill] sm:$0xff]  ;;  %v11801_v20 = vld [vmem:[#allocation74_spill] sm:$0xff] }
 0x3af   : > { %v4993_v21 = vsel %vm1530_vm1, %v4990_v2, %v11794_v58  ;;  %v5601_v56 = vmul.f32 %v10278_v16, %v10560_v54  ;;  %v5721_v45 = vrot.slane %v5599_v32, 2  ;;  %v5235_v39 = vsel %vm2677_vm2, %v5233_v30, %v5234_v3  ;;  %v11799_v2 = vld [vmem:[#allocation67_spill] sm:$0xff]  ;;  %v11800_v30 = vld [vmem:[#allocation90_spill] sm:$0xff] }
 0x3b0   : > { %v5063_v52 = vadd.f32 %v4993_v21, %v4819_v24  ;;  %v11796_v51 = vrot.slane %v11795_v53, 2  ;;  %v5479_v49 = vsel %vm2677_vm2, %v5477_v42, %v5478_v57  ;;  %v11797_v8 = vrot.slane %v10475_v55, 2  ;;  %v11804_v53 = vld [vmem:[#allocation64_spill] sm:$0xff] }
 0x3b1   : > { %v5306_v50 = vadd.f32 %v5235_v39, %v5062_v6  ;;  %v5722_v61 = vrot.slane %v5600_v0, 2  ;;  %v5724_v59 = vrot.slane %v5601_v56, 2  ;;  %v4179_v54 = vmul.f32 %v9271_v29, %v11740_v5  ;;  %v11803_v6 = vld [vmem:[#allocation70_spill] sm:$0xff] }
 0x3b2   : > { %v5237_v19 = vsel %vm2677_vm2, %v5234_v3, %v11796_v51  ;;  %v5481_v48 = vsel %vm2677_vm2, %v5478_v57, %v11797_v8  ;;  %v4215_v34 = vmul.f32 %v9280_v62, %v11773_v47  ;;  %v4246_v28 = vadd.f32 %v11799_v2, %v11798_v25  ;;  %v11802_v3 = vld [vmem:[#allocation71_spill] sm:$0xff] }
 0x3b3   : > { %v5307_v43 = vadd.f32 %v5237_v19, %v5063_v52  ;;  %v4283_v18 = vmul.f32 %v9345_v12, %v11800_v30  ;;  %v5550_v15 = vadd.f32 %v5479_v49, %v5306_v50  ;;  %v5723_v32 = vsel %vm2677_vm2, %v5721_v45, %v5722_v61 }
 0x3b4   : > { %v5725_v33 = vsel %vm2677_vm2, %v5722_v61, %v5724_v59  ;;  %v4247_v24 = vadd.f32 %v4215_v34, %v4179_v54  ;;  %v4314_v58 = vadd.f32 %v11801_v20, %v4246_v28  ;;  %v4356_v21 = vmul.f32 %v9284_v31, %v11740_v5  ;;  %v11806_v61 = vld [vmem:[#allocation48_spill] sm:$0xff]  ;;  %v11808_v34 = vld [vmem:[#allocation55_spill] sm:$0xff] }
 0x3b5   : > { %v5551_v55 = vadd.f32 %v5481_v48, %v5307_v43  ;;  %v4705_v42 = vrot.slane %v11802_v3, 1  ;;  %v5794_v57 = vadd.f32 %v5723_v32, %v5550_v15  ;;  %v4843_v52 = vmul.f32 %v9310_v63, %v11803_v6  ;;  %v11810_v32 = vld [vmem:[#allocation85_spill] sm:$0xff] }
 0x3b6   : > { %v4844_v56 = vmul.f32 %v9310_v63, %v11800_v30  ;;  %v4315_v39 = vadd.f32 %v4283_v18, %v4247_v24  ;;  %v4462_v45 = vrot.slane %v4356_v21, 1  ;;  %v11805_v51 = vrot.slane %v11804_v53, 1 }
 0x3b7   : > { %v5795_v0 = vadd.f32 %v5725_v33, %v5551_v55  ;;  %v5087_v49 = vmul.f32 %v9304_v44, %v11744_v35  ;;  %v4949_v48 = vrot.slane %v4843_v52, 1  ;;  %v5088_v43 = vmul.f32 %v9304_v44, %v11740_v5 }
 0x3b8   : > { %v4707_v19 = vsel %vm1530_vm1, %v4705_v42, %v11805_v51  ;;  %v4950_v50 = vrot.slane %v4844_v56, 1  ;;  %v11807_v59 = vrot.slane %v11806_v61, 1  ;;  %v11809_v25 = vrot.slane %v11808_v34, 1 }
 0x3b9   : > { %v6569_v8 = vpack.c.bf16 %v5795_v0, %v5794_v57  ;;  %v5193_v28 = vrot.slane %v5087_v49, 2  ;;  %v5331_v18 = vmul.f32 %v9314_v46, %v11780_v22  ;;  %v11811_v33 = vrot.slane %v11810_v32, 1  ;;  %v11812_v57 = vld [vmem:[#allocation82_spill] sm:$0xff] }
 0x3ba   : > { %v4463_v54 = vsel %vm1530_vm1, %v11807_v59, %v4462_v45  ;;  %v4465_v2 = vsel %vm1530_vm1, %v4462_v45, %v11809_v25  ;;  %v4951_v55 = vsel %vm1530_vm1, %v4949_v48, %v4950_v50  ;;  %v5194_v24 = vrot.slane %v5088_v43, 2 }
 0x3bb   : > { %6570 = vmatprep.subr.bf16.mxu1 %v6569_v8  ;;  %v4558_v35 = vadd.f32 %v4463_v54, %v4314_v58  ;;  %v4559_v15 = vadd.f32 %v4465_v2, %v4315_v39  ;;  %v4953_v5 = vsel %vm1530_vm1, %v4950_v50, %v11811_v33  ;;  %v5332_v20 = vmul.f32 %v9314_v46, %v11773_v47  ;;  %v11813_v39 = vld [vmem:[#allocation60_spill] sm:$0xff] }
 0x3bc   : > { %v5437_v21 = vrot.slane %v5331_v18, 2  ;;  %v5575_v3 = vmul.f32 %v10278_v16, %v11803_v6  ;;  %v5576_v58 = vmul.f32 %v10278_v16, %v11800_v30  ;;  %v4197_v52 = vmul.f32 %v9271_v29, %v10320_v13  ;;  %v11815_v16 = vld [vmem:[#allocation78_spill] sm:$0xff]  ;;  %v11817_v18 = vld [vmem:[#allocation88_spill] sm:$0xff] }
 0x3bd   : > { %v4802_v42 = vadd.f32 %v4707_v19, %v4558_v35  ;;  %v4803_v0 = vadd.f32 %v11812_v57, %v4559_v15  ;;  %v5195_v56 = vsel %vm2677_vm2, %v5193_v28, %v5194_v24  ;;  %v11814_v45 = vrot.slane %v11813_v39, 2 }
 0x3be   : > { %v5438_v51 = vrot.slane %v5332_v20, 2  ;;  %v5681_v49 = vrot.slane %v5575_v3, 2  ;;  %v5682_v50 = vrot.slane %v5576_v58, 2  ;;  %v4233_v19 = vmul.f32 %v9280_v62, %v10550_v60 }
 0x3bf   : > { %v5197_v53 = vsel %vm2677_vm2, %v5194_v24, %v11814_v45  ;;  %v5046_v8 = vadd.f32 %v4951_v55, %v4802_v42  ;;  %v5047_v48 = vadd.f32 %v4953_v5, %v4803_v0  ;;  %v11816_v61 = vrot.slane %v11815_v16, 2 }
 0x3c0   : > { %v5439_v43 = vsel %vm2677_vm2, %v5437_v21, %v5438_v51  ;;  %v4382_v54 = vmul.f32 %v9284_v31, %v10332_v7  ;;  %v4383_v34 = vmul.f32 %v9284_v31, %v10320_v13  ;;  %v5683_v28 = vsel %vm2677_vm2, %v5681_v49, %v5682_v50 }
 0x3c1   : > { %v5441_v59 = vsel %vm2677_vm2, %v5438_v51, %v11816_v61  ;;  %v5290_v25 = vadd.f32 %v5195_v56, %v5046_v8  ;;  %v5291_v2 = vadd.f32 %v5197_v53, %v5047_v48  ;;  %v11818_v35 = vrot.slane %v11817_v18, 2 }
 0x3c2   : > { %v4265_v55 = vadd.f32 %v4233_v19, %v4197_v52  ;;  %v4506_v32 = vrot.slane %v4382_v54, 1  ;;  %v4507_v33 = vrot.slane %v4383_v34, 1  ;;  %v4626_v5 = vmul.f32 %v9290_v41, %v10443_v26  ;;  %v10914_v34 = vld [vmem:[%s11095_s5 + $0x8] ss:$0 sm:$0xff] }
 0x3c3   : > { %v5685_v15 = vsel %vm2677_vm2, %v5682_v50, %v11818_v35  ;;  %v5534_v24 = vadd.f32 %v5439_v43, %v5290_v25  ;;  %v5535_v20 = vadd.f32 %v5441_v59, %v5291_v2  ;;  %v4627_v21 = vmul.f32 %v9290_v41, %v10550_v60  ;;  %v11822_v50 = vld [vmem:[#allocation11_spill] sm:$0xff] }
 0x3c4   : > { %v11819_v3 = vrot.slane %v10633_v10, 1  ;;  %v11820_v42 = vrot.slane %v10653_v11, 1  ;;  %v4333_v0 = vadd.f32 %v10625_v38, %v4265_v55  ;;  %v4508_v58 = vsel %vm1530_vm1, %v4506_v32, %v4507_v33 }
 0x3c5   : > { %v11821_v52 = vrot.slane %v10459_v9, 1  ;;  %v4750_v39 = vrot.slane %v4626_v5, 1  ;;  %v5778_v45 = vadd.f32 %v5683_v28, %v5534_v24  ;;  %v5779_v53 = vadd.f32 %v5685_v15, %v5535_v20  ;;  %v11824_v15 = vld [vmem:[#allocation15_spill] sm:$0xff]  ;;  %v11826_v5 = vld [vmem:[#allocation4_spill] sm:$0xff] }
 0x3c6   : > { %v4996_v57 = vsel %vm1530_vm1, %v11820_v42, %v11819_v3  ;;  %v4576_v51 = vadd.f32 %v4508_v58, %v10662_v27  ;;  %v4751_v49 = vrot.slane %v4627_v21, 1  ;;  %v5114_v10 = vmul.f32 %v9304_v44, %v10332_v7 }
 0x3c7   : > { %v4510_v56 = vsel %vm1530_vm1, %v4507_v33, %v11821_v52  ;;  %v5115_v11 = vmul.f32 %v9304_v44, %v10320_v13  ;;  %v5358_v38 = vmul.f32 %v9314_v46, %v10443_v26  ;;  %v6571_v48 = vpack.c.bf16 %v5779_v53, %v5778_v45  ;;  %v11831_v53 = vld [vmem:[#allocation89_spill] sm:$0xff] }
 0x3c8   : > { %v4577_v8 = vadd.f32 %v4510_v56, %v4333_v0  ;;  %v4752_v9 = vsel %vm1530_vm1, %v4750_v39, %v4751_v49  ;;  %v11823_v19 = vrot.slane %v11822_v50, 1  ;;  %v5359_v27 = vmul.f32 %v9314_v46, %v10550_v60  ;;  %v11829_v56 = vld [vmem:[#allocation66_spill] sm:$0xff]  ;;  %v11830_v39 = vld [vmem:[#allocation73_spill] sm:$0xff] }
 0x3c9   : > { %v4820_v16 = vadd.f32 %v4752_v9, %v4576_v51  ;;  %v5238_v59 = vrot.slane %v5114_v10, 2  ;;  %v5239_v7 = vrot.slane %v5115_v11, 2  ;;  %6572 = vmatpush3.bf16.xpose.msra.mxu1 %v6571_v48  ;;  %v5482_v54 = vrot.slane %v5358_v38, 2  ;;  %v11832_v11 = vld [vmem:[#allocation26_spill] sm:$0xff]  ;;  %v11834_v48 = vld [vmem:[#allocation68_spill] sm:$0xff] }
 0x3ca   : > { %v4754_v43 = vsel %vm1530_vm1, %v4751_v49, %v11823_v19  ;;  %v5483_v13 = vrot.slane %v5359_v27, 2  ;;  %v5602_v25 = vmul.f32 %v10914_v34, %v10637_v14  ;;  %v5603_v2 = vmul.f32 %v10914_v34, %v10612_v1  ;;  %v11836_v19 = vld [vmem:[#allocation96_spill] sm:$0xff] }
 0x3cb   : > { %v4821_v61 = vadd.f32 %v4754_v43, %v4577_v8  ;;  %v5064_v28 = vadd.f32 %v4996_v57, %v4820_v16  ;;  %v5240_v35 = vsel %vm2677_vm2, %v5238_v59, %v5239_v7  ;;  %v11825_v55 = vrot.slane %v11824_v15, 2  ;;  %v11837_v27 = vld [vmem:[#allocation80_spill] sm:$0xff] }
 0x3cc   : > { %v5484_v33 = vsel %vm2677_vm2, %v5482_v54, %v5483_v13  ;;  %v11827_v24 = vrot.slane %v11826_v5, 2  ;;  %v5726_v21 = vrot.slane %v5602_v25, 2  ;;  %v5727_v14 = vrot.slane %v5603_v2, 2 }
 0x3cd   : > { %v5065_v18 = vadd.f32 %v10696_v4, %v4821_v61  ;;  %v5242_v32 = vsel %vm2677_vm2, %v5239_v7, %v11825_v55  ;;  %v5308_v3 = vadd.f32 %v5240_v35, %v5064_v28  ;;  %v4181_v57 = vmul.f32 %v9271_v29, %v11773_v47  ;;  %v11838_v61 = vld [vmem:[#allocation93_spill] sm:$0xff] }
 0x3ce   : > { %v5486_v20 = vsel %vm2677_vm2, %v5483_v13, %v11827_v24  ;;  %v4217_v4 = vmul.f32 %v9280_v62, %v11800_v30  ;;  %v5728_v0 = vsel %vm2677_vm2, %v5726_v21, %v5727_v14  ;;  %v11828_v58 = vrot.slane %v10680_v40, 2  ;;  %v11839_v55 = vld [vmem:[#allocation81_spill] sm:$0xff]  ;;  %v11840_v24 = vld [vmem:[#allocation84_spill] sm:$0xff] }
 0x3cf   : > { %v5309_v42 = vadd.f32 %v5242_v32, %v5065_v18  ;;  %v4248_v45 = vadd.f32 %v11830_v39, %v11829_v56  ;;  %v4285_v51 = vmul.f32 %v9345_v12, %v11831_v53  ;;  %v5552_v49 = vadd.f32 %v5484_v33, %v5308_v3 }
 0x3d0   : > { %v5730_v52 = vsel %vm2677_vm2, %v5727_v14, %v11828_v58  ;;  %v4249_v10 = vadd.f32 %v4217_v4, %v4181_v57  ;;  %v11833_v38 = vrot.slane %v11832_v11, 1  ;;  %v11835_v9 = vrot.slane %v11834_v48, 1  ;;  %v11842_v4 = vld [vmem:[#allocation98_spill] sm:$0xff]  ;;  %v11844_v11 = vld [vmem:[#allocation77_spill] sm:$0xff] }
 0x3d1   : > { %v5553_v8 = vadd.f32 %v5486_v20, %v5309_v42  ;;  %v4316_v43 = vadd.f32 %v11836_v19, %v4248_v45  ;;  %v4603_v40 = vmul.f32 %v9290_v41, %v11800_v30  ;;  %v4710_v16 = vrot.slane %v11837_v27, 1 }
 0x3d2   : > { %v4468_v50 = vsel %vm1530_vm1, %v11835_v9, %v11833_v38  ;;  %v4846_v59 = vmul.f32 %v9310_v63, %v11838_v61  ;;  %v5796_v7 = vadd.f32 %v5728_v0, %v5552_v49  ;;  %v4317_v13 = vadd.f32 %v4285_v51, %v4249_v10 }
 0x3d3   : > { %v5797_v54 = vadd.f32 %v5730_v52, %v5553_v8  ;;  %v4847_v25 = vmul.f32 %v9310_v63, %v11831_v53  ;;  %v4560_v2 = vadd.f32 %v4468_v50, %v4316_v43  ;;  %v4711_v28 = vrot.slane %v4603_v40, 1 }
 0x3d4   : > { %v4954_v18 = vrot.slane %v4846_v59, 1  ;;  %v5090_v35 = vmul.f32 %v9304_v44, %v11780_v22  ;;  %v4561_v41 = vadd.f32 %v11839_v55, %v4317_v13  ;;  %v5091_v33 = vmul.f32 %v9304_v44, %v11773_v47  ;;  %v11846_v59 = vld [vmem:[#allocation87_spill] sm:$0xff]  ;;  %v11850_v55 = vld [vmem:[#allocation101_spill] sm:$0xff] }
 0x3d5   : > { %v6573_v15 = vpack.c.bf16 %v5797_v54, %v5796_v7  ;;  %v4955_v32 = vrot.slane %v4847_v25, 1  ;;  %v4712_v5 = vsel %vm1530_vm1, %v4710_v16, %v4711_v28  ;;  %v11841_v20 = vrot.slane %v11840_v24, 1 }
 0x3d6   : > { %v5198_v14 = vrot.slane %v5090_v35, 2  ;;  %v5334_v3 = vmul.f32 %v9314_v46, %v11803_v6  ;;  %v4804_v42 = vadd.f32 %v4712_v5, %v4560_v2  ;;  %v11843_v0 = vrot.slane %v11842_v4, 1 }
 0x3d7   : > { %v4714_v21 = vsel %vm1530_vm1, %v4711_v28, %v11841_v20  ;;  %6574 = vmatprep.subr.bf16.mxu1 %v6573_v15  ;;  %v4956_v57 = vsel %vm1530_vm1, %v4954_v18, %v4955_v32  ;;  %v5199_v47 = vrot.slane %v5091_v33, 2  ;;  %v5335_v52 = vmul.f32 %v9314_v46, %v11800_v30  ;;  %v11852_v33 = vld [vmem:[#allocation29_spill] sm:$0xff] }
 0x3d8   : > { %v4805_v22 = vadd.f32 %v4714_v21, %v4561_v41  ;;  %v4958_v58 = vsel %vm1530_vm1, %v4955_v32, %v11843_v0  ;;  %v5442_v56 = vrot.slane %v5334_v3, 2  ;;  %v5578_v39 = vmul.f32 %v10914_v34, %v11838_v61 }
 0x3d9   : > { %v5048_v45 = vadd.f32 %v4956_v57, %v4804_v42  ;;  %v5579_v49 = vmul.f32 %v10914_v34, %v11831_v53  ;;  %v4385_v8 = vmul.f32 %v9284_v31, %v10443_v26  ;;  %v5200_v10 = vsel %vm2677_vm2, %v5198_v14, %v5199_v47 }
 0x3da   : > { %v5049_v51 = vadd.f32 %v4958_v58, %v4805_v22  ;;  %v11845_v38 = vrot.slane %v11844_v11, 2  ;;  %v5443_v9 = vrot.slane %v5335_v52, 2  ;;  %v5686_v50 = vrot.slane %v5578_v39, 2  ;;  %v11858_v11 = vld [vmem:[#allocation35_spill] sm:$0xff] }
 0x3db   : > { %v5292_v19 = vadd.f32 %v5200_v10, %v5048_v45  ;;  %v5687_v40 = vrot.slane %v5579_v49, 2  ;;  %v4511_v27 = vrot.slane %v4385_v8, 1  ;;  %v11847_v7 = vrot.slane %v11846_v59, 2  ;;  %v11856_v49 = vld [vmem:[#allocation7_spill] sm:$0xff]  ;;  %v11863_v59 = vld [vmem:[#allocation97_spill] sm:$0xff] }
 0x3dc   : > { %v5202_v48 = vsel %vm2677_vm2, %v5199_v47, %v11845_v38  ;;  %v5444_v16 = vsel %vm2677_vm2, %v5442_v56, %v5443_v9  ;;  %v11848_v13 = vrot.slane %v10629_v23, 1  ;;  %v11849_v25 = vrot.slane %v10649_v37, 1  ;;  %v11854_v56 = vld [vmem:[#allocation17_spill] sm:$0xff] }
 0x3dd   : > { %v5293_v43 = vadd.f32 %v5202_v48, %v5049_v51  ;;  %v5446_v54 = vsel %vm2677_vm2, %v5443_v9, %v11847_v7  ;;  %v4873_v28 = vmul.f32 0.0, %v9310_v63  ;;  %v5536_v18 = vadd.f32 %v5444_v16, %v5292_v19  ;;  %v11860_v48 = vld [vmem:[#allocation72_spill] sm:$0xff]  ;;  %v11861_v9 = vld [vmem:[#allocation95_spill] sm:$0xff] }
 0x3de   : > { %v4757_v2 = vsel %vm1530_vm1, %v11849_v25, %v11848_v13  ;;  %v5688_v15 = vsel %vm2677_vm2, %v5686_v50, %v5687_v40  ;;  %v11851_v41 = vrot.slane %v11850_v55, 2  ;;  %v11853_v5 = vrot.slane %v11852_v33, 1  ;;  %v11865_v25 = vld [vmem:[#allocation99_spill] sm:$0xff] }
 0x3df   : > { %v5537_v35 = vadd.f32 %v5446_v54, %v5293_v43  ;;  %v4999_v20 = vrot.slane %v4873_v28, 1  ;;  %v5117_v23 = vmul.f32 %v9304_v44, %v10443_v26  ;;  %v5118_v37 = vmul.f32 %v9304_v44, %v10550_v60  ;;  %v11862_v43 = vld [vmem:[#allocation92_spill] sm:$0xff]  ;;  %v11864_v54 = vld [vmem:[#allocation94_spill] sm:$0xff]  ;;  %v11868_v33 = vld [vmem:[#allocation75_spill] sm:$0xff] }
 0x3e0   : > { %v5690_v32 = vsel %vm2677_vm2, %v5687_v40, %v11851_v41  ;;  %v4513_v24 = vsel %vm1530_vm1, %v4511_v27, %v11853_v5  ;;  %v5780_v21 = vadd.f32 %v5688_v15, %v5536_v18  ;;  %v5362_v42 = vmul.f32 %v9314_v46, %v10612_v1 }
 0x3e1   : > { %v5781_v14 = vadd.f32 %v5690_v32, %v5537_v35  ;;  %v4578_v3 = vadd.f32 %v4513_v24, %v10672_v36  ;;  %v5067_v22 = vadd.f32 %v4999_v20, %v10702_v17  ;;  %v5243_v57 = vrot.slane %v5117_v23, 2 }
 0x3e2   : > { %v5244_v4 = vrot.slane %v5118_v37, 2  ;;  %v5605_v0 = vmul.f32 0.0, %v10914_v34  ;;  %v5488_v52 = vrot.slane %v5362_v42, 2  ;;  %v4183_v26 = vmul.f32 %v9271_v29, %v11800_v30 }
 0x3e3   : > { %v6575_v58 = vpack.c.bf16 %v5781_v14, %v5780_v21  ;;  %v4822_v47 = vadd.f32 %v4757_v2, %v4578_v3  ;;  %v11855_v39 = vrot.slane %v11854_v56, 2  ;;  %v4219_v1 = vmul.f32 %v9280_v62, %v11831_v53  ;;  %v11874_v56 = vld [vmem:[#allocation103_spill] sm:$0xff] }
 0x3e4   : > { %v5245_v60 = vsel %vm2677_vm2, %v5243_v57, %v5244_v4  ;;  %v5731_v45 = vrot.slane %v5605_v0, 2  ;;  %v11857_v8 = vrot.slane %v11856_v49, 2  ;;  %v11859_v38 = vrot.slane %v11858_v11, 2 }
 0x3e5   : > { %v5247_v36 = vsel %vm2677_vm2, %v5244_v4, %v11855_v39  ;;  %6576 = vmatpush3.bf16.xpose.msra.mxu1 %v6575_v58  ;;  %v5066_v17 = vadd.f32 %v4999_v20, %v4822_v47  ;;  %v4250_v50 = vadd.f32 %v11861_v9, %v11860_v48  ;;  %v4251_v19 = vadd.f32 %v4219_v1, %v4183_v26  ;;  %v11870_v20 = vld [vmem:[#allocation83_spill] sm:$0xff]  ;;  %v11872_v4 = vld [vmem:[#allocation102_spill] sm:$0xff] }
 0x3e6   : > { %v5311_v51 = vadd.f32 %v5247_v36, %v5067_v22  ;;  %v5489_v10 = vsel %vm2677_vm2, %v11857_v8, %v5488_v52  ;;  %v5491_v29 = vsel %vm2677_vm2, %v5488_v52, %v11859_v38  ;;  %v4287_v40 = vmul.f32 %v9345_v12, %v11862_v43  ;;  %v11866_v12 = vld [vmem:[#allocation91_spill] sm:$0xff] }
 0x3e7   : > { %v4362_v62 = vmul.f32 %v9284_v31, %v11800_v30  ;;  %v5310_v27 = vadd.f32 %v5245_v60, %v5066_v17  ;;  %v4715_v7 = vrot.slane %v11863_v59, 1  ;;  %v4849_v13 = vmul.f32 %v9310_v63, %v11864_v54 }
 0x3e8   : > { %v5555_v16 = vadd.f32 %v5491_v29, %v5311_v51  ;;  %v4318_v2 = vadd.f32 %v11865_v25, %v4250_v50  ;;  %v4319_v28 = vadd.f32 %v4287_v40, %v4251_v19  ;;  %v4850_v35 = vmul.f32 %v9310_v63, %v11862_v43  ;;  %v11875_v51 = vld [vmem:[#allocation86_spill] sm:$0xff]  ;;  %v11878_v50 = vld [vmem:[#allocation100_spill] sm:$0xff] }
 0x3e9   : > { %v4472_v18 = vrot.slane %v4362_v62, 1  ;;  %v5554_v15 = vadd.f32 %v5489_v10, %v5310_v27  ;;  %v11867_v41 = vrot.slane %v11866_v12, 1  ;;  %v4959_v32 = vrot.slane %v4849_v13, 1 }
 0x3ea   : > { %v5799_v55 = vadd.f32 %v5731_v45, %v5555_v16  ;;  %v11869_v5 = vrot.slane %v11868_v33, 1  ;;  %v11871_v23 = vrot.slane %v11870_v20, 1  ;;  %v4960_v21 = vrot.slane %v4850_v35, 1  ;;  %v5803_v16 = vld [vmem:[%s11097_s7 + $0x8] sm:$0x1] }
 0x3eb   : > { %v4717_v31 = vsel %vm1530_vm1, %v4715_v7, %v11867_v41  ;;  %v5093_v14 = vmul.f32 %v9304_v44, %v11803_v6  ;;  %v5798_v63 = vadd.f32 %v5731_v45, %v5554_v15  ;;  %v5094_v22 = vmul.f32 %v9304_v44, %v11800_v30 }
 0x3ec   : > { %v4473_v24 = vsel %vm1530_vm1, %v11869_v5, %v4472_v18  ;;  %v4475_v37 = vsel %vm1530_vm1, %v4472_v18, %v11871_v23  ;;  %v4961_v57 = vsel %vm1530_vm1, %v4959_v32, %v4960_v21  ;;  %v11873_v0 = vrot.slane %v11872_v4, 1 }
 0x3ed   : > { %v4562_v3 = vadd.f32 %v4473_v24, %v4318_v2  ;;  %v4563_v42 = vadd.f32 %v4475_v37, %v4319_v28  ;;  %v5203_v47 = vrot.slane %v5093_v14, 2  ;;  %v5337_v52 = vmul.f32 %v9314_v46, %v11838_v61  ;;  %v5801_v2 = vld [vmem:[%s11096_s6 + $0x8] sm:$0x1]  ;;  %v6606_v28 = vld [vmem:[%s11096_s6] sm:$0xff] }
 0x3ee   : > { %v4963_v58 = vsel %vm1530_vm1, %v4960_v21, %v11873_v0  ;;  %v6577_v26 = vpack.c.bf16 %v5799_v55, %v5798_v63  ;;  %v5204_v39 = vrot.slane %v5094_v22, 2  ;;  %v5338_v36 = vmul.f32 %v9314_v46, %v11831_v53  ;;  %v5802_v46 = vld [vmem:[%s11097_s7] sm:$0xff]  ;;  %v11877_v53 = vld [vmem:[#allocation104_spill] sm:$0xff] }
 0x3ef   : > { %v4806_v60 = vadd.f32 %v4717_v31, %v4562_v3  ;;  %v4807_v6 = vadd.f32 %v11874_v56, %v4563_v42  ;;  %v5447_v45 = vrot.slane %v5337_v52, 2  ;;  %v5581_v44 = vmul.f32 %v10914_v34, %v11864_v54  ;;  %v11880_v63 = vld [vmem:[#allocation2_spill] sm:$0xff] }
 0x3f0   : > { %v5582_v30 = vmul.f32 %v10914_v34, %v11862_v43  ;;  %6578 = vmatprep.subr.bf16.mxu1 %v6577_v26  ;;  %v5205_v61 = vsel %vm2677_vm2, %v5203_v47, %v5204_v39  ;;  %v11876_v49 = vrot.slane %v11875_v51, 2  ;;  %v5694_v10 = vrot.slane %v11877_v53, 2 }
 0x3f1   : > { %v5050_v1 = vadd.f32 %v4961_v57, %v4806_v60  ;;  %v5051_v17 = vadd.f32 %v4963_v58, %v4807_v6  ;;  %v5448_v11 = vrot.slane %v5338_v36, 2  ;;  %v6615_v34 = vmov 0  }
 0x3f2   : > { %v5207_v8 = vsel %vm2677_vm2, %v5204_v39, %v11876_v49  ;;  %v5692_v38 = vrot.slane %v5582_v30, 2  ;;  %6591 = vset.pattern.permute.xlu0 %v6615_v34  ;;  %v11879_v19 = vrot.slane %v11878_v50, 2  ;;  %v5691_v40 = vrot.slane %v5581_v44, 2 }
 0x3f3   : > { %v5294_v29 = vadd.f32 %v5205_v61, %v5050_v1  ;;  %v5295_v48 = vadd.f32 %v5207_v8, %v5051_v17  ;;  %v5449_v9 = vsel %vm2677_vm2, %v5447_v45, %v5448_v11  ;;  %5806 = vperm.xlu0 %6591, %v5802_v46   ;;  %vm5891_vm5 = vcmp.le.s32.totalorder %v11880_v63, 4 }
 0x3f4   : > { %v5451_v43 = vsel %vm2677_vm2, %v5448_v11, %v11879_v19  ;;  %v5693_v59 = vsel %vm2677_vm2, %v5691_v40, %v5692_v38  ;;  %v5695_v7 = vsel %vm2677_vm2, %v5692_v38, %v5694_v10 }
 0x3f5   : > { %v5538_v62 = vadd.f32 %v5449_v9, %v5294_v29  ;;  %v5539_v27 = vadd.f32 %v5451_v43, %v5295_v48 }
 0x3f7   : > { %v5782_v54 = vadd.f32 %v5693_v59, %v5538_v62  ;;  %v5783_v13 = vadd.f32 %v5695_v7, %v5539_v27  ;;  %5811 = vperm.xlu0 %6591, %v5803_v16  }
 0x3f9   : > { %v6579_v25 = vpack.c.bf16 %v5783_v13, %v5782_v54 }
 0x3fb   : > { %6580 = vmatpush3.bf16.xpose.msra.mxu1 %v6579_v25 }
 0x402   : > { %6265 = vmatmul.mubr.f32.vlgmr.msra.gmra.mrb[54].mxu1 %v6606_v28 }
 0x403   : > { %6266 = vmatprep.mubr.f32.mxu1 %v5801_v2 }
 0x406   : > { %6267 = vmatmul.mubr.f32.gmra.mrb[56].mxu1 %v5801_v2 }
 0x472   : > { %v5807_v18 = vpop.permute.xlu0 %5806 }
 0x476   : > { %v5812_v33 = vpop.permute.xlu0 %5811 }
 0x4d5   : > { %v5880_v35 = vpop.f32.mrb[54].mxu1 }
 0x4d6   : > { %v5881_v15 = vadd.f32 %v5880_v35, %v5807_v18  ;;  %v5882_v55 = vpop.f32.mrb[55].mxu1 }
 0x4d7   : > { %v5883_v12 = vadd.f32 %v5882_v55, %v5807_v18 }
 0x4d8   : > { %v6071_v41 = vmul.f32 -1.442695, %v5881_v15 }
 0x4d9   : > { %v6072_v31 = vmul.f32 -1.442695, %v5883_v12  ;;  %v5886_v32 = vpop.f32.mrb[56].mxu1 }
 0x4da   : > { %6592 = vpow2.f32 %v6071_v41  ;;  %v5887_v5 = vadd.f32 %v5886_v32, %v5812_v33  ;;  %v5888_v24 = vpop.f32.mrb[57].mxu1 }
 0x4db   : > { %6594 = vpow2.f32 %v6072_v31  ;;  %v5889_v20 = vadd.f32 %v5888_v24, %v5812_v33 }
 0x4dc   : > { %5923 = vst [vmem:[%s305_s29 + $0x10] sm:$0x1] %v5887_v5 }
 0x4dd   : > { %5924 = vst [vmem:[%s305_s29 + $0x18] sm:$0x1] %v5889_v20 }
 0x4e4   : > { %v6593_v23 = vpop.eup %6592 }
 0x4e5   : > { %v6595_v37 = vpop.eup %6594  ;;  %v5905_v21 = vadd.f32 1.0, %v6593_v23 }
 0x4e6   : > { %v5906_v14 = vadd.f32 1.0, %v6595_v37 }
 0x4e7   : > { %6596 = vrcp.f32 %v5905_v21 }
 0x4e8   : > { %6598 = vrcp.f32 %v5906_v14 }
 0x4f1   : > { %v6597_v3 = vpop.eup %6596 }
 0x4f2   : > { %v6599_v42 = vpop.eup %6598  ;;  %v5917_v22 = vsel %vm5891_vm5, %v6597_v3, %v5881_v15 }
 0x4f3   : > { %v5918_v57 = vsel %vm5891_vm5, %v6599_v42, %v5883_v12  ;;  %5921 = vst [vmem:[%s305_s29] sm:$0xff] %v5917_v22 }
 0x4f4   : > { %5922 = vst [vmem:[%s305_s29 + $0x8] sm:$0xff] %v5918_v57 }
 0x4f5 PF: > { %s18_s27 = sadd.s32 1, %s6613_s27  }
 0x4f6   : > { %p15_p4 = scmp.ge.s32.totalorder %s18_s27, 4  }
 0x4f8   :  { %17 = sbr.rel (!%p15_p4) target bundleno = 1 (0x1), region = 82 }

</bundles_post_ra>
